<compile_context>
chip_gen: v7x
topology: tpu7x:2x2x1
jax: 0.10.0
libtpu: 0.0.40
codegen_flags: <defaults>
</compile_context>

<pallas_src>
import functools
import math

import jax
import jax.numpy as jnp
from jax import lax
from jax.experimental import pallas as pl
from jax.experimental.pallas import tpu as pltpu


def _round_up(x, m):
    return (x + m - 1) // m * m


# ----------------------------- in-kernel building blocks -----------------------------

def _layer_norm(y, g, b, eps):
    """f32 LayerNorm over the last dim.  g/b: (1, D)."""
    mu = jnp.mean(y, axis=-1, keepdims=True)
    yc = y - mu
    var = jnp.mean(yc * yc, axis=-1, keepdims=True)
    return yc * lax.rsqrt(var + eps) * g + b


def _mha_proj(q, k, v, wo, num_heads):
    """Multi-head attention, already projected q/k/v (f32, q pre-scaled by 1/sqrt(dh)).

    q: (Sq, D), k/v: (Skv, D), wo: (D, D) bf16.  Returns attn(q,k,v) @ wo  (no bias),
    shape (Sq, D) f32.  Heads are a static unrolled loop over lane slices; per-head
    context is accumulated directly through wo's row slab (no concat, no transposes).
    """
    Sq, D = q.shape
    dh = D // num_heads
    acc = jnp.zeros((Sq, D), jnp.float32)
    for h in range(num_heads):
        sl = slice(h * dh, (h + 1) * dh)
        qh = q[:, sl].astype(jnp.bfloat16)
        kh = k[:, sl].astype(jnp.bfloat16)
        vh = v[:, sl].astype(jnp.bfloat16)
        # scores: contract last dims of both operands — no explicit K transpose.
        s = lax.dot_general(qh, kh, (((1,), (1,)), ((), ())),
                            preferred_element_type=jnp.float32)        # (Sq, Skv) f32
        m = jnp.max(s, axis=-1, keepdims=True)
        p = jnp.exp(s - m)
        # approx reciprocal on the EUP; ~1e-4 rel. error, fine for inference.
        inv = pl.reciprocal(jnp.sum(p, axis=-1, keepdims=True), approx=True)
        ctx = jnp.dot((p * inv).astype(jnp.bfloat16), vh,
                      preferred_element_type=jnp.float32)               # (Sq, dh)
        acc = acc + jnp.dot(ctx.astype(jnp.bfloat16), wo[sl, :],
                            preferred_element_type=jnp.float32)         # (Sq, D)
    return acc


def _encoder_layer(h, l, r, num_heads, eps):
    """nn.TransformerEncoderLayer (post-norm, ReLU, eval). h: (S, D) f32."""
    D = h.shape[-1]
    qkv = (jnp.dot(h.astype(jnp.bfloat16), r["enc_wqkv"][l],
                   preferred_element_type=jnp.float32) + r["enc_bqkv"][l])   # (S, 3D)
    attn = _mha_proj(qkv[:, :D], qkv[:, D:2 * D], qkv[:, 2 * D:],
                     r["enc_wo"][l], num_heads) + r["enc_bo"][l]
    h = _layer_norm(h + attn, r["enc_ln1_g"][l], r["enc_ln1_b"][l], eps)
    f = (jnp.dot(h.astype(jnp.bfloat16), r["enc_lin1_w"][l],
                 preferred_element_type=jnp.float32) + r["enc_lin1_b"][l])
    f = jnp.maximum(f, 0.0)
    ff = (jnp.dot(f.astype(jnp.bfloat16), r["enc_lin2_w"][l],
                  preferred_element_type=jnp.float32) + r["enc_lin2_b"][l])
    h = _layer_norm(h + ff, r["enc_ln2_g"][l], r["enc_ln2_b"][l], eps)
    return h


def _decoder_layer(h, mem_b, l, r, num_heads, eps):
    """nn.TransformerDecoderLayer (post-norm, ReLU, eval, no masks).
    h: (S, D) f32, mem_b: (Sm, D) bf16 (encoder output, pre-cast once)."""
    D = h.shape[-1]
    # self-attention block
    qkv = (jnp.dot(h.astype(jnp.bfloat16), r["dec_wqkv"][l],
                   preferred_element_type=jnp.float32) + r["dec_bqkv"][l])
    attn = _mha_proj(qkv[:, :D], qkv[:, D:2 * D], qkv[:, 2 * D:],
                     r["dec_wo"][l], num_heads) + r["dec_bo"][l]
    h = _layer_norm(h + attn, r["dec_ln1_g"][l], r["dec_ln1_b"][l], eps)
    # cross-attention block (K|V projection of memory fused into one matmul)
    q = (jnp.dot(h.astype(jnp.bfloat16), r["dec_ca_wq"][l],
                 preferred_element_type=jnp.float32) + r["dec_ca_bq"][l])
    kv = (jnp.dot(mem_b, r["dec_ca_wkv"][l],
                  preferred_element_type=jnp.float32) + r["dec_ca_bkv"][l])  # (Sm, 2D)
    attn = _mha_proj(q, kv[:, :D], kv[:, D:],
                     r["dec_ca_wo"][l], num_heads) + r["dec_ca_bo"][l]
    h = _layer_norm(h + attn, r["dec_ln2_g"][l], r["dec_ln2_b"][l], eps)
    # feed-forward block
    f = (jnp.dot(h.astype(jnp.bfloat16), r["dec_lin1_w"][l],
                 preferred_element_type=jnp.float32) + r["dec_lin1_b"][l])
    f = jnp.maximum(f, 0.0)
    ff = (jnp.dot(f.astype(jnp.bfloat16), r["dec_lin2_w"][l],
                  preferred_element_type=jnp.float32) + r["dec_lin2_b"][l])
    h = _layer_norm(h + ff, r["dec_ln3_g"][l], r["dec_ln3_b"][l], eps)
    return h


def _generator_kernel(*refs, names, num_heads, n_enc, n_dec, eps):
    """Whole TransformerGenerator forward for one batch element (grid step)."""
    o_ref = refs[-1]
    r = dict(zip(names, refs[:-1]))

    x = r["x"][0]                                                    # (S, CPin) f32
    # input projection + positional-encoding add fused in the epilogue
    h = (jnp.dot(x.astype(jnp.bfloat16), r["w_in"][...],
                 preferred_element_type=jnp.float32)
         + r["b_in"][...] + r["pe"][...])                            # (S, D) f32
    # TODO(synk): mask_embedding add + key_padding_mask not implemented (mask=None).

    enc = h
    for l in range(n_enc):
        enc = _encoder_layer(enc, l, r, num_heads, eps)

    mem_b = enc.astype(jnp.bfloat16)                                 # cast memory once
    dec = h
    for l in range(n_dec):
        dec = _decoder_layer(dec, mem_b, l, r, num_heads, eps)

    out = (jnp.dot(dec.astype(jnp.bfloat16), r["w_out"][...],
                   preferred_element_type=jnp.float32) + r["b_out"][...])
    o_ref[0] = out.astype(o_ref.dtype)                               # lane-dense store


# ----------------------------- host-side wrapper -----------------------------

_WEIGHT_NAMES = (
    "pe", "w_in", "b_in",
    "enc_wqkv", "enc_bqkv", "enc_wo", "enc_bo",
    "enc_ln1_g", "enc_ln1_b",
    "enc_lin1_w", "enc_lin1_b", "enc_lin2_w", "enc_lin2_b",
    "enc_ln2_g", "enc_ln2_b",
    "dec_wqkv", "dec_bqkv", "dec_wo", "dec_bo",
    "dec_ln1_g", "dec_ln1_b",
    "dec_ca_wq", "dec_ca_bq", "dec_ca_wkv", "dec_ca_bkv",
    "dec_ca_wo", "dec_ca_bo",
    "dec_ln2_g", "dec_ln2_b",
    "dec_lin1_w", "dec_lin1_b", "dec_lin2_w", "dec_lin2_b",
    "dec_ln3_g", "dec_ln3_b",
    "w_out", "b_out",
)


def transformer_generator_forward(prep, x, num_heads):
    """x: (B, input_dim, seq_len) channels-first — identical layout to the PyTorch
    module input.  Returns (B, input_dim, seq_len)."""
    B, C, S = x.shape
    cp_in, d_model = prep["w_in"].shape
    cp_out = prep["w_out"].shape[1]
    n_enc = prep["enc_wqkv"].shape[0]
    n_dec = prep["dec_wqkv"].shape[0]

    # (B, C, S) -> (B, S, cp_in) zero-padded, lane-dense
    xt = jnp.transpose(x, (0, 2, 1))
    x_pad = jnp.zeros((B, S, cp_in), jnp.float32).at[:, :, :C].set(xt)

    weights = dict(prep)
    weights["pe"] = prep["pe"][:S]                       # pass pe once as (S, D)

    def rep_spec(a):                                     # replicated, VMEM-resident
        nd = a.ndim
        return pl.BlockSpec(a.shape, lambda b, _nd=nd: (0,) * _nd)

    in_specs = [pl.BlockSpec((1, S, cp_in), lambda b: (b, 0, 0))]
    in_specs += [rep_spec(weights[n]) for n in _WEIGHT_NAMES]

    kernel = functools.partial(
        _generator_kernel,
        names=("x",) + _WEIGHT_NAMES,
        num_heads=num_heads, n_enc=n_enc, n_dec=n_dec, eps=1e-5)

    out = pl.pallas_call(
        kernel,
        out_shape=jax.ShapeDtypeStruct((B, S, cp_out), jnp.float32),
        grid=(B,),
        in_specs=in_specs,
        out_specs=pl.BlockSpec((1, S, cp_out), lambda b: (b, 0, 0)),
        compiler_params=pltpu.CompilerParams(
            dimension_semantics=("parallel",)),          # both TCs on v7x (B>=2)
    )(x_pad, *[weights[n] for n in _WEIGHT_NAMES])

    out = out[:, :, :C]                                  # drop lane padding
    return jnp.transpose(out, (0, 2, 1))                 # (B, input_dim, seq_len)


# ----------------------------- parameters -----------------------------

def positional_encoding(seq_len, d_model):
    pos = jnp.arange(seq_len, dtype=jnp.float32)[:, None]
    div = jnp.exp(jnp.arange(0, d_model, 2, dtype=jnp.float32)
                  * (-math.log(10000.0) / d_model))
    ang = pos * div
    pe = jnp.zeros((seq_len, d_model), jnp.float32)
    pe = pe.at[:, 0::2].set(jnp.sin(ang))
    pe = pe.at[:, 1::2].set(jnp.cos(ang))
    return pe


def _dense_init(key, shape, scale=0.02):
    return scale * jax.random.normal(key, shape, dtype=jnp.float32)


def init_encoder_layer(key, d_model, d_ff):
    ks = jax.random.split(key, 10)
    return dict(
        sa_wqkv=jnp.concatenate([_dense_init(ks[0], (d_model, d_model)),
                                 _dense_init(ks[1], (d_model, d_model)),
                                 _dense_init(ks[2], (d_model, d_model))], axis=1),
        sa_bqkv=_dense_init(ks[3], (3 * d_model,)),
        sa_wo=_dense_init(ks[4], (d_model, d_model)),
        sa_bo=_dense_init(ks[5], (d_model,)),
        lin1_w=_dense_init(ks[6], (d_model, d_ff)),
        lin1_b=_dense_init(ks[7], (d_ff,)),
        lin2_w=_dense_init(ks[8], (d_ff, d_model)),
        lin2_b=_dense_init(ks[9], (d_model,)),
        norm1_g=jnp.ones((d_model,), jnp.float32), norm1_b=jnp.zeros((d_model,), jnp.float32),
        norm2_g=jnp.ones((d_model,), jnp.float32), norm2_b=jnp.zeros((d_model,), jnp.float32),
    )


def init_decoder_layer(key, d_model, d_ff):
    ks = jax.random.split(key, 16)
    return dict(
        sa_wqkv=jnp.concatenate([_dense_init(ks[0], (d_model, d_model)),
                                 _dense_init(ks[1], (d_model, d_model)),
                                 _dense_init(ks[2], (d_model, d_model))], axis=1),
        sa_bqkv=_dense_init(ks[3], (3 * d_model,)),
        sa_wo=_dense_init(ks[4], (d_model, d_model)),
        sa_bo=_dense_init(ks[5], (d_model,)),
        ca_wq=_dense_init(ks[6], (d_model, d_model)),
        ca_bq=_dense_init(ks[7], (d_model,)),
        ca_wkv=jnp.concatenate([_dense_init(ks[8], (d_model, d_model)),
                                _dense_init(ks[9], (d_model, d_model))], axis=1),
        ca_bkv=_dense_init(ks[10], (2 * d_model,)),
        ca_wo=_dense_init(ks[11], (d_model, d_model)),
        ca_bo=_dense_init(ks[12], (d_model,)),
        lin1_w=_dense_init(ks[13], (d_model, d_ff)),
        lin1_b=_dense_init(ks[14], (d_ff,)),
        lin2_w=_dense_init(ks[15], (d_ff, d_model)),
        lin2_b=jnp.zeros((d_model,), jnp.float32),
        norm1_g=jnp.ones((d_model,), jnp.float32), norm1_b=jnp.zeros((d_model,), jnp.float32),
        norm2_g=jnp.ones((d_model,), jnp.float32), norm2_b=jnp.zeros((d_model,), jnp.float32),
        norm3_g=jnp.ones((d_model,), jnp.float32), norm3_b=jnp.zeros((d_model,), jnp.float32),
    )


def init_params(key, input_dim, d_model, num_layers):
    n_layers = num_layers + 1            # PyTorch module builds num_layers + 1 of each
    d_ff = 5 * d_model
    keys = jax.random.split(key, 6 + 2 * n_layers)
    return dict(
        in_proj_w=_dense_init(keys[0], (input_dim, d_model)),
        in_proj_b=_dense_init(keys[1], (d_model,)),
        mask_emb_w=_dense_init(keys[2], (input_dim, d_model)),   # shape parity; unused (mask=None)
        mask_emb_b=jnp.zeros((d_model,), jnp.float32),
        out_proj_w=_dense_init(keys[3], (d_model, input_dim)),
        out_proj_b=_dense_init(keys[4], (input_dim,)),
        encoder_layers=[init_encoder_layer(keys[6 + i], d_model, d_ff)
                        for i in range(n_layers)],
        decoder_layers=[init_decoder_layer(keys[6 + n_layers + i], d_model, d_ff)
                        for i in range(n_layers)],
    )


def prepare_params(params, num_heads, seq_len):
    """One-time transform: stack per-layer weights into (L, ...) slabs, fold the
    1/sqrt(dh) attention scale into the Q projections, pad the input/output
    projections to 128 lanes, cast matmul weights to bf16 (biases / LN stay f32)."""
    input_dim, d_model = params["in_proj_w"].shape
    dh = d_model // num_heads
    scale = 1.0 / math.sqrt(dh)
    wdt = jnp.bfloat16

    def row(b):
        return jnp.asarray(b, jnp.float32).reshape(1, -1)

    def stack_w(layers, k, fn=lambda w: w):
        return jnp.stack([fn(lp[k]) for lp in layers]).astype(wdt)

    def stack_b(layers, k, fn=lambda b: b):
        return jnp.stack([row(fn(lp[k])) for lp in layers])

    def scale_q_w(w):                       # fused (D, 3D): scale the Q output columns
        return w.at[:, :d_model].multiply(scale)

    def scale_q_b(b):
        return b.at[:d_model].multiply(scale)

    enc = params["encoder_layers"]
    dec = params["decoder_layers"]

    cp_in = _round_up(input_dim, 128)
    cp_out = _round_up(input_dim, 128)
    w_in = jnp.zeros((cp_in, d_model), jnp.float32).at[:input_dim].set(params["in_proj_w"])
    w_out = jnp.zeros((d_model, cp_out), jnp.float32).at[:, :input_dim].set(params["out_proj_w"])
    b_out = jnp.zeros((cp_out,), jnp.float32).at[:input_dim].set(params["out_proj_b"])

    return dict(
        pe=positional_encoding(seq_len, d_model),
        w_in=w_in.astype(wdt), b_in=row(params["in_proj_b"]),
        w_out=w_out.astype(wdt), b_out=row(b_out),

        enc_wqkv=stack_w(enc, "sa_wqkv", scale_q_w),
        enc_bqkv=stack_b(enc, "sa_bqkv", scale_q_b),
        enc_wo=stack_w(enc, "sa_wo"), enc_bo=stack_b(enc, "sa_bo"),
        enc_ln1_g=stack_b(enc, "norm1_g"), enc_ln1_b=stack_b(enc, "norm1_b"),
        enc_lin1_w=stack_w(enc, "lin1_w"), enc_lin1_b=stack_b(enc, "lin1_b"),
        enc_lin2_w=stack_w(enc, "lin2_w"), enc_lin2_b=stack_b(enc, "lin2_b"),
        enc_ln2_g=stack_b(enc, "norm2_g"), enc_ln2_b=stack_b(enc, "norm2_b"),

        dec_wqkv=stack_w(dec, "sa_wqkv", scale_q_w),
        dec_bqkv=stack_b(dec, "sa_bqkv", scale_q_b),
        dec_wo=stack_w(dec, "sa_wo"), dec_bo=stack_b(dec, "sa_bo"),
        dec_ln1_g=stack_b(dec, "norm1_g"), dec_ln1_b=stack_b(dec, "norm1_b"),
        dec_ca_wq=stack_w(dec, "ca_wq", lambda w: w * scale),
        dec_ca_bq=stack_b(dec, "ca_bq", lambda b: b * scale),
        dec_ca_wkv=stack_w(dec, "ca_wkv"), dec_ca_bkv=stack_b(dec, "ca_bkv"),
        dec_ca_wo=stack_w(dec, "ca_wo"), dec_ca_bo=stack_b(dec, "ca_bo"),
        dec_ln2_g=stack_b(dec, "norm2_g"), dec_ln2_b=stack_b(dec, "norm2_b"),
        dec_lin1_w=stack_w(dec, "lin1_w"), dec_lin1_b=stack_b(dec, "lin1_b"),
        dec_lin2_w=stack_w(dec, "lin2_w"), dec_lin2_b=stack_b(dec, "lin2_b"),
        dec_ln3_g=stack_b(dec, "norm3_g"), dec_ln3_b=stack_b(dec, "norm3_b"),
    )


# ----------------------------- main -----------------------------

if __name__ == "__main__":
    B, INPUT_DIM, SEQ = 2, 5, 16
    D_MODEL, NUM_HEADS, NUM_LAYERS = 128, 4, 1      # -> 2 encoder + 2 decoder layers

    root = jax.random.PRNGKey(0)
    k_param, k_x = jax.random.split(root)
    params = init_params(k_param, INPUT_DIM, D_MODEL, NUM_LAYERS)
    prep = prepare_params(params, NUM_HEADS, SEQ)

    x = jax.random.normal(k_x, (B, INPUT_DIM, SEQ), dtype=jnp.float32)

    fwd = jax.jit(functools.partial(transformer_generator_forward, num_heads=NUM_HEADS))
    out = jax.block_until_ready(fwd(prep, x))
    assert out.shape == (B, INPUT_DIM, SEQ), out.shape
    assert bool(jnp.all(jnp.isfinite(out)))
    print("KERNEL_OK")
</pallas_src>

<mosaic_0001>
module attributes {stable_mosaic.version = 11 : i64} {
  func.func @_generator_kernel(%arg0: i32, %arg1: memref<1x16x128xf32, #tpu.memory_space<vmem>>, %arg2: memref<16x128xf32, #tpu.memory_space<vmem>>, %arg3: memref<128x128xbf16, #tpu.memory_space<vmem>>, %arg4: memref<1x128xf32, #tpu.memory_space<vmem>>, %arg5: memref<2x128x384xbf16, #tpu.memory_space<vmem>>, %arg6: memref<2x1x384xf32, #tpu.memory_space<vmem>>, %arg7: memref<2x128x128xbf16, #tpu.memory_space<vmem>>, %arg8: memref<2x1x128xf32, #tpu.memory_space<vmem>>, %arg9: memref<2x1x128xf32, #tpu.memory_space<vmem>>, %arg10: memref<2x1x128xf32, #tpu.memory_space<vmem>>, %arg11: memref<2x128x640xbf16, #tpu.memory_space<vmem>>, %arg12: memref<2x1x640xf32, #tpu.memory_space<vmem>>, %arg13: memref<2x640x128xbf16, #tpu.memory_space<vmem>>, %arg14: memref<2x1x128xf32, #tpu.memory_space<vmem>>, %arg15: memref<2x1x128xf32, #tpu.memory_space<vmem>>, %arg16: memref<2x1x128xf32, #tpu.memory_space<vmem>>, %arg17: memref<2x128x384xbf16, #tpu.memory_space<vmem>>, %arg18: memref<2x1x384xf32, #tpu.memory_space<vmem>>, %arg19: memref<2x128x128xbf16, #tpu.memory_space<vmem>>, %arg20: memref<2x1x128xf32, #tpu.memory_space<vmem>>, %arg21: memref<2x1x128xf32, #tpu.memory_space<vmem>>, %arg22: memref<2x1x128xf32, #tpu.memory_space<vmem>>, %arg23: memref<2x128x128xbf16, #tpu.memory_space<vmem>>, %arg24: memref<2x1x128xf32, #tpu.memory_space<vmem>>, %arg25: memref<2x128x256xbf16, #tpu.memory_space<vmem>>, %arg26: memref<2x1x256xf32, #tpu.memory_space<vmem>>, %arg27: memref<2x128x128xbf16, #tpu.memory_space<vmem>>, %arg28: memref<2x1x128xf32, #tpu.memory_space<vmem>>, %arg29: memref<2x1x128xf32, #tpu.memory_space<vmem>>, %arg30: memref<2x1x128xf32, #tpu.memory_space<vmem>>, %arg31: memref<2x128x640xbf16, #tpu.memory_space<vmem>>, %arg32: memref<2x1x640xf32, #tpu.memory_space<vmem>>, %arg33: memref<2x640x128xbf16, #tpu.memory_space<vmem>>, %arg34: memref<2x1x128xf32, #tpu.memory_space<vmem>>, %arg35: memref<2x1x128xf32, #tpu.memory_space<vmem>>, %arg36: memref<2x1x128xf32, #tpu.memory_space<vmem>>, %arg37: memref<128x128xbf16, #tpu.memory_space<vmem>>, %arg38: memref<1x128xf32, #tpu.memory_space<vmem>>, %arg39: memref<1x16x128xf32, #tpu.memory_space<vmem>>) attributes {dimension_semantics = [#tpu.dimension_semantics<parallel>], iteration_bounds = array<i64: 2>, scalar_prefetch = 0 : i64, scratch_operands = 0 : i64, tpu.core_type = #tpu.core_type<tc>, window_params = [{transform_indices = @transform_0, window_bounds = array<i64: 1, 16, 128>}, {pipeline_mode = #tpu.pipeline_mode<synchronous>, transform_indices = @transform_1, window_bounds = array<i64: 16, 128>}, {pipeline_mode = #tpu.pipeline_mode<synchronous>, transform_indices = @transform_2, window_bounds = array<i64: 128, 128>}, {pipeline_mode = #tpu.pipeline_mode<synchronous>, transform_indices = @transform_3, window_bounds = array<i64: 1, 128>}, {pipeline_mode = #tpu.pipeline_mode<synchronous>, transform_indices = @transform_4, window_bounds = array<i64: 2, 128, 384>}, {pipeline_mode = #tpu.pipeline_mode<synchronous>, transform_indices = @transform_5, window_bounds = array<i64: 2, 1, 384>}, {pipeline_mode = #tpu.pipeline_mode<synchronous>, transform_indices = @transform_6, window_bounds = array<i64: 2, 128, 128>}, {pipeline_mode = #tpu.pipeline_mode<synchronous>, transform_indices = @transform_7, window_bounds = array<i64: 2, 1, 128>}, {pipeline_mode = #tpu.pipeline_mode<synchronous>, transform_indices = @transform_8, window_bounds = array<i64: 2, 1, 128>}, {pipeline_mode = #tpu.pipeline_mode<synchronous>, transform_indices = @transform_9, window_bounds = array<i64: 2, 1, 128>}, {pipeline_mode = #tpu.pipeline_mode<synchronous>, transform_indices = @transform_10, window_bounds = array<i64: 2, 128, 640>}, {pipeline_mode = #tpu.pipeline_mode<synchronous>, transform_indices = @transform_11, window_bounds = array<i64: 2, 1, 640>}, {pipeline_mode = #tpu.pipeline_mode<synchronous>, transform_indices = @transform_12, window_bounds = array<i64: 2, 640, 128>}, {pipeline_mode = #tpu.pipeline_mode<synchronous>, transform_indices = @transform_13, window_bounds = array<i64: 2, 1, 128>}, {pipeline_mode = #tpu.pipeline_mode<synchronous>, transform_indices = @transform_14, window_bounds = array<i64: 2, 1, 128>}, {pipeline_mode = #tpu.pipeline_mode<synchronous>, transform_indices = @transform_15, window_bounds = array<i64: 2, 1, 128>}, {pipeline_mode = #tpu.pipeline_mode<synchronous>, transform_indices = @transform_16, window_bounds = array<i64: 2, 128, 384>}, {pipeline_mode = #tpu.pipeline_mode<synchronous>, transform_indices = @transform_17, window_bounds = array<i64: 2, 1, 384>}, {pipeline_mode = #tpu.pipeline_mode<synchronous>, transform_indices = @transform_18, window_bounds = array<i64: 2, 128, 128>}, {pipeline_mode = #tpu.pipeline_mode<synchronous>, transform_indices = @transform_19, window_bounds = array<i64: 2, 1, 128>}, {pipeline_mode = #tpu.pipeline_mode<synchronous>, transform_indices = @transform_20, window_bounds = array<i64: 2, 1, 128>}, {pipeline_mode = #tpu.pipeline_mode<synchronous>, transform_indices = @transform_21, window_bounds = array<i64: 2, 1, 128>}, {pipeline_mode = #tpu.pipeline_mode<synchronous>, transform_indices = @transform_22, window_bounds = array<i64: 2, 128, 128>}, {pipeline_mode = #tpu.pipeline_mode<synchronous>, transform_indices = @transform_23, window_bounds = array<i64: 2, 1, 128>}, {pipeline_mode = #tpu.pipeline_mode<synchronous>, transform_indices = @transform_24, window_bounds = array<i64: 2, 128, 256>}, {pipeline_mode = #tpu.pipeline_mode<synchronous>, transform_indices = @transform_25, window_bounds = array<i64: 2, 1, 256>}, {pipeline_mode = #tpu.pipeline_mode<synchronous>, transform_indices = @transform_26, window_bounds = array<i64: 2, 128, 128>}, {pipeline_mode = #tpu.pipeline_mode<synchronous>, transform_indices = @transform_27, window_bounds = array<i64: 2, 1, 128>}, {pipeline_mode = #tpu.pipeline_mode<synchronous>, transform_indices = @transform_28, window_bounds = array<i64: 2, 1, 128>}, {pipeline_mode = #tpu.pipeline_mode<synchronous>, transform_indices = @transform_29, window_bounds = array<i64: 2, 1, 128>}, {pipeline_mode = #tpu.pipeline_mode<synchronous>, transform_indices = @transform_30, window_bounds = array<i64: 2, 128, 640>}, {pipeline_mode = #tpu.pipeline_mode<synchronous>, transform_indices = @transform_31, window_bounds = array<i64: 2, 1, 640>}, {pipeline_mode = #tpu.pipeline_mode<synchronous>, transform_indices = @transform_32, window_bounds = array<i64: 2, 640, 128>}, {pipeline_mode = #tpu.pipeline_mode<synchronous>, transform_indices = @transform_33, window_bounds = array<i64: 2, 1, 128>}, {pipeline_mode = #tpu.pipeline_mode<synchronous>, transform_indices = @transform_34, window_bounds = array<i64: 2, 1, 128>}, {pipeline_mode = #tpu.pipeline_mode<synchronous>, transform_indices = @transform_35, window_bounds = array<i64: 2, 1, 128>}, {pipeline_mode = #tpu.pipeline_mode<synchronous>, transform_indices = @transform_36, window_bounds = array<i64: 128, 128>}, {pipeline_mode = #tpu.pipeline_mode<synchronous>, transform_indices = @transform_37, window_bounds = array<i64: 1, 128>}, {transform_indices = @transform_38, window_bounds = array<i64: 1, 16, 128>}]} {
    %c0 = arith.constant 0 : index
    %c0_0 = arith.constant 0 : index
    %c0_1 = arith.constant 0 : index
    %0 = vector.load %arg1[%c0, %c0_0, %c0_1] : memref<1x16x128xf32, #tpu.memory_space<vmem>>, vector<1x16x128xf32>
    %1 = vector.shape_cast %0 : vector<1x16x128xf32> to vector<16x128xf32>
    %2 = arith.truncf %1 : vector<16x128xf32> to vector<16x128xbf16>
    %c0_2 = arith.constant 0 : index
    %c0_3 = arith.constant 0 : index
    %3 = vector.load %arg3[%c0_2, %c0_3] : memref<128x128xbf16, #tpu.memory_space<vmem>>, vector<128x128xbf16>
    %cst = arith.constant dense<0.000000e+00> : vector<16x128xf32>
    %4 = tpu.matmul %2, %3, %cst {dimension_numbers = #tpu.dot_dimension_numbers<[1], [0], [0], [1], [0, 0, 1, 1], [], []>} : vector<16x128xbf16>, vector<128x128xbf16>, vector<16x128xf32> -> vector<16x128xf32>
    %c0_4 = arith.constant 0 : index
    %c0_5 = arith.constant 0 : index
    %5 = vector.load %arg4[%c0_4, %c0_5] : memref<1x128xf32, #tpu.memory_space<vmem>>, vector<1x128xf32>
    %6 = vector.broadcast %5 : vector<1x128xf32> to vector<16x128xf32>
    %7 = arith.addf %4, %6 : vector<16x128xf32>
    %c0_6 = arith.constant 0 : index
    %c0_7 = arith.constant 0 : index
    %8 = vector.load %arg2[%c0_6, %c0_7] : memref<16x128xf32, #tpu.memory_space<vmem>>, vector<16x128xf32>
    %9 = arith.addf %7, %8 : vector<16x128xf32>
    %10 = arith.truncf %9 : vector<16x128xf32> to vector<16x128xbf16>
    %c0_8 = arith.constant 0 : index
    %c0_9 = arith.constant 0 : index
    %c0_10 = arith.constant 0 : index
    %11 = vector.load %arg5[%c0_8, %c0_9, %c0_10] : memref<2x128x384xbf16, #tpu.memory_space<vmem>>, vector<1x128x384xbf16>
    %12 = vector.shape_cast %11 : vector<1x128x384xbf16> to vector<128x384xbf16>
    %cst_11 = arith.constant dense<0.000000e+00> : vector<16x384xf32>
    %13 = tpu.matmul %10, %12, %cst_11 {dimension_numbers = #tpu.dot_dimension_numbers<[1], [0], [0], [1], [0, 0, 1, 1], [], []>} : vector<16x128xbf16>, vector<128x384xbf16>, vector<16x384xf32> -> vector<16x384xf32>
    %c0_12 = arith.constant 0 : index
    %c0_13 = arith.constant 0 : index
    %c0_14 = arith.constant 0 : index
    %14 = vector.load %arg6[%c0_12, %c0_13, %c0_14] : memref<2x1x384xf32, #tpu.memory_space<vmem>>, vector<1x1x384xf32>
    %15 = vector.shape_cast %14 : vector<1x1x384xf32> to vector<1x384xf32>
    %16 = vector.broadcast %15 : vector<1x384xf32> to vector<16x384xf32>
    %17 = arith.addf %13, %16 : vector<16x384xf32>
    %18 = vector.extract_strided_slice %17 {offsets = [0, 0], sizes = [16, 128], strides = [1, 1]} : vector<16x384xf32> to vector<16x128xf32>
    %19 = vector.extract_strided_slice %17 {offsets = [0, 128], sizes = [16, 128], strides = [1, 1]} : vector<16x384xf32> to vector<16x128xf32>
    %20 = vector.extract_strided_slice %17 {offsets = [0, 256], sizes = [16, 128], strides = [1, 1]} : vector<16x384xf32> to vector<16x128xf32>
    %c0_15 = arith.constant 0 : index
    %c0_16 = arith.constant 0 : index
    %c0_17 = arith.constant 0 : index
    %21 = vector.load %arg7[%c0_15, %c0_16, %c0_17] : memref<2x128x128xbf16, #tpu.memory_space<vmem>>, vector<1x128x128xbf16>
    %22 = vector.shape_cast %21 : vector<1x128x128xbf16> to vector<128x128xbf16>
    %cst_18 = arith.constant 0.000000e+00 : f32
    %23 = vector.broadcast %cst_18 : f32 to vector<16x128xf32>
    %24 = vector.extract_strided_slice %18 {offsets = [0, 0], sizes = [16, 32], strides = [1, 1]} : vector<16x128xf32> to vector<16x32xf32>
    %25 = arith.truncf %24 : vector<16x32xf32> to vector<16x32xbf16>
    %26 = vector.extract_strided_slice %19 {offsets = [0, 0], sizes = [16, 32], strides = [1, 1]} : vector<16x128xf32> to vector<16x32xf32>
    %27 = arith.truncf %26 : vector<16x32xf32> to vector<16x32xbf16>
    %28 = vector.extract_strided_slice %20 {offsets = [0, 0], sizes = [16, 32], strides = [1, 1]} : vector<16x128xf32> to vector<16x32xf32>
    %29 = arith.truncf %28 : vector<16x32xf32> to vector<16x32xbf16>
    %cst_19 = arith.constant dense<0.000000e+00> : vector<16x16xf32>
    %30 = tpu.matmul %25, %27, %cst_19 {dimension_numbers = #tpu.dot_dimension_numbers<[1], [1], [0], [0], [0, 0, 1, 0], [], []>} : vector<16x32xbf16>, vector<16x32xbf16>, vector<16x16xf32> -> vector<16x16xf32>
    %cst_20 = arith.constant dense<0xFF800000> : vector<16xf32>
    %31 = vector.multi_reduction <maximumf>, %30, %cst_20 [1] : vector<16x16xf32> to vector<16xf32>
    %32 = vector.shape_cast %31 : vector<16xf32> to vector<16x1xf32>
    %33 = vector.broadcast %32 : vector<16x1xf32> to vector<16x16xf32>
    %34 = arith.subf %30, %33 : vector<16x16xf32>
    %35 = math.exp %34 : vector<16x16xf32>
    %cst_21 = arith.constant dense<0.000000e+00> : vector<16xf32>
    %36 = vector.multi_reduction <add>, %35, %cst_21 [1] : vector<16x16xf32> to vector<16xf32>
    %37 = vector.shape_cast %36 : vector<16xf32> to vector<16x1xf32>
    %38 = tpu.reciprocal %37 {approx = true} : vector<16x1xf32> -> vector<16x1xf32>
    %39 = vector.broadcast %38 : vector<16x1xf32> to vector<16x16xf32>
    %40 = arith.mulf %35, %39 : vector<16x16xf32>
    %41 = arith.truncf %40 : vector<16x16xf32> to vector<16x16xbf16>
    %cst_22 = arith.constant dense<0.000000e+00> : vector<16x32xf32>
    %42 = tpu.matmul %41, %29, %cst_22 {dimension_numbers = #tpu.dot_dimension_numbers<[1], [0], [0], [1], [0, 0, 1, 1], [], []>} : vector<16x16xbf16>, vector<16x32xbf16>, vector<16x32xf32> -> vector<16x32xf32>
    %43 = arith.truncf %42 : vector<16x32xf32> to vector<16x32xbf16>
    %44 = vector.extract_strided_slice %22 {offsets = [0, 0], sizes = [32, 128], strides = [1, 1]} : vector<128x128xbf16> to vector<32x128xbf16>
    %cst_23 = arith.constant dense<0.000000e+00> : vector<16x128xf32>
    %45 = tpu.matmul %43, %44, %cst_23 {dimension_numbers = #tpu.dot_dimension_numbers<[1], [0], [0], [1], [0, 0, 1, 1], [], []>} : vector<16x32xbf16>, vector<32x128xbf16>, vector<16x128xf32> -> vector<16x128xf32>
    %46 = arith.addf %23, %45 : vector<16x128xf32>
    %47 = vector.extract_strided_slice %18 {offsets = [0, 32], sizes = [16, 32], strides = [1, 1]} : vector<16x128xf32> to vector<16x32xf32>
    %48 = arith.truncf %47 : vector<16x32xf32> to vector<16x32xbf16>
    %49 = vector.extract_strided_slice %19 {offsets = [0, 32], sizes = [16, 32], strides = [1, 1]} : vector<16x128xf32> to vector<16x32xf32>
    %50 = arith.truncf %49 : vector<16x32xf32> to vector<16x32xbf16>
    %51 = vector.extract_strided_slice %20 {offsets = [0, 32], sizes = [16, 32], strides = [1, 1]} : vector<16x128xf32> to vector<16x32xf32>
    %52 = arith.truncf %51 : vector<16x32xf32> to vector<16x32xbf16>
    %cst_24 = arith.constant dense<0.000000e+00> : vector<16x16xf32>
    %53 = tpu.matmul %48, %50, %cst_24 {dimension_numbers = #tpu.dot_dimension_numbers<[1], [1], [0], [0], [0, 0, 1, 0], [], []>} : vector<16x32xbf16>, vector<16x32xbf16>, vector<16x16xf32> -> vector<16x16xf32>
    %cst_25 = arith.constant dense<0xFF800000> : vector<16xf32>
    %54 = vector.multi_reduction <maximumf>, %53, %cst_25 [1] : vector<16x16xf32> to vector<16xf32>
    %55 = vector.shape_cast %54 : vector<16xf32> to vector<16x1xf32>
    %56 = vector.broadcast %55 : vector<16x1xf32> to vector<16x16xf32>
    %57 = arith.subf %53, %56 : vector<16x16xf32>
    %58 = math.exp %57 : vector<16x16xf32>
    %cst_26 = arith.constant dense<0.000000e+00> : vector<16xf32>
    %59 = vector.multi_reduction <add>, %58, %cst_26 [1] : vector<16x16xf32> to vector<16xf32>
    %60 = vector.shape_cast %59 : vector<16xf32> to vector<16x1xf32>
    %61 = tpu.reciprocal %60 {approx = true} : vector<16x1xf32> -> vector<16x1xf32>
    %62 = vector.broadcast %61 : vector<16x1xf32> to vector<16x16xf32>
    %63 = arith.mulf %58, %62 : vector<16x16xf32>
    %64 = arith.truncf %63 : vector<16x16xf32> to vector<16x16xbf16>
    %cst_27 = arith.constant dense<0.000000e+00> : vector<16x32xf32>
    %65 = tpu.matmul %64, %52, %cst_27 {dimension_numbers = #tpu.dot_dimension_numbers<[1], [0], [0], [1], [0, 0, 1, 1], [], []>} : vector<16x16xbf16>, vector<16x32xbf16>, vector<16x32xf32> -> vector<16x32xf32>
    %66 = arith.truncf %65 : vector<16x32xf32> to vector<16x32xbf16>
    %67 = vector.extract_strided_slice %22 {offsets = [32, 0], sizes = [32, 128], strides = [1, 1]} : vector<128x128xbf16> to vector<32x128xbf16>
    %cst_28 = arith.constant dense<0.000000e+00> : vector<16x128xf32>
    %68 = tpu.matmul %66, %67, %cst_28 {dimension_numbers = #tpu.dot_dimension_numbers<[1], [0], [0], [1], [0, 0, 1, 1], [], []>} : vector<16x32xbf16>, vector<32x128xbf16>, vector<16x128xf32> -> vector<16x128xf32>
    %69 = arith.addf %46, %68 : vector<16x128xf32>
    %70 = vector.extract_strided_slice %18 {offsets = [0, 64], sizes = [16, 32], strides = [1, 1]} : vector<16x128xf32> to vector<16x32xf32>
    %71 = arith.truncf %70 : vector<16x32xf32> to vector<16x32xbf16>
    %72 = vector.extract_strided_slice %19 {offsets = [0, 64], sizes = [16, 32], strides = [1, 1]} : vector<16x128xf32> to vector<16x32xf32>
    %73 = arith.truncf %72 : vector<16x32xf32> to vector<16x32xbf16>
    %74 = vector.extract_strided_slice %20 {offsets = [0, 64], sizes = [16, 32], strides = [1, 1]} : vector<16x128xf32> to vector<16x32xf32>
    %75 = arith.truncf %74 : vector<16x32xf32> to vector<16x32xbf16>
    %cst_29 = arith.constant dense<0.000000e+00> : vector<16x16xf32>
    %76 = tpu.matmul %71, %73, %cst_29 {dimension_numbers = #tpu.dot_dimension_numbers<[1], [1], [0], [0], [0, 0, 1, 0], [], []>} : vector<16x32xbf16>, vector<16x32xbf16>, vector<16x16xf32> -> vector<16x16xf32>
    %cst_30 = arith.constant dense<0xFF800000> : vector<16xf32>
    %77 = vector.multi_reduction <maximumf>, %76, %cst_30 [1] : vector<16x16xf32> to vector<16xf32>
    %78 = vector.shape_cast %77 : vector<16xf32> to vector<16x1xf32>
    %79 = vector.broadcast %78 : vector<16x1xf32> to vector<16x16xf32>
    %80 = arith.subf %76, %79 : vector<16x16xf32>
    %81 = math.exp %80 : vector<16x16xf32>
    %cst_31 = arith.constant dense<0.000000e+00> : vector<16xf32>
    %82 = vector.multi_reduction <add>, %81, %cst_31 [1] : vector<16x16xf32> to vector<16xf32>
    %83 = vector.shape_cast %82 : vector<16xf32> to vector<16x1xf32>
    %84 = tpu.reciprocal %83 {approx = true} : vector<16x1xf32> -> vector<16x1xf32>
    %85 = vector.broadcast %84 : vector<16x1xf32> to vector<16x16xf32>
    %86 = arith.mulf %81, %85 : vector<16x16xf32>
    %87 = arith.truncf %86 : vector<16x16xf32> to vector<16x16xbf16>
    %cst_32 = arith.constant dense<0.000000e+00> : vector<16x32xf32>
    %88 = tpu.matmul %87, %75, %cst_32 {dimension_numbers = #tpu.dot_dimension_numbers<[1], [0], [0], [1], [0, 0, 1, 1], [], []>} : vector<16x16xbf16>, vector<16x32xbf16>, vector<16x32xf32> -> vector<16x32xf32>
    %89 = arith.truncf %88 : vector<16x32xf32> to vector<16x32xbf16>
    %90 = vector.extract_strided_slice %22 {offsets = [64, 0], sizes = [32, 128], strides = [1, 1]} : vector<128x128xbf16> to vector<32x128xbf16>
    %cst_33 = arith.constant dense<0.000000e+00> : vector<16x128xf32>
    %91 = tpu.matmul %89, %90, %cst_33 {dimension_numbers = #tpu.dot_dimension_numbers<[1], [0], [0], [1], [0, 0, 1, 1], [], []>} : vector<16x32xbf16>, vector<32x128xbf16>, vector<16x128xf32> -> vector<16x128xf32>
    %92 = arith.addf %69, %91 : vector<16x128xf32>
    %93 = vector.extract_strided_slice %18 {offsets = [0, 96], sizes = [16, 32], strides = [1, 1]} : vector<16x128xf32> to vector<16x32xf32>
    %94 = arith.truncf %93 : vector<16x32xf32> to vector<16x32xbf16>
    %95 = vector.extract_strided_slice %19 {offsets = [0, 96], sizes = [16, 32], strides = [1, 1]} : vector<16x128xf32> to vector<16x32xf32>
    %96 = arith.truncf %95 : vector<16x32xf32> to vector<16x32xbf16>
    %97 = vector.extract_strided_slice %20 {offsets = [0, 96], sizes = [16, 32], strides = [1, 1]} : vector<16x128xf32> to vector<16x32xf32>
    %98 = arith.truncf %97 : vector<16x32xf32> to vector<16x32xbf16>
    %cst_34 = arith.constant dense<0.000000e+00> : vector<16x16xf32>
    %99 = tpu.matmul %94, %96, %cst_34 {dimension_numbers = #tpu.dot_dimension_numbers<[1], [1], [0], [0], [0, 0, 1, 0], [], []>} : vector<16x32xbf16>, vector<16x32xbf16>, vector<16x16xf32> -> vector<16x16xf32>
    %cst_35 = arith.constant dense<0xFF800000> : vector<16xf32>
    %100 = vector.multi_reduction <maximumf>, %99, %cst_35 [1] : vector<16x16xf32> to vector<16xf32>
    %101 = vector.shape_cast %100 : vector<16xf32> to vector<16x1xf32>
    %102 = vector.broadcast %101 : vector<16x1xf32> to vector<16x16xf32>
    %103 = arith.subf %99, %102 : vector<16x16xf32>
    %104 = math.exp %103 : vector<16x16xf32>
    %cst_36 = arith.constant dense<0.000000e+00> : vector<16xf32>
    %105 = vector.multi_reduction <add>, %104, %cst_36 [1] : vector<16x16xf32> to vector<16xf32>
    %106 = vector.shape_cast %105 : vector<16xf32> to vector<16x1xf32>
    %107 = tpu.reciprocal %106 {approx = true} : vector<16x1xf32> -> vector<16x1xf32>
    %108 = vector.broadcast %107 : vector<16x1xf32> to vector<16x16xf32>
    %109 = arith.mulf %104, %108 : vector<16x16xf32>
    %110 = arith.truncf %109 : vector<16x16xf32> to vector<16x16xbf16>
    %cst_37 = arith.constant dense<0.000000e+00> : vector<16x32xf32>
    %111 = tpu.matmul %110, %98, %cst_37 {dimension_numbers = #tpu.dot_dimension_numbers<[1], [0], [0], [1], [0, 0, 1, 1], [], []>} : vector<16x16xbf16>, vector<16x32xbf16>, vector<16x32xf32> -> vector<16x32xf32>
    %112 = arith.truncf %111 : vector<16x32xf32> to vector<16x32xbf16>
    %113 = vector.extract_strided_slice %22 {offsets = [96, 0], sizes = [32, 128], strides = [1, 1]} : vector<128x128xbf16> to vector<32x128xbf16>
    %cst_38 = arith.constant dense<0.000000e+00> : vector<16x128xf32>
    %114 = tpu.matmul %112, %113, %cst_38 {dimension_numbers = #tpu.dot_dimension_numbers<[1], [0], [0], [1], [0, 0, 1, 1], [], []>} : vector<16x32xbf16>, vector<32x128xbf16>, vector<16x128xf32> -> vector<16x128xf32>
    %115 = arith.addf %92, %114 : vector<16x128xf32>
    %c0_39 = arith.constant 0 : index
    %c0_40 = arith.constant 0 : index
    %c0_41 = arith.constant 0 : index
    %116 = vector.load %arg8[%c0_39, %c0_40, %c0_41] : memref<2x1x128xf32, #tpu.memory_space<vmem>>, vector<1x1x128xf32>
    %117 = vector.shape_cast %116 : vector<1x1x128xf32> to vector<1x128xf32>
    %118 = vector.broadcast %117 : vector<1x128xf32> to vector<16x128xf32>
    %119 = arith.addf %115, %118 : vector<16x128xf32>
    %120 = arith.addf %9, %119 : vector<16x128xf32>
    %c0_42 = arith.constant 0 : index
    %c0_43 = arith.constant 0 : index
    %c0_44 = arith.constant 0 : index
    %121 = vector.load %arg9[%c0_42, %c0_43, %c0_44] : memref<2x1x128xf32, #tpu.memory_space<vmem>>, vector<1x1x128xf32>
    %122 = vector.shape_cast %121 : vector<1x1x128xf32> to vector<1x128xf32>
    %c0_45 = arith.constant 0 : index
    %c0_46 = arith.constant 0 : index
    %c0_47 = arith.constant 0 : index
    %123 = vector.load %arg10[%c0_45, %c0_46, %c0_47] : memref<2x1x128xf32, #tpu.memory_space<vmem>>, vector<1x1x128xf32>
    %124 = vector.shape_cast %123 : vector<1x1x128xf32> to vector<1x128xf32>
    %cst_48 = arith.constant dense<0.000000e+00> : vector<16xf32>
    %125 = vector.multi_reduction <add>, %120, %cst_48 [1] : vector<16x128xf32> to vector<16xf32>
    %126 = vector.shape_cast %125 : vector<16xf32> to vector<16x1xf32>
    %cst_49 = arith.constant 1.280000e+02 : f32
    %127 = vector.broadcast %cst_49 : f32 to vector<16x1xf32>
    %128 = arith.divf %126, %127 : vector<16x1xf32>
    %129 = vector.broadcast %128 : vector<16x1xf32> to vector<16x128xf32>
    %130 = arith.subf %120, %129 : vector<16x128xf32>
    %131 = arith.mulf %130, %130 : vector<16x128xf32>
    %cst_50 = arith.constant dense<0.000000e+00> : vector<16xf32>
    %132 = vector.multi_reduction <add>, %131, %cst_50 [1] : vector<16x128xf32> to vector<16xf32>
    %133 = vector.shape_cast %132 : vector<16xf32> to vector<16x1xf32>
    %cst_51 = arith.constant 1.280000e+02 : f32
    %134 = vector.broadcast %cst_51 : f32 to vector<16x1xf32>
    %135 = arith.divf %133, %134 : vector<16x1xf32>
    %cst_52 = arith.constant 9.99999974E-6 : f32
    %136 = vector.broadcast %cst_52 : f32 to vector<16x1xf32>
    %137 = arith.addf %135, %136 : vector<16x1xf32>
    %138 = math.rsqrt %137 : vector<16x1xf32>
    %139 = vector.broadcast %138 : vector<16x1xf32> to vector<16x128xf32>
    %140 = arith.mulf %130, %139 : vector<16x128xf32>
    %141 = vector.broadcast %122 : vector<1x128xf32> to vector<16x128xf32>
    %142 = arith.mulf %140, %141 : vector<16x128xf32>
    %143 = vector.broadcast %124 : vector<1x128xf32> to vector<16x128xf32>
    %144 = arith.addf %142, %143 : vector<16x128xf32>
    %145 = arith.truncf %144 : vector<16x128xf32> to vector<16x128xbf16>
    %c0_53 = arith.constant 0 : index
    %c0_54 = arith.constant 0 : index
    %c0_55 = arith.constant 0 : index
    %146 = vector.load %arg11[%c0_53, %c0_54, %c0_55] : memref<2x128x640xbf16, #tpu.memory_space<vmem>>, vector<1x128x640xbf16>
    %147 = vector.shape_cast %146 : vector<1x128x640xbf16> to vector<128x640xbf16>
    %cst_56 = arith.constant dense<0.000000e+00> : vector<16x640xf32>
    %148 = tpu.matmul %145, %147, %cst_56 {dimension_numbers = #tpu.dot_dimension_numbers<[1], [0], [0], [1], [0, 0, 1, 1], [], []>} : vector<16x128xbf16>, vector<128x640xbf16>, vector<16x640xf32> -> vector<16x640xf32>
    %c0_57 = arith.constant 0 : index
    %c0_58 = arith.constant 0 : index
    %c0_59 = arith.constant 0 : index
    %149 = vector.load %arg12[%c0_57, %c0_58, %c0_59] : memref<2x1x640xf32, #tpu.memory_space<vmem>>, vector<1x1x640xf32>
    %150 = vector.shape_cast %149 : vector<1x1x640xf32> to vector<1x640xf32>
    %151 = vector.broadcast %150 : vector<1x640xf32> to vector<16x640xf32>
    %152 = arith.addf %148, %151 : vector<16x640xf32>
    %cst_60 = arith.constant 0.000000e+00 : f32
    %153 = vector.broadcast %cst_60 : f32 to vector<16x640xf32>
    %154 = arith.maximumf %152, %153 : vector<16x640xf32>
    %155 = arith.truncf %154 : vector<16x640xf32> to vector<16x640xbf16>
    %c0_61 = arith.constant 0 : index
    %c0_62 = arith.constant 0 : index
    %c0_63 = arith.constant 0 : index
    %156 = vector.load %arg13[%c0_61, %c0_62, %c0_63] : memref<2x640x128xbf16, #tpu.memory_space<vmem>>, vector<1x640x128xbf16>
    %157 = vector.shape_cast %156 : vector<1x640x128xbf16> to vector<640x128xbf16>
    %cst_64 = arith.constant dense<0.000000e+00> : vector<16x128xf32>
    %158 = tpu.matmul %155, %157, %cst_64 {dimension_numbers = #tpu.dot_dimension_numbers<[1], [0], [0], [1], [0, 0, 1, 1], [], []>} : vector<16x640xbf16>, vector<640x128xbf16>, vector<16x128xf32> -> vector<16x128xf32>
    %c0_65 = arith.constant 0 : index
    %c0_66 = arith.constant 0 : index
    %c0_67 = arith.constant 0 : index
    %159 = vector.load %arg14[%c0_65, %c0_66, %c0_67] : memref<2x1x128xf32, #tpu.memory_space<vmem>>, vector<1x1x128xf32>
    %160 = vector.shape_cast %159 : vector<1x1x128xf32> to vector<1x128xf32>
    %161 = vector.broadcast %160 : vector<1x128xf32> to vector<16x128xf32>
    %162 = arith.addf %158, %161 : vector<16x128xf32>
    %163 = arith.addf %144, %162 : vector<16x128xf32>
    %c0_68 = arith.constant 0 : index
    %c0_69 = arith.constant 0 : index
    %c0_70 = arith.constant 0 : index
    %164 = vector.load %arg15[%c0_68, %c0_69, %c0_70] : memref<2x1x128xf32, #tpu.memory_space<vmem>>, vector<1x1x128xf32>
    %165 = vector.shape_cast %164 : vector<1x1x128xf32> to vector<1x128xf32>
    %c0_71 = arith.constant 0 : index
    %c0_72 = arith.constant 0 : index
    %c0_73 = arith.constant 0 : index
    %166 = vector.load %arg16[%c0_71, %c0_72, %c0_73] : memref<2x1x128xf32, #tpu.memory_space<vmem>>, vector<1x1x128xf32>
    %167 = vector.shape_cast %166 : vector<1x1x128xf32> to vector<1x128xf32>
    %cst_74 = arith.constant dense<0.000000e+00> : vector<16xf32>
    %168 = vector.multi_reduction <add>, %163, %cst_74 [1] : vector<16x128xf32> to vector<16xf32>
    %169 = vector.shape_cast %168 : vector<16xf32> to vector<16x1xf32>
    %cst_75 = arith.constant 1.280000e+02 : f32
    %170 = vector.broadcast %cst_75 : f32 to vector<16x1xf32>
    %171 = arith.divf %169, %170 : vector<16x1xf32>
    %172 = vector.broadcast %171 : vector<16x1xf32> to vector<16x128xf32>
    %173 = arith.subf %163, %172 : vector<16x128xf32>
    %174 = arith.mulf %173, %173 : vector<16x128xf32>
    %cst_76 = arith.constant dense<0.000000e+00> : vector<16xf32>
    %175 = vector.multi_reduction <add>, %174, %cst_76 [1] : vector<16x128xf32> to vector<16xf32>
    %176 = vector.shape_cast %175 : vector<16xf32> to vector<16x1xf32>
    %cst_77 = arith.constant 1.280000e+02 : f32
    %177 = vector.broadcast %cst_77 : f32 to vector<16x1xf32>
    %178 = arith.divf %176, %177 : vector<16x1xf32>
    %cst_78 = arith.constant 9.99999974E-6 : f32
    %179 = vector.broadcast %cst_78 : f32 to vector<16x1xf32>
    %180 = arith.addf %178, %179 : vector<16x1xf32>
    %181 = math.rsqrt %180 : vector<16x1xf32>
    %182 = vector.broadcast %181 : vector<16x1xf32> to vector<16x128xf32>
    %183 = arith.mulf %173, %182 : vector<16x128xf32>
    %184 = vector.broadcast %165 : vector<1x128xf32> to vector<16x128xf32>
    %185 = arith.mulf %183, %184 : vector<16x128xf32>
    %186 = vector.broadcast %167 : vector<1x128xf32> to vector<16x128xf32>
    %187 = arith.addf %185, %186 : vector<16x128xf32>
    %188 = arith.truncf %187 : vector<16x128xf32> to vector<16x128xbf16>
    %c1 = arith.constant 1 : index
    %c0_79 = arith.constant 0 : index
    %c0_80 = arith.constant 0 : index
    %189 = vector.load %arg5[%c1, %c0_79, %c0_80] : memref<2x128x384xbf16, #tpu.memory_space<vmem>>, vector<1x128x384xbf16>
    %190 = vector.shape_cast %189 : vector<1x128x384xbf16> to vector<128x384xbf16>
    %cst_81 = arith.constant dense<0.000000e+00> : vector<16x384xf32>
    %191 = tpu.matmul %188, %190, %cst_81 {dimension_numbers = #tpu.dot_dimension_numbers<[1], [0], [0], [1], [0, 0, 1, 1], [], []>} : vector<16x128xbf16>, vector<128x384xbf16>, vector<16x384xf32> -> vector<16x384xf32>
    %c1_82 = arith.constant 1 : index
    %c0_83 = arith.constant 0 : index
    %c0_84 = arith.constant 0 : index
    %192 = vector.load %arg6[%c1_82, %c0_83, %c0_84] : memref<2x1x384xf32, #tpu.memory_space<vmem>>, vector<1x1x384xf32>
    %193 = vector.shape_cast %192 : vector<1x1x384xf32> to vector<1x384xf32>
    %194 = vector.broadcast %193 : vector<1x384xf32> to vector<16x384xf32>
    %195 = arith.addf %191, %194 : vector<16x384xf32>
    %196 = vector.extract_strided_slice %195 {offsets = [0, 0], sizes = [16, 128], strides = [1, 1]} : vector<16x384xf32> to vector<16x128xf32>
    %197 = vector.extract_strided_slice %195 {offsets = [0, 128], sizes = [16, 128], strides = [1, 1]} : vector<16x384xf32> to vector<16x128xf32>
    %198 = vector.extract_strided_slice %195 {offsets = [0, 256], sizes = [16, 128], strides = [1, 1]} : vector<16x384xf32> to vector<16x128xf32>
    %c1_85 = arith.constant 1 : index
    %c0_86 = arith.constant 0 : index
    %c0_87 = arith.constant 0 : index
    %199 = vector.load %arg7[%c1_85, %c0_86, %c0_87] : memref<2x128x128xbf16, #tpu.memory_space<vmem>>, vector<1x128x128xbf16>
    %200 = vector.shape_cast %199 : vector<1x128x128xbf16> to vector<128x128xbf16>
    %cst_88 = arith.constant 0.000000e+00 : f32
    %201 = vector.broadcast %cst_88 : f32 to vector<16x128xf32>
    %202 = vector.extract_strided_slice %196 {offsets = [0, 0], sizes = [16, 32], strides = [1, 1]} : vector<16x128xf32> to vector<16x32xf32>
    %203 = arith.truncf %202 : vector<16x32xf32> to vector<16x32xbf16>
    %204 = vector.extract_strided_slice %197 {offsets = [0, 0], sizes = [16, 32], strides = [1, 1]} : vector<16x128xf32> to vector<16x32xf32>
    %205 = arith.truncf %204 : vector<16x32xf32> to vector<16x32xbf16>
    %206 = vector.extract_strided_slice %198 {offsets = [0, 0], sizes = [16, 32], strides = [1, 1]} : vector<16x128xf32> to vector<16x32xf32>
    %207 = arith.truncf %206 : vector<16x32xf32> to vector<16x32xbf16>
    %cst_89 = arith.constant dense<0.000000e+00> : vector<16x16xf32>
    %208 = tpu.matmul %203, %205, %cst_89 {dimension_numbers = #tpu.dot_dimension_numbers<[1], [1], [0], [0], [0, 0, 1, 0], [], []>} : vector<16x32xbf16>, vector<16x32xbf16>, vector<16x16xf32> -> vector<16x16xf32>
    %cst_90 = arith.constant dense<0xFF800000> : vector<16xf32>
    %209 = vector.multi_reduction <maximumf>, %208, %cst_90 [1] : vector<16x16xf32> to vector<16xf32>
    %210 = vector.shape_cast %209 : vector<16xf32> to vector<16x1xf32>
    %211 = vector.broadcast %210 : vector<16x1xf32> to vector<16x16xf32>
    %212 = arith.subf %208, %211 : vector<16x16xf32>
    %213 = math.exp %212 : vector<16x16xf32>
    %cst_91 = arith.constant dense<0.000000e+00> : vector<16xf32>
    %214 = vector.multi_reduction <add>, %213, %cst_91 [1] : vector<16x16xf32> to vector<16xf32>
    %215 = vector.shape_cast %214 : vector<16xf32> to vector<16x1xf32>
    %216 = tpu.reciprocal %215 {approx = true} : vector<16x1xf32> -> vector<16x1xf32>
    %217 = vector.broadcast %216 : vector<16x1xf32> to vector<16x16xf32>
    %218 = arith.mulf %213, %217 : vector<16x16xf32>
    %219 = arith.truncf %218 : vector<16x16xf32> to vector<16x16xbf16>
    %cst_92 = arith.constant dense<0.000000e+00> : vector<16x32xf32>
    %220 = tpu.matmul %219, %207, %cst_92 {dimension_numbers = #tpu.dot_dimension_numbers<[1], [0], [0], [1], [0, 0, 1, 1], [], []>} : vector<16x16xbf16>, vector<16x32xbf16>, vector<16x32xf32> -> vector<16x32xf32>
    %221 = arith.truncf %220 : vector<16x32xf32> to vector<16x32xbf16>
    %222 = vector.extract_strided_slice %200 {offsets = [0, 0], sizes = [32, 128], strides = [1, 1]} : vector<128x128xbf16> to vector<32x128xbf16>
    %cst_93 = arith.constant dense<0.000000e+00> : vector<16x128xf32>
    %223 = tpu.matmul %221, %222, %cst_93 {dimension_numbers = #tpu.dot_dimension_numbers<[1], [0], [0], [1], [0, 0, 1, 1], [], []>} : vector<16x32xbf16>, vector<32x128xbf16>, vector<16x128xf32> -> vector<16x128xf32>
    %224 = arith.addf %201, %223 : vector<16x128xf32>
    %225 = vector.extract_strided_slice %196 {offsets = [0, 32], sizes = [16, 32], strides = [1, 1]} : vector<16x128xf32> to vector<16x32xf32>
    %226 = arith.truncf %225 : vector<16x32xf32> to vector<16x32xbf16>
    %227 = vector.extract_strided_slice %197 {offsets = [0, 32], sizes = [16, 32], strides = [1, 1]} : vector<16x128xf32> to vector<16x32xf32>
    %228 = arith.truncf %227 : vector<16x32xf32> to vector<16x32xbf16>
    %229 = vector.extract_strided_slice %198 {offsets = [0, 32], sizes = [16, 32], strides = [1, 1]} : vector<16x128xf32> to vector<16x32xf32>
    %230 = arith.truncf %229 : vector<16x32xf32> to vector<16x32xbf16>
    %cst_94 = arith.constant dense<0.000000e+00> : vector<16x16xf32>
    %231 = tpu.matmul %226, %228, %cst_94 {dimension_numbers = #tpu.dot_dimension_numbers<[1], [1], [0], [0], [0, 0, 1, 0], [], []>} : vector<16x32xbf16>, vector<16x32xbf16>, vector<16x16xf32> -> vector<16x16xf32>
    %cst_95 = arith.constant dense<0xFF800000> : vector<16xf32>
    %232 = vector.multi_reduction <maximumf>, %231, %cst_95 [1] : vector<16x16xf32> to vector<16xf32>
    %233 = vector.shape_cast %232 : vector<16xf32> to vector<16x1xf32>
    %234 = vector.broadcast %233 : vector<16x1xf32> to vector<16x16xf32>
    %235 = arith.subf %231, %234 : vector<16x16xf32>
    %236 = math.exp %235 : vector<16x16xf32>
    %cst_96 = arith.constant dense<0.000000e+00> : vector<16xf32>
    %237 = vector.multi_reduction <add>, %236, %cst_96 [1] : vector<16x16xf32> to vector<16xf32>
    %238 = vector.shape_cast %237 : vector<16xf32> to vector<16x1xf32>
    %239 = tpu.reciprocal %238 {approx = true} : vector<16x1xf32> -> vector<16x1xf32>
    %240 = vector.broadcast %239 : vector<16x1xf32> to vector<16x16xf32>
    %241 = arith.mulf %236, %240 : vector<16x16xf32>
    %242 = arith.truncf %241 : vector<16x16xf32> to vector<16x16xbf16>
    %cst_97 = arith.constant dense<0.000000e+00> : vector<16x32xf32>
    %243 = tpu.matmul %242, %230, %cst_97 {dimension_numbers = #tpu.dot_dimension_numbers<[1], [0], [0], [1], [0, 0, 1, 1], [], []>} : vector<16x16xbf16>, vector<16x32xbf16>, vector<16x32xf32> -> vector<16x32xf32>
    %244 = arith.truncf %243 : vector<16x32xf32> to vector<16x32xbf16>
    %245 = vector.extract_strided_slice %200 {offsets = [32, 0], sizes = [32, 128], strides = [1, 1]} : vector<128x128xbf16> to vector<32x128xbf16>
    %cst_98 = arith.constant dense<0.000000e+00> : vector<16x128xf32>
    %246 = tpu.matmul %244, %245, %cst_98 {dimension_numbers = #tpu.dot_dimension_numbers<[1], [0], [0], [1], [0, 0, 1, 1], [], []>} : vector<16x32xbf16>, vector<32x128xbf16>, vector<16x128xf32> -> vector<16x128xf32>
    %247 = arith.addf %224, %246 : vector<16x128xf32>
    %248 = vector.extract_strided_slice %196 {offsets = [0, 64], sizes = [16, 32], strides = [1, 1]} : vector<16x128xf32> to vector<16x32xf32>
    %249 = arith.truncf %248 : vector<16x32xf32> to vector<16x32xbf16>
    %250 = vector.extract_strided_slice %197 {offsets = [0, 64], sizes = [16, 32], strides = [1, 1]} : vector<16x128xf32> to vector<16x32xf32>
    %251 = arith.truncf %250 : vector<16x32xf32> to vector<16x32xbf16>
    %252 = vector.extract_strided_slice %198 {offsets = [0, 64], sizes = [16, 32], strides = [1, 1]} : vector<16x128xf32> to vector<16x32xf32>
    %253 = arith.truncf %252 : vector<16x32xf32> to vector<16x32xbf16>
    %cst_99 = arith.constant dense<0.000000e+00> : vector<16x16xf32>
    %254 = tpu.matmul %249, %251, %cst_99 {dimension_numbers = #tpu.dot_dimension_numbers<[1], [1], [0], [0], [0, 0, 1, 0], [], []>} : vector<16x32xbf16>, vector<16x32xbf16>, vector<16x16xf32> -> vector<16x16xf32>
    %cst_100 = arith.constant dense<0xFF800000> : vector<16xf32>
    %255 = vector.multi_reduction <maximumf>, %254, %cst_100 [1] : vector<16x16xf32> to vector<16xf32>
    %256 = vector.shape_cast %255 : vector<16xf32> to vector<16x1xf32>
    %257 = vector.broadcast %256 : vector<16x1xf32> to vector<16x16xf32>
    %258 = arith.subf %254, %257 : vector<16x16xf32>
    %259 = math.exp %258 : vector<16x16xf32>
    %cst_101 = arith.constant dense<0.000000e+00> : vector<16xf32>
    %260 = vector.multi_reduction <add>, %259, %cst_101 [1] : vector<16x16xf32> to vector<16xf32>
    %261 = vector.shape_cast %260 : vector<16xf32> to vector<16x1xf32>
    %262 = tpu.reciprocal %261 {approx = true} : vector<16x1xf32> -> vector<16x1xf32>
    %263 = vector.broadcast %262 : vector<16x1xf32> to vector<16x16xf32>
    %264 = arith.mulf %259, %263 : vector<16x16xf32>
    %265 = arith.truncf %264 : vector<16x16xf32> to vector<16x16xbf16>
    %cst_102 = arith.constant dense<0.000000e+00> : vector<16x32xf32>
    %266 = tpu.matmul %265, %253, %cst_102 {dimension_numbers = #tpu.dot_dimension_numbers<[1], [0], [0], [1], [0, 0, 1, 1], [], []>} : vector<16x16xbf16>, vector<16x32xbf16>, vector<16x32xf32> -> vector<16x32xf32>
    %267 = arith.truncf %266 : vector<16x32xf32> to vector<16x32xbf16>
    %268 = vector.extract_strided_slice %200 {offsets = [64, 0], sizes = [32, 128], strides = [1, 1]} : vector<128x128xbf16> to vector<32x128xbf16>
    %cst_103 = arith.constant dense<0.000000e+00> : vector<16x128xf32>
    %269 = tpu.matmul %267, %268, %cst_103 {dimension_numbers = #tpu.dot_dimension_numbers<[1], [0], [0], [1], [0, 0, 1, 1], [], []>} : vector<16x32xbf16>, vector<32x128xbf16>, vector<16x128xf32> -> vector<16x128xf32>
    %270 = arith.addf %247, %269 : vector<16x128xf32>
    %271 = vector.extract_strided_slice %196 {offsets = [0, 96], sizes = [16, 32], strides = [1, 1]} : vector<16x128xf32> to vector<16x32xf32>
    %272 = arith.truncf %271 : vector<16x32xf32> to vector<16x32xbf16>
    %273 = vector.extract_strided_slice %197 {offsets = [0, 96], sizes = [16, 32], strides = [1, 1]} : vector<16x128xf32> to vector<16x32xf32>
    %274 = arith.truncf %273 : vector<16x32xf32> to vector<16x32xbf16>
    %275 = vector.extract_strided_slice %198 {offsets = [0, 96], sizes = [16, 32], strides = [1, 1]} : vector<16x128xf32> to vector<16x32xf32>
    %276 = arith.truncf %275 : vector<16x32xf32> to vector<16x32xbf16>
    %cst_104 = arith.constant dense<0.000000e+00> : vector<16x16xf32>
    %277 = tpu.matmul %272, %274, %cst_104 {dimension_numbers = #tpu.dot_dimension_numbers<[1], [1], [0], [0], [0, 0, 1, 0], [], []>} : vector<16x32xbf16>, vector<16x32xbf16>, vector<16x16xf32> -> vector<16x16xf32>
    %cst_105 = arith.constant dense<0xFF800000> : vector<16xf32>
    %278 = vector.multi_reduction <maximumf>, %277, %cst_105 [1] : vector<16x16xf32> to vector<16xf32>
    %279 = vector.shape_cast %278 : vector<16xf32> to vector<16x1xf32>
    %280 = vector.broadcast %279 : vector<16x1xf32> to vector<16x16xf32>
    %281 = arith.subf %277, %280 : vector<16x16xf32>
    %282 = math.exp %281 : vector<16x16xf32>
    %cst_106 = arith.constant dense<0.000000e+00> : vector<16xf32>
    %283 = vector.multi_reduction <add>, %282, %cst_106 [1] : vector<16x16xf32> to vector<16xf32>
    %284 = vector.shape_cast %283 : vector<16xf32> to vector<16x1xf32>
    %285 = tpu.reciprocal %284 {approx = true} : vector<16x1xf32> -> vector<16x1xf32>
    %286 = vector.broadcast %285 : vector<16x1xf32> to vector<16x16xf32>
    %287 = arith.mulf %282, %286 : vector<16x16xf32>
    %288 = arith.truncf %287 : vector<16x16xf32> to vector<16x16xbf16>
    %cst_107 = arith.constant dense<0.000000e+00> : vector<16x32xf32>
    %289 = tpu.matmul %288, %276, %cst_107 {dimension_numbers = #tpu.dot_dimension_numbers<[1], [0], [0], [1], [0, 0, 1, 1], [], []>} : vector<16x16xbf16>, vector<16x32xbf16>, vector<16x32xf32> -> vector<16x32xf32>
    %290 = arith.truncf %289 : vector<16x32xf32> to vector<16x32xbf16>
    %291 = vector.extract_strided_slice %200 {offsets = [96, 0], sizes = [32, 128], strides = [1, 1]} : vector<128x128xbf16> to vector<32x128xbf16>
    %cst_108 = arith.constant dense<0.000000e+00> : vector<16x128xf32>
    %292 = tpu.matmul %290, %291, %cst_108 {dimension_numbers = #tpu.dot_dimension_numbers<[1], [0], [0], [1], [0, 0, 1, 1], [], []>} : vector<16x32xbf16>, vector<32x128xbf16>, vector<16x128xf32> -> vector<16x128xf32>
    %293 = arith.addf %270, %292 : vector<16x128xf32>
    %c1_109 = arith.constant 1 : index
    %c0_110 = arith.constant 0 : index
    %c0_111 = arith.constant 0 : index
    %294 = vector.load %arg8[%c1_109, %c0_110, %c0_111] : memref<2x1x128xf32, #tpu.memory_space<vmem>>, vector<1x1x128xf32>
    %295 = vector.shape_cast %294 : vector<1x1x128xf32> to vector<1x128xf32>
    %296 = vector.broadcast %295 : vector<1x128xf32> to vector<16x128xf32>
    %297 = arith.addf %293, %296 : vector<16x128xf32>
    %298 = arith.addf %187, %297 : vector<16x128xf32>
    %c1_112 = arith.constant 1 : index
    %c0_113 = arith.constant 0 : index
    %c0_114 = arith.constant 0 : index
    %299 = vector.load %arg9[%c1_112, %c0_113, %c0_114] : memref<2x1x128xf32, #tpu.memory_space<vmem>>, vector<1x1x128xf32>
    %300 = vector.shape_cast %299 : vector<1x1x128xf32> to vector<1x128xf32>
    %c1_115 = arith.constant 1 : index
    %c0_116 = arith.constant 0 : index
    %c0_117 = arith.constant 0 : index
    %301 = vector.load %arg10[%c1_115, %c0_116, %c0_117] : memref<2x1x128xf32, #tpu.memory_space<vmem>>, vector<1x1x128xf32>
    %302 = vector.shape_cast %301 : vector<1x1x128xf32> to vector<1x128xf32>
    %cst_118 = arith.constant dense<0.000000e+00> : vector<16xf32>
    %303 = vector.multi_reduction <add>, %298, %cst_118 [1] : vector<16x128xf32> to vector<16xf32>
    %304 = vector.shape_cast %303 : vector<16xf32> to vector<16x1xf32>
    %cst_119 = arith.constant 1.280000e+02 : f32
    %305 = vector.broadcast %cst_119 : f32 to vector<16x1xf32>
    %306 = arith.divf %304, %305 : vector<16x1xf32>
    %307 = vector.broadcast %306 : vector<16x1xf32> to vector<16x128xf32>
    %308 = arith.subf %298, %307 : vector<16x128xf32>
    %309 = arith.mulf %308, %308 : vector<16x128xf32>
    %cst_120 = arith.constant dense<0.000000e+00> : vector<16xf32>
    %310 = vector.multi_reduction <add>, %309, %cst_120 [1] : vector<16x128xf32> to vector<16xf32>
    %311 = vector.shape_cast %310 : vector<16xf32> to vector<16x1xf32>
    %cst_121 = arith.constant 1.280000e+02 : f32
    %312 = vector.broadcast %cst_121 : f32 to vector<16x1xf32>
    %313 = arith.divf %311, %312 : vector<16x1xf32>
    %cst_122 = arith.constant 9.99999974E-6 : f32
    %314 = vector.broadcast %cst_122 : f32 to vector<16x1xf32>
    %315 = arith.addf %313, %314 : vector<16x1xf32>
    %316 = math.rsqrt %315 : vector<16x1xf32>
    %317 = vector.broadcast %316 : vector<16x1xf32> to vector<16x128xf32>
    %318 = arith.mulf %308, %317 : vector<16x128xf32>
    %319 = vector.broadcast %300 : vector<1x128xf32> to vector<16x128xf32>
    %320 = arith.mulf %318, %319 : vector<16x128xf32>
    %321 = vector.broadcast %302 : vector<1x128xf32> to vector<16x128xf32>
    %322 = arith.addf %320, %321 : vector<16x128xf32>
    %323 = arith.truncf %322 : vector<16x128xf32> to vector<16x128xbf16>
    %c1_123 = arith.constant 1 : index
    %c0_124 = arith.constant 0 : index
    %c0_125 = arith.constant 0 : index
    %324 = vector.load %arg11[%c1_123, %c0_124, %c0_125] : memref<2x128x640xbf16, #tpu.memory_space<vmem>>, vector<1x128x640xbf16>
    %325 = vector.shape_cast %324 : vector<1x128x640xbf16> to vector<128x640xbf16>
    %cst_126 = arith.constant dense<0.000000e+00> : vector<16x640xf32>
    %326 = tpu.matmul %323, %325, %cst_126 {dimension_numbers = #tpu.dot_dimension_numbers<[1], [0], [0], [1], [0, 0, 1, 1], [], []>} : vector<16x128xbf16>, vector<128x640xbf16>, vector<16x640xf32> -> vector<16x640xf32>
    %c1_127 = arith.constant 1 : index
    %c0_128 = arith.constant 0 : index
    %c0_129 = arith.constant 0 : index
    %327 = vector.load %arg12[%c1_127, %c0_128, %c0_129] : memref<2x1x640xf32, #tpu.memory_space<vmem>>, vector<1x1x640xf32>
    %328 = vector.shape_cast %327 : vector<1x1x640xf32> to vector<1x640xf32>
    %329 = vector.broadcast %328 : vector<1x640xf32> to vector<16x640xf32>
    %330 = arith.addf %326, %329 : vector<16x640xf32>
    %cst_130 = arith.constant 0.000000e+00 : f32
    %331 = vector.broadcast %cst_130 : f32 to vector<16x640xf32>
    %332 = arith.maximumf %330, %331 : vector<16x640xf32>
    %333 = arith.truncf %332 : vector<16x640xf32> to vector<16x640xbf16>
    %c1_131 = arith.constant 1 : index
    %c0_132 = arith.constant 0 : index
    %c0_133 = arith.constant 0 : index
    %334 = vector.load %arg13[%c1_131, %c0_132, %c0_133] : memref<2x640x128xbf16, #tpu.memory_space<vmem>>, vector<1x640x128xbf16>
    %335 = vector.shape_cast %334 : vector<1x640x128xbf16> to vector<640x128xbf16>
    %cst_134 = arith.constant dense<0.000000e+00> : vector<16x128xf32>
    %336 = tpu.matmul %333, %335, %cst_134 {dimension_numbers = #tpu.dot_dimension_numbers<[1], [0], [0], [1], [0, 0, 1, 1], [], []>} : vector<16x640xbf16>, vector<640x128xbf16>, vector<16x128xf32> -> vector<16x128xf32>
    %c1_135 = arith.constant 1 : index
    %c0_136 = arith.constant 0 : index
    %c0_137 = arith.constant 0 : index
    %337 = vector.load %arg14[%c1_135, %c0_136, %c0_137] : memref<2x1x128xf32, #tpu.memory_space<vmem>>, vector<1x1x128xf32>
    %338 = vector.shape_cast %337 : vector<1x1x128xf32> to vector<1x128xf32>
    %339 = vector.broadcast %338 : vector<1x128xf32> to vector<16x128xf32>
    %340 = arith.addf %336, %339 : vector<16x128xf32>
    %341 = arith.addf %322, %340 : vector<16x128xf32>
    %c1_138 = arith.constant 1 : index
    %c0_139 = arith.constant 0 : index
    %c0_140 = arith.constant 0 : index
    %342 = vector.load %arg15[%c1_138, %c0_139, %c0_140] : memref<2x1x128xf32, #tpu.memory_space<vmem>>, vector<1x1x128xf32>
    %343 = vector.shape_cast %342 : vector<1x1x128xf32> to vector<1x128xf32>
    %c1_141 = arith.constant 1 : index
    %c0_142 = arith.constant 0 : index
    %c0_143 = arith.constant 0 : index
    %344 = vector.load %arg16[%c1_141, %c0_142, %c0_143] : memref<2x1x128xf32, #tpu.memory_space<vmem>>, vector<1x1x128xf32>
    %345 = vector.shape_cast %344 : vector<1x1x128xf32> to vector<1x128xf32>
    %cst_144 = arith.constant dense<0.000000e+00> : vector<16xf32>
    %346 = vector.multi_reduction <add>, %341, %cst_144 [1] : vector<16x128xf32> to vector<16xf32>
    %347 = vector.shape_cast %346 : vector<16xf32> to vector<16x1xf32>
    %cst_145 = arith.constant 1.280000e+02 : f32
    %348 = vector.broadcast %cst_145 : f32 to vector<16x1xf32>
    %349 = arith.divf %347, %348 : vector<16x1xf32>
    %350 = vector.broadcast %349 : vector<16x1xf32> to vector<16x128xf32>
    %351 = arith.subf %341, %350 : vector<16x128xf32>
    %352 = arith.mulf %351, %351 : vector<16x128xf32>
    %cst_146 = arith.constant dense<0.000000e+00> : vector<16xf32>
    %353 = vector.multi_reduction <add>, %352, %cst_146 [1] : vector<16x128xf32> to vector<16xf32>
    %354 = vector.shape_cast %353 : vector<16xf32> to vector<16x1xf32>
    %cst_147 = arith.constant 1.280000e+02 : f32
    %355 = vector.broadcast %cst_147 : f32 to vector<16x1xf32>
    %356 = arith.divf %354, %355 : vector<16x1xf32>
    %cst_148 = arith.constant 9.99999974E-6 : f32
    %357 = vector.broadcast %cst_148 : f32 to vector<16x1xf32>
    %358 = arith.addf %356, %357 : vector<16x1xf32>
    %359 = math.rsqrt %358 : vector<16x1xf32>
    %360 = vector.broadcast %359 : vector<16x1xf32> to vector<16x128xf32>
    %361 = arith.mulf %351, %360 : vector<16x128xf32>
    %362 = vector.broadcast %343 : vector<1x128xf32> to vector<16x128xf32>
    %363 = arith.mulf %361, %362 : vector<16x128xf32>
    %364 = vector.broadcast %345 : vector<1x128xf32> to vector<16x128xf32>
    %365 = arith.addf %363, %364 : vector<16x128xf32>
    %366 = arith.truncf %365 : vector<16x128xf32> to vector<16x128xbf16>
    %367 = arith.truncf %9 : vector<16x128xf32> to vector<16x128xbf16>
    %c0_149 = arith.constant 0 : index
    %c0_150 = arith.constant 0 : index
    %c0_151 = arith.constant 0 : index
    %368 = vector.load %arg17[%c0_149, %c0_150, %c0_151] : memref<2x128x384xbf16, #tpu.memory_space<vmem>>, vector<1x128x384xbf16>
    %369 = vector.shape_cast %368 : vector<1x128x384xbf16> to vector<128x384xbf16>
    %cst_152 = arith.constant dense<0.000000e+00> : vector<16x384xf32>
    %370 = tpu.matmul %367, %369, %cst_152 {dimension_numbers = #tpu.dot_dimension_numbers<[1], [0], [0], [1], [0, 0, 1, 1], [], []>} : vector<16x128xbf16>, vector<128x384xbf16>, vector<16x384xf32> -> vector<16x384xf32>
    %c0_153 = arith.constant 0 : index
    %c0_154 = arith.constant 0 : index
    %c0_155 = arith.constant 0 : index
    %371 = vector.load %arg18[%c0_153, %c0_154, %c0_155] : memref<2x1x384xf32, #tpu.memory_space<vmem>>, vector<1x1x384xf32>
    %372 = vector.shape_cast %371 : vector<1x1x384xf32> to vector<1x384xf32>
    %373 = vector.broadcast %372 : vector<1x384xf32> to vector<16x384xf32>
    %374 = arith.addf %370, %373 : vector<16x384xf32>
    %375 = vector.extract_strided_slice %374 {offsets = [0, 0], sizes = [16, 128], strides = [1, 1]} : vector<16x384xf32> to vector<16x128xf32>
    %376 = vector.extract_strided_slice %374 {offsets = [0, 128], sizes = [16, 128], strides = [1, 1]} : vector<16x384xf32> to vector<16x128xf32>
    %377 = vector.extract_strided_slice %374 {offsets = [0, 256], sizes = [16, 128], strides = [1, 1]} : vector<16x384xf32> to vector<16x128xf32>
    %c0_156 = arith.constant 0 : index
    %c0_157 = arith.constant 0 : index
    %c0_158 = arith.constant 0 : index
    %378 = vector.load %arg19[%c0_156, %c0_157, %c0_158] : memref<2x128x128xbf16, #tpu.memory_space<vmem>>, vector<1x128x128xbf16>
    %379 = vector.shape_cast %378 : vector<1x128x128xbf16> to vector<128x128xbf16>
    %cst_159 = arith.constant 0.000000e+00 : f32
    %380 = vector.broadcast %cst_159 : f32 to vector<16x128xf32>
    %381 = vector.extract_strided_slice %375 {offsets = [0, 0], sizes = [16, 32], strides = [1, 1]} : vector<16x128xf32> to vector<16x32xf32>
    %382 = arith.truncf %381 : vector<16x32xf32> to vector<16x32xbf16>
    %383 = vector.extract_strided_slice %376 {offsets = [0, 0], sizes = [16, 32], strides = [1, 1]} : vector<16x128xf32> to vector<16x32xf32>
    %384 = arith.truncf %383 : vector<16x32xf32> to vector<16x32xbf16>
    %385 = vector.extract_strided_slice %377 {offsets = [0, 0], sizes = [16, 32], strides = [1, 1]} : vector<16x128xf32> to vector<16x32xf32>
    %386 = arith.truncf %385 : vector<16x32xf32> to vector<16x32xbf16>
    %cst_160 = arith.constant dense<0.000000e+00> : vector<16x16xf32>
    %387 = tpu.matmul %382, %384, %cst_160 {dimension_numbers = #tpu.dot_dimension_numbers<[1], [1], [0], [0], [0, 0, 1, 0], [], []>} : vector<16x32xbf16>, vector<16x32xbf16>, vector<16x16xf32> -> vector<16x16xf32>
    %cst_161 = arith.constant dense<0xFF800000> : vector<16xf32>
    %388 = vector.multi_reduction <maximumf>, %387, %cst_161 [1] : vector<16x16xf32> to vector<16xf32>
    %389 = vector.shape_cast %388 : vector<16xf32> to vector<16x1xf32>
    %390 = vector.broadcast %389 : vector<16x1xf32> to vector<16x16xf32>
    %391 = arith.subf %387, %390 : vector<16x16xf32>
    %392 = math.exp %391 : vector<16x16xf32>
    %cst_162 = arith.constant dense<0.000000e+00> : vector<16xf32>
    %393 = vector.multi_reduction <add>, %392, %cst_162 [1] : vector<16x16xf32> to vector<16xf32>
    %394 = vector.shape_cast %393 : vector<16xf32> to vector<16x1xf32>
    %395 = tpu.reciprocal %394 {approx = true} : vector<16x1xf32> -> vector<16x1xf32>
    %396 = vector.broadcast %395 : vector<16x1xf32> to vector<16x16xf32>
    %397 = arith.mulf %392, %396 : vector<16x16xf32>
    %398 = arith.truncf %397 : vector<16x16xf32> to vector<16x16xbf16>
    %cst_163 = arith.constant dense<0.000000e+00> : vector<16x32xf32>
    %399 = tpu.matmul %398, %386, %cst_163 {dimension_numbers = #tpu.dot_dimension_numbers<[1], [0], [0], [1], [0, 0, 1, 1], [], []>} : vector<16x16xbf16>, vector<16x32xbf16>, vector<16x32xf32> -> vector<16x32xf32>
    %400 = arith.truncf %399 : vector<16x32xf32> to vector<16x32xbf16>
    %401 = vector.extract_strided_slice %379 {offsets = [0, 0], sizes = [32, 128], strides = [1, 1]} : vector<128x128xbf16> to vector<32x128xbf16>
    %cst_164 = arith.constant dense<0.000000e+00> : vector<16x128xf32>
    %402 = tpu.matmul %400, %401, %cst_164 {dimension_numbers = #tpu.dot_dimension_numbers<[1], [0], [0], [1], [0, 0, 1, 1], [], []>} : vector<16x32xbf16>, vector<32x128xbf16>, vector<16x128xf32> -> vector<16x128xf32>
    %403 = arith.addf %380, %402 : vector<16x128xf32>
    %404 = vector.extract_strided_slice %375 {offsets = [0, 32], sizes = [16, 32], strides = [1, 1]} : vector<16x128xf32> to vector<16x32xf32>
    %405 = arith.truncf %404 : vector<16x32xf32> to vector<16x32xbf16>
    %406 = vector.extract_strided_slice %376 {offsets = [0, 32], sizes = [16, 32], strides = [1, 1]} : vector<16x128xf32> to vector<16x32xf32>
    %407 = arith.truncf %406 : vector<16x32xf32> to vector<16x32xbf16>
    %408 = vector.extract_strided_slice %377 {offsets = [0, 32], sizes = [16, 32], strides = [1, 1]} : vector<16x128xf32> to vector<16x32xf32>
    %409 = arith.truncf %408 : vector<16x32xf32> to vector<16x32xbf16>
    %cst_165 = arith.constant dense<0.000000e+00> : vector<16x16xf32>
    %410 = tpu.matmul %405, %407, %cst_165 {dimension_numbers = #tpu.dot_dimension_numbers<[1], [1], [0], [0], [0, 0, 1, 0], [], []>} : vector<16x32xbf16>, vector<16x32xbf16>, vector<16x16xf32> -> vector<16x16xf32>
    %cst_166 = arith.constant dense<0xFF800000> : vector<16xf32>
    %411 = vector.multi_reduction <maximumf>, %410, %cst_166 [1] : vector<16x16xf32> to vector<16xf32>
    %412 = vector.shape_cast %411 : vector<16xf32> to vector<16x1xf32>
    %413 = vector.broadcast %412 : vector<16x1xf32> to vector<16x16xf32>
    %414 = arith.subf %410, %413 : vector<16x16xf32>
    %415 = math.exp %414 : vector<16x16xf32>
    %cst_167 = arith.constant dense<0.000000e+00> : vector<16xf32>
    %416 = vector.multi_reduction <add>, %415, %cst_167 [1] : vector<16x16xf32> to vector<16xf32>
    %417 = vector.shape_cast %416 : vector<16xf32> to vector<16x1xf32>
    %418 = tpu.reciprocal %417 {approx = true} : vector<16x1xf32> -> vector<16x1xf32>
    %419 = vector.broadcast %418 : vector<16x1xf32> to vector<16x16xf32>
    %420 = arith.mulf %415, %419 : vector<16x16xf32>
    %421 = arith.truncf %420 : vector<16x16xf32> to vector<16x16xbf16>
    %cst_168 = arith.constant dense<0.000000e+00> : vector<16x32xf32>
    %422 = tpu.matmul %421, %409, %cst_168 {dimension_numbers = #tpu.dot_dimension_numbers<[1], [0], [0], [1], [0, 0, 1, 1], [], []>} : vector<16x16xbf16>, vector<16x32xbf16>, vector<16x32xf32> -> vector<16x32xf32>
    %423 = arith.truncf %422 : vector<16x32xf32> to vector<16x32xbf16>
    %424 = vector.extract_strided_slice %379 {offsets = [32, 0], sizes = [32, 128], strides = [1, 1]} : vector<128x128xbf16> to vector<32x128xbf16>
    %cst_169 = arith.constant dense<0.000000e+00> : vector<16x128xf32>
    %425 = tpu.matmul %423, %424, %cst_169 {dimension_numbers = #tpu.dot_dimension_numbers<[1], [0], [0], [1], [0, 0, 1, 1], [], []>} : vector<16x32xbf16>, vector<32x128xbf16>, vector<16x128xf32> -> vector<16x128xf32>
    %426 = arith.addf %403, %425 : vector<16x128xf32>
    %427 = vector.extract_strided_slice %375 {offsets = [0, 64], sizes = [16, 32], strides = [1, 1]} : vector<16x128xf32> to vector<16x32xf32>
    %428 = arith.truncf %427 : vector<16x32xf32> to vector<16x32xbf16>
    %429 = vector.extract_strided_slice %376 {offsets = [0, 64], sizes = [16, 32], strides = [1, 1]} : vector<16x128xf32> to vector<16x32xf32>
    %430 = arith.truncf %429 : vector<16x32xf32> to vector<16x32xbf16>
    %431 = vector.extract_strided_slice %377 {offsets = [0, 64], sizes = [16, 32], strides = [1, 1]} : vector<16x128xf32> to vector<16x32xf32>
    %432 = arith.truncf %431 : vector<16x32xf32> to vector<16x32xbf16>
    %cst_170 = arith.constant dense<0.000000e+00> : vector<16x16xf32>
    %433 = tpu.matmul %428, %430, %cst_170 {dimension_numbers = #tpu.dot_dimension_numbers<[1], [1], [0], [0], [0, 0, 1, 0], [], []>} : vector<16x32xbf16>, vector<16x32xbf16>, vector<16x16xf32> -> vector<16x16xf32>
    %cst_171 = arith.constant dense<0xFF800000> : vector<16xf32>
    %434 = vector.multi_reduction <maximumf>, %433, %cst_171 [1] : vector<16x16xf32> to vector<16xf32>
    %435 = vector.shape_cast %434 : vector<16xf32> to vector<16x1xf32>
    %436 = vector.broadcast %435 : vector<16x1xf32> to vector<16x16xf32>
    %437 = arith.subf %433, %436 : vector<16x16xf32>
    %438 = math.exp %437 : vector<16x16xf32>
    %cst_172 = arith.constant dense<0.000000e+00> : vector<16xf32>
    %439 = vector.multi_reduction <add>, %438, %cst_172 [1] : vector<16x16xf32> to vector<16xf32>
    %440 = vector.shape_cast %439 : vector<16xf32> to vector<16x1xf32>
    %441 = tpu.reciprocal %440 {approx = true} : vector<16x1xf32> -> vector<16x1xf32>
    %442 = vector.broadcast %441 : vector<16x1xf32> to vector<16x16xf32>
    %443 = arith.mulf %438, %442 : vector<16x16xf32>
    %444 = arith.truncf %443 : vector<16x16xf32> to vector<16x16xbf16>
    %cst_173 = arith.constant dense<0.000000e+00> : vector<16x32xf32>
    %445 = tpu.matmul %444, %432, %cst_173 {dimension_numbers = #tpu.dot_dimension_numbers<[1], [0], [0], [1], [0, 0, 1, 1], [], []>} : vector<16x16xbf16>, vector<16x32xbf16>, vector<16x32xf32> -> vector<16x32xf32>
    %446 = arith.truncf %445 : vector<16x32xf32> to vector<16x32xbf16>
    %447 = vector.extract_strided_slice %379 {offsets = [64, 0], sizes = [32, 128], strides = [1, 1]} : vector<128x128xbf16> to vector<32x128xbf16>
    %cst_174 = arith.constant dense<0.000000e+00> : vector<16x128xf32>
    %448 = tpu.matmul %446, %447, %cst_174 {dimension_numbers = #tpu.dot_dimension_numbers<[1], [0], [0], [1], [0, 0, 1, 1], [], []>} : vector<16x32xbf16>, vector<32x128xbf16>, vector<16x128xf32> -> vector<16x128xf32>
    %449 = arith.addf %426, %448 : vector<16x128xf32>
    %450 = vector.extract_strided_slice %375 {offsets = [0, 96], sizes = [16, 32], strides = [1, 1]} : vector<16x128xf32> to vector<16x32xf32>
    %451 = arith.truncf %450 : vector<16x32xf32> to vector<16x32xbf16>
    %452 = vector.extract_strided_slice %376 {offsets = [0, 96], sizes = [16, 32], strides = [1, 1]} : vector<16x128xf32> to vector<16x32xf32>
    %453 = arith.truncf %452 : vector<16x32xf32> to vector<16x32xbf16>
    %454 = vector.extract_strided_slice %377 {offsets = [0, 96], sizes = [16, 32], strides = [1, 1]} : vector<16x128xf32> to vector<16x32xf32>
    %455 = arith.truncf %454 : vector<16x32xf32> to vector<16x32xbf16>
    %cst_175 = arith.constant dense<0.000000e+00> : vector<16x16xf32>
    %456 = tpu.matmul %451, %453, %cst_175 {dimension_numbers = #tpu.dot_dimension_numbers<[1], [1], [0], [0], [0, 0, 1, 0], [], []>} : vector<16x32xbf16>, vector<16x32xbf16>, vector<16x16xf32> -> vector<16x16xf32>
    %cst_176 = arith.constant dense<0xFF800000> : vector<16xf32>
    %457 = vector.multi_reduction <maximumf>, %456, %cst_176 [1] : vector<16x16xf32> to vector<16xf32>
    %458 = vector.shape_cast %457 : vector<16xf32> to vector<16x1xf32>
    %459 = vector.broadcast %458 : vector<16x1xf32> to vector<16x16xf32>
    %460 = arith.subf %456, %459 : vector<16x16xf32>
    %461 = math.exp %460 : vector<16x16xf32>
    %cst_177 = arith.constant dense<0.000000e+00> : vector<16xf32>
    %462 = vector.multi_reduction <add>, %461, %cst_177 [1] : vector<16x16xf32> to vector<16xf32>
    %463 = vector.shape_cast %462 : vector<16xf32> to vector<16x1xf32>
    %464 = tpu.reciprocal %463 {approx = true} : vector<16x1xf32> -> vector<16x1xf32>
    %465 = vector.broadcast %464 : vector<16x1xf32> to vector<16x16xf32>
    %466 = arith.mulf %461, %465 : vector<16x16xf32>
    %467 = arith.truncf %466 : vector<16x16xf32> to vector<16x16xbf16>
    %cst_178 = arith.constant dense<0.000000e+00> : vector<16x32xf32>
    %468 = tpu.matmul %467, %455, %cst_178 {dimension_numbers = #tpu.dot_dimension_numbers<[1], [0], [0], [1], [0, 0, 1, 1], [], []>} : vector<16x16xbf16>, vector<16x32xbf16>, vector<16x32xf32> -> vector<16x32xf32>
    %469 = arith.truncf %468 : vector<16x32xf32> to vector<16x32xbf16>
    %470 = vector.extract_strided_slice %379 {offsets = [96, 0], sizes = [32, 128], strides = [1, 1]} : vector<128x128xbf16> to vector<32x128xbf16>
    %cst_179 = arith.constant dense<0.000000e+00> : vector<16x128xf32>
    %471 = tpu.matmul %469, %470, %cst_179 {dimension_numbers = #tpu.dot_dimension_numbers<[1], [0], [0], [1], [0, 0, 1, 1], [], []>} : vector<16x32xbf16>, vector<32x128xbf16>, vector<16x128xf32> -> vector<16x128xf32>
    %472 = arith.addf %449, %471 : vector<16x128xf32>
    %c0_180 = arith.constant 0 : index
    %c0_181 = arith.constant 0 : index
    %c0_182 = arith.constant 0 : index
    %473 = vector.load %arg20[%c0_180, %c0_181, %c0_182] : memref<2x1x128xf32, #tpu.memory_space<vmem>>, vector<1x1x128xf32>
    %474 = vector.shape_cast %473 : vector<1x1x128xf32> to vector<1x128xf32>
    %475 = vector.broadcast %474 : vector<1x128xf32> to vector<16x128xf32>
    %476 = arith.addf %472, %475 : vector<16x128xf32>
    %477 = arith.addf %9, %476 : vector<16x128xf32>
    %c0_183 = arith.constant 0 : index
    %c0_184 = arith.constant 0 : index
    %c0_185 = arith.constant 0 : index
    %478 = vector.load %arg21[%c0_183, %c0_184, %c0_185] : memref<2x1x128xf32, #tpu.memory_space<vmem>>, vector<1x1x128xf32>
    %479 = vector.shape_cast %478 : vector<1x1x128xf32> to vector<1x128xf32>
    %c0_186 = arith.constant 0 : index
    %c0_187 = arith.constant 0 : index
    %c0_188 = arith.constant 0 : index
    %480 = vector.load %arg22[%c0_186, %c0_187, %c0_188] : memref<2x1x128xf32, #tpu.memory_space<vmem>>, vector<1x1x128xf32>
    %481 = vector.shape_cast %480 : vector<1x1x128xf32> to vector<1x128xf32>
    %cst_189 = arith.constant dense<0.000000e+00> : vector<16xf32>
    %482 = vector.multi_reduction <add>, %477, %cst_189 [1] : vector<16x128xf32> to vector<16xf32>
    %483 = vector.shape_cast %482 : vector<16xf32> to vector<16x1xf32>
    %cst_190 = arith.constant 1.280000e+02 : f32
    %484 = vector.broadcast %cst_190 : f32 to vector<16x1xf32>
    %485 = arith.divf %483, %484 : vector<16x1xf32>
    %486 = vector.broadcast %485 : vector<16x1xf32> to vector<16x128xf32>
    %487 = arith.subf %477, %486 : vector<16x128xf32>
    %488 = arith.mulf %487, %487 : vector<16x128xf32>
    %cst_191 = arith.constant dense<0.000000e+00> : vector<16xf32>
    %489 = vector.multi_reduction <add>, %488, %cst_191 [1] : vector<16x128xf32> to vector<16xf32>
    %490 = vector.shape_cast %489 : vector<16xf32> to vector<16x1xf32>
    %cst_192 = arith.constant 1.280000e+02 : f32
    %491 = vector.broadcast %cst_192 : f32 to vector<16x1xf32>
    %492 = arith.divf %490, %491 : vector<16x1xf32>
    %cst_193 = arith.constant 9.99999974E-6 : f32
    %493 = vector.broadcast %cst_193 : f32 to vector<16x1xf32>
    %494 = arith.addf %492, %493 : vector<16x1xf32>
    %495 = math.rsqrt %494 : vector<16x1xf32>
    %496 = vector.broadcast %495 : vector<16x1xf32> to vector<16x128xf32>
    %497 = arith.mulf %487, %496 : vector<16x128xf32>
    %498 = vector.broadcast %479 : vector<1x128xf32> to vector<16x128xf32>
    %499 = arith.mulf %497, %498 : vector<16x128xf32>
    %500 = vector.broadcast %481 : vector<1x128xf32> to vector<16x128xf32>
    %501 = arith.addf %499, %500 : vector<16x128xf32>
    %502 = arith.truncf %501 : vector<16x128xf32> to vector<16x128xbf16>
    %c0_194 = arith.constant 0 : index
    %c0_195 = arith.constant 0 : index
    %c0_196 = arith.constant 0 : index
    %503 = vector.load %arg23[%c0_194, %c0_195, %c0_196] : memref<2x128x128xbf16, #tpu.memory_space<vmem>>, vector<1x128x128xbf16>
    %504 = vector.shape_cast %503 : vector<1x128x128xbf16> to vector<128x128xbf16>
    %cst_197 = arith.constant dense<0.000000e+00> : vector<16x128xf32>
    %505 = tpu.matmul %502, %504, %cst_197 {dimension_numbers = #tpu.dot_dimension_numbers<[1], [0], [0], [1], [0, 0, 1, 1], [], []>} : vector<16x128xbf16>, vector<128x128xbf16>, vector<16x128xf32> -> vector<16x128xf32>
    %c0_198 = arith.constant 0 : index
    %c0_199 = arith.constant 0 : index
    %c0_200 = arith.constant 0 : index
    %506 = vector.load %arg24[%c0_198, %c0_199, %c0_200] : memref<2x1x128xf32, #tpu.memory_space<vmem>>, vector<1x1x128xf32>
    %507 = vector.shape_cast %506 : vector<1x1x128xf32> to vector<1x128xf32>
    %508 = vector.broadcast %507 : vector<1x128xf32> to vector<16x128xf32>
    %509 = arith.addf %505, %508 : vector<16x128xf32>
    %c0_201 = arith.constant 0 : index
    %c0_202 = arith.constant 0 : index
    %c0_203 = arith.constant 0 : index
    %510 = vector.load %arg25[%c0_201, %c0_202, %c0_203] : memref<2x128x256xbf16, #tpu.memory_space<vmem>>, vector<1x128x256xbf16>
    %511 = vector.shape_cast %510 : vector<1x128x256xbf16> to vector<128x256xbf16>
    %cst_204 = arith.constant dense<0.000000e+00> : vector<16x256xf32>
    %512 = tpu.matmul %366, %511, %cst_204 {dimension_numbers = #tpu.dot_dimension_numbers<[1], [0], [0], [1], [0, 0, 1, 1], [], []>} : vector<16x128xbf16>, vector<128x256xbf16>, vector<16x256xf32> -> vector<16x256xf32>
    %c0_205 = arith.constant 0 : index
    %c0_206 = arith.constant 0 : index
    %c0_207 = arith.constant 0 : index
    %513 = vector.load %arg26[%c0_205, %c0_206, %c0_207] : memref<2x1x256xf32, #tpu.memory_space<vmem>>, vector<1x1x256xf32>
    %514 = vector.shape_cast %513 : vector<1x1x256xf32> to vector<1x256xf32>
    %515 = vector.broadcast %514 : vector<1x256xf32> to vector<16x256xf32>
    %516 = arith.addf %512, %515 : vector<16x256xf32>
    %517 = vector.extract_strided_slice %516 {offsets = [0, 0], sizes = [16, 128], strides = [1, 1]} : vector<16x256xf32> to vector<16x128xf32>
    %518 = vector.extract_strided_slice %516 {offsets = [0, 128], sizes = [16, 128], strides = [1, 1]} : vector<16x256xf32> to vector<16x128xf32>
    %c0_208 = arith.constant 0 : index
    %c0_209 = arith.constant 0 : index
    %c0_210 = arith.constant 0 : index
    %519 = vector.load %arg27[%c0_208, %c0_209, %c0_210] : memref<2x128x128xbf16, #tpu.memory_space<vmem>>, vector<1x128x128xbf16>
    %520 = vector.shape_cast %519 : vector<1x128x128xbf16> to vector<128x128xbf16>
    %cst_211 = arith.constant 0.000000e+00 : f32
    %521 = vector.broadcast %cst_211 : f32 to vector<16x128xf32>
    %522 = vector.extract_strided_slice %509 {offsets = [0, 0], sizes = [16, 32], strides = [1, 1]} : vector<16x128xf32> to vector<16x32xf32>
    %523 = arith.truncf %522 : vector<16x32xf32> to vector<16x32xbf16>
    %524 = vector.extract_strided_slice %517 {offsets = [0, 0], sizes = [16, 32], strides = [1, 1]} : vector<16x128xf32> to vector<16x32xf32>
    %525 = arith.truncf %524 : vector<16x32xf32> to vector<16x32xbf16>
    %526 = vector.extract_strided_slice %518 {offsets = [0, 0], sizes = [16, 32], strides = [1, 1]} : vector<16x128xf32> to vector<16x32xf32>
    %527 = arith.truncf %526 : vector<16x32xf32> to vector<16x32xbf16>
    %cst_212 = arith.constant dense<0.000000e+00> : vector<16x16xf32>
    %528 = tpu.matmul %523, %525, %cst_212 {dimension_numbers = #tpu.dot_dimension_numbers<[1], [1], [0], [0], [0, 0, 1, 0], [], []>} : vector<16x32xbf16>, vector<16x32xbf16>, vector<16x16xf32> -> vector<16x16xf32>
    %cst_213 = arith.constant dense<0xFF800000> : vector<16xf32>
    %529 = vector.multi_reduction <maximumf>, %528, %cst_213 [1] : vector<16x16xf32> to vector<16xf32>
    %530 = vector.shape_cast %529 : vector<16xf32> to vector<16x1xf32>
    %531 = vector.broadcast %530 : vector<16x1xf32> to vector<16x16xf32>
    %532 = arith.subf %528, %531 : vector<16x16xf32>
    %533 = math.exp %532 : vector<16x16xf32>
    %cst_214 = arith.constant dense<0.000000e+00> : vector<16xf32>
    %534 = vector.multi_reduction <add>, %533, %cst_214 [1] : vector<16x16xf32> to vector<16xf32>
    %535 = vector.shape_cast %534 : vector<16xf32> to vector<16x1xf32>
    %536 = tpu.reciprocal %535 {approx = true} : vector<16x1xf32> -> vector<16x1xf32>
    %537 = vector.broadcast %536 : vector<16x1xf32> to vector<16x16xf32>
    %538 = arith.mulf %533, %537 : vector<16x16xf32>
    %539 = arith.truncf %538 : vector<16x16xf32> to vector<16x16xbf16>
    %cst_215 = arith.constant dense<0.000000e+00> : vector<16x32xf32>
    %540 = tpu.matmul %539, %527, %cst_215 {dimension_numbers = #tpu.dot_dimension_numbers<[1], [0], [0], [1], [0, 0, 1, 1], [], []>} : vector<16x16xbf16>, vector<16x32xbf16>, vector<16x32xf32> -> vector<16x32xf32>
    %541 = arith.truncf %540 : vector<16x32xf32> to vector<16x32xbf16>
    %542 = vector.extract_strided_slice %520 {offsets = [0, 0], sizes = [32, 128], strides = [1, 1]} : vector<128x128xbf16> to vector<32x128xbf16>
    %cst_216 = arith.constant dense<0.000000e+00> : vector<16x128xf32>
    %543 = tpu.matmul %541, %542, %cst_216 {dimension_numbers = #tpu.dot_dimension_numbers<[1], [0], [0], [1], [0, 0, 1, 1], [], []>} : vector<16x32xbf16>, vector<32x128xbf16>, vector<16x128xf32> -> vector<16x128xf32>
    %544 = arith.addf %521, %543 : vector<16x128xf32>
    %545 = vector.extract_strided_slice %509 {offsets = [0, 32], sizes = [16, 32], strides = [1, 1]} : vector<16x128xf32> to vector<16x32xf32>
    %546 = arith.truncf %545 : vector<16x32xf32> to vector<16x32xbf16>
    %547 = vector.extract_strided_slice %517 {offsets = [0, 32], sizes = [16, 32], strides = [1, 1]} : vector<16x128xf32> to vector<16x32xf32>
    %548 = arith.truncf %547 : vector<16x32xf32> to vector<16x32xbf16>
    %549 = vector.extract_strided_slice %518 {offsets = [0, 32], sizes = [16, 32], strides = [1, 1]} : vector<16x128xf32> to vector<16x32xf32>
    %550 = arith.truncf %549 : vector<16x32xf32> to vector<16x32xbf16>
    %cst_217 = arith.constant dense<0.000000e+00> : vector<16x16xf32>
    %551 = tpu.matmul %546, %548, %cst_217 {dimension_numbers = #tpu.dot_dimension_numbers<[1], [1], [0], [0], [0, 0, 1, 0], [], []>} : vector<16x32xbf16>, vector<16x32xbf16>, vector<16x16xf32> -> vector<16x16xf32>
    %cst_218 = arith.constant dense<0xFF800000> : vector<16xf32>
    %552 = vector.multi_reduction <maximumf>, %551, %cst_218 [1] : vector<16x16xf32> to vector<16xf32>
    %553 = vector.shape_cast %552 : vector<16xf32> to vector<16x1xf32>
    %554 = vector.broadcast %553 : vector<16x1xf32> to vector<16x16xf32>
    %555 = arith.subf %551, %554 : vector<16x16xf32>
    %556 = math.exp %555 : vector<16x16xf32>
    %cst_219 = arith.constant dense<0.000000e+00> : vector<16xf32>
    %557 = vector.multi_reduction <add>, %556, %cst_219 [1] : vector<16x16xf32> to vector<16xf32>
    %558 = vector.shape_cast %557 : vector<16xf32> to vector<16x1xf32>
    %559 = tpu.reciprocal %558 {approx = true} : vector<16x1xf32> -> vector<16x1xf32>
    %560 = vector.broadcast %559 : vector<16x1xf32> to vector<16x16xf32>
    %561 = arith.mulf %556, %560 : vector<16x16xf32>
    %562 = arith.truncf %561 : vector<16x16xf32> to vector<16x16xbf16>
    %cst_220 = arith.constant dense<0.000000e+00> : vector<16x32xf32>
    %563 = tpu.matmul %562, %550, %cst_220 {dimension_numbers = #tpu.dot_dimension_numbers<[1], [0], [0], [1], [0, 0, 1, 1], [], []>} : vector<16x16xbf16>, vector<16x32xbf16>, vector<16x32xf32> -> vector<16x32xf32>
    %564 = arith.truncf %563 : vector<16x32xf32> to vector<16x32xbf16>
    %565 = vector.extract_strided_slice %520 {offsets = [32, 0], sizes = [32, 128], strides = [1, 1]} : vector<128x128xbf16> to vector<32x128xbf16>
    %cst_221 = arith.constant dense<0.000000e+00> : vector<16x128xf32>
    %566 = tpu.matmul %564, %565, %cst_221 {dimension_numbers = #tpu.dot_dimension_numbers<[1], [0], [0], [1], [0, 0, 1, 1], [], []>} : vector<16x32xbf16>, vector<32x128xbf16>, vector<16x128xf32> -> vector<16x128xf32>
    %567 = arith.addf %544, %566 : vector<16x128xf32>
    %568 = vector.extract_strided_slice %509 {offsets = [0, 64], sizes = [16, 32], strides = [1, 1]} : vector<16x128xf32> to vector<16x32xf32>
    %569 = arith.truncf %568 : vector<16x32xf32> to vector<16x32xbf16>
    %570 = vector.extract_strided_slice %517 {offsets = [0, 64], sizes = [16, 32], strides = [1, 1]} : vector<16x128xf32> to vector<16x32xf32>
    %571 = arith.truncf %570 : vector<16x32xf32> to vector<16x32xbf16>
    %572 = vector.extract_strided_slice %518 {offsets = [0, 64], sizes = [16, 32], strides = [1, 1]} : vector<16x128xf32> to vector<16x32xf32>
    %573 = arith.truncf %572 : vector<16x32xf32> to vector<16x32xbf16>
    %cst_222 = arith.constant dense<0.000000e+00> : vector<16x16xf32>
    %574 = tpu.matmul %569, %571, %cst_222 {dimension_numbers = #tpu.dot_dimension_numbers<[1], [1], [0], [0], [0, 0, 1, 0], [], []>} : vector<16x32xbf16>, vector<16x32xbf16>, vector<16x16xf32> -> vector<16x16xf32>
    %cst_223 = arith.constant dense<0xFF800000> : vector<16xf32>
    %575 = vector.multi_reduction <maximumf>, %574, %cst_223 [1] : vector<16x16xf32> to vector<16xf32>
    %576 = vector.shape_cast %575 : vector<16xf32> to vector<16x1xf32>
    %577 = vector.broadcast %576 : vector<16x1xf32> to vector<16x16xf32>
    %578 = arith.subf %574, %577 : vector<16x16xf32>
    %579 = math.exp %578 : vector<16x16xf32>
    %cst_224 = arith.constant dense<0.000000e+00> : vector<16xf32>
    %580 = vector.multi_reduction <add>, %579, %cst_224 [1] : vector<16x16xf32> to vector<16xf32>
    %581 = vector.shape_cast %580 : vector<16xf32> to vector<16x1xf32>
    %582 = tpu.reciprocal %581 {approx = true} : vector<16x1xf32> -> vector<16x1xf32>
    %583 = vector.broadcast %582 : vector<16x1xf32> to vector<16x16xf32>
    %584 = arith.mulf %579, %583 : vector<16x16xf32>
    %585 = arith.truncf %584 : vector<16x16xf32> to vector<16x16xbf16>
    %cst_225 = arith.constant dense<0.000000e+00> : vector<16x32xf32>
    %586 = tpu.matmul %585, %573, %cst_225 {dimension_numbers = #tpu.dot_dimension_numbers<[1], [0], [0], [1], [0, 0, 1, 1], [], []>} : vector<16x16xbf16>, vector<16x32xbf16>, vector<16x32xf32> -> vector<16x32xf32>
    %587 = arith.truncf %586 : vector<16x32xf32> to vector<16x32xbf16>
    %588 = vector.extract_strided_slice %520 {offsets = [64, 0], sizes = [32, 128], strides = [1, 1]} : vector<128x128xbf16> to vector<32x128xbf16>
    %cst_226 = arith.constant dense<0.000000e+00> : vector<16x128xf32>
    %589 = tpu.matmul %587, %588, %cst_226 {dimension_numbers = #tpu.dot_dimension_numbers<[1], [0], [0], [1], [0, 0, 1, 1], [], []>} : vector<16x32xbf16>, vector<32x128xbf16>, vector<16x128xf32> -> vector<16x128xf32>
    %590 = arith.addf %567, %589 : vector<16x128xf32>
    %591 = vector.extract_strided_slice %509 {offsets = [0, 96], sizes = [16, 32], strides = [1, 1]} : vector<16x128xf32> to vector<16x32xf32>
    %592 = arith.truncf %591 : vector<16x32xf32> to vector<16x32xbf16>
    %593 = vector.extract_strided_slice %517 {offsets = [0, 96], sizes = [16, 32], strides = [1, 1]} : vector<16x128xf32> to vector<16x32xf32>
    %594 = arith.truncf %593 : vector<16x32xf32> to vector<16x32xbf16>
    %595 = vector.extract_strided_slice %518 {offsets = [0, 96], sizes = [16, 32], strides = [1, 1]} : vector<16x128xf32> to vector<16x32xf32>
    %596 = arith.truncf %595 : vector<16x32xf32> to vector<16x32xbf16>
    %cst_227 = arith.constant dense<0.000000e+00> : vector<16x16xf32>
    %597 = tpu.matmul %592, %594, %cst_227 {dimension_numbers = #tpu.dot_dimension_numbers<[1], [1], [0], [0], [0, 0, 1, 0], [], []>} : vector<16x32xbf16>, vector<16x32xbf16>, vector<16x16xf32> -> vector<16x16xf32>
    %cst_228 = arith.constant dense<0xFF800000> : vector<16xf32>
    %598 = vector.multi_reduction <maximumf>, %597, %cst_228 [1] : vector<16x16xf32> to vector<16xf32>
    %599 = vector.shape_cast %598 : vector<16xf32> to vector<16x1xf32>
    %600 = vector.broadcast %599 : vector<16x1xf32> to vector<16x16xf32>
    %601 = arith.subf %597, %600 : vector<16x16xf32>
    %602 = math.exp %601 : vector<16x16xf32>
    %cst_229 = arith.constant dense<0.000000e+00> : vector<16xf32>
    %603 = vector.multi_reduction <add>, %602, %cst_229 [1] : vector<16x16xf32> to vector<16xf32>
    %604 = vector.shape_cast %603 : vector<16xf32> to vector<16x1xf32>
    %605 = tpu.reciprocal %604 {approx = true} : vector<16x1xf32> -> vector<16x1xf32>
    %606 = vector.broadcast %605 : vector<16x1xf32> to vector<16x16xf32>
    %607 = arith.mulf %602, %606 : vector<16x16xf32>
    %608 = arith.truncf %607 : vector<16x16xf32> to vector<16x16xbf16>
    %cst_230 = arith.constant dense<0.000000e+00> : vector<16x32xf32>
    %609 = tpu.matmul %608, %596, %cst_230 {dimension_numbers = #tpu.dot_dimension_numbers<[1], [0], [0], [1], [0, 0, 1, 1], [], []>} : vector<16x16xbf16>, vector<16x32xbf16>, vector<16x32xf32> -> vector<16x32xf32>
    %610 = arith.truncf %609 : vector<16x32xf32> to vector<16x32xbf16>
    %611 = vector.extract_strided_slice %520 {offsets = [96, 0], sizes = [32, 128], strides = [1, 1]} : vector<128x128xbf16> to vector<32x128xbf16>
    %cst_231 = arith.constant dense<0.000000e+00> : vector<16x128xf32>
    %612 = tpu.matmul %610, %611, %cst_231 {dimension_numbers = #tpu.dot_dimension_numbers<[1], [0], [0], [1], [0, 0, 1, 1], [], []>} : vector<16x32xbf16>, vector<32x128xbf16>, vector<16x128xf32> -> vector<16x128xf32>
    %613 = arith.addf %590, %612 : vector<16x128xf32>
    %c0_232 = arith.constant 0 : index
    %c0_233 = arith.constant 0 : index
    %c0_234 = arith.constant 0 : index
    %614 = vector.load %arg28[%c0_232, %c0_233, %c0_234] : memref<2x1x128xf32, #tpu.memory_space<vmem>>, vector<1x1x128xf32>
    %615 = vector.shape_cast %614 : vector<1x1x128xf32> to vector<1x128xf32>
    %616 = vector.broadcast %615 : vector<1x128xf32> to vector<16x128xf32>
    %617 = arith.addf %613, %616 : vector<16x128xf32>
    %618 = arith.addf %501, %617 : vector<16x128xf32>
    %c0_235 = arith.constant 0 : index
    %c0_236 = arith.constant 0 : index
    %c0_237 = arith.constant 0 : index
    %619 = vector.load %arg29[%c0_235, %c0_236, %c0_237] : memref<2x1x128xf32, #tpu.memory_space<vmem>>, vector<1x1x128xf32>
    %620 = vector.shape_cast %619 : vector<1x1x128xf32> to vector<1x128xf32>
    %c0_238 = arith.constant 0 : index
    %c0_239 = arith.constant 0 : index
    %c0_240 = arith.constant 0 : index
    %621 = vector.load %arg30[%c0_238, %c0_239, %c0_240] : memref<2x1x128xf32, #tpu.memory_space<vmem>>, vector<1x1x128xf32>
    %622 = vector.shape_cast %621 : vector<1x1x128xf32> to vector<1x128xf32>
    %cst_241 = arith.constant dense<0.000000e+00> : vector<16xf32>
    %623 = vector.multi_reduction <add>, %618, %cst_241 [1] : vector<16x128xf32> to vector<16xf32>
    %624 = vector.shape_cast %623 : vector<16xf32> to vector<16x1xf32>
    %cst_242 = arith.constant 1.280000e+02 : f32
    %625 = vector.broadcast %cst_242 : f32 to vector<16x1xf32>
    %626 = arith.divf %624, %625 : vector<16x1xf32>
    %627 = vector.broadcast %626 : vector<16x1xf32> to vector<16x128xf32>
    %628 = arith.subf %618, %627 : vector<16x128xf32>
    %629 = arith.mulf %628, %628 : vector<16x128xf32>
    %cst_243 = arith.constant dense<0.000000e+00> : vector<16xf32>
    %630 = vector.multi_reduction <add>, %629, %cst_243 [1] : vector<16x128xf32> to vector<16xf32>
    %631 = vector.shape_cast %630 : vector<16xf32> to vector<16x1xf32>
    %cst_244 = arith.constant 1.280000e+02 : f32
    %632 = vector.broadcast %cst_244 : f32 to vector<16x1xf32>
    %633 = arith.divf %631, %632 : vector<16x1xf32>
    %cst_245 = arith.constant 9.99999974E-6 : f32
    %634 = vector.broadcast %cst_245 : f32 to vector<16x1xf32>
    %635 = arith.addf %633, %634 : vector<16x1xf32>
    %636 = math.rsqrt %635 : vector<16x1xf32>
    %637 = vector.broadcast %636 : vector<16x1xf32> to vector<16x128xf32>
    %638 = arith.mulf %628, %637 : vector<16x128xf32>
    %639 = vector.broadcast %620 : vector<1x128xf32> to vector<16x128xf32>
    %640 = arith.mulf %638, %639 : vector<16x128xf32>
    %641 = vector.broadcast %622 : vector<1x128xf32> to vector<16x128xf32>
    %642 = arith.addf %640, %641 : vector<16x128xf32>
    %643 = arith.truncf %642 : vector<16x128xf32> to vector<16x128xbf16>
    %c0_246 = arith.constant 0 : index
    %c0_247 = arith.constant 0 : index
    %c0_248 = arith.constant 0 : index
    %644 = vector.load %arg31[%c0_246, %c0_247, %c0_248] : memref<2x128x640xbf16, #tpu.memory_space<vmem>>, vector<1x128x640xbf16>
    %645 = vector.shape_cast %644 : vector<1x128x640xbf16> to vector<128x640xbf16>
    %cst_249 = arith.constant dense<0.000000e+00> : vector<16x640xf32>
    %646 = tpu.matmul %643, %645, %cst_249 {dimension_numbers = #tpu.dot_dimension_numbers<[1], [0], [0], [1], [0, 0, 1, 1], [], []>} : vector<16x128xbf16>, vector<128x640xbf16>, vector<16x640xf32> -> vector<16x640xf32>
    %c0_250 = arith.constant 0 : index
    %c0_251 = arith.constant 0 : index
    %c0_252 = arith.constant 0 : index
    %647 = vector.load %arg32[%c0_250, %c0_251, %c0_252] : memref<2x1x640xf32, #tpu.memory_space<vmem>>, vector<1x1x640xf32>
    %648 = vector.shape_cast %647 : vector<1x1x640xf32> to vector<1x640xf32>
    %649 = vector.broadcast %648 : vector<1x640xf32> to vector<16x640xf32>
    %650 = arith.addf %646, %649 : vector<16x640xf32>
    %cst_253 = arith.constant 0.000000e+00 : f32
    %651 = vector.broadcast %cst_253 : f32 to vector<16x640xf32>
    %652 = arith.maximumf %650, %651 : vector<16x640xf32>
    %653 = arith.truncf %652 : vector<16x640xf32> to vector<16x640xbf16>
    %c0_254 = arith.constant 0 : index
    %c0_255 = arith.constant 0 : index
    %c0_256 = arith.constant 0 : index
    %654 = vector.load %arg33[%c0_254, %c0_255, %c0_256] : memref<2x640x128xbf16, #tpu.memory_space<vmem>>, vector<1x640x128xbf16>
    %655 = vector.shape_cast %654 : vector<1x640x128xbf16> to vector<640x128xbf16>
    %cst_257 = arith.constant dense<0.000000e+00> : vector<16x128xf32>
    %656 = tpu.matmul %653, %655, %cst_257 {dimension_numbers = #tpu.dot_dimension_numbers<[1], [0], [0], [1], [0, 0, 1, 1], [], []>} : vector<16x640xbf16>, vector<640x128xbf16>, vector<16x128xf32> -> vector<16x128xf32>
    %c0_258 = arith.constant 0 : index
    %c0_259 = arith.constant 0 : index
    %c0_260 = arith.constant 0 : index
    %657 = vector.load %arg34[%c0_258, %c0_259, %c0_260] : memref<2x1x128xf32, #tpu.memory_space<vmem>>, vector<1x1x128xf32>
    %658 = vector.shape_cast %657 : vector<1x1x128xf32> to vector<1x128xf32>
    %659 = vector.broadcast %658 : vector<1x128xf32> to vector<16x128xf32>
    %660 = arith.addf %656, %659 : vector<16x128xf32>
    %661 = arith.addf %642, %660 : vector<16x128xf32>
    %c0_261 = arith.constant 0 : index
    %c0_262 = arith.constant 0 : index
    %c0_263 = arith.constant 0 : index
    %662 = vector.load %arg35[%c0_261, %c0_262, %c0_263] : memref<2x1x128xf32, #tpu.memory_space<vmem>>, vector<1x1x128xf32>
    %663 = vector.shape_cast %662 : vector<1x1x128xf32> to vector<1x128xf32>
    %c0_264 = arith.constant 0 : index
    %c0_265 = arith.constant 0 : index
    %c0_266 = arith.constant 0 : index
    %664 = vector.load %arg36[%c0_264, %c0_265, %c0_266] : memref<2x1x128xf32, #tpu.memory_space<vmem>>, vector<1x1x128xf32>
    %665 = vector.shape_cast %664 : vector<1x1x128xf32> to vector<1x128xf32>
    %cst_267 = arith.constant dense<0.000000e+00> : vector<16xf32>
    %666 = vector.multi_reduction <add>, %661, %cst_267 [1] : vector<16x128xf32> to vector<16xf32>
    %667 = vector.shape_cast %666 : vector<16xf32> to vector<16x1xf32>
    %cst_268 = arith.constant 1.280000e+02 : f32
    %668 = vector.broadcast %cst_268 : f32 to vector<16x1xf32>
    %669 = arith.divf %667, %668 : vector<16x1xf32>
    %670 = vector.broadcast %669 : vector<16x1xf32> to vector<16x128xf32>
    %671 = arith.subf %661, %670 : vector<16x128xf32>
    %672 = arith.mulf %671, %671 : vector<16x128xf32>
    %cst_269 = arith.constant dense<0.000000e+00> : vector<16xf32>
    %673 = vector.multi_reduction <add>, %672, %cst_269 [1] : vector<16x128xf32> to vector<16xf32>
    %674 = vector.shape_cast %673 : vector<16xf32> to vector<16x1xf32>
    %cst_270 = arith.constant 1.280000e+02 : f32
    %675 = vector.broadcast %cst_270 : f32 to vector<16x1xf32>
    %676 = arith.divf %674, %675 : vector<16x1xf32>
    %cst_271 = arith.constant 9.99999974E-6 : f32
    %677 = vector.broadcast %cst_271 : f32 to vector<16x1xf32>
    %678 = arith.addf %676, %677 : vector<16x1xf32>
    %679 = math.rsqrt %678 : vector<16x1xf32>
    %680 = vector.broadcast %679 : vector<16x1xf32> to vector<16x128xf32>
    %681 = arith.mulf %671, %680 : vector<16x128xf32>
    %682 = vector.broadcast %663 : vector<1x128xf32> to vector<16x128xf32>
    %683 = arith.mulf %681, %682 : vector<16x128xf32>
    %684 = vector.broadcast %665 : vector<1x128xf32> to vector<16x128xf32>
    %685 = arith.addf %683, %684 : vector<16x128xf32>
    %686 = arith.truncf %685 : vector<16x128xf32> to vector<16x128xbf16>
    %c1_272 = arith.constant 1 : index
    %c0_273 = arith.constant 0 : index
    %c0_274 = arith.constant 0 : index
    %687 = vector.load %arg17[%c1_272, %c0_273, %c0_274] : memref<2x128x384xbf16, #tpu.memory_space<vmem>>, vector<1x128x384xbf16>
    %688 = vector.shape_cast %687 : vector<1x128x384xbf16> to vector<128x384xbf16>
    %cst_275 = arith.constant dense<0.000000e+00> : vector<16x384xf32>
    %689 = tpu.matmul %686, %688, %cst_275 {dimension_numbers = #tpu.dot_dimension_numbers<[1], [0], [0], [1], [0, 0, 1, 1], [], []>} : vector<16x128xbf16>, vector<128x384xbf16>, vector<16x384xf32> -> vector<16x384xf32>
    %c1_276 = arith.constant 1 : index
    %c0_277 = arith.constant 0 : index
    %c0_278 = arith.constant 0 : index
    %690 = vector.load %arg18[%c1_276, %c0_277, %c0_278] : memref<2x1x384xf32, #tpu.memory_space<vmem>>, vector<1x1x384xf32>
    %691 = vector.shape_cast %690 : vector<1x1x384xf32> to vector<1x384xf32>
    %692 = vector.broadcast %691 : vector<1x384xf32> to vector<16x384xf32>
    %693 = arith.addf %689, %692 : vector<16x384xf32>
    %694 = vector.extract_strided_slice %693 {offsets = [0, 0], sizes = [16, 128], strides = [1, 1]} : vector<16x384xf32> to vector<16x128xf32>
    %695 = vector.extract_strided_slice %693 {offsets = [0, 128], sizes = [16, 128], strides = [1, 1]} : vector<16x384xf32> to vector<16x128xf32>
    %696 = vector.extract_strided_slice %693 {offsets = [0, 256], sizes = [16, 128], strides = [1, 1]} : vector<16x384xf32> to vector<16x128xf32>
    %c1_279 = arith.constant 1 : index
    %c0_280 = arith.constant 0 : index
    %c0_281 = arith.constant 0 : index
    %697 = vector.load %arg19[%c1_279, %c0_280, %c0_281] : memref<2x128x128xbf16, #tpu.memory_space<vmem>>, vector<1x128x128xbf16>
    %698 = vector.shape_cast %697 : vector<1x128x128xbf16> to vector<128x128xbf16>
    %cst_282 = arith.constant 0.000000e+00 : f32
    %699 = vector.broadcast %cst_282 : f32 to vector<16x128xf32>
    %700 = vector.extract_strided_slice %694 {offsets = [0, 0], sizes = [16, 32], strides = [1, 1]} : vector<16x128xf32> to vector<16x32xf32>
    %701 = arith.truncf %700 : vector<16x32xf32> to vector<16x32xbf16>
    %702 = vector.extract_strided_slice %695 {offsets = [0, 0], sizes = [16, 32], strides = [1, 1]} : vector<16x128xf32> to vector<16x32xf32>
    %703 = arith.truncf %702 : vector<16x32xf32> to vector<16x32xbf16>
    %704 = vector.extract_strided_slice %696 {offsets = [0, 0], sizes = [16, 32], strides = [1, 1]} : vector<16x128xf32> to vector<16x32xf32>
    %705 = arith.truncf %704 : vector<16x32xf32> to vector<16x32xbf16>
    %cst_283 = arith.constant dense<0.000000e+00> : vector<16x16xf32>
    %706 = tpu.matmul %701, %703, %cst_283 {dimension_numbers = #tpu.dot_dimension_numbers<[1], [1], [0], [0], [0, 0, 1, 0], [], []>} : vector<16x32xbf16>, vector<16x32xbf16>, vector<16x16xf32> -> vector<16x16xf32>
    %cst_284 = arith.constant dense<0xFF800000> : vector<16xf32>
    %707 = vector.multi_reduction <maximumf>, %706, %cst_284 [1] : vector<16x16xf32> to vector<16xf32>
    %708 = vector.shape_cast %707 : vector<16xf32> to vector<16x1xf32>
    %709 = vector.broadcast %708 : vector<16x1xf32> to vector<16x16xf32>
    %710 = arith.subf %706, %709 : vector<16x16xf32>
    %711 = math.exp %710 : vector<16x16xf32>
    %cst_285 = arith.constant dense<0.000000e+00> : vector<16xf32>
    %712 = vector.multi_reduction <add>, %711, %cst_285 [1] : vector<16x16xf32> to vector<16xf32>
    %713 = vector.shape_cast %712 : vector<16xf32> to vector<16x1xf32>
    %714 = tpu.reciprocal %713 {approx = true} : vector<16x1xf32> -> vector<16x1xf32>
    %715 = vector.broadcast %714 : vector<16x1xf32> to vector<16x16xf32>
    %716 = arith.mulf %711, %715 : vector<16x16xf32>
    %717 = arith.truncf %716 : vector<16x16xf32> to vector<16x16xbf16>
    %cst_286 = arith.constant dense<0.000000e+00> : vector<16x32xf32>
    %718 = tpu.matmul %717, %705, %cst_286 {dimension_numbers = #tpu.dot_dimension_numbers<[1], [0], [0], [1], [0, 0, 1, 1], [], []>} : vector<16x16xbf16>, vector<16x32xbf16>, vector<16x32xf32> -> vector<16x32xf32>
    %719 = arith.truncf %718 : vector<16x32xf32> to vector<16x32xbf16>
    %720 = vector.extract_strided_slice %698 {offsets = [0, 0], sizes = [32, 128], strides = [1, 1]} : vector<128x128xbf16> to vector<32x128xbf16>
    %cst_287 = arith.constant dense<0.000000e+00> : vector<16x128xf32>
    %721 = tpu.matmul %719, %720, %cst_287 {dimension_numbers = #tpu.dot_dimension_numbers<[1], [0], [0], [1], [0, 0, 1, 1], [], []>} : vector<16x32xbf16>, vector<32x128xbf16>, vector<16x128xf32> -> vector<16x128xf32>
    %722 = arith.addf %699, %721 : vector<16x128xf32>
    %723 = vector.extract_strided_slice %694 {offsets = [0, 32], sizes = [16, 32], strides = [1, 1]} : vector<16x128xf32> to vector<16x32xf32>
    %724 = arith.truncf %723 : vector<16x32xf32> to vector<16x32xbf16>
    %725 = vector.extract_strided_slice %695 {offsets = [0, 32], sizes = [16, 32], strides = [1, 1]} : vector<16x128xf32> to vector<16x32xf32>
    %726 = arith.truncf %725 : vector<16x32xf32> to vector<16x32xbf16>
    %727 = vector.extract_strided_slice %696 {offsets = [0, 32], sizes = [16, 32], strides = [1, 1]} : vector<16x128xf32> to vector<16x32xf32>
    %728 = arith.truncf %727 : vector<16x32xf32> to vector<16x32xbf16>
    %cst_288 = arith.constant dense<0.000000e+00> : vector<16x16xf32>
    %729 = tpu.matmul %724, %726, %cst_288 {dimension_numbers = #tpu.dot_dimension_numbers<[1], [1], [0], [0], [0, 0, 1, 0], [], []>} : vector<16x32xbf16>, vector<16x32xbf16>, vector<16x16xf32> -> vector<16x16xf32>
    %cst_289 = arith.constant dense<0xFF800000> : vector<16xf32>
    %730 = vector.multi_reduction <maximumf>, %729, %cst_289 [1] : vector<16x16xf32> to vector<16xf32>
    %731 = vector.shape_cast %730 : vector<16xf32> to vector<16x1xf32>
    %732 = vector.broadcast %731 : vector<16x1xf32> to vector<16x16xf32>
    %733 = arith.subf %729, %732 : vector<16x16xf32>
    %734 = math.exp %733 : vector<16x16xf32>
    %cst_290 = arith.constant dense<0.000000e+00> : vector<16xf32>
    %735 = vector.multi_reduction <add>, %734, %cst_290 [1] : vector<16x16xf32> to vector<16xf32>
    %736 = vector.shape_cast %735 : vector<16xf32> to vector<16x1xf32>
    %737 = tpu.reciprocal %736 {approx = true} : vector<16x1xf32> -> vector<16x1xf32>
    %738 = vector.broadcast %737 : vector<16x1xf32> to vector<16x16xf32>
    %739 = arith.mulf %734, %738 : vector<16x16xf32>
    %740 = arith.truncf %739 : vector<16x16xf32> to vector<16x16xbf16>
    %cst_291 = arith.constant dense<0.000000e+00> : vector<16x32xf32>
    %741 = tpu.matmul %740, %728, %cst_291 {dimension_numbers = #tpu.dot_dimension_numbers<[1], [0], [0], [1], [0, 0, 1, 1], [], []>} : vector<16x16xbf16>, vector<16x32xbf16>, vector<16x32xf32> -> vector<16x32xf32>
    %742 = arith.truncf %741 : vector<16x32xf32> to vector<16x32xbf16>
    %743 = vector.extract_strided_slice %698 {offsets = [32, 0], sizes = [32, 128], strides = [1, 1]} : vector<128x128xbf16> to vector<32x128xbf16>
    %cst_292 = arith.constant dense<0.000000e+00> : vector<16x128xf32>
    %744 = tpu.matmul %742, %743, %cst_292 {dimension_numbers = #tpu.dot_dimension_numbers<[1], [0], [0], [1], [0, 0, 1, 1], [], []>} : vector<16x32xbf16>, vector<32x128xbf16>, vector<16x128xf32> -> vector<16x128xf32>
    %745 = arith.addf %722, %744 : vector<16x128xf32>
    %746 = vector.extract_strided_slice %694 {offsets = [0, 64], sizes = [16, 32], strides = [1, 1]} : vector<16x128xf32> to vector<16x32xf32>
    %747 = arith.truncf %746 : vector<16x32xf32> to vector<16x32xbf16>
    %748 = vector.extract_strided_slice %695 {offsets = [0, 64], sizes = [16, 32], strides = [1, 1]} : vector<16x128xf32> to vector<16x32xf32>
    %749 = arith.truncf %748 : vector<16x32xf32> to vector<16x32xbf16>
    %750 = vector.extract_strided_slice %696 {offsets = [0, 64], sizes = [16, 32], strides = [1, 1]} : vector<16x128xf32> to vector<16x32xf32>
    %751 = arith.truncf %750 : vector<16x32xf32> to vector<16x32xbf16>
    %cst_293 = arith.constant dense<0.000000e+00> : vector<16x16xf32>
    %752 = tpu.matmul %747, %749, %cst_293 {dimension_numbers = #tpu.dot_dimension_numbers<[1], [1], [0], [0], [0, 0, 1, 0], [], []>} : vector<16x32xbf16>, vector<16x32xbf16>, vector<16x16xf32> -> vector<16x16xf32>
    %cst_294 = arith.constant dense<0xFF800000> : vector<16xf32>
    %753 = vector.multi_reduction <maximumf>, %752, %cst_294 [1] : vector<16x16xf32> to vector<16xf32>
    %754 = vector.shape_cast %753 : vector<16xf32> to vector<16x1xf32>
    %755 = vector.broadcast %754 : vector<16x1xf32> to vector<16x16xf32>
    %756 = arith.subf %752, %755 : vector<16x16xf32>
    %757 = math.exp %756 : vector<16x16xf32>
    %cst_295 = arith.constant dense<0.000000e+00> : vector<16xf32>
    %758 = vector.multi_reduction <add>, %757, %cst_295 [1] : vector<16x16xf32> to vector<16xf32>
    %759 = vector.shape_cast %758 : vector<16xf32> to vector<16x1xf32>
    %760 = tpu.reciprocal %759 {approx = true} : vector<16x1xf32> -> vector<16x1xf32>
    %761 = vector.broadcast %760 : vector<16x1xf32> to vector<16x16xf32>
    %762 = arith.mulf %757, %761 : vector<16x16xf32>
    %763 = arith.truncf %762 : vector<16x16xf32> to vector<16x16xbf16>
    %cst_296 = arith.constant dense<0.000000e+00> : vector<16x32xf32>
    %764 = tpu.matmul %763, %751, %cst_296 {dimension_numbers = #tpu.dot_dimension_numbers<[1], [0], [0], [1], [0, 0, 1, 1], [], []>} : vector<16x16xbf16>, vector<16x32xbf16>, vector<16x32xf32> -> vector<16x32xf32>
    %765 = arith.truncf %764 : vector<16x32xf32> to vector<16x32xbf16>
    %766 = vector.extract_strided_slice %698 {offsets = [64, 0], sizes = [32, 128], strides = [1, 1]} : vector<128x128xbf16> to vector<32x128xbf16>
    %cst_297 = arith.constant dense<0.000000e+00> : vector<16x128xf32>
    %767 = tpu.matmul %765, %766, %cst_297 {dimension_numbers = #tpu.dot_dimension_numbers<[1], [0], [0], [1], [0, 0, 1, 1], [], []>} : vector<16x32xbf16>, vector<32x128xbf16>, vector<16x128xf32> -> vector<16x128xf32>
    %768 = arith.addf %745, %767 : vector<16x128xf32>
    %769 = vector.extract_strided_slice %694 {offsets = [0, 96], sizes = [16, 32], strides = [1, 1]} : vector<16x128xf32> to vector<16x32xf32>
    %770 = arith.truncf %769 : vector<16x32xf32> to vector<16x32xbf16>
    %771 = vector.extract_strided_slice %695 {offsets = [0, 96], sizes = [16, 32], strides = [1, 1]} : vector<16x128xf32> to vector<16x32xf32>
    %772 = arith.truncf %771 : vector<16x32xf32> to vector<16x32xbf16>
    %773 = vector.extract_strided_slice %696 {offsets = [0, 96], sizes = [16, 32], strides = [1, 1]} : vector<16x128xf32> to vector<16x32xf32>
    %774 = arith.truncf %773 : vector<16x32xf32> to vector<16x32xbf16>
    %cst_298 = arith.constant dense<0.000000e+00> : vector<16x16xf32>
    %775 = tpu.matmul %770, %772, %cst_298 {dimension_numbers = #tpu.dot_dimension_numbers<[1], [1], [0], [0], [0, 0, 1, 0], [], []>} : vector<16x32xbf16>, vector<16x32xbf16>, vector<16x16xf32> -> vector<16x16xf32>
    %cst_299 = arith.constant dense<0xFF800000> : vector<16xf32>
    %776 = vector.multi_reduction <maximumf>, %775, %cst_299 [1] : vector<16x16xf32> to vector<16xf32>
    %777 = vector.shape_cast %776 : vector<16xf32> to vector<16x1xf32>
    %778 = vector.broadcast %777 : vector<16x1xf32> to vector<16x16xf32>
    %779 = arith.subf %775, %778 : vector<16x16xf32>
    %780 = math.exp %779 : vector<16x16xf32>
    %cst_300 = arith.constant dense<0.000000e+00> : vector<16xf32>
    %781 = vector.multi_reduction <add>, %780, %cst_300 [1] : vector<16x16xf32> to vector<16xf32>
    %782 = vector.shape_cast %781 : vector<16xf32> to vector<16x1xf32>
    %783 = tpu.reciprocal %782 {approx = true} : vector<16x1xf32> -> vector<16x1xf32>
    %784 = vector.broadcast %783 : vector<16x1xf32> to vector<16x16xf32>
    %785 = arith.mulf %780, %784 : vector<16x16xf32>
    %786 = arith.truncf %785 : vector<16x16xf32> to vector<16x16xbf16>
    %cst_301 = arith.constant dense<0.000000e+00> : vector<16x32xf32>
    %787 = tpu.matmul %786, %774, %cst_301 {dimension_numbers = #tpu.dot_dimension_numbers<[1], [0], [0], [1], [0, 0, 1, 1], [], []>} : vector<16x16xbf16>, vector<16x32xbf16>, vector<16x32xf32> -> vector<16x32xf32>
    %788 = arith.truncf %787 : vector<16x32xf32> to vector<16x32xbf16>
    %789 = vector.extract_strided_slice %698 {offsets = [96, 0], sizes = [32, 128], strides = [1, 1]} : vector<128x128xbf16> to vector<32x128xbf16>
    %cst_302 = arith.constant dense<0.000000e+00> : vector<16x128xf32>
    %790 = tpu.matmul %788, %789, %cst_302 {dimension_numbers = #tpu.dot_dimension_numbers<[1], [0], [0], [1], [0, 0, 1, 1], [], []>} : vector<16x32xbf16>, vector<32x128xbf16>, vector<16x128xf32> -> vector<16x128xf32>
    %791 = arith.addf %768, %790 : vector<16x128xf32>
    %c1_303 = arith.constant 1 : index
    %c0_304 = arith.constant 0 : index
    %c0_305 = arith.constant 0 : index
    %792 = vector.load %arg20[%c1_303, %c0_304, %c0_305] : memref<2x1x128xf32, #tpu.memory_space<vmem>>, vector<1x1x128xf32>
    %793 = vector.shape_cast %792 : vector<1x1x128xf32> to vector<1x128xf32>
    %794 = vector.broadcast %793 : vector<1x128xf32> to vector<16x128xf32>
    %795 = arith.addf %791, %794 : vector<16x128xf32>
    %796 = arith.addf %685, %795 : vector<16x128xf32>
    %c1_306 = arith.constant 1 : index
    %c0_307 = arith.constant 0 : index
    %c0_308 = arith.constant 0 : index
    %797 = vector.load %arg21[%c1_306, %c0_307, %c0_308] : memref<2x1x128xf32, #tpu.memory_space<vmem>>, vector<1x1x128xf32>
    %798 = vector.shape_cast %797 : vector<1x1x128xf32> to vector<1x128xf32>
    %c1_309 = arith.constant 1 : index
    %c0_310 = arith.constant 0 : index
    %c0_311 = arith.constant 0 : index
    %799 = vector.load %arg22[%c1_309, %c0_310, %c0_311] : memref<2x1x128xf32, #tpu.memory_space<vmem>>, vector<1x1x128xf32>
    %800 = vector.shape_cast %799 : vector<1x1x128xf32> to vector<1x128xf32>
    %cst_312 = arith.constant dense<0.000000e+00> : vector<16xf32>
    %801 = vector.multi_reduction <add>, %796, %cst_312 [1] : vector<16x128xf32> to vector<16xf32>
    %802 = vector.shape_cast %801 : vector<16xf32> to vector<16x1xf32>
    %cst_313 = arith.constant 1.280000e+02 : f32
    %803 = vector.broadcast %cst_313 : f32 to vector<16x1xf32>
    %804 = arith.divf %802, %803 : vector<16x1xf32>
    %805 = vector.broadcast %804 : vector<16x1xf32> to vector<16x128xf32>
    %806 = arith.subf %796, %805 : vector<16x128xf32>
    %807 = arith.mulf %806, %806 : vector<16x128xf32>
    %cst_314 = arith.constant dense<0.000000e+00> : vector<16xf32>
    %808 = vector.multi_reduction <add>, %807, %cst_314 [1] : vector<16x128xf32> to vector<16xf32>
    %809 = vector.shape_cast %808 : vector<16xf32> to vector<16x1xf32>
    %cst_315 = arith.constant 1.280000e+02 : f32
    %810 = vector.broadcast %cst_315 : f32 to vector<16x1xf32>
    %811 = arith.divf %809, %810 : vector<16x1xf32>
    %cst_316 = arith.constant 9.99999974E-6 : f32
    %812 = vector.broadcast %cst_316 : f32 to vector<16x1xf32>
    %813 = arith.addf %811, %812 : vector<16x1xf32>
    %814 = math.rsqrt %813 : vector<16x1xf32>
    %815 = vector.broadcast %814 : vector<16x1xf32> to vector<16x128xf32>
    %816 = arith.mulf %806, %815 : vector<16x128xf32>
    %817 = vector.broadcast %798 : vector<1x128xf32> to vector<16x128xf32>
    %818 = arith.mulf %816, %817 : vector<16x128xf32>
    %819 = vector.broadcast %800 : vector<1x128xf32> to vector<16x128xf32>
    %820 = arith.addf %818, %819 : vector<16x128xf32>
    %821 = arith.truncf %820 : vector<16x128xf32> to vector<16x128xbf16>
    %c1_317 = arith.constant 1 : index
    %c0_318 = arith.constant 0 : index
    %c0_319 = arith.constant 0 : index
    %822 = vector.load %arg23[%c1_317, %c0_318, %c0_319] : memref<2x128x128xbf16, #tpu.memory_space<vmem>>, vector<1x128x128xbf16>
    %823 = vector.shape_cast %822 : vector<1x128x128xbf16> to vector<128x128xbf16>
    %cst_320 = arith.constant dense<0.000000e+00> : vector<16x128xf32>
    %824 = tpu.matmul %821, %823, %cst_320 {dimension_numbers = #tpu.dot_dimension_numbers<[1], [0], [0], [1], [0, 0, 1, 1], [], []>} : vector<16x128xbf16>, vector<128x128xbf16>, vector<16x128xf32> -> vector<16x128xf32>
    %c1_321 = arith.constant 1 : index
    %c0_322 = arith.constant 0 : index
    %c0_323 = arith.constant 0 : index
    %825 = vector.load %arg24[%c1_321, %c0_322, %c0_323] : memref<2x1x128xf32, #tpu.memory_space<vmem>>, vector<1x1x128xf32>
    %826 = vector.shape_cast %825 : vector<1x1x128xf32> to vector<1x128xf32>
    %827 = vector.broadcast %826 : vector<1x128xf32> to vector<16x128xf32>
    %828 = arith.addf %824, %827 : vector<16x128xf32>
    %c1_324 = arith.constant 1 : index
    %c0_325 = arith.constant 0 : index
    %c0_326 = arith.constant 0 : index
    %829 = vector.load %arg25[%c1_324, %c0_325, %c0_326] : memref<2x128x256xbf16, #tpu.memory_space<vmem>>, vector<1x128x256xbf16>
    %830 = vector.shape_cast %829 : vector<1x128x256xbf16> to vector<128x256xbf16>
    %cst_327 = arith.constant dense<0.000000e+00> : vector<16x256xf32>
    %831 = tpu.matmul %366, %830, %cst_327 {dimension_numbers = #tpu.dot_dimension_numbers<[1], [0], [0], [1], [0, 0, 1, 1], [], []>} : vector<16x128xbf16>, vector<128x256xbf16>, vector<16x256xf32> -> vector<16x256xf32>
    %c1_328 = arith.constant 1 : index
    %c0_329 = arith.constant 0 : index
    %c0_330 = arith.constant 0 : index
    %832 = vector.load %arg26[%c1_328, %c0_329, %c0_330] : memref<2x1x256xf32, #tpu.memory_space<vmem>>, vector<1x1x256xf32>
    %833 = vector.shape_cast %832 : vector<1x1x256xf32> to vector<1x256xf32>
    %834 = vector.broadcast %833 : vector<1x256xf32> to vector<16x256xf32>
    %835 = arith.addf %831, %834 : vector<16x256xf32>
    %836 = vector.extract_strided_slice %835 {offsets = [0, 0], sizes = [16, 128], strides = [1, 1]} : vector<16x256xf32> to vector<16x128xf32>
    %837 = vector.extract_strided_slice %835 {offsets = [0, 128], sizes = [16, 128], strides = [1, 1]} : vector<16x256xf32> to vector<16x128xf32>
    %c1_331 = arith.constant 1 : index
    %c0_332 = arith.constant 0 : index
    %c0_333 = arith.constant 0 : index
    %838 = vector.load %arg27[%c1_331, %c0_332, %c0_333] : memref<2x128x128xbf16, #tpu.memory_space<vmem>>, vector<1x128x128xbf16>
    %839 = vector.shape_cast %838 : vector<1x128x128xbf16> to vector<128x128xbf16>
    %cst_334 = arith.constant 0.000000e+00 : f32
    %840 = vector.broadcast %cst_334 : f32 to vector<16x128xf32>
    %841 = vector.extract_strided_slice %828 {offsets = [0, 0], sizes = [16, 32], strides = [1, 1]} : vector<16x128xf32> to vector<16x32xf32>
    %842 = arith.truncf %841 : vector<16x32xf32> to vector<16x32xbf16>
    %843 = vector.extract_strided_slice %836 {offsets = [0, 0], sizes = [16, 32], strides = [1, 1]} : vector<16x128xf32> to vector<16x32xf32>
    %844 = arith.truncf %843 : vector<16x32xf32> to vector<16x32xbf16>
    %845 = vector.extract_strided_slice %837 {offsets = [0, 0], sizes = [16, 32], strides = [1, 1]} : vector<16x128xf32> to vector<16x32xf32>
    %846 = arith.truncf %845 : vector<16x32xf32> to vector<16x32xbf16>
    %cst_335 = arith.constant dense<0.000000e+00> : vector<16x16xf32>
    %847 = tpu.matmul %842, %844, %cst_335 {dimension_numbers = #tpu.dot_dimension_numbers<[1], [1], [0], [0], [0, 0, 1, 0], [], []>} : vector<16x32xbf16>, vector<16x32xbf16>, vector<16x16xf32> -> vector<16x16xf32>
    %cst_336 = arith.constant dense<0xFF800000> : vector<16xf32>
    %848 = vector.multi_reduction <maximumf>, %847, %cst_336 [1] : vector<16x16xf32> to vector<16xf32>
    %849 = vector.shape_cast %848 : vector<16xf32> to vector<16x1xf32>
    %850 = vector.broadcast %849 : vector<16x1xf32> to vector<16x16xf32>
    %851 = arith.subf %847, %850 : vector<16x16xf32>
    %852 = math.exp %851 : vector<16x16xf32>
    %cst_337 = arith.constant dense<0.000000e+00> : vector<16xf32>
    %853 = vector.multi_reduction <add>, %852, %cst_337 [1] : vector<16x16xf32> to vector<16xf32>
    %854 = vector.shape_cast %853 : vector<16xf32> to vector<16x1xf32>
    %855 = tpu.reciprocal %854 {approx = true} : vector<16x1xf32> -> vector<16x1xf32>
    %856 = vector.broadcast %855 : vector<16x1xf32> to vector<16x16xf32>
    %857 = arith.mulf %852, %856 : vector<16x16xf32>
    %858 = arith.truncf %857 : vector<16x16xf32> to vector<16x16xbf16>
    %cst_338 = arith.constant dense<0.000000e+00> : vector<16x32xf32>
    %859 = tpu.matmul %858, %846, %cst_338 {dimension_numbers = #tpu.dot_dimension_numbers<[1], [0], [0], [1], [0, 0, 1, 1], [], []>} : vector<16x16xbf16>, vector<16x32xbf16>, vector<16x32xf32> -> vector<16x32xf32>
    %860 = arith.truncf %859 : vector<16x32xf32> to vector<16x32xbf16>
    %861 = vector.extract_strided_slice %839 {offsets = [0, 0], sizes = [32, 128], strides = [1, 1]} : vector<128x128xbf16> to vector<32x128xbf16>
    %cst_339 = arith.constant dense<0.000000e+00> : vector<16x128xf32>
    %862 = tpu.matmul %860, %861, %cst_339 {dimension_numbers = #tpu.dot_dimension_numbers<[1], [0], [0], [1], [0, 0, 1, 1], [], []>} : vector<16x32xbf16>, vector<32x128xbf16>, vector<16x128xf32> -> vector<16x128xf32>
    %863 = arith.addf %840, %862 : vector<16x128xf32>
    %864 = vector.extract_strided_slice %828 {offsets = [0, 32], sizes = [16, 32], strides = [1, 1]} : vector<16x128xf32> to vector<16x32xf32>
    %865 = arith.truncf %864 : vector<16x32xf32> to vector<16x32xbf16>
    %866 = vector.extract_strided_slice %836 {offsets = [0, 32], sizes = [16, 32], strides = [1, 1]} : vector<16x128xf32> to vector<16x32xf32>
    %867 = arith.truncf %866 : vector<16x32xf32> to vector<16x32xbf16>
    %868 = vector.extract_strided_slice %837 {offsets = [0, 32], sizes = [16, 32], strides = [1, 1]} : vector<16x128xf32> to vector<16x32xf32>
    %869 = arith.truncf %868 : vector<16x32xf32> to vector<16x32xbf16>
    %cst_340 = arith.constant dense<0.000000e+00> : vector<16x16xf32>
    %870 = tpu.matmul %865, %867, %cst_340 {dimension_numbers = #tpu.dot_dimension_numbers<[1], [1], [0], [0], [0, 0, 1, 0], [], []>} : vector<16x32xbf16>, vector<16x32xbf16>, vector<16x16xf32> -> vector<16x16xf32>
    %cst_341 = arith.constant dense<0xFF800000> : vector<16xf32>
    %871 = vector.multi_reduction <maximumf>, %870, %cst_341 [1] : vector<16x16xf32> to vector<16xf32>
    %872 = vector.shape_cast %871 : vector<16xf32> to vector<16x1xf32>
    %873 = vector.broadcast %872 : vector<16x1xf32> to vector<16x16xf32>
    %874 = arith.subf %870, %873 : vector<16x16xf32>
    %875 = math.exp %874 : vector<16x16xf32>
    %cst_342 = arith.constant dense<0.000000e+00> : vector<16xf32>
    %876 = vector.multi_reduction <add>, %875, %cst_342 [1] : vector<16x16xf32> to vector<16xf32>
    %877 = vector.shape_cast %876 : vector<16xf32> to vector<16x1xf32>
    %878 = tpu.reciprocal %877 {approx = true} : vector<16x1xf32> -> vector<16x1xf32>
    %879 = vector.broadcast %878 : vector<16x1xf32> to vector<16x16xf32>
    %880 = arith.mulf %875, %879 : vector<16x16xf32>
    %881 = arith.truncf %880 : vector<16x16xf32> to vector<16x16xbf16>
    %cst_343 = arith.constant dense<0.000000e+00> : vector<16x32xf32>
    %882 = tpu.matmul %881, %869, %cst_343 {dimension_numbers = #tpu.dot_dimension_numbers<[1], [0], [0], [1], [0, 0, 1, 1], [], []>} : vector<16x16xbf16>, vector<16x32xbf16>, vector<16x32xf32> -> vector<16x32xf32>
    %883 = arith.truncf %882 : vector<16x32xf32> to vector<16x32xbf16>
    %884 = vector.extract_strided_slice %839 {offsets = [32, 0], sizes = [32, 128], strides = [1, 1]} : vector<128x128xbf16> to vector<32x128xbf16>
    %cst_344 = arith.constant dense<0.000000e+00> : vector<16x128xf32>
    %885 = tpu.matmul %883, %884, %cst_344 {dimension_numbers = #tpu.dot_dimension_numbers<[1], [0], [0], [1], [0, 0, 1, 1], [], []>} : vector<16x32xbf16>, vector<32x128xbf16>, vector<16x128xf32> -> vector<16x128xf32>
    %886 = arith.addf %863, %885 : vector<16x128xf32>
    %887 = vector.extract_strided_slice %828 {offsets = [0, 64], sizes = [16, 32], strides = [1, 1]} : vector<16x128xf32> to vector<16x32xf32>
    %888 = arith.truncf %887 : vector<16x32xf32> to vector<16x32xbf16>
    %889 = vector.extract_strided_slice %836 {offsets = [0, 64], sizes = [16, 32], strides = [1, 1]} : vector<16x128xf32> to vector<16x32xf32>
    %890 = arith.truncf %889 : vector<16x32xf32> to vector<16x32xbf16>
    %891 = vector.extract_strided_slice %837 {offsets = [0, 64], sizes = [16, 32], strides = [1, 1]} : vector<16x128xf32> to vector<16x32xf32>
    %892 = arith.truncf %891 : vector<16x32xf32> to vector<16x32xbf16>
    %cst_345 = arith.constant dense<0.000000e+00> : vector<16x16xf32>
    %893 = tpu.matmul %888, %890, %cst_345 {dimension_numbers = #tpu.dot_dimension_numbers<[1], [1], [0], [0], [0, 0, 1, 0], [], []>} : vector<16x32xbf16>, vector<16x32xbf16>, vector<16x16xf32> -> vector<16x16xf32>
    %cst_346 = arith.constant dense<0xFF800000> : vector<16xf32>
    %894 = vector.multi_reduction <maximumf>, %893, %cst_346 [1] : vector<16x16xf32> to vector<16xf32>
    %895 = vector.shape_cast %894 : vector<16xf32> to vector<16x1xf32>
    %896 = vector.broadcast %895 : vector<16x1xf32> to vector<16x16xf32>
    %897 = arith.subf %893, %896 : vector<16x16xf32>
    %898 = math.exp %897 : vector<16x16xf32>
    %cst_347 = arith.constant dense<0.000000e+00> : vector<16xf32>
    %899 = vector.multi_reduction <add>, %898, %cst_347 [1] : vector<16x16xf32> to vector<16xf32>
    %900 = vector.shape_cast %899 : vector<16xf32> to vector<16x1xf32>
    %901 = tpu.reciprocal %900 {approx = true} : vector<16x1xf32> -> vector<16x1xf32>
    %902 = vector.broadcast %901 : vector<16x1xf32> to vector<16x16xf32>
    %903 = arith.mulf %898, %902 : vector<16x16xf32>
    %904 = arith.truncf %903 : vector<16x16xf32> to vector<16x16xbf16>
    %cst_348 = arith.constant dense<0.000000e+00> : vector<16x32xf32>
    %905 = tpu.matmul %904, %892, %cst_348 {dimension_numbers = #tpu.dot_dimension_numbers<[1], [0], [0], [1], [0, 0, 1, 1], [], []>} : vector<16x16xbf16>, vector<16x32xbf16>, vector<16x32xf32> -> vector<16x32xf32>
    %906 = arith.truncf %905 : vector<16x32xf32> to vector<16x32xbf16>
    %907 = vector.extract_strided_slice %839 {offsets = [64, 0], sizes = [32, 128], strides = [1, 1]} : vector<128x128xbf16> to vector<32x128xbf16>
    %cst_349 = arith.constant dense<0.000000e+00> : vector<16x128xf32>
    %908 = tpu.matmul %906, %907, %cst_349 {dimension_numbers = #tpu.dot_dimension_numbers<[1], [0], [0], [1], [0, 0, 1, 1], [], []>} : vector<16x32xbf16>, vector<32x128xbf16>, vector<16x128xf32> -> vector<16x128xf32>
    %909 = arith.addf %886, %908 : vector<16x128xf32>
    %910 = vector.extract_strided_slice %828 {offsets = [0, 96], sizes = [16, 32], strides = [1, 1]} : vector<16x128xf32> to vector<16x32xf32>
    %911 = arith.truncf %910 : vector<16x32xf32> to vector<16x32xbf16>
    %912 = vector.extract_strided_slice %836 {offsets = [0, 96], sizes = [16, 32], strides = [1, 1]} : vector<16x128xf32> to vector<16x32xf32>
    %913 = arith.truncf %912 : vector<16x32xf32> to vector<16x32xbf16>
    %914 = vector.extract_strided_slice %837 {offsets = [0, 96], sizes = [16, 32], strides = [1, 1]} : vector<16x128xf32> to vector<16x32xf32>
    %915 = arith.truncf %914 : vector<16x32xf32> to vector<16x32xbf16>
    %cst_350 = arith.constant dense<0.000000e+00> : vector<16x16xf32>
    %916 = tpu.matmul %911, %913, %cst_350 {dimension_numbers = #tpu.dot_dimension_numbers<[1], [1], [0], [0], [0, 0, 1, 0], [], []>} : vector<16x32xbf16>, vector<16x32xbf16>, vector<16x16xf32> -> vector<16x16xf32>
    %cst_351 = arith.constant dense<0xFF800000> : vector<16xf32>
    %917 = vector.multi_reduction <maximumf>, %916, %cst_351 [1] : vector<16x16xf32> to vector<16xf32>
    %918 = vector.shape_cast %917 : vector<16xf32> to vector<16x1xf32>
    %919 = vector.broadcast %918 : vector<16x1xf32> to vector<16x16xf32>
    %920 = arith.subf %916, %919 : vector<16x16xf32>
    %921 = math.exp %920 : vector<16x16xf32>
    %cst_352 = arith.constant dense<0.000000e+00> : vector<16xf32>
    %922 = vector.multi_reduction <add>, %921, %cst_352 [1] : vector<16x16xf32> to vector<16xf32>
    %923 = vector.shape_cast %922 : vector<16xf32> to vector<16x1xf32>
    %924 = tpu.reciprocal %923 {approx = true} : vector<16x1xf32> -> vector<16x1xf32>
    %925 = vector.broadcast %924 : vector<16x1xf32> to vector<16x16xf32>
    %926 = arith.mulf %921, %925 : vector<16x16xf32>
    %927 = arith.truncf %926 : vector<16x16xf32> to vector<16x16xbf16>
    %cst_353 = arith.constant dense<0.000000e+00> : vector<16x32xf32>
    %928 = tpu.matmul %927, %915, %cst_353 {dimension_numbers = #tpu.dot_dimension_numbers<[1], [0], [0], [1], [0, 0, 1, 1], [], []>} : vector<16x16xbf16>, vector<16x32xbf16>, vector<16x32xf32> -> vector<16x32xf32>
    %929 = arith.truncf %928 : vector<16x32xf32> to vector<16x32xbf16>
    %930 = vector.extract_strided_slice %839 {offsets = [96, 0], sizes = [32, 128], strides = [1, 1]} : vector<128x128xbf16> to vector<32x128xbf16>
    %cst_354 = arith.constant dense<0.000000e+00> : vector<16x128xf32>
    %931 = tpu.matmul %929, %930, %cst_354 {dimension_numbers = #tpu.dot_dimension_numbers<[1], [0], [0], [1], [0, 0, 1, 1], [], []>} : vector<16x32xbf16>, vector<32x128xbf16>, vector<16x128xf32> -> vector<16x128xf32>
    %932 = arith.addf %909, %931 : vector<16x128xf32>
    %c1_355 = arith.constant 1 : index
    %c0_356 = arith.constant 0 : index
    %c0_357 = arith.constant 0 : index
    %933 = vector.load %arg28[%c1_355, %c0_356, %c0_357] : memref<2x1x128xf32, #tpu.memory_space<vmem>>, vector<1x1x128xf32>
    %934 = vector.shape_cast %933 : vector<1x1x128xf32> to vector<1x128xf32>
    %935 = vector.broadcast %934 : vector<1x128xf32> to vector<16x128xf32>
    %936 = arith.addf %932, %935 : vector<16x128xf32>
    %937 = arith.addf %820, %936 : vector<16x128xf32>
    %c1_358 = arith.constant 1 : index
    %c0_359 = arith.constant 0 : index
    %c0_360 = arith.constant 0 : index
    %938 = vector.load %arg29[%c1_358, %c0_359, %c0_360] : memref<2x1x128xf32, #tpu.memory_space<vmem>>, vector<1x1x128xf32>
    %939 = vector.shape_cast %938 : vector<1x1x128xf32> to vector<1x128xf32>
    %c1_361 = arith.constant 1 : index
    %c0_362 = arith.constant 0 : index
    %c0_363 = arith.constant 0 : index
    %940 = vector.load %arg30[%c1_361, %c0_362, %c0_363] : memref<2x1x128xf32, #tpu.memory_space<vmem>>, vector<1x1x128xf32>
    %941 = vector.shape_cast %940 : vector<1x1x128xf32> to vector<1x128xf32>
    %cst_364 = arith.constant dense<0.000000e+00> : vector<16xf32>
    %942 = vector.multi_reduction <add>, %937, %cst_364 [1] : vector<16x128xf32> to vector<16xf32>
    %943 = vector.shape_cast %942 : vector<16xf32> to vector<16x1xf32>
    %cst_365 = arith.constant 1.280000e+02 : f32
    %944 = vector.broadcast %cst_365 : f32 to vector<16x1xf32>
    %945 = arith.divf %943, %944 : vector<16x1xf32>
    %946 = vector.broadcast %945 : vector<16x1xf32> to vector<16x128xf32>
    %947 = arith.subf %937, %946 : vector<16x128xf32>
    %948 = arith.mulf %947, %947 : vector<16x128xf32>
    %cst_366 = arith.constant dense<0.000000e+00> : vector<16xf32>
    %949 = vector.multi_reduction <add>, %948, %cst_366 [1] : vector<16x128xf32> to vector<16xf32>
    %950 = vector.shape_cast %949 : vector<16xf32> to vector<16x1xf32>
    %cst_367 = arith.constant 1.280000e+02 : f32
    %951 = vector.broadcast %cst_367 : f32 to vector<16x1xf32>
    %952 = arith.divf %950, %951 : vector<16x1xf32>
    %cst_368 = arith.constant 9.99999974E-6 : f32
    %953 = vector.broadcast %cst_368 : f32 to vector<16x1xf32>
    %954 = arith.addf %952, %953 : vector<16x1xf32>
    %955 = math.rsqrt %954 : vector<16x1xf32>
    %956 = vector.broadcast %955 : vector<16x1xf32> to vector<16x128xf32>
    %957 = arith.mulf %947, %956 : vector<16x128xf32>
    %958 = vector.broadcast %939 : vector<1x128xf32> to vector<16x128xf32>
    %959 = arith.mulf %957, %958 : vector<16x128xf32>
    %960 = vector.broadcast %941 : vector<1x128xf32> to vector<16x128xf32>
    %961 = arith.addf %959, %960 : vector<16x128xf32>
    %962 = arith.truncf %961 : vector<16x128xf32> to vector<16x128xbf16>
    %c1_369 = arith.constant 1 : index
    %c0_370 = arith.constant 0 : index
    %c0_371 = arith.constant 0 : index
    %963 = vector.load %arg31[%c1_369, %c0_370, %c0_371] : memref<2x128x640xbf16, #tpu.memory_space<vmem>>, vector<1x128x640xbf16>
    %964 = vector.shape_cast %963 : vector<1x128x640xbf16> to vector<128x640xbf16>
    %cst_372 = arith.constant dense<0.000000e+00> : vector<16x640xf32>
    %965 = tpu.matmul %962, %964, %cst_372 {dimension_numbers = #tpu.dot_dimension_numbers<[1], [0], [0], [1], [0, 0, 1, 1], [], []>} : vector<16x128xbf16>, vector<128x640xbf16>, vector<16x640xf32> -> vector<16x640xf32>
    %c1_373 = arith.constant 1 : index
    %c0_374 = arith.constant 0 : index
    %c0_375 = arith.constant 0 : index
    %966 = vector.load %arg32[%c1_373, %c0_374, %c0_375] : memref<2x1x640xf32, #tpu.memory_space<vmem>>, vector<1x1x640xf32>
    %967 = vector.shape_cast %966 : vector<1x1x640xf32> to vector<1x640xf32>
    %968 = vector.broadcast %967 : vector<1x640xf32> to vector<16x640xf32>
    %969 = arith.addf %965, %968 : vector<16x640xf32>
    %cst_376 = arith.constant 0.000000e+00 : f32
    %970 = vector.broadcast %cst_376 : f32 to vector<16x640xf32>
    %971 = arith.maximumf %969, %970 : vector<16x640xf32>
    %972 = arith.truncf %971 : vector<16x640xf32> to vector<16x640xbf16>
    %c1_377 = arith.constant 1 : index
    %c0_378 = arith.constant 0 : index
    %c0_379 = arith.constant 0 : index
    %973 = vector.load %arg33[%c1_377, %c0_378, %c0_379] : memref<2x640x128xbf16, #tpu.memory_space<vmem>>, vector<1x640x128xbf16>
    %974 = vector.shape_cast %973 : vector<1x640x128xbf16> to vector<640x128xbf16>
    %cst_380 = arith.constant dense<0.000000e+00> : vector<16x128xf32>
    %975 = tpu.matmul %972, %974, %cst_380 {dimension_numbers = #tpu.dot_dimension_numbers<[1], [0], [0], [1], [0, 0, 1, 1], [], []>} : vector<16x640xbf16>, vector<640x128xbf16>, vector<16x128xf32> -> vector<16x128xf32>
    %c1_381 = arith.constant 1 : index
    %c0_382 = arith.constant 0 : index
    %c0_383 = arith.constant 0 : index
    %976 = vector.load %arg34[%c1_381, %c0_382, %c0_383] : memref<2x1x128xf32, #tpu.memory_space<vmem>>, vector<1x1x128xf32>
    %977 = vector.shape_cast %976 : vector<1x1x128xf32> to vector<1x128xf32>
    %978 = vector.broadcast %977 : vector<1x128xf32> to vector<16x128xf32>
    %979 = arith.addf %975, %978 : vector<16x128xf32>
    %980 = arith.addf %961, %979 : vector<16x128xf32>
    %c1_384 = arith.constant 1 : index
    %c0_385 = arith.constant 0 : index
    %c0_386 = arith.constant 0 : index
    %981 = vector.load %arg35[%c1_384, %c0_385, %c0_386] : memref<2x1x128xf32, #tpu.memory_space<vmem>>, vector<1x1x128xf32>
    %982 = vector.shape_cast %981 : vector<1x1x128xf32> to vector<1x128xf32>
    %c1_387 = arith.constant 1 : index
    %c0_388 = arith.constant 0 : index
    %c0_389 = arith.constant 0 : index
    %983 = vector.load %arg36[%c1_387, %c0_388, %c0_389] : memref<2x1x128xf32, #tpu.memory_space<vmem>>, vector<1x1x128xf32>
    %984 = vector.shape_cast %983 : vector<1x1x128xf32> to vector<1x128xf32>
    %cst_390 = arith.constant dense<0.000000e+00> : vector<16xf32>
    %985 = vector.multi_reduction <add>, %980, %cst_390 [1] : vector<16x128xf32> to vector<16xf32>
    %986 = vector.shape_cast %985 : vector<16xf32> to vector<16x1xf32>
    %cst_391 = arith.constant 1.280000e+02 : f32
    %987 = vector.broadcast %cst_391 : f32 to vector<16x1xf32>
    %988 = arith.divf %986, %987 : vector<16x1xf32>
    %989 = vector.broadcast %988 : vector<16x1xf32> to vector<16x128xf32>
    %990 = arith.subf %980, %989 : vector<16x128xf32>
    %991 = arith.mulf %990, %990 : vector<16x128xf32>
    %cst_392 = arith.constant dense<0.000000e+00> : vector<16xf32>
    %992 = vector.multi_reduction <add>, %991, %cst_392 [1] : vector<16x128xf32> to vector<16xf32>
    %993 = vector.shape_cast %992 : vector<16xf32> to vector<16x1xf32>
    %cst_393 = arith.constant 1.280000e+02 : f32
    %994 = vector.broadcast %cst_393 : f32 to vector<16x1xf32>
    %995 = arith.divf %993, %994 : vector<16x1xf32>
    %cst_394 = arith.constant 9.99999974E-6 : f32
    %996 = vector.broadcast %cst_394 : f32 to vector<16x1xf32>
    %997 = arith.addf %995, %996 : vector<16x1xf32>
    %998 = math.rsqrt %997 : vector<16x1xf32>
    %999 = vector.broadcast %998 : vector<16x1xf32> to vector<16x128xf32>
    %1000 = arith.mulf %990, %999 : vector<16x128xf32>
    %1001 = vector.broadcast %982 : vector<1x128xf32> to vector<16x128xf32>
    %1002 = arith.mulf %1000, %1001 : vector<16x128xf32>
    %1003 = vector.broadcast %984 : vector<1x128xf32> to vector<16x128xf32>
    %1004 = arith.addf %1002, %1003 : vector<16x128xf32>
    %1005 = arith.truncf %1004 : vector<16x128xf32> to vector<16x128xbf16>
    %c0_395 = arith.constant 0 : index
    %c0_396 = arith.constant 0 : index
    %1006 = vector.load %arg37[%c0_395, %c0_396] : memref<128x128xbf16, #tpu.memory_space<vmem>>, vector<128x128xbf16>
    %cst_397 = arith.constant dense<0.000000e+00> : vector<16x128xf32>
    %1007 = tpu.matmul %1005, %1006, %cst_397 {dimension_numbers = #tpu.dot_dimension_numbers<[1], [0], [0], [1], [0, 0, 1, 1], [], []>} : vector<16x128xbf16>, vector<128x128xbf16>, vector<16x128xf32> -> vector<16x128xf32>
    %c0_398 = arith.constant 0 : index
    %c0_399 = arith.constant 0 : index
    %1008 = vector.load %arg38[%c0_398, %c0_399] : memref<1x128xf32, #tpu.memory_space<vmem>>, vector<1x128xf32>
    %1009 = vector.broadcast %1008 : vector<1x128xf32> to vector<16x128xf32>
    %1010 = arith.addf %1007, %1009 : vector<16x128xf32>
    %c0_400 = arith.constant 0 : index
    %c0_401 = arith.constant 0 : index
    %c0_402 = arith.constant 0 : index
    %1011 = vector.load %arg39[%c0_400, %c0_401, %c0_402] : memref<1x16x128xf32, #tpu.memory_space<vmem>>, vector<1x16x128xf32>
    %1012 = vector.shape_cast %1011 : vector<1x16x128xf32> to vector<16x128xf32>
    %1013 = vector.shape_cast %1010 : vector<16x128xf32> to vector<1x16x128xf32>
    tpu.vector_store %arg39[%c0_400, %c0_401, %c0_402], %1013 {strides = array<i32>} : memref<1x16x128xf32, #tpu.memory_space<vmem>>, vector<1x16x128xf32>,
    return
  }
  func.func @transform_0(%arg0: i32) -> (i32, i32, i32) {
    %c0_i32 = arith.constant 0 : i32
    %c0_i32_0 = arith.constant 0 : i32
    %c0_i32_1 = arith.constant 0 : i32
    return %arg0, %c0_i32, %c0_i32_0 : i32, i32, i32
  }
  func.func @transform_1(%arg0: i32) -> (i32, i32) {
    %c0_i32 = arith.constant 0 : i32
    %c0_i32_0 = arith.constant 0 : i32
    %c0_i32_1 = arith.constant 0 : i32
    return %c0_i32, %c0_i32_0 : i32, i32
  }
  func.func @transform_2(%arg0: i32) -> (i32, i32) {
    %c0_i32 = arith.constant 0 : i32
    %c0_i32_0 = arith.constant 0 : i32
    %c0_i32_1 = arith.constant 0 : i32
    return %c0_i32, %c0_i32_0 : i32, i32
  }
  func.func @transform_3(%arg0: i32) -> (i32, i32) {
    %c0_i32 = arith.constant 0 : i32
    %c0_i32_0 = arith.constant 0 : i32
    %c0_i32_1 = arith.constant 0 : i32
    return %c0_i32, %c0_i32_0 : i32, i32
  }
  func.func @transform_4(%arg0: i32) -> (i32, i32, i32) {
    %c0_i32 = arith.constant 0 : i32
    %c0_i32_0 = arith.constant 0 : i32
    %c0_i32_1 = arith.constant 0 : i32
    %c0_i32_2 = arith.constant 0 : i32
    return %c0_i32, %c0_i32_0, %c0_i32_1 : i32, i32, i32
  }
  func.func @transform_5(%arg0: i32) -> (i32, i32, i32) {
    %c0_i32 = arith.constant 0 : i32
    %c0_i32_0 = arith.constant 0 : i32
    %c0_i32_1 = arith.constant 0 : i32
    %c0_i32_2 = arith.constant 0 : i32
    return %c0_i32, %c0_i32_0, %c0_i32_1 : i32, i32, i32
  }
  func.func @transform_6(%arg0: i32) -> (i32, i32, i32) {
    %c0_i32 = arith.constant 0 : i32
    %c0_i32_0 = arith.constant 0 : i32
    %c0_i32_1 = arith.constant 0 : i32
    %c0_i32_2 = arith.constant 0 : i32
    return %c0_i32, %c0_i32_0, %c0_i32_1 : i32, i32, i32
  }
  func.func @transform_7(%arg0: i32) -> (i32, i32, i32) {
    %c0_i32 = arith.constant 0 : i32
    %c0_i32_0 = arith.constant 0 : i32
    %c0_i32_1 = arith.constant 0 : i32
    %c0_i32_2 = arith.constant 0 : i32
    return %c0_i32, %c0_i32_0, %c0_i32_1 : i32, i32, i32
  }
  func.func @transform_8(%arg0: i32) -> (i32, i32, i32) {
    %c0_i32 = arith.constant 0 : i32
    %c0_i32_0 = arith.constant 0 : i32
    %c0_i32_1 = arith.constant 0 : i32
    %c0_i32_2 = arith.constant 0 : i32
    return %c0_i32, %c0_i32_0, %c0_i32_1 : i32, i32, i32
  }
  func.func @transform_9(%arg0: i32) -> (i32, i32, i32) {
    %c0_i32 = arith.constant 0 : i32
    %c0_i32_0 = arith.constant 0 : i32
    %c0_i32_1 = arith.constant 0 : i32
    %c0_i32_2 = arith.constant 0 : i32
    return %c0_i32, %c0_i32_0, %c0_i32_1 : i32, i32, i32
  }
  func.func @transform_10(%arg0: i32) -> (i32, i32, i32) {
    %c0_i32 = arith.constant 0 : i32
    %c0_i32_0 = arith.constant 0 : i32
    %c0_i32_1 = arith.constant 0 : i32
    %c0_i32_2 = arith.constant 0 : i32
    return %c0_i32, %c0_i32_0, %c0_i32_1 : i32, i32, i32
  }
  func.func @transform_11(%arg0: i32) -> (i32, i32, i32) {
    %c0_i32 = arith.constant 0 : i32
    %c0_i32_0 = arith.constant 0 : i32
    %c0_i32_1 = arith.constant 0 : i32
    %c0_i32_2 = arith.constant 0 : i32
    return %c0_i32, %c0_i32_0, %c0_i32_1 : i32, i32, i32
  }
  func.func @transform_12(%arg0: i32) -> (i32, i32, i32) {
    %c0_i32 = arith.constant 0 : i32
    %c0_i32_0 = arith.constant 0 : i32
    %c0_i32_1 = arith.constant 0 : i32
    %c0_i32_2 = arith.constant 0 : i32
    return %c0_i32, %c0_i32_0, %c0_i32_1 : i32, i32, i32
  }
  func.func @transform_13(%arg0: i32) -> (i32, i32, i32) {
    %c0_i32 = arith.constant 0 : i32
    %c0_i32_0 = arith.constant 0 : i32
    %c0_i32_1 = arith.constant 0 : i32
    %c0_i32_2 = arith.constant 0 : i32
    return %c0_i32, %c0_i32_0, %c0_i32_1 : i32, i32, i32
  }
  func.func @transform_14(%arg0: i32) -> (i32, i32, i32) {
    %c0_i32 = arith.constant 0 : i32
    %c0_i32_0 = arith.constant 0 : i32
    %c0_i32_1 = arith.constant 0 : i32
    %c0_i32_2 = arith.constant 0 : i32
    return %c0_i32, %c0_i32_0, %c0_i32_1 : i32, i32, i32
  }
  func.func @transform_15(%arg0: i32) -> (i32, i32, i32) {
    %c0_i32 = arith.constant 0 : i32
    %c0_i32_0 = arith.constant 0 : i32
    %c0_i32_1 = arith.constant 0 : i32
    %c0_i32_2 = arith.constant 0 : i32
    return %c0_i32, %c0_i32_0, %c0_i32_1 : i32, i32, i32
  }
  func.func @transform_16(%arg0: i32) -> (i32, i32, i32) {
    %c0_i32 = arith.constant 0 : i32
    %c0_i32_0 = arith.constant 0 : i32
    %c0_i32_1 = arith.constant 0 : i32
    %c0_i32_2 = arith.constant 0 : i32
    return %c0_i32, %c0_i32_0, %c0_i32_1 : i32, i32, i32
  }
  func.func @transform_17(%arg0: i32) -> (i32, i32, i32) {
    %c0_i32 = arith.constant 0 : i32
    %c0_i32_0 = arith.constant 0 : i32
    %c0_i32_1 = arith.constant 0 : i32
    %c0_i32_2 = arith.constant 0 : i32
    return %c0_i32, %c0_i32_0, %c0_i32_1 : i32, i32, i32
  }
  func.func @transform_18(%arg0: i32) -> (i32, i32, i32) {
    %c0_i32 = arith.constant 0 : i32
    %c0_i32_0 = arith.constant 0 : i32
    %c0_i32_1 = arith.constant 0 : i32
    %c0_i32_2 = arith.constant 0 : i32
    return %c0_i32, %c0_i32_0, %c0_i32_1 : i32, i32, i32
  }
  func.func @transform_19(%arg0: i32) -> (i32, i32, i32) {
    %c0_i32 = arith.constant 0 : i32
    %c0_i32_0 = arith.constant 0 : i32
    %c0_i32_1 = arith.constant 0 : i32
    %c0_i32_2 = arith.constant 0 : i32
    return %c0_i32, %c0_i32_0, %c0_i32_1 : i32, i32, i32
  }
  func.func @transform_20(%arg0: i32) -> (i32, i32, i32) {
    %c0_i32 = arith.constant 0 : i32
    %c0_i32_0 = arith.constant 0 : i32
    %c0_i32_1 = arith.constant 0 : i32
    %c0_i32_2 = arith.constant 0 : i32
    return %c0_i32, %c0_i32_0, %c0_i32_1 : i32, i32, i32
  }
  func.func @transform_21(%arg0: i32) -> (i32, i32, i32) {
    %c0_i32 = arith.constant 0 : i32
    %c0_i32_0 = arith.constant 0 : i32
    %c0_i32_1 = arith.constant 0 : i32
    %c0_i32_2 = arith.constant 0 : i32
    return %c0_i32, %c0_i32_0, %c0_i32_1 : i32, i32, i32
  }
  func.func @transform_22(%arg0: i32) -> (i32, i32, i32) {
    %c0_i32 = arith.constant 0 : i32
    %c0_i32_0 = arith.constant 0 : i32
    %c0_i32_1 = arith.constant 0 : i32
    %c0_i32_2 = arith.constant 0 : i32
    return %c0_i32, %c0_i32_0, %c0_i32_1 : i32, i32, i32
  }
  func.func @transform_23(%arg0: i32) -> (i32, i32, i32) {
    %c0_i32 = arith.constant 0 : i32
    %c0_i32_0 = arith.constant 0 : i32
    %c0_i32_1 = arith.constant 0 : i32
    %c0_i32_2 = arith.constant 0 : i32
    return %c0_i32, %c0_i32_0, %c0_i32_1 : i32, i32, i32
  }
  func.func @transform_24(%arg0: i32) -> (i32, i32, i32) {
    %c0_i32 = arith.constant 0 : i32
    %c0_i32_0 = arith.constant 0 : i32
    %c0_i32_1 = arith.constant 0 : i32
    %c0_i32_2 = arith.constant 0 : i32
    return %c0_i32, %c0_i32_0, %c0_i32_1 : i32, i32, i32
  }
  func.func @transform_25(%arg0: i32) -> (i32, i32, i32) {
    %c0_i32 = arith.constant 0 : i32
    %c0_i32_0 = arith.constant 0 : i32
    %c0_i32_1 = arith.constant 0 : i32
    %c0_i32_2 = arith.constant 0 : i32
    return %c0_i32, %c0_i32_0, %c0_i32_1 : i32, i32, i32
  }
  func.func @transform_26(%arg0: i32) -> (i32, i32, i32) {
    %c0_i32 = arith.constant 0 : i32
    %c0_i32_0 = arith.constant 0 : i32
    %c0_i32_1 = arith.constant 0 : i32
    %c0_i32_2 = arith.constant 0 : i32
    return %c0_i32, %c0_i32_0, %c0_i32_1 : i32, i32, i32
  }
  func.func @transform_27(%arg0: i32) -> (i32, i32, i32) {
    %c0_i32 = arith.constant 0 : i32
    %c0_i32_0 = arith.constant 0 : i32
    %c0_i32_1 = arith.constant 0 : i32
    %c0_i32_2 = arith.constant 0 : i32
    return %c0_i32, %c0_i32_0, %c0_i32_1 : i32, i32, i32
  }
  func.func @transform_28(%arg0: i32) -> (i32, i32, i32) {
    %c0_i32 = arith.constant 0 : i32
    %c0_i32_0 = arith.constant 0 : i32
    %c0_i32_1 = arith.constant 0 : i32
    %c0_i32_2 = arith.constant 0 : i32
    return %c0_i32, %c0_i32_0, %c0_i32_1 : i32, i32, i32
  }
  func.func @transform_29(%arg0: i32) -> (i32, i32, i32) {
    %c0_i32 = arith.constant 0 : i32
    %c0_i32_0 = arith.constant 0 : i32
    %c0_i32_1 = arith.constant 0 : i32
    %c0_i32_2 = arith.constant 0 : i32
    return %c0_i32, %c0_i32_0, %c0_i32_1 : i32, i32, i32
  }
  func.func @transform_30(%arg0: i32) -> (i32, i32, i32) {
    %c0_i32 = arith.constant 0 : i32
    %c0_i32_0 = arith.constant 0 : i32
    %c0_i32_1 = arith.constant 0 : i32
    %c0_i32_2 = arith.constant 0 : i32
    return %c0_i32, %c0_i32_0, %c0_i32_1 : i32, i32, i32
  }
  func.func @transform_31(%arg0: i32) -> (i32, i32, i32) {
    %c0_i32 = arith.constant 0 : i32
    %c0_i32_0 = arith.constant 0 : i32
    %c0_i32_1 = arith.constant 0 : i32
    %c0_i32_2 = arith.constant 0 : i32
    return %c0_i32, %c0_i32_0, %c0_i32_1 : i32, i32, i32
  }
  func.func @transform_32(%arg0: i32) -> (i32, i32, i32) {
    %c0_i32 = arith.constant 0 : i32
    %c0_i32_0 = arith.constant 0 : i32
    %c0_i32_1 = arith.constant 0 : i32
    %c0_i32_2 = arith.constant 0 : i32
    return %c0_i32, %c0_i32_0, %c0_i32_1 : i32, i32, i32
  }
  func.func @transform_33(%arg0: i32) -> (i32, i32, i32) {
    %c0_i32 = arith.constant 0 : i32
    %c0_i32_0 = arith.constant 0 : i32
    %c0_i32_1 = arith.constant 0 : i32
    %c0_i32_2 = arith.constant 0 : i32
    return %c0_i32, %c0_i32_0, %c0_i32_1 : i32, i32, i32
  }
  func.func @transform_34(%arg0: i32) -> (i32, i32, i32) {
    %c0_i32 = arith.constant 0 : i32
    %c0_i32_0 = arith.constant 0 : i32
    %c0_i32_1 = arith.constant 0 : i32
    %c0_i32_2 = arith.constant 0 : i32
    return %c0_i32, %c0_i32_0, %c0_i32_1 : i32, i32, i32
  }
  func.func @transform_35(%arg0: i32) -> (i32, i32, i32) {
    %c0_i32 = arith.constant 0 : i32
    %c0_i32_0 = arith.constant 0 : i32
    %c0_i32_1 = arith.constant 0 : i32
    %c0_i32_2 = arith.constant 0 : i32
    return %c0_i32, %c0_i32_0, %c0_i32_1 : i32, i32, i32
  }
  func.func @transform_36(%arg0: i32) -> (i32, i32) {
    %c0_i32 = arith.constant 0 : i32
    %c0_i32_0 = arith.constant 0 : i32
    %c0_i32_1 = arith.constant 0 : i32
    return %c0_i32, %c0_i32_0 : i32, i32
  }
  func.func @transform_37(%arg0: i32) -> (i32, i32) {
    %c0_i32 = arith.constant 0 : i32
    %c0_i32_0 = arith.constant 0 : i32
    %c0_i32_1 = arith.constant 0 : i32
    return %c0_i32, %c0_i32_0 : i32, i32
  }
  func.func @transform_38(%arg0: i32) -> (i32, i32, i32) {
    %c0_i32 = arith.constant 0 : i32
    %c0_i32_0 = arith.constant 0 : i32
    %c0_i32_1 = arith.constant 0 : i32
    return %arg0, %c0_i32, %c0_i32_0 : i32, i32, i32
  }
}

</mosaic_0001>

<bundles_post_ra>
// kernel: transformer_generator_forward.1
= control target key start
LH: loop header
LB: loop body
LE: loop exit
PB: predicated region body
PF: predicated region fallthrough
CT: control target
= control target key end

     0   :  { %s16407_s6 = smov 1   ;;  %s16408_s10 = smov 2   ;;  %s18313_s0 = inlined_call_operand.smem [shape: u32[39], index: -1, kind: input, shape index: {}] }
   0x1   :  { %s16504_s5 = sld [smem:[%s18313_s0]]   ;;  %s16409_s14 = smov 3  }
   0x2   :  { %s16509_s9 = sld [smem:[%s18313_s0 + %s16407_s6]]   ;;  %s16410_s18 = smov 4  }
   0x3   :  { %s16514_s13 = sld [smem:[%s18313_s0 + %s16408_s10]]   ;;  %s16411_s22 = smov 5  }
   0x4   :  { %s16519_s17 = sld [smem:[%s18313_s0 + %s16409_s14]]   ;;  %s16412_s26 = smov 6  }
   0x5   :  { %s16524_s21 = sld [smem:[%s18313_s0 + %s16410_s18]]   ;;  %s16413_s30 = smov 7  }
   0x6   :  { %s16529_s25 = sld [smem:[%s18313_s0 + %s16411_s22]]   ;;  %s16414_s4 = smov 8  }
   0x7   :  { %18365 = sst [smem:[#allocation65_spill]] %s16504_s5  ;;  %s16415_s10 = smov 9  }
   0x8   :  { %18366 = sst [smem:[#allocation66_spill]] %s16509_s9  ;;  %s16416_s15 = smov 10  }
   0x9   :  { %18367 = sst [smem:[#allocation67_spill]] %s16514_s13  ;;  %s16417_s20 = smov 11  }
   0xa   :  { %18368 = sst [smem:[#allocation68_spill]] %s16519_s17  ;;  %s16419_s1 = smov 13  }
   0xb   :  { %18369 = sst [smem:[#allocation69_spill]] %s16524_s21  ;;  %s16420_s7 = smov 14  }
   0xc   :  { %s16534_s29 = sld [smem:[%s18313_s0 + %s16412_s26]]   ;;  %s16418_s26 = smov 12  }
   0xd   :  { %s16539_s3 = sld [smem:[%s18313_s0 + %s16413_s30]]   ;;  %s16422_s22 = smov 16  }
   0xe   :  { %s16544_s8 = sld [smem:[%s18313_s0 + %s16414_s4]]   ;;  %s16423_s28 = smov 17  }
   0xf   :  { %s16549_s14 = sld [smem:[%s18313_s0 + %s16415_s10]]  }
  0x10   :  { %s16554_s19 = sld [smem:[%s18313_s0 + %s16416_s15]]   ;;  %s16421_s15 = smov 15  }
  0x11   :  { %s16559_s24 = sld [smem:[%s18313_s0 + %s16417_s20]]  }
  0x12   :  { %18370 = sst [smem:[#allocation70_spill]] %s16534_s29 }
  0x13   :  { %18371 = sst [smem:[#allocation71_spill]] %s16539_s3 }
  0x14   :  { %18372 = sst [smem:[#allocation72_spill]] %s16544_s8 }
  0x15   :  { %18373 = sst [smem:[#allocation73_spill]] %s16549_s14 }
  0x16   :  { %s16564_s30 = sld [smem:[%s18313_s0 + %s16418_s26]]  }
  0x17   :  { %18374 = sst [smem:[#allocation74_spill]] %s16559_s24 }
  0x18   :  { %s16569_s6 = sld [smem:[%s18313_s0 + %s16419_s1]]  }
  0x19   :  { %s16574_s12 = sld [smem:[%s18313_s0 + %s16420_s7]]   ;;  %s16424_s7 = smov 18  }
  0x1a   :  { %s16579_s20 = sld [smem:[%s18313_s0 + %s16421_s15]]   ;;  %s16425_s15 = smov 19  }
  0x1b   :  { %s16584_s27 = sld [smem:[%s18313_s0 + %s16422_s22]]   ;;  %s16426_s22 = smov 20  }
  0x1c   :  { %18375 = sst [smem:[#allocation75_spill]] %s16564_s30 }
  0x1d   :  { %s16589_s4 = sld [smem:[%s18313_s0 + %s16423_s28]]   ;;  %s16427_s28 = smov 21  }
  0x1e   :  { %18376 = sst [smem:[#allocation76_spill]] %s16569_s6 }
  0x1f   :  { %18377 = sst [smem:[#allocation77_spill]] %s16574_s12 }
  0x20   :  { %s16594_s24 = sld [smem:[%s18313_s0 + %s16424_s7]]   ;;  %s16428_s7 = smov 22  }
  0x21   :  { %18378 = sst [smem:[#allocation78_spill]] %s16584_s27 }
  0x22   :  { %s16599_s29 = sld [smem:[%s18313_s0 + %s16425_s15]]   ;;  %s16429_s15 = smov 23  }
  0x23   :  { %18379 = sst [smem:[#allocation79_spill]] %s16589_s4 }
  0x24   :  { %s16604_s9 = sld [smem:[%s18313_s0 + %s16426_s22]]   ;;  %s16430_s22 = smov 24  }
  0x25   :  { %s16609_s17 = sld [smem:[%s18313_s0 + %s16427_s28]]   ;;  %s16431_s28 = smov 25  }
  0x26   :  { %18380 = sst [smem:[#allocation80_spill]] %s16594_s24 }
  0x27   :  { %s16614_s5 = sld [smem:[%s18313_s0 + %s16428_s7]]   ;;  %s16432_s7 = smov 26  }
  0x28   :  { %s16619_s13 = sld [smem:[%s18313_s0 + %s16429_s15]]   ;;  %s16433_s15 = smov 27  }
  0x29   :  { %s16629_s24 = sld [smem:[%s18313_s0 + %s16431_s28]]   ;;  %s16435_s28 = smov 29  }
  0x2a   :  { %18381 = sst [smem:[#allocation81_spill]] %s16604_s9 }
  0x2b   :  { %s16624_s9 = sld [smem:[%s18313_s0 + %s16430_s22]]   ;;  %s16434_s22 = smov 28  }
  0x2c   :  { %s16639_s27 = sld [smem:[%s18313_s0 + %s16433_s15]]   ;;  %s16437_s15 = smov 31  }
  0x2d   :  { %18382 = sst [smem:[#allocation82_spill]] %s16614_s5 }
  0x2e   :  { %s16634_s5 = sld [smem:[%s18313_s0 + %s16432_s7]]   ;;  %s16436_s7 = smov 30  }
  0x2f   :  { %s16649_s12 = sld [smem:[%s18313_s0 + %s16435_s28]]   ;;  %s16439_s28 = smov 33  }
  0x30   :  { %s16659_s30 = sld [smem:[%s18313_s0 + %s16437_s15]]   ;;  %s16441_s15 = smov 35  }
  0x31   :  { %18383 = sst [smem:[#allocation83_spill]] %s16624_s9 }
  0x32   :  { %s16644_s9 = sld [smem:[%s18313_s0 + %s16434_s22]]   ;;  %s16438_s22 = smov 32  }
  0x33   :  { %s16669_s14 = sld [smem:[%s18313_s0 + %s16439_s28]]   ;;  %s16443_s28 = smov 37  }
  0x34   :  { %18384 = sst [smem:[#allocation84_spill]] %s16634_s5 }
  0x35   :  { %18386 = sst [smem:[#allocation86_spill]] %s16649_s12 }
  0x36   :  { %s16654_s5 = sld [smem:[%s18313_s0 + %s16436_s7]]   ;;  %s16440_s7 = smov 34  }
  0x37   :  { %18388 = sst [smem:[#allocation88_spill]] %s16659_s30 }
  0x38   :  { %18385 = sst [smem:[#allocation85_spill]] %s16644_s9 }
  0x39   :  { %s16664_s9 = sld [smem:[%s18313_s0 + %s16438_s22]]   ;;  %s16442_s22 = smov 36  }
  0x3a   :  { %18390 = sst [smem:[#allocation90_spill]] %s16669_s14 }
  0x3b   :  { %s16679_s30 = sld [smem:[%s18313_s0 + %s16441_s15]]  }
  0x3c   :  { %18387 = sst [smem:[#allocation87_spill]] %s16654_s5 }
  0x3d   :  { %s16674_s5 = sld [smem:[%s18313_s0 + %s16440_s7]]   ;;  %s16444_s7 = smov 38  }
  0x3e   :  { %s16684_s3 = sld [smem:[%s18313_s0 + %s16442_s22]]  }
  0x3f   :  { %18389 = sst [smem:[#allocation89_spill]] %s16664_s9 }
  0x40   :  { %s16689_s14 = sld [smem:[%s18313_s0 + %s16443_s28]]  }
  0x41   :  { %s16694_s21 = sld [smem:[%s18313_s0 + %s16444_s7]]  }
  0x43   :  { %18391 = sst [smem:[#allocation91_spill]] %s16674_s5 }
  0x44   :  { %18392 = sst [smem:[#allocation92_spill]] %s16684_s3 }
  0x45   :  { %82 = vsyncpa [#allocation3], 0 }
  0x46   :  { %83 = vsyncpa [#allocation5], 0 }
  0x47   :  { %84 = vsyncpa [#allocation8], 0 }
  0x48   :  { %85 = vsyncpa [#allocation11], 0 }
  0x49   :  { %86 = vsyncpa [#allocation14], 0 }
  0x4a   :  { %87 = vsyncpa [#allocation17], 0 }
  0x4b   :  { %88 = vsyncpa [#allocation20], 0 }
  0x4c   :  { %89 = vsyncpa [#allocation23], 0 }
  0x4d   :  { %90 = vsyncpa [#allocation26], 0 }
  0x4e   :  { %91 = vsyncpa [#allocation29], 0 }
  0x4f   :  { %92 = vsyncpa [#allocation32], 0 }
  0x50   :  { %93 = vsyncpa [#allocation35], 0 }
  0x51   :  { %94 = vsyncpa [#allocation38], 0 }
  0x52   :  { %95 = vsyncpa [#allocation41], 0 }
  0x53   :  { %96 = vsyncpa [#allocation44], 0 }
  0x54   :  { %97 = vsyncpa [#allocation47], 0  ;;  %s16696_s15 = smov 0  }
  0x55 LB: > { %s18393_s12 = sld [smem:[#allocation86_spill]]  ;;  %s18394_s9 = sld [smem:[#allocation89_spill]]  ;;  %s16405_s15 = sphi %s16696_s15, %s103_s15  }
  0x56   : > { %s18395_s5 = sld [smem:[#allocation91_spill]]  ;;  %s18396_s3 = sld [smem:[#allocation92_spill]] }
  0x57   : > { %s18397_s6 = sld [smem:[#allocation76_spill]]  ;;  %s18398_s4 = sld [smem:[#allocation79_spill]] }
  0x58   : > { %s18399_s8 = sld [smem:[#allocation72_spill]]  ;;  %s16445_s0 = smov [#allocation4]  }
  0x59   : > { %s971_s16 = sshll.u32 %s16445_s0, 4  ;;  %s16702_s18 = sadd.s32 4294967295, %s16405_s15   ;;  %s16707_s16 = int_to_ptr.vmem [resolvable:$true] %s971_s16 }
  0x5a   : > { %p12205_p0 = scmp.ge.s32.totalorder %s16405_s15, 1  ;;  %p937_p1 = scmp.lt.s32.totalorder %s16405_s15, 3 }
  0x5b   : > { %p18333_p2 = scmp.eq.s32.totalorder %s16702_s18, 0  ;;  %s16446_s26 = smov [#allocation7]  }
  0x5c   : > { %p16709_p3 = pnand %p12205_p0, %p937_p1  ;;  %s1000_s28 = sshll.u32 %s16446_s26, 4  ;;  %s16721_s28 = int_to_ptr.vmem [resolvable:$true] %s1000_s28 }
  0x5d   : > { %s16447_s1 = smov [#allocation10]   ;;  %s15467_s7 = scalar_lea.hbm %s16529_s25, 96 }
  0x5e   : > { %s18400_s22 = scalar_select %p16709_p3, 1, 0 }
  0x5f   : > { %p14342_p4 = pneg %p16709_p3  ;;  %s16723_s2 = sshll.u32 %s16447_s1, 4  ;;  %s1027_s2 = int_to_ptr.vmem [resolvable:$true] %s16723_s2 }
  0x60   : > { %p15468_p6 = scmp.ne.s32.totalorder %s16529_s25, %s15467_s7  ;;  %p15474_p10 = scmp.lt.u32.totalorder %s15467_s7, %s16529_s25 }
  0x61   : > { %p16717_p5 = pnand %p18333_p2, %p14342_p4 }
  0x63   : > { %p16729_p7 = pneg %p16717_p5 }
  0x65   : > { %p15470_p8 = pnand %p16729_p7, %p15468_p6 }
  0x67   : > { %p15471_p9 = pneg %p15470_p8 }
  0x69   : > { %p15476_p11 = pnand %p15474_p10, %p15471_p9 }
  0x6b   : > { %15479 = shalt.err (!%p15476_p11)
}
  0x6c   : > { %s15480_s11 = scalar_lea.vmem %s16707_s16, 96  ;;  %p15488_p1 = scmp.lt.s32.totalorder %s16707_s16, %s16707_s16 }
  0x6d   : > { %p15481_p12 = scmp.ne.s32.totalorder %s16707_s16, %s15480_s11  ;;  %p15489_p4 = scmp.lt.s32.totalorder %s15480_s11, %s15480_s11 }
  0x6f   : > { %p15483_p13 = pnand %p15481_p12, %p16729_p7  ;;  %p15490_p2 = por %p15489_p4, %p15488_p1 }
  0x71   : > { %p15484_p0 = pneg %p15483_p13 }
  0x73   : > { %p15491_p3 = pnand %p15490_p2, %p15484_p0 }
  0x75   : > { %15494 = shalt.err (!%p15491_p3)
}
  0x76   : > { %s18335_s0 = smov 48   ;;  %s18336_s26 = smov 3  }
  0x77   : > { %14348 = dma.hbm_to_vmem [thread:$0]  (!%p16717_p5), %s16529_s25, 96, %s16707_s16, [#allocation5], %s18335_s0, %s18335_s0, %s18336_s26  }
  0x78   : > { %s15495_s1 = scalar_lea.hbm %s18399_s8, 32 }
  0x79   : > { %p15496_p6 = scmp.ne.s32.totalorder %s18399_s8, %s15495_s1  ;;  %p15502_p3 = scmp.lt.u32.totalorder %s15495_s1, %s18399_s8 }
  0x7b   : > { %p15498_p8 = pnand %p15496_p6, %p16729_p7 }
  0x7d   : > { %p15499_p2 = pneg %p15498_p8 }
  0x7f   : > { %p15504_p9 = pnand %p15502_p3, %p15499_p2 }
  0x81   : > { %15507 = shalt.err (!%p15504_p9)
}
  0x82   : > { %s15508_s7 = scalar_lea.vmem %s16721_s28, 32  ;;  %p15516_p13 = scmp.lt.s32.totalorder %s16721_s28, %s16721_s28 }
  0x83   : > { %p15509_p10 = scmp.ne.s32.totalorder %s16721_s28, %s15508_s7  ;;  %p15517_p0 = scmp.lt.s32.totalorder %s15508_s7, %s15508_s7 }
  0x85   : > { %p15511_p11 = pnand %p15509_p10, %p16729_p7  ;;  %p15518_p1 = por %p15517_p0, %p15516_p13 }
  0x87   : > { %p15512_p12 = pneg %p15511_p11 }
  0x89   : > { %p15519_p4 = pnand %p15518_p1, %p15512_p12 }
  0x8b   : > { %15522 = shalt.err (!%p15519_p4)
}
  0x8c   : > { %s18337_s16 = smov 16   ;;  %s18339_s11 = smov 1  }
  0x8d   : > { %14354 = dma.hbm_to_vmem [thread:$0]  (!%p16717_p5), %s18399_s8, 32, %s16721_s28, [#allocation8], %s18337_s16, %s18337_s16, %s18339_s11  }
  0x8e   : > { %s15523_s1 = scalar_lea.hbm %s16554_s19, 10240 }
  0x8f   : > { %p15524_p6 = scmp.ne.s32.totalorder %s16554_s19, %s15523_s1  ;;  %p15530_p3 = scmp.lt.u32.totalorder %s15523_s1, %s16554_s19 }
  0x91   : > { %p15526_p8 = pnand %p15524_p6, %p16729_p7 }
  0x93   : > { %p15527_p2 = pneg %p15526_p8 }
  0x95   : > { %p15532_p9 = pnand %p15530_p3, %p15527_p2 }
  0x97   : > { %15535 = shalt.err (!%p15532_p9)
}
  0x98   : > { %s15536_s7 = scalar_lea.vmem %s1027_s2, 10240  ;;  %p15544_p13 = scmp.lt.s32.totalorder %s1027_s2, %s1027_s2 }
  0x99   : > { %p15537_p10 = scmp.ne.s32.totalorder %s1027_s2, %s15536_s7  ;;  %p15545_p0 = scmp.lt.s32.totalorder %s15536_s7, %s15536_s7 }
  0x9b   : > { %p15539_p11 = pnand %p15537_p10, %p16729_p7  ;;  %p15546_p1 = por %p15545_p0, %p15544_p13 }
  0x9d   : > { %p15540_p12 = pneg %p15539_p11 }
  0x9f   : > { %p15547_p4 = pnand %p15546_p1, %p15540_p12 }
  0xa1   : > { %15550 = shalt.err (!%p15547_p4)
}
  0xa2   : > { %s18342_s28 = smov 320   ;;  %s18343_s1 = smov 20  }
  0xa3   : > { %14360 = dma.hbm_to_vmem [thread:$0]  (!%p16717_p5), %s16554_s19, 10240, %s1027_s2, [#allocation11], %s18342_s28, %s18342_s28, %s18343_s1  }
  0xa4   : > { %s16454_s0 = smov [#allocation13]   ;;  %s16455_s7 = smov [#allocation16]  }
  0xa5   : > { %s1055_s26 = sshll.u32 %s16454_s0, 4  ;;  %s1081_s16 = sshll.u32 %s16455_s7, 4  ;;  %s1056_s26 = int_to_ptr.vmem [resolvable:$true] %s1055_s26  ;;  %s1082_s16 = int_to_ptr.vmem [resolvable:$true] %s1081_s16 }
  0xa6   : > { %s15551_s11 = scalar_lea.hbm %s18397_s6, 32 }
  0xa7   : > { %p15552_p6 = scmp.ne.s32.totalorder %s18397_s6, %s15551_s11  ;;  %p15558_p3 = scmp.lt.u32.totalorder %s15551_s11, %s18397_s6 }
  0xa9   : > { %p15554_p8 = pnand %p15552_p6, %p16729_p7 }
  0xab   : > { %p15555_p2 = pneg %p15554_p8 }
  0xad   : > { %p15560_p9 = pnand %p15558_p3, %p15555_p2 }
  0xaf   : > { %15563 = shalt.err (!%p15560_p9)
}
  0xb0   : > { %s15564_s8 = scalar_lea.vmem %s1056_s26, 32  ;;  %p15572_p13 = scmp.lt.s32.totalorder %s1056_s26, %s1056_s26 }
  0xb1   : > { %p15565_p10 = scmp.ne.s32.totalorder %s1056_s26, %s15564_s8  ;;  %p15573_p0 = scmp.lt.s32.totalorder %s15564_s8, %s15564_s8 }
  0xb3   : > { %p15567_p11 = pnand %p15565_p10, %p16729_p7  ;;  %p15574_p1 = por %p15573_p0, %p15572_p13 }
  0xb5   : > { %p15568_p12 = pneg %p15567_p11 }
  0xb7   : > { %p15575_p4 = pnand %p15574_p1, %p15568_p12 }
  0xb9   : > { %15578 = shalt.err (!%p15575_p4)
}
  0xba   : > { %s18403_s2 = smov 1   ;;  %s18404_s0 = smov 16  }
  0xbb   : > { %14366 = dma.hbm_to_vmem [thread:$0]  (!%p16717_p5), %s18397_s6, 32, %s1056_s26, [#allocation14], %s18404_s0, %s18404_s0, %s18403_s2  }
  0xbc   : > { %s15579_s11 = scalar_lea.hbm %s16579_s20, 32 }
  0xbd   : > { %p15580_p6 = scmp.ne.s32.totalorder %s16579_s20, %s15579_s11  ;;  %p15586_p3 = scmp.lt.u32.totalorder %s15579_s11, %s16579_s20 }
  0xbf   : > { %p15582_p8 = pnand %p15580_p6, %p16729_p7 }
  0xc1   : > { %p15583_p2 = pneg %p15582_p8 }
  0xc3   : > { %p15588_p9 = pnand %p15586_p3, %p15583_p2 }
  0xc5   : > { %15591 = shalt.err (!%p15588_p9)
}
  0xc6   : > { %s15592_s8 = scalar_lea.vmem %s1082_s16, 32  ;;  %p15600_p13 = scmp.lt.s32.totalorder %s1082_s16, %s1082_s16 }
  0xc7   : > { %p15593_p10 = scmp.ne.s32.totalorder %s1082_s16, %s15592_s8  ;;  %p15601_p0 = scmp.lt.s32.totalorder %s15592_s8, %s15592_s8 }
  0xc9   : > { %p15595_p11 = pnand %p15593_p10, %p16729_p7  ;;  %p15602_p1 = por %p15601_p0, %p15600_p13 }
  0xcb   : > { %p15596_p12 = pneg %p15595_p11 }
  0xcd   : > { %p15603_p4 = pnand %p15602_p1, %p15596_p12 }
  0xcf   : > { %15606 = shalt.err (!%p15603_p4)
}
  0xd0   : > { %14372 = dma.hbm_to_vmem [thread:$0]  (!%p16717_p5), %s16579_s20, 32, %s1082_s16, [#allocation17], %s18404_s0, %s18404_s0, %s18403_s2  }
  0xd1   : > { %s16456_s26 = smov [#allocation19]   ;;  %s16457_s11 = smov [#allocation22]  }
  0xd2   : > { %s1107_s7 = sshll.u32 %s16456_s26, 4  ;;  %s1133_s28 = sshll.u32 %s16457_s11, 4  ;;  %s1108_s7 = int_to_ptr.vmem [resolvable:$true] %s1107_s7  ;;  %s1134_s28 = int_to_ptr.vmem [resolvable:$true] %s1133_s28 }
  0xd3   : > { %s15607_s8 = scalar_lea.hbm %s18398_s4, 96 }
  0xd4   : > { %p15608_p6 = scmp.ne.s32.totalorder %s18398_s4, %s15607_s8  ;;  %p15614_p3 = scmp.lt.u32.totalorder %s15607_s8, %s18398_s4 }
  0xd6   : > { %p15610_p8 = pnand %p15608_p6, %p16729_p7 }
  0xd8   : > { %p15611_p2 = pneg %p15610_p8 }
  0xda   : > { %p15616_p9 = pnand %p15614_p3, %p15611_p2 }
  0xdc   : > { %15619 = shalt.err (!%p15616_p9)
}
  0xdd   : > { %s15620_s1 = scalar_lea.vmem %s1108_s7, 96  ;;  %p15628_p13 = scmp.lt.s32.totalorder %s1108_s7, %s1108_s7 }
  0xde   : > { %p15621_p10 = scmp.ne.s32.totalorder %s1108_s7, %s15620_s1  ;;  %p15629_p0 = scmp.lt.s32.totalorder %s15620_s1, %s15620_s1 }
  0xe0   : > { %p15623_p11 = pnand %p15621_p10, %p16729_p7  ;;  %p15630_p1 = por %p15629_p0, %p15628_p13 }
  0xe2   : > { %p15624_p12 = pneg %p15623_p11 }
  0xe4   : > { %p15631_p4 = pnand %p15630_p1, %p15624_p12 }
  0xe6   : > { %15634 = shalt.err (!%p15631_p4)
}
  0xe7   : > { %s18405_s16 = smov 3   ;;  %s18406_s26 = smov 48  }
  0xe8   : > { %14378 = dma.hbm_to_vmem [thread:$0]  (!%p16717_p5), %s18398_s4, 96, %s1108_s7, [#allocation20], %s18406_s26, %s18406_s26, %s18405_s16  }
  0xe9   : > { %s15635_s11 = scalar_lea.hbm %s16599_s29, 32 }
  0xea   : > { %p15636_p6 = scmp.ne.s32.totalorder %s16599_s29, %s15635_s11  ;;  %p15642_p3 = scmp.lt.u32.totalorder %s15635_s11, %s16599_s29 }
  0xec   : > { %p15638_p8 = pnand %p15636_p6, %p16729_p7 }
  0xee   : > { %p15639_p2 = pneg %p15638_p8 }
  0xf0   : > { %p15644_p9 = pnand %p15642_p3, %p15639_p2 }
  0xf2   : > { %15647 = shalt.err (!%p15644_p9)
}
  0xf3   : > { %s15648_s1 = scalar_lea.vmem %s1134_s28, 32  ;;  %p15656_p13 = scmp.lt.s32.totalorder %s1134_s28, %s1134_s28 }
  0xf4   : > { %p15649_p10 = scmp.ne.s32.totalorder %s1134_s28, %s15648_s1  ;;  %p15657_p0 = scmp.lt.s32.totalorder %s15648_s1, %s15648_s1 }
  0xf6   : > { %p15651_p11 = pnand %p15649_p10, %p16729_p7  ;;  %p15658_p1 = por %p15657_p0, %p15656_p13 }
  0xf8   : > { %p15652_p12 = pneg %p15651_p11 }
  0xfa   : > { %p15659_p4 = pnand %p15658_p1, %p15652_p12 }
  0xfc   : > { %15662 = shalt.err (!%p15659_p4)
}
  0xfd   : > { %14384 = dma.hbm_to_vmem [thread:$0]  (!%p16717_p5), %s16599_s29, 32, %s1134_s28, [#allocation23], %s18404_s0, %s18404_s0, %s18403_s2  }
  0xfe   : > { %s16458_s7 = smov [#allocation25]   ;;  %s16459_s16 = smov [#allocation28]  }
  0xff   : > { %s1159_s8 = sshll.u32 %s16458_s7, 4  ;;  %s1185_s26 = sshll.u32 %s16459_s16, 4  ;;  %s1160_s8 = int_to_ptr.vmem [resolvable:$true] %s1159_s8  ;;  %s1186_s26 = int_to_ptr.vmem [resolvable:$true] %s1185_s26 }
 0x100   : > { %s15663_s11 = scalar_lea.hbm %s16609_s17, 32 }
 0x101   : > { %p15664_p6 = scmp.ne.s32.totalorder %s16609_s17, %s15663_s11  ;;  %p15670_p3 = scmp.lt.u32.totalorder %s15663_s11, %s16609_s17 }
 0x103   : > { %p15666_p8 = pnand %p15664_p6, %p16729_p7 }
 0x105   : > { %p15667_p2 = pneg %p15666_p8 }
 0x107   : > { %p15672_p9 = pnand %p15670_p3, %p15667_p2 }
 0x109   : > { %15675 = shalt.err (!%p15672_p9)
}
 0x10a   : > { %s15676_s1 = scalar_lea.vmem %s1160_s8, 32  ;;  %p15684_p13 = scmp.lt.s32.totalorder %s1160_s8, %s1160_s8 }
 0x10b   : > { %p15677_p10 = scmp.ne.s32.totalorder %s1160_s8, %s15676_s1  ;;  %p15685_p0 = scmp.lt.s32.totalorder %s15676_s1, %s15676_s1 }
 0x10d   : > { %p15679_p11 = pnand %p15677_p10, %p16729_p7  ;;  %p15686_p1 = por %p15685_p0, %p15684_p13 }
 0x10f   : > { %p15680_p12 = pneg %p15679_p11 }
 0x111   : > { %p15687_p4 = pnand %p15686_p1, %p15680_p12 }
 0x113   : > { %15690 = shalt.err (!%p15687_p4)
}
 0x114   : > { %14390 = dma.hbm_to_vmem [thread:$0]  (!%p16717_p5), %s16609_s17, 32, %s1160_s8, [#allocation26], %s18404_s0, %s18404_s0, %s18403_s2  }
 0x115   : > { %s15691_s28 = scalar_lea.hbm %s16619_s13, 32 }
 0x116   : > { %p15692_p6 = scmp.ne.s32.totalorder %s16619_s13, %s15691_s28  ;;  %p15698_p3 = scmp.lt.u32.totalorder %s15691_s28, %s16619_s13 }
 0x118   : > { %p15694_p8 = pnand %p15692_p6, %p16729_p7 }
 0x11a   : > { %p15695_p2 = pneg %p15694_p8 }
 0x11c   : > { %p15700_p9 = pnand %p15698_p3, %p15695_p2 }
 0x11e   : > { %15703 = shalt.err (!%p15700_p9)
}
 0x11f   : > { %s15704_s7 = scalar_lea.vmem %s1186_s26, 32  ;;  %p15712_p13 = scmp.lt.s32.totalorder %s1186_s26, %s1186_s26 }
 0x120   : > { %p15705_p10 = scmp.ne.s32.totalorder %s1186_s26, %s15704_s7  ;;  %p15713_p0 = scmp.lt.s32.totalorder %s15704_s7, %s15704_s7 }
 0x122   : > { %p15707_p11 = pnand %p15705_p10, %p16729_p7  ;;  %p15714_p1 = por %p15713_p0, %p15712_p13 }
 0x124   : > { %p15708_p12 = pneg %p15707_p11 }
 0x126   : > { %p15715_p4 = pnand %p15714_p1, %p15708_p12 }
 0x128   : > { %15718 = shalt.err (!%p15715_p4)
}
 0x129   : > { %14396 = dma.hbm_to_vmem [thread:$0]  (!%p16717_p5), %s16619_s13, 32, %s1186_s26, [#allocation29], %s18404_s0, %s18404_s0, %s18403_s2  }
 0x12a   : > { %s16460_s8 = smov [#allocation31]   ;;  %s15719_s11 = scalar_lea.hbm %s16629_s24, 64 }
 0x12b   : > { %s1211_s16 = sshll.u32 %s16460_s8, 4  ;;  %p15720_p6 = scmp.ne.s32.totalorder %s16629_s24, %s15719_s11  ;;  %s1212_s16 = int_to_ptr.vmem [resolvable:$true] %s1211_s16 }
 0x12c   : > { %p15726_p3 = scmp.lt.u32.totalorder %s15719_s11, %s16629_s24 }
 0x12d   : > { %p15722_p8 = pnand %p15720_p6, %p16729_p7 }
 0x12f   : > { %p15723_p2 = pneg %p15722_p8 }
 0x131   : > { %p15728_p9 = pnand %p15726_p3, %p15723_p2 }
 0x133   : > { %15731 = shalt.err (!%p15728_p9)
}
 0x134   : > { %s15732_s1 = scalar_lea.vmem %s1212_s16, 64  ;;  %p15740_p13 = scmp.lt.s32.totalorder %s1212_s16, %s1212_s16 }
 0x135   : > { %p15733_p10 = scmp.ne.s32.totalorder %s1212_s16, %s15732_s1  ;;  %p15741_p0 = scmp.lt.s32.totalorder %s15732_s1, %s15732_s1 }
 0x137   : > { %p15735_p11 = pnand %p15733_p10, %p16729_p7  ;;  %p15742_p1 = por %p15741_p0, %p15740_p13 }
 0x139   : > { %p15736_p12 = pneg %p15735_p11 }
 0x13b   : > { %p15743_p4 = pnand %p15742_p1, %p15736_p12 }
 0x13d   : > { %15746 = shalt.err (!%p15743_p4)
}
 0x13e   : > { %s16461_s26 = smov 32   ;;  %s16462_s28 = smov 2  }
 0x13f   : > { %14402 = dma.hbm_to_vmem [thread:$0]  (!%p16717_p5), %s16629_s24, 64, %s1212_s16, [#allocation32], %s16461_s26, %s16461_s26, %s16462_s28  }
 0x140   : > { %s16463_s7 = smov [#allocation34]   ;;  %s16464_s11 = smov [#allocation37]  }
 0x141   : > { %s1237_s8 = sshll.u32 %s16463_s7, 4  ;;  %s1263_s4 = sshll.u32 %s16464_s11, 4  ;;  %s1238_s8 = int_to_ptr.vmem [resolvable:$true] %s1237_s8  ;;  %s16869_s4 = int_to_ptr.vmem [resolvable:$true] %s1263_s4 }
 0x142   : > { %s15747_s1 = scalar_lea.hbm %s16639_s27, 32 }
 0x143   : > { %p15748_p6 = scmp.ne.s32.totalorder %s16639_s27, %s15747_s1  ;;  %p15754_p3 = scmp.lt.u32.totalorder %s15747_s1, %s16639_s27 }
 0x145   : > { %p15750_p8 = pnand %p15748_p6, %p16729_p7 }
 0x147   : > { %p15751_p2 = pneg %p15750_p8 }
 0x149   : > { %p15756_p9 = pnand %p15754_p3, %p15751_p2 }
 0x14b   : > { %15759 = shalt.err (!%p15756_p9)
}
 0x14c   : > { %s15760_s6 = scalar_lea.vmem %s1238_s8, 32  ;;  %p15768_p13 = scmp.lt.s32.totalorder %s1238_s8, %s1238_s8 }
 0x14d   : > { %p15761_p10 = scmp.ne.s32.totalorder %s1238_s8, %s15760_s6  ;;  %p15769_p0 = scmp.lt.s32.totalorder %s15760_s6, %s15760_s6 }
 0x14f   : > { %p15763_p11 = pnand %p15761_p10, %p16729_p7  ;;  %p15770_p1 = por %p15769_p0, %p15768_p13 }
 0x151   : > { %p15764_p12 = pneg %p15763_p11 }
 0x153   : > { %p15771_p4 = pnand %p15770_p1, %p15764_p12 }
 0x155   : > { %15774 = shalt.err (!%p15771_p4)
}
 0x156   : > { %14408 = dma.hbm_to_vmem [thread:$0]  (!%p16717_p5), %s16639_s27, 32, %s1238_s8, [#allocation35], %s18404_s0, %s18404_s0, %s18403_s2  }
 0x157   : > { %s15775_s16 = scalar_lea.hbm %s18393_s12, 32 }
 0x158   : > { %p15776_p6 = scmp.ne.s32.totalorder %s18393_s12, %s15775_s16  ;;  %p15782_p3 = scmp.lt.u32.totalorder %s15775_s16, %s18393_s12 }
 0x15a   : > { %p15778_p8 = pnand %p15776_p6, %p16729_p7 }
 0x15c   : > { %p15779_p2 = pneg %p15778_p8 }
 0x15e   : > { %p15784_p9 = pnand %p15782_p3, %p15779_p2 }
 0x160   : > { %15787 = shalt.err (!%p15784_p9)
}
 0x161   : > { %s15788_s6 = scalar_lea.vmem %s16869_s4, 32  ;;  %p15796_p13 = scmp.lt.s32.totalorder %s16869_s4, %s16869_s4 }
 0x162   : > { %p15789_p10 = scmp.ne.s32.totalorder %s16869_s4, %s15788_s6  ;;  %p15797_p0 = scmp.lt.s32.totalorder %s15788_s6, %s15788_s6 }
 0x164   : > { %p15791_p11 = pnand %p15789_p10, %p16729_p7  ;;  %p15798_p1 = por %p15797_p0, %p15796_p13 }
 0x166   : > { %p15792_p12 = pneg %p15791_p11 }
 0x168   : > { %p15799_p4 = pnand %p15798_p1, %p15792_p12 }
 0x16a   : > { %15802 = shalt.err (!%p15799_p4)
}
 0x16b   : > { %14414 = dma.hbm_to_vmem [thread:$0]  (!%p16717_p5), %s18393_s12, 32, %s16869_s4, [#allocation38], %s18404_s0, %s18404_s0, %s18403_s2  }
 0x16c   : > { %s16465_s26 = smov [#allocation40]   ;;  %s16466_s7 = smov [#allocation43]  }
 0x16d   : > { %s1292_s28 = sshll.u32 %s16465_s26, 4  ;;  %s1318_s8 = sshll.u32 %s16466_s7, 4  ;;  %s1293_s28 = int_to_ptr.vmem [resolvable:$true] %s1292_s28  ;;  %s16902_s8 = int_to_ptr.vmem [resolvable:$true] %s1318_s8 }
 0x16e   : > { %s15803_s11 = scalar_lea.hbm %s18394_s9, 10240 }
 0x16f   : > { %p15804_p6 = scmp.ne.s32.totalorder %s18394_s9, %s15803_s11  ;;  %p15810_p3 = scmp.lt.u32.totalorder %s15803_s11, %s18394_s9 }
 0x171   : > { %p15806_p8 = pnand %p15804_p6, %p16729_p7 }
 0x173   : > { %p15807_p2 = pneg %p15806_p8 }
 0x175   : > { %p15812_p9 = pnand %p15810_p3, %p15807_p2 }
 0x177   : > { %15815 = shalt.err (!%p15812_p9)
}
 0x178   : > { %s15816_s1 = scalar_lea.vmem %s1293_s28, 10240  ;;  %p15824_p13 = scmp.lt.s32.totalorder %s1293_s28, %s1293_s28 }
 0x179   : > { %p15817_p10 = scmp.ne.s32.totalorder %s1293_s28, %s15816_s1  ;;  %p15825_p0 = scmp.lt.s32.totalorder %s15816_s1, %s15816_s1 }
 0x17b   : > { %p15819_p11 = pnand %p15817_p10, %p16729_p7  ;;  %p15826_p1 = por %p15825_p0, %p15824_p13 }
 0x17d   : > { %p15820_p12 = pneg %p15819_p11 }
 0x17f   : > { %p15827_p4 = pnand %p15826_p1, %p15820_p12 }
 0x181   : > { %15830 = shalt.err (!%p15827_p4)
}
 0x182   : > { %s18346_s4 = smov 64   ;;  %s18348_s16 = smov 4  }
 0x183   : > { %14420 = dma.hbm_to_vmem [thread:$0]  (!%p16717_p5), %s18394_s9, 10240, %s1293_s28, [#allocation41], %s18346_s4, %s18346_s4, %s18348_s16  }
 0x184   : > { %s15831_s6 = scalar_lea.hbm %s18395_s5, 32 }
 0x185   : > { %p15832_p6 = scmp.ne.s32.totalorder %s18395_s5, %s15831_s6  ;;  %p15838_p3 = scmp.lt.u32.totalorder %s15831_s6, %s18395_s5 }
 0x187   : > { %p15834_p8 = pnand %p15832_p6, %p16729_p7 }
 0x189   : > { %p15835_p2 = pneg %p15834_p8 }
 0x18b   : > { %p15840_p9 = pnand %p15838_p3, %p15835_p2 }
 0x18d   : > { %15843 = shalt.err (!%p15840_p9)
}
 0x18e   : > { %s15844_s26 = scalar_lea.vmem %s16902_s8, 32  ;;  %p15852_p13 = scmp.lt.s32.totalorder %s16902_s8, %s16902_s8 }
 0x18f   : > { %p15845_p10 = scmp.ne.s32.totalorder %s16902_s8, %s15844_s26  ;;  %p15853_p0 = scmp.lt.s32.totalorder %s15844_s26, %s15844_s26 }
 0x191   : > { %p15847_p11 = pnand %p15845_p10, %p16729_p7  ;;  %p15854_p1 = por %p15853_p0, %p15852_p13 }
 0x193   : > { %p15848_p12 = pneg %p15847_p11 }
 0x195   : > { %p15855_p4 = pnand %p15854_p1, %p15848_p12 }
 0x197   : > { %15858 = shalt.err (!%p15855_p4)
}
 0x198   : > { %14426 = dma.hbm_to_vmem [thread:$0]  (!%p16717_p5), %s18395_s5, 32, %s16902_s8, [#allocation44], %s18404_s0, %s18404_s0, %s18403_s2  }
 0x199   : > { %s16469_s28 = smov [#allocation46]   ;;  %s16470_s11 = smov [#allocation2]  }
 0x19a   : > { %s1344_s7 = sshll.u32 %s16469_s28, 4  ;;  %s958_s1 = sshll.u32 %s16470_s11, 4  ;;  %s1345_s7 = int_to_ptr.vmem [resolvable:$true] %s1344_s7  ;;  %s16935_s1 = int_to_ptr.vmem [resolvable:$true] %s958_s1 }
 0x19b   : > { %s15859_s6 = scalar_lea.hbm %s18396_s3, 1024 }
 0x19c   : > { %p15860_p6 = scmp.ne.s32.totalorder %s18396_s3, %s15859_s6  ;;  %p15866_p3 = scmp.lt.u32.totalorder %s15859_s6, %s18396_s3 }
 0x19e   : > { %p15862_p8 = pnand %p15860_p6, %p16729_p7 }
 0x1a0   : > { %p15863_p2 = pneg %p15862_p8 }
 0x1a2   : > { %p15868_p9 = pnand %p15866_p3, %p15863_p2 }
 0x1a4   : > { %15871 = shalt.err (!%p15868_p9)
}
 0x1a5   : > { %s15872_s26 = scalar_lea.vmem %s1345_s7, 1024  ;;  %p15880_p13 = scmp.lt.s32.totalorder %s1345_s7, %s1345_s7 }
 0x1a6   : > { %p15873_p10 = scmp.ne.s32.totalorder %s1345_s7, %s15872_s26  ;;  %p15881_p0 = scmp.lt.s32.totalorder %s15872_s26, %s15872_s26 }
 0x1a8   : > { %p15875_p11 = pnand %p15873_p10, %p16729_p7  ;;  %p15882_p1 = por %p15881_p0, %p15880_p13 }
 0x1aa   : > { %p15876_p12 = pneg %p15875_p11 }
 0x1ac   : > { %p15883_p4 = pnand %p15882_p1, %p15876_p12 }
 0x1ae   : > { %15886 = shalt.err (!%p15883_p4)
}
 0x1af   : > { %s18407_s8 = sld [smem:[#allocation69_spill]] }
 0x1b0   : > { %14432 = dma.hbm_to_vmem [thread:$0]  (!%p16717_p5), %s18396_s3, 1024, %s1345_s7, [#allocation47], %s18346_s4, %s18346_s4, %s18348_s16  }
 0x1b5   : > { %s15887_s28 = scalar_lea.hbm %s18407_s8, 6144 }
 0x1b6   : > { %p15888_p6 = scmp.ne.s32.totalorder %s18407_s8, %s15887_s28  ;;  %p15894_p3 = scmp.lt.u32.totalorder %s15887_s28, %s18407_s8 }
 0x1b8   : > { %p15890_p8 = pnand %p15888_p6, %p16729_p7 }
 0x1ba   : > { %p15891_p2 = pneg %p15890_p8 }
 0x1bc   : > { %p15896_p9 = pnand %p15894_p3, %p15891_p2 }
 0x1be   : > { %15899 = shalt.err (!%p15896_p9)
}
 0x1bf   : > { %s15900_s11 = scalar_lea.vmem %s16935_s1, 6144  ;;  %p15908_p13 = scmp.lt.s32.totalorder %s16935_s1, %s16935_s1 }
 0x1c0   : > { %p15901_p10 = scmp.ne.s32.totalorder %s16935_s1, %s15900_s11  ;;  %p15909_p0 = scmp.lt.s32.totalorder %s15900_s11, %s15900_s11 }
 0x1c2   : > { %p15903_p11 = pnand %p15901_p10, %p16729_p7  ;;  %p15910_p1 = por %p15909_p0, %p15908_p13 }
 0x1c4   : > { %p15904_p12 = pneg %p15903_p11 }
 0x1c6   : > { %p15911_p4 = pnand %p15910_p1, %p15904_p12 }
 0x1c8   : > { %15914 = shalt.err (!%p15911_p4)
}
 0x1c9   : > { %s18352_s7 = smov 192   ;;  %s18408_s6 = sld [smem:[#allocation71_spill]] }
 0x1ca   : > { %s18353_s26 = smov 12   ;;  %s16473_s28 = smov [#allocation6]  }
 0x1cb   : > { %14345 = dma.hbm_to_vmem [thread:$0]  (!%p16717_p5), %s18407_s8, 6144, %s16935_s1, [#allocation3], %s18352_s7, %s18352_s7, %s18353_s26  }
 0x1cc   : > { %s987_s4 = sshll.u32 %s16473_s28, 4  ;;  %s16474_s11 = smov [#allocation9]   ;;  %s988_s4 = int_to_ptr.vmem [resolvable:$true] %s987_s4 }
 0x1cd   : > { %s1013_s16 = sshll.u32 %s16474_s11, 4  ;;  %s1014_s16 = int_to_ptr.vmem [resolvable:$true] %s1013_s16 }
 0x1cf   : > { %s15915_s3 = scalar_lea.hbm %s18408_s6, 32 }
 0x1d0   : > { %p15916_p6 = scmp.ne.s32.totalorder %s18408_s6, %s15915_s3  ;;  %p15922_p3 = scmp.lt.u32.totalorder %s15915_s3, %s18408_s6 }
 0x1d2   : > { %p15918_p8 = pnand %p15916_p6, %p16729_p7 }
 0x1d4   : > { %p15919_p2 = pneg %p15918_p8 }
 0x1d6   : > { %p15924_p9 = pnand %p15922_p3, %p15919_p2 }
 0x1d8   : > { %15927 = shalt.err (!%p15924_p9)
}
 0x1d9   : > { %s15928_s5 = scalar_lea.vmem %s988_s4, 32  ;;  %p15936_p13 = scmp.lt.s32.totalorder %s988_s4, %s988_s4 }
 0x1da   : > { %p15929_p10 = scmp.ne.s32.totalorder %s988_s4, %s15928_s5  ;;  %p15937_p0 = scmp.lt.s32.totalorder %s15928_s5, %s15928_s5 }
 0x1dc   : > { %p15931_p11 = pnand %p15929_p10, %p16729_p7  ;;  %p15938_p1 = por %p15937_p0, %p15936_p13 }
 0x1de   : > { %p15932_p12 = pneg %p15931_p11 }
 0x1e0   : > { %p15939_p4 = pnand %p15938_p1, %p15932_p12 }
 0x1e2   : > { %15942 = shalt.err (!%p15939_p4)
}
 0x1e3   : > { %s18409_s3 = sld [smem:[#allocation73_spill]] }
 0x1e4   : > { %14351 = dma.hbm_to_vmem [thread:$0]  (!%p16717_p5), %s18408_s6, 32, %s988_s4, [#allocation5], %s18404_s0, %s18404_s0, %s18403_s2  }
 0x1e9   : > { %s15943_s1 = scalar_lea.hbm %s18409_s3, 32 }
 0x1ea   : > { %p15944_p6 = scmp.ne.s32.totalorder %s18409_s3, %s15943_s1  ;;  %p15950_p3 = scmp.lt.u32.totalorder %s15943_s1, %s18409_s3 }
 0x1ec   : > { %p15946_p8 = pnand %p15944_p6, %p16729_p7 }
 0x1ee   : > { %p15947_p2 = pneg %p15946_p8 }
 0x1f0   : > { %p15952_p9 = pnand %p15950_p3, %p15947_p2 }
 0x1f2   : > { %15955 = shalt.err (!%p15952_p9)
}
 0x1f3   : > { %s15956_s5 = scalar_lea.vmem %s1014_s16, 32  ;;  %p15964_p13 = scmp.lt.s32.totalorder %s1014_s16, %s1014_s16 }
 0x1f4   : > { %p15957_p10 = scmp.ne.s32.totalorder %s1014_s16, %s15956_s5  ;;  %p15965_p0 = scmp.lt.s32.totalorder %s15956_s5, %s15956_s5 }
 0x1f6   : > { %p15959_p11 = pnand %p15957_p10, %p16729_p7  ;;  %p15966_p1 = por %p15965_p0, %p15964_p13 }
 0x1f8   : > { %p15960_p12 = pneg %p15959_p11 }
 0x1fa   : > { %p15967_p4 = pnand %p15966_p1, %p15960_p12 }
 0x1fc   : > { %15970 = shalt.err (!%p15967_p4)
}
 0x1fd   : > { %s18410_s4 = sld [smem:[#allocation75_spill]]  ;;  %s16475_s28 = smov [#allocation12]  }
 0x1fe   : > { %14357 = dma.hbm_to_vmem [thread:$0]  (!%p16717_p5), %s18409_s3, 32, %s1014_s16, [#allocation8], %s18404_s0, %s18404_s0, %s18403_s2  }
 0x1ff   : > { %s1042_s11 = sshll.u32 %s16475_s28, 4  ;;  %s16476_s1 = smov [#allocation15]   ;;  %s1043_s11 = int_to_ptr.vmem [resolvable:$true] %s1042_s11 }
 0x200   : > { %s1068_s7 = sshll.u32 %s16476_s1, 4  ;;  %s1069_s7 = int_to_ptr.vmem [resolvable:$true] %s1068_s7 }
 0x203   : > { %s15971_s5 = scalar_lea.hbm %s18410_s4, 10240 }
 0x204   : > { %p15972_p6 = scmp.ne.s32.totalorder %s18410_s4, %s15971_s5  ;;  %p15978_p3 = scmp.lt.u32.totalorder %s15971_s5, %s18410_s4 }
 0x206   : > { %p15974_p8 = pnand %p15972_p6, %p16729_p7 }
 0x208   : > { %p15975_p2 = pneg %p15974_p8 }
 0x20a   : > { %p15980_p9 = pnand %p15978_p3, %p15975_p2 }
 0x20c   : > { %15983 = shalt.err (!%p15980_p9)
}
 0x20d   : > { %s15984_s26 = scalar_lea.vmem %s1043_s11, 10240  ;;  %p15992_p13 = scmp.lt.s32.totalorder %s1043_s11, %s1043_s11 }
 0x20e   : > { %p15985_p10 = scmp.ne.s32.totalorder %s1043_s11, %s15984_s26  ;;  %p15993_p0 = scmp.lt.s32.totalorder %s15984_s26, %s15984_s26 }
 0x210   : > { %p15987_p11 = pnand %p15985_p10, %p16729_p7  ;;  %p15994_p1 = por %p15993_p0, %p15992_p13 }
 0x212   : > { %p15988_p12 = pneg %p15987_p11 }
 0x214   : > { %p15995_p4 = pnand %p15994_p1, %p15988_p12 }
 0x216   : > { %15998 = shalt.err (!%p15995_p4)
}
 0x217   : > { %s18411_s16 = smov 4   ;;  %s18412_s28 = smov 64  }
 0x218   : > { %s18413_s1 = sld [smem:[#allocation77_spill]] }
 0x219   : > { %14363 = dma.hbm_to_vmem [thread:$0]  (!%p16717_p5), %s18410_s4, 10240, %s1043_s11, [#allocation11], %s18412_s28, %s18412_s28, %s18411_s16  }
 0x21e   : > { %s15999_s5 = scalar_lea.hbm %s18413_s1, 32 }
 0x21f   : > { %p16000_p6 = scmp.ne.s32.totalorder %s18413_s1, %s15999_s5  ;;  %p16006_p3 = scmp.lt.u32.totalorder %s15999_s5, %s18413_s1 }
 0x221   : > { %p16002_p8 = pnand %p16000_p6, %p16729_p7 }
 0x223   : > { %p16003_p2 = pneg %p16002_p8 }
 0x225   : > { %p16008_p9 = pnand %p16006_p3, %p16003_p2 }
 0x227   : > { %16011 = shalt.err (!%p16008_p9)
}
 0x228   : > { %s16012_s26 = scalar_lea.vmem %s1069_s7, 32  ;;  %p16020_p13 = scmp.lt.s32.totalorder %s1069_s7, %s1069_s7 }
 0x229   : > { %p16013_p10 = scmp.ne.s32.totalorder %s1069_s7, %s16012_s26  ;;  %p16021_p0 = scmp.lt.s32.totalorder %s16012_s26, %s16012_s26 }
 0x22b   : > { %p16015_p11 = pnand %p16013_p10, %p16729_p7  ;;  %p16022_p1 = por %p16021_p0, %p16020_p13 }
 0x22d   : > { %p16016_p12 = pneg %p16015_p11 }
 0x22f   : > { %p16023_p4 = pnand %p16022_p1, %p16016_p12 }
 0x231   : > { %16026 = shalt.err (!%p16023_p4)
}
 0x232   : > { %s18414_s11 = sld [smem:[#allocation78_spill]]  ;;  %s16477_s5 = smov [#allocation18]  }
 0x233   : > { %14369 = dma.hbm_to_vmem [thread:$0]  (!%p16717_p5), %s18413_s1, 32, %s1069_s7, [#allocation14], %s18404_s0, %s18404_s0, %s18403_s2  }
 0x234   : > { %s1094_s3 = sshll.u32 %s16477_s5, 4  ;;  %s16478_s4 = smov [#allocation21]   ;;  %s1095_s3 = int_to_ptr.vmem [resolvable:$true] %s1094_s3 }
 0x235   : > { %s1120_s6 = sshll.u32 %s16478_s4, 4  ;;  %s1121_s6 = int_to_ptr.vmem [resolvable:$true] %s1120_s6 }
 0x238   : > { %s16027_s26 = scalar_lea.hbm %s18414_s11, 6144 }
 0x239   : > { %p16028_p6 = scmp.ne.s32.totalorder %s18414_s11, %s16027_s26  ;;  %p16034_p3 = scmp.lt.u32.totalorder %s16027_s26, %s18414_s11 }
 0x23b   : > { %p16030_p8 = pnand %p16028_p6, %p16729_p7 }
 0x23d   : > { %p16031_p2 = pneg %p16030_p8 }
 0x23f   : > { %p16036_p9 = pnand %p16034_p3, %p16031_p2 }
 0x241   : > { %16039 = shalt.err (!%p16036_p9)
}
 0x242   : > { %s16040_s8 = scalar_lea.vmem %s1095_s3, 6144  ;;  %p16048_p13 = scmp.lt.s32.totalorder %s1095_s3, %s1095_s3 }
 0x243   : > { %p16041_p10 = scmp.ne.s32.totalorder %s1095_s3, %s16040_s8  ;;  %p16049_p0 = scmp.lt.s32.totalorder %s16040_s8, %s16040_s8 }
 0x245   : > { %p16043_p11 = pnand %p16041_p10, %p16729_p7  ;;  %p16050_p1 = por %p16049_p0, %p16048_p13 }
 0x247   : > { %p16044_p12 = pneg %p16043_p11 }
 0x249   : > { %p16051_p4 = pnand %p16050_p1, %p16044_p12 }
 0x24b   : > { %16054 = shalt.err (!%p16051_p4)
}
 0x24c   : > { %s18415_s7 = smov 12   ;;  %s18416_s4 = smov 192  }
 0x24d   : > { %s18417_s5 = sld [smem:[#allocation80_spill]] }
 0x24e   : > { %14375 = dma.hbm_to_vmem [thread:$0]  (!%p16717_p5), %s18414_s11, 6144, %s1095_s3, [#allocation17], %s18416_s4, %s18416_s4, %s18415_s7  }
 0x253   : > { %s16055_s26 = scalar_lea.hbm %s18417_s5, 2048 }
 0x254   : > { %p16056_p6 = scmp.ne.s32.totalorder %s18417_s5, %s16055_s26  ;;  %p16062_p3 = scmp.lt.u32.totalorder %s16055_s26, %s18417_s5 }
 0x256   : > { %p16058_p8 = pnand %p16056_p6, %p16729_p7 }
 0x258   : > { %p16059_p2 = pneg %p16058_p8 }
 0x25a   : > { %p16064_p9 = pnand %p16062_p3, %p16059_p2 }
 0x25c   : > { %16067 = shalt.err (!%p16064_p9)
}
 0x25d   : > { %s16068_s8 = scalar_lea.vmem %s1121_s6, 2048  ;;  %p16076_p13 = scmp.lt.s32.totalorder %s1121_s6, %s1121_s6 }
 0x25e   : > { %p16069_p10 = scmp.ne.s32.totalorder %s1121_s6, %s16068_s8  ;;  %p16077_p0 = scmp.lt.s32.totalorder %s16068_s8, %s16068_s8 }
 0x260   : > { %p16071_p11 = pnand %p16069_p10, %p16729_p7  ;;  %p16078_p1 = por %p16077_p0, %p16076_p13 }
 0x262   : > { %p16072_p12 = pneg %p16071_p11 }
 0x264   : > { %p16079_p4 = pnand %p16078_p1, %p16072_p12 }
 0x266   : > { %16082 = shalt.err (!%p16079_p4)
}
 0x267   : > { %s18418_s3 = sld [smem:[#allocation81_spill]]  ;;  %s16479_s7 = smov [#allocation24]  }
 0x268   : > { %14381 = dma.hbm_to_vmem [thread:$0]  (!%p16717_p5), %s18417_s5, 2048, %s1121_s6, [#allocation20], %s18412_s28, %s18412_s28, %s18411_s16  }
 0x269   : > { %s1146_s4 = sshll.u32 %s16479_s7, 4  ;;  %s16480_s26 = smov [#allocation27]   ;;  %s1147_s4 = int_to_ptr.vmem [resolvable:$true] %s1146_s4 }
 0x26a   : > { %s1172_s1 = sshll.u32 %s16480_s26, 4  ;;  %s1173_s1 = int_to_ptr.vmem [resolvable:$true] %s1172_s1 }
 0x26d   : > { %s16083_s8 = scalar_lea.hbm %s18418_s3, 32 }
 0x26e   : > { %p16084_p6 = scmp.ne.s32.totalorder %s18418_s3, %s16083_s8  ;;  %p16090_p3 = scmp.lt.u32.totalorder %s16083_s8, %s18418_s3 }
 0x270   : > { %p16086_p8 = pnand %p16084_p6, %p16729_p7 }
 0x272   : > { %p16087_p2 = pneg %p16086_p8 }
 0x274   : > { %p16092_p9 = pnand %p16090_p3, %p16087_p2 }
 0x276   : > { %16095 = shalt.err (!%p16092_p9)
}
 0x277   : > { %s16096_s9 = scalar_lea.vmem %s1147_s4, 32  ;;  %p16104_p13 = scmp.lt.s32.totalorder %s1147_s4, %s1147_s4 }
 0x278   : > { %p16097_p10 = scmp.ne.s32.totalorder %s1147_s4, %s16096_s9  ;;  %p16105_p0 = scmp.lt.s32.totalorder %s16096_s9, %s16096_s9 }
 0x27a   : > { %p16099_p11 = pnand %p16097_p10, %p16729_p7  ;;  %p16106_p1 = por %p16105_p0, %p16104_p13 }
 0x27c   : > { %p16100_p12 = pneg %p16099_p11 }
 0x27e   : > { %p16107_p4 = pnand %p16106_p1, %p16100_p12 }
 0x280   : > { %16110 = shalt.err (!%p16107_p4)
}
 0x281   : > { %s18419_s6 = sld [smem:[#allocation82_spill]] }
 0x282   : > { %14387 = dma.hbm_to_vmem [thread:$0]  (!%p16717_p5), %s18418_s3, 32, %s1147_s4, [#allocation23], %s18404_s0, %s18404_s0, %s18403_s2  }
 0x287   : > { %s16111_s7 = scalar_lea.hbm %s18419_s6, 2048 }
 0x288   : > { %p16112_p6 = scmp.ne.s32.totalorder %s18419_s6, %s16111_s7  ;;  %p16118_p3 = scmp.lt.u32.totalorder %s16111_s7, %s18419_s6 }
 0x28a   : > { %p16114_p8 = pnand %p16112_p6, %p16729_p7 }
 0x28c   : > { %p16115_p2 = pneg %p16114_p8 }
 0x28e   : > { %p16120_p9 = pnand %p16118_p3, %p16115_p2 }
 0x290   : > { %16123 = shalt.err (!%p16120_p9)
}
 0x291   : > { %s16124_s9 = scalar_lea.vmem %s1173_s1, 2048  ;;  %p16132_p13 = scmp.lt.s32.totalorder %s1173_s1, %s1173_s1 }
 0x292   : > { %p16125_p10 = scmp.ne.s32.totalorder %s1173_s1, %s16124_s9  ;;  %p16133_p0 = scmp.lt.s32.totalorder %s16124_s9, %s16124_s9 }
 0x294   : > { %p16127_p11 = pnand %p16125_p10, %p16729_p7  ;;  %p16134_p1 = por %p16133_p0, %p16132_p13 }
 0x296   : > { %p16128_p12 = pneg %p16127_p11 }
 0x298   : > { %p16135_p4 = pnand %p16134_p1, %p16128_p12 }
 0x29a   : > { %16138 = shalt.err (!%p16135_p4)
}
 0x29b   : > { %s18420_s4 = sld [smem:[#allocation83_spill]]  ;;  %s16481_s26 = smov [#allocation30]  }
 0x29c   : > { %14393 = dma.hbm_to_vmem [thread:$0]  (!%p16717_p5), %s18419_s6, 2048, %s1173_s1, [#allocation26], %s18412_s28, %s18412_s28, %s18411_s16  }
 0x29d   : > { %s1198_s8 = sshll.u32 %s16481_s26, 4  ;;  %s1199_s8 = int_to_ptr.vmem [resolvable:$true] %s1198_s8 }
 0x2a1   : > { %s16139_s7 = scalar_lea.hbm %s18420_s4, 4096 }
 0x2a2   : > { %p16140_p6 = scmp.ne.s32.totalorder %s18420_s4, %s16139_s7  ;;  %p16146_p3 = scmp.lt.u32.totalorder %s16139_s7, %s18420_s4 }
 0x2a4   : > { %p16142_p8 = pnand %p16140_p6, %p16729_p7 }
 0x2a6   : > { %p16143_p2 = pneg %p16142_p8 }
 0x2a8   : > { %p16148_p9 = pnand %p16146_p3, %p16143_p2 }
 0x2aa   : > { %16151 = shalt.err (!%p16148_p9)
}
 0x2ab   : > { %s16152_s9 = scalar_lea.vmem %s1199_s8, 4096  ;;  %p16160_p13 = scmp.lt.s32.totalorder %s1199_s8, %s1199_s8 }
 0x2ac   : > { %p16153_p10 = scmp.ne.s32.totalorder %s1199_s8, %s16152_s9  ;;  %p16161_p0 = scmp.lt.s32.totalorder %s16152_s9, %s16152_s9 }
 0x2ae   : > { %p16155_p11 = pnand %p16153_p10, %p16729_p7  ;;  %p16162_p1 = por %p16161_p0, %p16160_p13 }
 0x2b0   : > { %p16156_p12 = pneg %p16155_p11 }
 0x2b2   : > { %p16163_p4 = pnand %p16162_p1, %p16156_p12 }
 0x2b4   : > { %16166 = shalt.err (!%p16163_p4)
}
 0x2b5   : > { %s16482_s1 = smov 128   ;;  %s18421_s26 = sld [smem:[#allocation84_spill]] }
 0x2b6   : > { %s16483_s7 = smov 8   ;;  %s16484_s3 = smov [#allocation33]  }
 0x2b7   : > { %14399 = dma.hbm_to_vmem [thread:$0]  (!%p16717_p5), %s18420_s4, 4096, %s1199_s8, [#allocation29], %s16482_s1, %s16482_s1, %s16483_s7  }
 0x2b8   : > { %s1224_s5 = sshll.u32 %s16484_s3, 4  ;;  %s16485_s6 = smov [#allocation36]   ;;  %s1225_s5 = int_to_ptr.vmem [resolvable:$true] %s1224_s5 }
 0x2b9   : > { %s1250_s11 = sshll.u32 %s16485_s6, 4  ;;  %s17082_s11 = int_to_ptr.vmem [resolvable:$true] %s1250_s11 }
 0x2bb   : > { %s16167_s9 = scalar_lea.hbm %s18421_s26, 2048 }
 0x2bc   : > { %p16168_p6 = scmp.ne.s32.totalorder %s18421_s26, %s16167_s9  ;;  %p16174_p3 = scmp.lt.u32.totalorder %s16167_s9, %s18421_s26 }
 0x2be   : > { %p16170_p8 = pnand %p16168_p6, %p16729_p7 }
 0x2c0   : > { %p16171_p2 = pneg %p16170_p8 }
 0x2c2   : > { %p16176_p9 = pnand %p16174_p3, %p16171_p2 }
 0x2c4   : > { %16179 = shalt.err (!%p16176_p9)
}
 0x2c5   : > { %s16180_s12 = scalar_lea.vmem %s1225_s5, 2048  ;;  %p16188_p13 = scmp.lt.s32.totalorder %s1225_s5, %s1225_s5 }
 0x2c6   : > { %p16181_p10 = scmp.ne.s32.totalorder %s1225_s5, %s16180_s12  ;;  %p16189_p0 = scmp.lt.s32.totalorder %s16180_s12, %s16180_s12 }
 0x2c8   : > { %p16183_p11 = pnand %p16181_p10, %p16729_p7  ;;  %p16190_p1 = por %p16189_p0, %p16188_p13 }
 0x2ca   : > { %p16184_p12 = pneg %p16183_p11 }
 0x2cc   : > { %p16191_p4 = pnand %p16190_p1, %p16184_p12 }
 0x2ce   : > { %16194 = shalt.err (!%p16191_p4)
}
 0x2cf   : > { %s18422_s3 = sld [smem:[#allocation85_spill]] }
 0x2d0   : > { %14405 = dma.hbm_to_vmem [thread:$0]  (!%p16717_p5), %s18421_s26, 2048, %s1225_s5, [#allocation32], %s18412_s28, %s18412_s28, %s18411_s16  }
 0x2d5   : > { %s16195_s6 = scalar_lea.hbm %s18422_s3, 32 }
 0x2d6   : > { %p16196_p6 = scmp.ne.s32.totalorder %s18422_s3, %s16195_s6  ;;  %p16202_p3 = scmp.lt.u32.totalorder %s16195_s6, %s18422_s3 }
 0x2d8   : > { %p16198_p8 = pnand %p16196_p6, %p16729_p7 }
 0x2da   : > { %p16199_p2 = pneg %p16198_p8 }
 0x2dc   : > { %p16204_p9 = pnand %p16202_p3, %p16199_p2 }
 0x2de   : > { %16207 = shalt.err (!%p16204_p9)
}
 0x2df   : > { %s16208_s12 = scalar_lea.vmem %s17082_s11, 32  ;;  %p16216_p13 = scmp.lt.s32.totalorder %s17082_s11, %s17082_s11 }
 0x2e0   : > { %p16209_p10 = scmp.ne.s32.totalorder %s17082_s11, %s16208_s12  ;;  %p16217_p0 = scmp.lt.s32.totalorder %s16208_s12, %s16208_s12 }
 0x2e2   : > { %p16211_p11 = pnand %p16209_p10, %p16729_p7  ;;  %p16218_p1 = por %p16217_p0, %p16216_p13 }
 0x2e4   : > { %p16212_p12 = pneg %p16211_p11 }
 0x2e6   : > { %p16219_p4 = pnand %p16218_p1, %p16212_p12 }
 0x2e8   : > { %16222 = shalt.err (!%p16219_p4)
}
 0x2e9   : > { %s18423_s16 = sld [smem:[#allocation87_spill]]  ;;  %s16486_s28 = smov [#allocation39]  }
 0x2ea   : > { %14411 = dma.hbm_to_vmem [thread:$0]  (!%p16717_p5), %s18422_s3, 32, %s17082_s11, [#allocation35], %s18404_s0, %s18404_s0, %s18403_s2  }
 0x2eb   : > { %s1276_s5 = sshll.u32 %s16486_s28, 4  ;;  %s16487_s8 = smov [#allocation42]   ;;  %s1277_s5 = int_to_ptr.vmem [resolvable:$true] %s1276_s5 }
 0x2ec   : > { %s1305_s1 = sshll.u32 %s16487_s8, 4  ;;  %s17115_s1 = int_to_ptr.vmem [resolvable:$true] %s1305_s1 }
 0x2ef   : > { %s16223_s7 = scalar_lea.hbm %s18423_s16, 10240 }
 0x2f0   : > { %p16224_p6 = scmp.ne.s32.totalorder %s18423_s16, %s16223_s7  ;;  %p16230_p3 = scmp.lt.u32.totalorder %s16223_s7, %s18423_s16 }
 0x2f2   : > { %p16226_p8 = pnand %p16224_p6, %p16729_p7 }
 0x2f4   : > { %p16227_p2 = pneg %p16226_p8 }
 0x2f6   : > { %p16232_p9 = pnand %p16230_p3, %p16227_p2 }
 0x2f8   : > { %16235 = shalt.err (!%p16232_p9)
}
 0x2f9   : > { %s16236_s9 = scalar_lea.vmem %s1277_s5, 10240  ;;  %p16244_p13 = scmp.lt.s32.totalorder %s1277_s5, %s1277_s5 }
 0x2fa   : > { %p16237_p10 = scmp.ne.s32.totalorder %s1277_s5, %s16236_s9  ;;  %p16245_p0 = scmp.lt.s32.totalorder %s16236_s9, %s16236_s9 }
 0x2fc   : > { %p16239_p11 = pnand %p16237_p10, %p16729_p7  ;;  %p16246_p1 = por %p16245_p0, %p16244_p13 }
 0x2fe   : > { %p16240_p12 = pneg %p16239_p11 }
 0x300   : > { %p16247_p4 = pnand %p16246_p1, %p16240_p12 }
 0x302   : > { %16250 = shalt.err (!%p16247_p4)
}
 0x303   : > { %s18424_s11 = smov 20   ;;  %s18425_s6 = smov 320  }
 0x304   : > { %s18426_s12 = sld [smem:[#allocation90_spill]] }
 0x305   : > { %14417 = dma.hbm_to_vmem [thread:$0]  (!%p16717_p5), %s18423_s16, 10240, %s1277_s5, [#allocation38], %s18425_s6, %s18425_s6, %s18424_s11  }
 0x30a   : > { %s16251_s28 = scalar_lea.hbm %s18426_s12, 32 }
 0x30b   : > { %p16252_p6 = scmp.ne.s32.totalorder %s18426_s12, %s16251_s28  ;;  %p16258_p3 = scmp.lt.u32.totalorder %s16251_s28, %s18426_s12 }
 0x30d   : > { %p16254_p8 = pnand %p16252_p6, %p16729_p7 }
 0x30f   : > { %p16255_p2 = pneg %p16254_p8 }
 0x311   : > { %p16260_p9 = pnand %p16258_p3, %p16255_p2 }
 0x313   : > { %16263 = shalt.err (!%p16260_p9)
}
 0x314   : > { %s16264_s8 = scalar_lea.vmem %s17115_s1, 32  ;;  %p16272_p13 = scmp.lt.s32.totalorder %s17115_s1, %s17115_s1 }
 0x315   : > { %p16265_p10 = scmp.ne.s32.totalorder %s17115_s1, %s16264_s8  ;;  %p16273_p0 = scmp.lt.s32.totalorder %s16264_s8, %s16264_s8 }
 0x317   : > { %p16267_p11 = pnand %p16265_p10, %p16729_p7  ;;  %p16274_p1 = por %p16273_p0, %p16272_p13 }
 0x319   : > { %p16268_p12 = pneg %p16267_p11 }
 0x31b   : > { %p16275_p4 = pnand %p16274_p1, %p16268_p12 }
 0x31d   : > { %16278 = shalt.err (!%p16275_p4)
}
 0x31e   : > { %14423 = dma.hbm_to_vmem [thread:$0]  (!%p16717_p5), %s18426_s12, 32, %s17115_s1, [#allocation41], %s18404_s0, %s18404_s0, %s18403_s2  }
 0x31f   : > { %s16488_s5 = smov [#allocation45]   ;;  %s16489_s9 = smov [#allocation48]  }
 0x320   : > { %s1331_s7 = sshll.u32 %s16488_s5, 4  ;;  %s1358_s11 = sshll.u32 %s16489_s9, 4  ;;  %s1332_s7 = int_to_ptr.vmem [resolvable:$true] %s1331_s7  ;;  %s17148_s11 = int_to_ptr.vmem [resolvable:$true] %s1358_s11 }
 0x321   : > { %s16279_s6 = scalar_lea.hbm %s16679_s30, 32 }
 0x322   : > { %p16280_p6 = scmp.ne.s32.totalorder %s16679_s30, %s16279_s6  ;;  %p16286_p3 = scmp.lt.u32.totalorder %s16279_s6, %s16679_s30 }
 0x324   : > { %p16282_p8 = pnand %p16280_p6, %p16729_p7 }
 0x326   : > { %p16283_p2 = pneg %p16282_p8 }
 0x328   : > { %p16288_p9 = pnand %p16286_p3, %p16283_p2 }
 0x32a   : > { %16291 = shalt.err (!%p16288_p9)
}
 0x32b   : > { %s16292_s28 = scalar_lea.vmem %s1332_s7, 32  ;;  %p16300_p13 = scmp.lt.s32.totalorder %s1332_s7, %s1332_s7 }
 0x32c   : > { %p16293_p10 = scmp.ne.s32.totalorder %s1332_s7, %s16292_s28  ;;  %p16301_p0 = scmp.lt.s32.totalorder %s16292_s28, %s16292_s28 }
 0x32e   : > { %p16295_p11 = pnand %p16293_p10, %p16729_p7  ;;  %p16302_p1 = por %p16301_p0, %p16300_p13 }
 0x330   : > { %p16296_p12 = pneg %p16295_p11 }
 0x332   : > { %p16303_p4 = pnand %p16302_p1, %p16296_p12 }
 0x334   : > { %16306 = shalt.err (!%p16303_p4)
}
 0x335   : > { %14429 = dma.hbm_to_vmem [thread:$0]  (!%p16717_p5), %s16679_s30, 32, %s1332_s7, [#allocation44], %s18404_s0, %s18404_s0, %s18403_s2  }
 0x336   : > { %s16307_s1 = scalar_lea.hbm %s16689_s14, 16 }
 0x337   : > { %p16308_p6 = scmp.ne.s32.totalorder %s16689_s14, %s16307_s1  ;;  %p16314_p3 = scmp.lt.u32.totalorder %s16307_s1, %s16689_s14 }
 0x339   : > { %p16310_p8 = pnand %p16308_p6, %p16729_p7 }
 0x33b   : > { %p16311_p2 = pneg %p16310_p8 }
 0x33d   : > { %p16316_p9 = pnand %p16314_p3, %p16311_p2 }
 0x33f   : > { %16319 = shalt.err (!%p16316_p9)
}
 0x340   : > { %s16320_s8 = scalar_lea.vmem %s17148_s11, 16  ;;  %s16327_s5 = scalar_lea.vmem %s17148_s11, 32 }
 0x341   : > { %p16321_p10 = scmp.ne.s32.totalorder %s17148_s11, %s16320_s8  ;;  %p16328_p13 = scmp.lt.s32.totalorder %s17148_s11, %s17148_s11 }
 0x342   : > { %p16329_p0 = scmp.lt.s32.totalorder %s16327_s5, %s16320_s8 }
 0x343   : > { %p16323_p11 = pnand %p16321_p10, %p16729_p7 }
 0x344   : > { %p16330_p1 = por %p16329_p0, %p16328_p13 }
 0x345   : > { %p16324_p12 = pneg %p16323_p11 }
 0x347   : > { %p16331_p4 = pnand %p16330_p1, %p16324_p12 }
 0x349   : > { %16334 = shalt.err (!%p16331_p4)
}
 0x34a   : > { %14435 = dma.hbm_to_vmem [thread:$0]  (!%p16717_p5), %s16689_s14, 16, %s17148_s11, [#allocation47]  }
 0x34b   : > { %p18427_p6 = scmp.ne.s32.totalorder %s18400_s22, 0 }
 0x34c   : > { %p18428_p8 = scmp.eq.s32.totalorder (!%p18427_p6), %s16702_s18, 0 }
 0x34d   : > { %1379 = sbr.rel (%p18427_p6) target bundleno = 21925 (0x55a5), region = 172 }
 0x354   : > { %16340 = dma.done.wait (%p18428_p8), [#allocation3], 6144   ;;  %p18429_p7 = pmov %p18428_p8 }
 0x356   : > { %16342 = vsyncadd (%p18429_p7), [#allocation3], 4294961152  ;;  %p18430_p2 = pmov %p18429_p7 }
 0x358   : > { %16344 = dma.done.wait (%p18430_p2), [#allocation5], 128   ;;  %p18431_p3 = pmov %p18430_p2 }
 0x359   : > { %p18432_p9 = pmov %p18430_p2 }
 0x35a   : > { %16346 = vsyncadd (%p18431_p3), [#allocation5], 4294967168 }
 0x35b   : > { %16348 = dma.done.wait (%p18432_p9), [#allocation8], 64   ;;  %p18433_p5 = pmov %p18430_p2 }
 0x35c   : > { %p18434_p10 = pmov %p18430_p2 }
 0x35d   : > { %16350 = vsyncadd (%p18433_p5), [#allocation8], 4294967232 }
 0x35e   : > { %16352 = dma.done.wait (%p18434_p10), [#allocation11], 20480   ;;  %p18435_p11 = pmov %p18430_p2 }
 0x35f   : > { %p18436_p12 = pmov %p18430_p2 }
 0x360   : > { %16354 = vsyncadd (%p18435_p11), [#allocation11], 4294946816 }
 0x361   : > { %16356 = dma.done.wait (%p18436_p12), [#allocation14], 64   ;;  %p18437_p13 = pmov %p18430_p2 }
 0x362   : > { %p18438_p0 = pmov %p18430_p2 }
 0x363   : > { %16358 = vsyncadd (%p18437_p13), [#allocation14], 4294967232 }
 0x364   : > { %16360 = dma.done.wait (%p18438_p0), [#allocation17], 6176   ;;  %p18439_p1 = pmov %p18438_p0 }
 0x365   : > { %p18440_p4 = pmov %p18438_p0 }
 0x366   : > { %16362 = vsyncadd (%p18439_p1), [#allocation17], 4294961120 }
 0x367   : > { %16364 = dma.done.wait (%p18440_p4), [#allocation20], 2144   ;;  %p18441_p6 = pmov %p18438_p0 }
 0x368   : > { %p18442_p8 = pmov %p18438_p0 }
 0x369   : > { %16366 = vsyncadd (%p18441_p6), [#allocation20], 4294965152 }
 0x36a   : > { %16368 = dma.done.wait (%p18442_p8), [#allocation23], 64   ;;  %p18443_p7 = pmov %p18438_p0 }
 0x36b   : > { %p18444_p2 = pmov %p18438_p0 }
 0x36c   : > { %16370 = vsyncadd (%p18443_p7), [#allocation23], 4294967232 }
 0x36d   : > { %16372 = dma.done.wait (%p18444_p2), [#allocation26], 2080   ;;  %p18445_p3 = pmov %p18438_p0 }
 0x36e   : > { %p18446_p9 = pmov %p18438_p0 }
 0x36f   : > { %16374 = vsyncadd (%p18445_p3), [#allocation26], 4294965216 }
 0x370   : > { %16376 = dma.done.wait (%p18446_p9), [#allocation29], 4128   ;;  %p18447_p5 = pmov %p18438_p0 }
 0x371   : > { %p18448_p10 = pmov %p18438_p0 }
 0x372   : > { %16378 = vsyncadd (%p18447_p5), [#allocation29], 4294963168 }
 0x373   : > { %16380 = dma.done.wait (%p18448_p10), [#allocation32], 2112   ;;  %p18449_p11 = pmov %p18438_p0 }
 0x374   : > { %p18450_p12 = pmov %p18438_p0 }
 0x375   : > { %16382 = vsyncadd (%p18449_p11), [#allocation32], 4294965184 }
 0x376   : > { %16384 = dma.done.wait (%p18450_p12), [#allocation35], 64   ;;  %p18451_p13 = pmov %p18438_p0 }
 0x378   : > { %16386 = vsyncadd (%p18451_p13), [#allocation35], 4294967232 }
 0x379   : > { %16388 = dma.done.wait (%p18438_p0), [#allocation38], 10272   ;;  %p18452_p1 = pmov %p18438_p0 }
 0x37a   : > { %p18453_p4 = pmov %p18438_p0 }
 0x37b   : > { %16390 = vsyncadd (%p18452_p1), [#allocation38], 4294957024 }
 0x37c   : > { %16392 = dma.done.wait (%p18453_p4), [#allocation41], 10272   ;;  %p18454_p6 = pmov %p18438_p0 }
 0x37d   : > { %p18455_p8 = pmov %p18438_p0 }
 0x37e   : > { %16394 = vsyncadd (%p18454_p6), [#allocation41], 4294957024 }
 0x37f   : > { %16396 = dma.done.wait (%p18455_p8), [#allocation44], 64   ;;  %p18456_p7 = pmov %p18438_p0 }
 0x380   : > { %p18457_p2 = pmov %p18438_p0 }
 0x381   : > { %16398 = vsyncadd (%p18456_p7), [#allocation44], 4294967232 }
 0x382   : > { %16400 = dma.done.wait (%p18457_p2), [#allocation47], 1040   ;;  %p18458_p3 = pmov %p18438_p0 }
 0x383   : > { %s18459_s22 = sld [smem:[#allocation67_spill]]  ;;  %v16490_v0 = vmov 0.0   ;;  %vm16491_vm0 = vmmov 0   ;;  %v14603_v4 = vld [vmem:[#allocation2 + $0x4] ss:$12 sps:$4 sm:$0xff]   ;;  %p1593_p9 = scmp.lt.s32.totalorder %s16702_s18, 1  ;;  %v1758_v49 = vlaneseq }
 0x384   : > { %16402 = vsyncadd (%p18458_p3), [#allocation47], 4294966256  ;;  %13418 = vmatprep.subr.bf16.mxu0 %v16490_v0  ;;  %13434 = vmatprep.mubr.msk.bf16.mxu0 %vm16491_vm0, %v16490_v0  ;;  %v14605_v5 = vld [vmem:[#allocation2] ss:$12 sps:$4 sm:$0xff]   ;;  %v14607_v7 = vld [vmem:[#allocation2 + $0x1c] ss:$12 sps:$4 sm:$0xff]  }
 0x385   : > { %1901 = vmatprep.subr.bf16.mxu1 %v14603_v4  ;;  %v14609_v8 = vld [vmem:[#allocation2 + $0x18] ss:$12 sps:$4 sm:$0xff]   ;;  %s18460_s23 = sld [smem:[#allocation65_spill]]  ;;  %s18467_s18 = smov (!%p1593_p9, %s16702_s18), 1  ;;  %v14611_v10 = vld [vmem:[#allocation2 + $0x34] ss:$12 sps:$4 sm:$0xff]  }
 0x386   : > { %1902 = vmatpush1.bf16.msra.mxu1 %v14605_v5  ;;  %v14613_v11 = vld [vmem:[#allocation2 + $0x30] ss:$12 sps:$4 sm:$0xff]   ;;  %v14615_v12 = vld [vmem:[#allocation2 + $0x4c] ss:$12 sps:$4 sm:$0xff]   ;;  %s12928_s10 = sshll.u32 %s18467_s18, 4  ;;  %s18461_s0 = sld [smem:[#allocation68_spill]] }
 0x387   : > { %1903 = vmatprep.subr.bf16.mxu1 %v14607_v7  ;;  %v14617_v14 = vld [vmem:[#allocation2 + $0x48] ss:$12 sps:$4 sm:$0xff]   ;;  %v14619_v15 = vld [vmem:[#allocation2 + $0x64] ss:$12 sps:$4 sm:$0xff]   ;;  %v14621_v17 = vld [vmem:[#allocation2 + $0x60] ss:$12 sps:$4 sm:$0xff]   ;;  %s1602_s5 = scalar_lea.vmem %s16694_s21, %s12928_s10 }
 0x388   : > { %v14623_v18 = vld [vmem:[#allocation2 + $0x7c] ss:$12 sps:$4 sm:$0xff]   ;;  %v14625_v22 = vld [vmem:[#allocation2 + $0x78] ss:$12 sps:$4 sm:$0xff]   ;;  %v14610_v25 = vld [vmem:[#allocation2 + $0x20] ss:$12 sps:$4 sm:$0xff]  }
 0x389   : > { %v14595_v1 = vld [vmem:[%s18459_s22] sm:$0xff]   ;;  %v14596_v2 = vld [vmem:[%s18459_s22 + $0x8] sm:$0xff]   ;;  %v14597_v3 = vld [vmem:[%s18459_s22 + $0x10] sm:$0xff]   ;;  %s18462_s7 = sld [smem:[#allocation66_spill]]  ;;  %v16492_v36 = vmov 0   ;;  %v17301_v50 = vshrl.u32 %v1758_v49, 7 }
 0x38a   : > { %13419 = vmatpush3.bf16.msra.mxu0 %v14595_v1  ;;  %v14598_v6 = vld [vmem:[%s18459_s22 + $0x18] sm:$0xff]   ;;  %v14599_v9 = vld [vmem:[%s18459_s22 + $0x20] sm:$0xff]   ;;  %1904 = vmatpush1.bf16.msra.mxu1 %v14609_v8  ;;  %v14600_v13 = vld [vmem:[%s18459_s22 + $0x28] sm:$0xff]   ;;  %vm2004_vm1 = vcmask 261120   ;;  %vm2052_vm2 = vcmask 130048   ;;  %s16493_s9 = smov 96  }
 0x38b   : > { %13420 = vmatprep.subr.bf16.mxu0 %v16490_v0  ;;  %1905 = vmatprep.subr.bf16.mxu1 %v14611_v10  ;;  %s1597_s2 = scalar_lea.vmem %s18460_s23, %s12928_s10  ;;  %v14601_v16 = vld [vmem:[%s18459_s22 + $0x30] sm:$0xff]   ;;  %v14602_v19 = vld [vmem:[%s18459_s22 + $0x38] sm:$0xff]   ;;  %v14626_v29 = vld [vmem:[#allocation2 + $0x80] ss:$12 sps:$4 sm:$0xff]   ;;  %v17304_v51 = vsub.s32 0, %v17301_v50  ;;  %v17307_v52 = vsub.s32 2, %v17301_v50 }
 0x38c   : > { %v1604_v20 = vld [vmem:[%s1597_s2] sm:$0xff]  ;;  %v1605_v21 = vld [vmem:[%s1597_s2 + $0x8] sm:$0xff]  ;;  %v14618_v27 = vld [vmem:[#allocation2 + $0x50] ss:$12 sps:$4 sm:$0xff]   ;;  %1933 = vmatprep.mubr.bf16.mxu1 %v16492_v36  ;;  %v17310_v54 = vsub.s32 1, %v17301_v50  ;;  %s18463_s11 = sld [smem:[#allocation70_spill]] }
 0x38d   : > { %v14606_v23 = vld [vmem:[#allocation2 + $0x8] ss:$12 sps:$4 sm:$0xff]   ;;  %v1606_v24 = vpack.c.bf16 %v1605_v21, %v1604_v20  ;;  %v14614_v26 = vld [vmem:[#allocation2 + $0x38] ss:$12 sps:$4 sm:$0xff]   ;;  %v14629_v31 = vld [vmem:[#allocation2 + $0x90] ss:$12 sps:$4 sm:$0xff]  }
 0x38e   : > { %13421 = vmatpush3.bf16.msra.mxu0 %v14596_v2  ;;  %1906 = vmatpush1.bf16.msra.mxu1 %v14613_v11  ;;  %v14622_v28 = vld [vmem:[#allocation2 + $0x68] ss:$12 sps:$4 sm:$0xff]   ;;  %v14630_v32 = vld [vmem:[#allocation2 + $0x98] ss:$12 sps:$4 sm:$0xff]   ;;  %v14634_v35 = vld [vmem:[#allocation2 + $0xb0] ss:$12 sps:$4 sm:$0xff]  }
 0x38f   : > { %13422 = vmatprep.subr.bf16.mxu0 %v16490_v0  ;;  %1907 = vmatprep.subr.bf16.mxu1 %v14615_v12  ;;  %v14627_v30 = vld [vmem:[#allocation2 + $0x94] ss:$12 sps:$4 sm:$0xff]   ;;  %v14631_v33 = vld [vmem:[#allocation2 + $0xac] ss:$12 sps:$4 sm:$0xff]   ;;  %s16494_s6 = smov 64   ;;  %s16495_s28 = smov 32  }
 0x390   : > { %v14633_v34 = vld [vmem:[#allocation2 + $0xa8] ss:$12 sps:$4 sm:$0xff]   ;;  %v12274_v37 = vld [vmem:[%s18461_s0] ss:$0 sm:$0xff]  ;;  %s18464_s1 = sld [smem:[#allocation74_spill]]  ;;  %s18465_s8 = sld [smem:[#allocation88_spill]] }
 0x391   : > { %v1719_v39 = vld [vmem:[%s18462_s7] sm:$0xff]  ;;  %v1720_v40 = vld [vmem:[%s18462_s7 + $0x8] sm:$0xff] }
 0x392   : > { %13423 = vmatpush3.bf16.msra.mxu0 %v14597_v3  ;;  %1908 = vmatpush1.bf16.msra.mxu1 %v14617_v14  ;;  %v1756_v53 = vld [vmem:[#allocation4] sm:$0x7] }
 0x393   : > { %13424 = vmatprep.subr.bf16.mxu0 %v16490_v0  ;;  %1909 = vmatprep.subr.bf16.mxu1 %v14619_v15  ;;  %v1761_v55 = vrot.slane %v1756_v53, %v17304_v51  ;;  %v1769_v56 = vrot.slane %v1756_v53, %v17307_v52  ;;  %v1765_v59 = vrot.slane %v1756_v53, %v17310_v54 }
 0x396   : > { %13425 = vmatpush3.bf16.msra.mxu0 %v14598_v6  ;;  %1910 = vmatpush1.bf16.msra.mxu1 %v14621_v17 }
 0x397   : > { %13426 = vmatprep.subr.bf16.mxu0 %v16490_v0  ;;  %1911 = vmatprep.subr.bf16.mxu1 %v14623_v18 }
 0x39a   : > { %13427 = vmatpush3.bf16.msra.mxu0 %v14599_v9  ;;  %1912 = vmatpush1.bf16.msra.mxu1 %v14625_v22 }
 0x39b   : > { %13428 = vmatprep.subr.bf16.mxu0 %v16490_v0  ;;  %1913 = vmatprep.subr.bf16.mxu1 %v14627_v30 }
 0x39e   : > { %13429 = vmatpush3.bf16.msra.mxu0 %v14600_v13  ;;  %1914 = vmatpush1.bf16.msra.mxu1 %v14629_v31 }
 0x39f   : > { %13430 = vmatprep.subr.bf16.mxu0 %v16490_v0  ;;  %1915 = vmatprep.subr.bf16.mxu1 %v14631_v33 }
 0x3a2   : > { %13431 = vmatpush3.bf16.msra.mxu0 %v14601_v16  ;;  %1916 = vmatpush1.bf16.msra.mxu1 %v14633_v34 }
 0x3a3   : > { %13432 = vmatprep.subr.bf16.mxu0 %v16490_v0  ;;  %13458 = vmatprep.subr.bf16.mxu1 %v16490_v0 }
 0x3a6   : > { %13433 = vmatpush3.bf16.msra.mxu0 %v14602_v19 }
 0x3a7   : > { %13438 = vmatprep.subr.bf16.mxu0 %v16490_v0 }
 0x3a9   : > { %13435 = vmatmul.mubr.bf16.vlgmr.msra.gmra.mrb[0].mxu0 %v1606_v24 }
 0x3aa   : > { %13439 = vmatpush3.bf16.msra.mxu0 %v14606_v23  ;;  %13454 = vmatprep.mubr.msk.bf16.mxu0 %vm16491_vm0, %v16490_v0 }
 0x3ab   : > { %13440 = vmatprep.subr.bf16.mxu0 %v16490_v0 }
 0x3ae   : > { %13441 = vmatpush3.bf16.msra.mxu0 %v14610_v25 }
 0x3af   : > { %13442 = vmatprep.subr.bf16.mxu0 %v16490_v0 }
 0x3b2   : > { %13443 = vmatpush3.bf16.msra.mxu0 %v14614_v26 }
 0x3b3   : > { %13444 = vmatprep.subr.bf16.mxu0 %v16490_v0 }
 0x3b6   : > { %13445 = vmatpush3.bf16.msra.mxu0 %v14618_v27 }
 0x3b7   : > { %13446 = vmatprep.subr.bf16.mxu0 %v16490_v0 }
 0x3ba   : > { %13447 = vmatpush3.bf16.msra.mxu0 %v14622_v28 }
 0x3bb   : > { %13448 = vmatprep.subr.bf16.mxu0 %v16490_v0 }
 0x3be   : > { %13449 = vmatpush3.bf16.msra.mxu0 %v14626_v29 }
 0x3bf   : > { %13450 = vmatprep.subr.bf16.mxu0 %v16490_v0 }
 0x3c2   : > { %13451 = vmatpush3.bf16.msra.mxu0 %v14630_v32 }
 0x3c3   : > { %13452 = vmatprep.subr.bf16.mxu0 %v16490_v0 }
 0x3c6   : > { %13453 = vmatpush3.bf16.msra.mxu0 %v14634_v35 }
 0x3c7   : > { %13510 = vmatprep.subr.bf16.mxu0 %v16490_v0 }
 0x47c   : > { %v1712_v38 = vpop.f32.mrb[0].mxu0 }
 0x47d   : > { %v1713_v41 = vadd.f32 %v12274_v37, %v1712_v38  ;;  %v13436_v42 = vpop.f32.mrb[1].mxu0 }
 0x47e   : > { %v1715_v43 = vpop.f32.mrb[2].mxu0 }
 0x47f   : > { %v1716_v44 = vadd.f32 %v12274_v37, %v1715_v43  ;;  %v13437_v45 = vpop.f32.mrb[3].mxu0  ;;  %v17287_v46 = vadd.f32 %v1719_v39, %v1713_v41 }
 0x481   : > { %v17289_v47 = vadd.f32 %v1720_v40, %v1716_v44 }
 0x483   : > { %v17293_v48 = vpack.c.bf16 %v17289_v47, %v17287_v46 }
 0x485   : > { %1934 = vmatmul.mubr.bf16.vlgmr.msra.gmra.mrb[0].mxu1 %v17293_v48  ;;  %13455 = vmatmul.mubr.bf16.vlgmr.msra.gmra.mrb[4].mxu0 %v17293_v48 }
 0x486   : > { %13460 = vmatprep.mubr.msk.bf16.mxu1 %vm16491_vm0, %v16490_v0  ;;  %13514 = vmatprep.mubr.msk.bf16.mxu0 %vm16491_vm0, %v16490_v0 }
 0x558   : > { %v1935_v57 = vpop.f32.mrb[0].mxu1  ;;  %v1978_v58 = vpop.f32.mrb[4].mxu0 }
 0x559   : > { %v1937_v60 = vpop.f32.mrb[1].mxu1  ;;  %v13456_v61 = vpop.f32.mrb[5].mxu0  ;;  %v1936_v1 = vadd.f32 %v1935_v57, %v1761_v55  ;;  %v1979_v2 = vadd.f32 %v1978_v58, %v1769_v56 }
 0x55a   : > { %v1939_v62 = vpop.f32.mrb[2].mxu1  ;;  %v1981_v63 = vpop.f32.mrb[6].mxu0  ;;  %v1938_v7 = vadd.f32 %v1937_v60, %v1765_v59 }
 0x55b   : > { %v1940_v3 = vadd.f32 %v1939_v62, %v1761_v55  ;;  %v1982_v4 = vadd.f32 %v1981_v63, %v1769_v56  ;;  %v1941_v5 = vpop.f32.mrb[3].mxu1  ;;  %v13457_v6 = vpop.f32.mrb[7].mxu0 }
 0x55c   : > { %v1942_v8 = vadd.f32 %v1941_v5, %v1765_v59 }
 0x55d   : > { %v17315_v9 = vpack.c.bf16 %v1940_v3, %v1936_v1  ;;  %v17317_v10 = vpack.c.bf16 %v1982_v4, %v1979_v2 }
 0x55e   : > { %v17319_v11 = vpack.c.bf16 %v1942_v8, %v1938_v7 }
 0x560   : > { %v2009_v12 = vsel %vm2004_vm1, %v17319_v11, 0 }
 0x561   : > { %13459 = vmatpush3.bf16.xpose.msra.mxu1 %v2009_v12 }
 0x562   : > { %13464 = vmatprep.subr.bf16.mxu1 %v16490_v0 }
 0x568   : > { %13461 = vmatmul.mubr.msk.bf16.vlgmr.msra.gmra.mrb[4].mxu1 %vm2004_vm1, %v17315_v9 }
 0x569   : > { %13465 = vmatpush3.bf16.msra.mxu1 %v17317_v10  ;;  %13466 = vmatprep.mubr.msk.bf16.mxu1 %vm16491_vm0, %v16490_v0 }
 0x56a   : > { %13470 = vmatprep.subr.bf16.mxu1 %v16490_v0 }
 0x63b   : > { %v2045_v13 = vpop.f32.mrb[4].mxu1 }
 0x63c   : > { %v13462_v14 = vpop.f32.mrb[5].mxu1  ;;  %v2053_v15 = vsel %vm2052_vm2, %v2045_v13, -inf }
 0x63d   : > { %2054 = vmax.xlane.f32.xlu0 %v2053_v15  ;;  %v2048_v16 = vpop.f32.mrb[6].mxu1  ;;  %v14635_v15 = vld [vmem:[%s18463_s11 + $0x10] sm:$0xff]  }
 0x63e   : > { %v13463_v17 = vpop.f32.mrb[7].mxu1  ;;  %v2056_v18 = vsel %vm2052_vm2, %v2048_v16, -inf }
 0x63f   : > { %v14636_v17 = vld [vmem:[%s18463_s11 + $0x18] sm:$0xff]  }
 0x641   : > { %2057 = vmax.xlane.f32.xlu0 %v2056_v18 }
 0x657   : > { %2125 = vrot.lane.b32.xlu0 %v17319_v11, %s16493_s9 }
 0x6ca   : > { %v2055_v19 = vpop.xlane.xlu0 %2054 }
 0x6cb   : > { %v2059_v20 = vsub.f32 %v2045_v13, %v2055_v19 }
 0x6cd   : > { %v2061_v21 = vmul.f32 1.442695, %v2059_v20 }
 0x6ce   : > { %v2058_v22 = vpop.xlane.xlu0 %2057 }
 0x6cf   : > { %15235 = vpow2.f32 %v2061_v21  ;;  %v2060_v23 = vsub.f32 %v2048_v16, %v2058_v22  ;;  %v14637_v21 = vld [vmem:[%s18463_s11] sm:$0xff]  }
 0x6d1   : > { %v2063_v24 = vmul.f32 1.442695, %v2060_v23 }
 0x6d2   : > { %v2126_v35 = vpop.permute.xlu0 %2125 }
 0x6d3   : > { %15237 = vpow2.f32 %v2063_v24  ;;  %v2131_v38 = vsel %vm2004_vm1, %v2126_v35, 0  ;;  %v14638_v24 = vld [vmem:[%s18463_s11 + $0x8] sm:$0xff]  }
 0x6d9   : > { %v15236_v25 = vpop.eup %15235 }
 0x6da   : > { %v2065_v26 = vsel %vm2052_vm2, %v15236_v25, 0.0 }
 0x6db   : > { %2066 = vadd.xlane.f32.xlu1 %v2065_v26 }
 0x6dd   : > { %v15238_v27 = vpop.eup %15237 }
 0x6de   : > { %v2068_v28 = vsel %vm2052_vm2, %v15238_v27, 0.0 }
 0x6df   : > { %2069 = vadd.xlane.f32.xlu1 %v2068_v28 }
 0x6f0   : > { %2122 = vrot.lane.b32.xlu1 %v17315_v9, %s16493_s9 }
 0x768   : > { %v2067_v29 = vpop.xlane.xlu1 %2066 }
 0x769   : > { %15239 = vrcp.f32 %v2067_v29 }
 0x76c   : > { %v2070_v30 = vpop.xlane.xlu1 %2069 }
 0x76d   : > { %15241 = vrcp.f32 %v2070_v30 }
 0x770   : > { %v2123_v39 = vpop.permute.xlu1 %2122 }
 0x773   : > { %v15240_v31 = vpop.eup %15239 }
 0x774   : > { %v2073_v33 = vmul.f32 %v15240_v31, %v15236_v25 }
 0x777   : > { %v15242_v32 = vpop.eup %15241 }
 0x778   : > { %v2074_v34 = vmul.f32 %v15242_v32, %v15238_v27 }
 0x77a   : > { %v2075_v37 = vpack.c.bf16 %v2074_v34, %v2073_v33 }
 0x77c   : > { %13467 = vmatmul.mubr.msk.bf16.vlgmr.msra.gmra.mrb[8].mxu1 %vm2052_vm2, %v2075_v37 }
 0x77d   : > { %13471 = vmatpush3.bf16.xpose.msra.mxu1 %v2131_v38  ;;  %13472 = vmatprep.mubr.msk.bf16.mxu1 %vm16491_vm0, %v16490_v0 }
 0x77e   : > { %13476 = vmatprep.subr.bf16.mxu1 %v16490_v0 }
 0x784   : > { %13473 = vmatmul.mubr.msk.bf16.vlgmr.msra.gmra.mrb[12].mxu1 %vm2004_vm1, %v2123_v39 }
 0x785   : > { %13478 = vmatprep.mubr.msk.bf16.mxu1 %vm16491_vm0, %v16490_v0 }
 0x84f   : > { %v17346_v40 = vpop.f32.mrb[8].mxu1 }
 0x850   : > { %v13468_v41 = vpop.f32.mrb[9].mxu1 }
 0x851   : > { %v17348_v42 = vpop.f32.mrb[10].mxu1 }
 0x852   : > { %v2120_v43 = vpack.c.bf16 %v17348_v42, %v17346_v40  ;;  %v13469_v44 = vpop.f32.mrb[11].mxu1 }
 0x857   : > { %v2167_v45 = vpop.f32.mrb[12].mxu1 }
 0x858   : > { %v13474_v49 = vpop.f32.mrb[13].mxu1  ;;  %v2174_v53 = vsel %vm2052_vm2, %v2167_v45, -inf }
 0x859   : > { %2175 = vmax.xlane.f32.xlu1 %v2174_v53  ;;  %v2170_v55 = vpop.f32.mrb[14].mxu1 }
 0x85a   : > { %v13475_v56 = vpop.f32.mrb[15].mxu1  ;;  %v2177_v57 = vsel %vm2052_vm2, %v2170_v55, -inf }
 0x85b   : > { %2178 = vmax.xlane.f32.xlu0 %v2177_v57 }
 0x8e6   : > { %v2176_v58 = vpop.xlane.xlu1 %2175 }
 0x8e7   : > { %v2180_v59 = vsub.f32 %v2167_v45, %v2176_v58 }
 0x8e8   : > { %v2179_v60 = vpop.xlane.xlu0 %2178 }
 0x8e9   : > { %v2182_v61 = vmul.f32 1.442695, %v2180_v59  ;;  %v2181_v62 = vsub.f32 %v2170_v55, %v2179_v60 }
 0x8eb   : > { %15243 = vpow2.f32 %v2182_v61  ;;  %v2184_v63 = vmul.f32 1.442695, %v2181_v62  ;;  %v14639_v62 = vld [vmem:[%s18463_s11 + $0x20] sm:$0xff]  }
 0x8ec   : > { %13511 = vmatpush3.bf16.msra.mxu0 %v14639_v62  ;;  %v12327_v62 = vld [vmem:[#allocation6] ss:$0 sm:$0xff] }
 0x8ed   : > { %15245 = vpow2.f32 %v2184_v63  ;;  %13512 = vmatprep.subr.bf16.mxu0 %v16490_v0 }
 0x8f5   : > { %v15244_v1 = vpop.eup %15243 }
 0x8f6   : > { %v2186_v2 = vsel %vm2052_vm2, %v15244_v1, 0.0 }
 0x8f7   : > { %v15246_v3 = vpop.eup %15245  ;;  %2187 = vadd.xlane.f32.xlu0 %v2186_v2 }
 0x8f8   : > { %v2189_v4 = vsel %vm2052_vm2, %v15246_v3, 0.0 }
 0x8f9   : > { %2190 = vadd.xlane.f32.xlu1 %v2189_v4 }
 0x90a   : > { %2360 = vrot.lane.b32.xlu1 %v17319_v11, %s16494_s6 }
 0x90d   : > { %2198 = vrot.lane.b32.xlu0 %v17317_v10, %s16493_s9 }
 0x90e   : > { %2358 = vrot.lane.b32.xlu1 %v17315_v9, %s16494_s6 }
 0x984   : > { %v2188_v5 = vpop.xlane.xlu0 %2187 }
 0x985   : > { %15247 = vrcp.f32 %v2188_v5 }
 0x986   : > { %v2191_v6 = vpop.xlane.xlu1 %2190 }
 0x987   : > { %15249 = vrcp.f32 %v2191_v6 }
 0x988   : > { %v2199_v7 = vpop.permute.xlu0 %2198 }
 0x989   : > { %13477 = vmatpush3.bf16.msra.mxu1 %v2199_v7 }
 0x98a   : > { %13482 = vmatprep.subr.bf16.mxu1 %v16490_v0  ;;  %v2361_v25 = vpop.permute.xlu1 %2360 }
 0x98b   : > { %v2366_v26 = vsel %vm2004_vm1, %v2361_v25, 0 }
 0x98e   : > { %v2359_v27 = vpop.permute.xlu1 %2358 }
 0x98f   : > { %v15248_v8 = vpop.eup %15247 }
 0x990   : > { %v2194_v13 = vmul.f32 %v15248_v8, %v15244_v1 }
 0x991   : > { %v15250_v12 = vpop.eup %15249 }
 0x992   : > { %v2195_v14 = vmul.f32 %v15250_v12, %v15246_v3  ;;  %v14640_v12 = vld [vmem:[%s18463_s11 + $0x28] sm:$0xff]  }
 0x993   : > { %13513 = vmatpush3.bf16.msra.mxu0 %v14640_v12  ;;  %v14645_v12 = vld [vmem:[#allocation10 + $0x4] ss:$20 sps:$4 sm:$0xff]  }
 0x994   : > { %v2196_v16 = vpack.c.bf16 %v2195_v14, %v2194_v13  ;;  %13524 = vmatprep.subr.bf16.mxu0 %v16490_v0 }
 0x996   : > { %13479 = vmatmul.mubr.msk.bf16.vlgmr.msra.gmra.mrb[16].mxu1 %vm2052_vm2, %v2196_v16 }
 0x997   : > { %13483 = vmatpush3.bf16.msra.mxu1 %v14635_v15  ;;  %13486 = vmatprep.mubr.msk.bf16.mxu1 %vm16491_vm0, %v16490_v0 }
 0x998   : > { %13484 = vmatprep.subr.bf16.mxu1 %v16490_v0 }
 0x99b   : > { %13485 = vmatpush3.bf16.msra.mxu1 %v14636_v17 }
 0x99c   : > { %13490 = vmatprep.subr.bf16.mxu1 %v16490_v0 }
 0xa69   : > { %v2238_v18 = vpop.f32.mrb[16].mxu1 }
 0xa6a   : > { %v13480_v19 = vpop.f32.mrb[17].mxu1 }
 0xa6b   : > { %v2241_v20 = vpop.f32.mrb[18].mxu1 }
 0xa6c   : > { %v2245_v22 = vpack.c.bf16 %v2241_v20, %v2238_v18  ;;  %v13481_v23 = vpop.f32.mrb[19].mxu1 }
 0xa6e   : > { %13487 = vmatmul.mubr.msk.bf16.vlgmr.msra.gmra.mrb[20].mxu1 %vm2004_vm1, %v2245_v22 }
 0xa6f   : > { %13491 = vmatpush3.bf16.msra.mxu1 %v14637_v21  ;;  %13494 = vmatprep.mubr.msk.bf16.mxu1 %vm16491_vm0, %v16490_v0 }
 0xa70   : > { %13492 = vmatprep.subr.bf16.mxu1 %v16490_v0 }
 0xa73   : > { %13493 = vmatpush3.bf16.msra.mxu1 %v14638_v24 }
 0xa74   : > { %13498 = vmatprep.subr.bf16.mxu1 %v16490_v0 }
 0xa76   : > { %13495 = vmatmul.mubr.msk.bf16.vlgmr.msra.gmra.mrb[24].mxu1 %vm2004_vm1, %v2120_v43 }
 0xa77   : > { %13500 = vmatprep.mubr.msk.bf16.mxu1 %vm16491_vm0, %v16490_v0 }
 0xa7c   : > { %13499 = vmatpush3.bf16.xpose.msra.mxu1 %v2366_v26 }
 0xa7d   : > { %13504 = vmatprep.subr.bf16.mxu1 %v16490_v0 }
 0xa83   : > { %13501 = vmatmul.mubr.msk.bf16.vlgmr.msra.gmra.mrb[28].mxu1 %vm2004_vm1, %v2359_v27 }
 0xa84   : > { %13506 = vmatprep.mubr.msk.bf16.mxu1 %vm16491_vm0, %v16490_v0 }
 0xb41   : > { %v2295_v28 = vpop.f32.mrb[20].mxu1 }
 0xb42   : > { %v13488_v29 = vpop.f32.mrb[21].mxu1 }
 0xb43   : > { %v2298_v30 = vpop.f32.mrb[22].mxu1 }
 0xb44   : > { %v13489_v31 = vpop.f32.mrb[23].mxu1 }
 0xb49   : > { %v2351_v32 = vpop.f32.mrb[24].mxu1 }
 0xb4a   : > { %v17385_v33 = vadd.f32 %v2351_v32, %v2295_v28  ;;  %v13496_v34 = vpop.f32.mrb[25].mxu1 }
 0xb4b   : > { %v2354_v35 = vpop.f32.mrb[26].mxu1 }
 0xb4c   : > { %v17387_v37 = vadd.f32 %v2354_v35, %v2298_v30  ;;  %v13497_v38 = vpop.f32.mrb[27].mxu1  ;;  %v14641_v35 = vld [vmem:[%s18463_s11 + $0x30] sm:$0xff]  }
 0xb56   : > { %v2402_v39 = vpop.f32.mrb[28].mxu1 }
 0xb57   : > { %v13502_v40 = vpop.f32.mrb[29].mxu1  ;;  %v2409_v41 = vsel %vm2052_vm2, %v2402_v39, -inf }
 0xb58   : > { %2410 = vmax.xlane.f32.xlu1 %v2409_v41  ;;  %v2405_v42 = vpop.f32.mrb[30].mxu1 }
 0xb59   : > { %v13503_v43 = vpop.f32.mrb[31].mxu1  ;;  %v2412_v44 = vsel %vm2052_vm2, %v2405_v42, -inf }
 0xb5a   : > { %2413 = vmax.xlane.f32.xlu0 %v2412_v44 }
 0xb69   : > { %2432 = vrot.lane.b32.xlu1 %v17317_v10, %s16494_s6 }
 0xb6d   : > { %2538 = vrot.lane.b32.xlu1 %v17315_v9, %s16495_s28 }
 0xbe5   : > { %v2411_v45 = vpop.xlane.xlu1 %2410 }
 0xbe6   : > { %v2415_v49 = vsub.f32 %v2402_v39, %v2411_v45 }
 0xbe7   : > { %v2414_v53 = vpop.xlane.xlu0 %2413 }
 0xbe8   : > { %v2417_v55 = vmul.f32 1.442695, %v2415_v49  ;;  %v2416_v56 = vsub.f32 %v2405_v42, %v2414_v53 }
 0xbe9   : > { %v2433_v57 = vpop.permute.xlu1 %2432 }
 0xbea   : > { %15251 = vpow2.f32 %v2417_v55  ;;  %v2419_v58 = vmul.f32 1.442695, %v2416_v56  ;;  %13505 = vmatpush3.bf16.msra.mxu1 %v2433_v57 }
 0xbeb   : > { %13518 = vmatprep.subr.bf16.mxu1 %v16490_v0 }
 0xbec   : > { %15253 = vpow2.f32 %v2419_v58 }
 0xbf4   : > { %v15252_v59 = vpop.eup %15251 }
 0xbf5   : > { %v2421_v60 = vsel %vm2052_vm2, %v15252_v59, 0.0 }
 0xbf6   : > { %v15254_v61 = vpop.eup %15253  ;;  %2422 = vadd.xlane.f32.xlu0 %v2421_v60 }
 0xbf7   : > { %v2424_v9 = vsel %vm2052_vm2, %v15254_v61, 0.0 }
 0xbfa   : > { %2425 = vadd.xlane.f32.xlu0 %v2424_v9 }
 0xc10   : > { %2540 = vrot.lane.b32.xlu0 %v17319_v11, %s16495_s28  ;;  %v2539_v11 = vpop.permute.xlu1 %2538 }
 0xc83   : > { %v2423_v63 = vpop.xlane.xlu0 %2422 }
 0xc84   : > { %15255 = vrcp.f32 %v2423_v63 }
 0xc87   : > { %v2426_v1 = vpop.xlane.xlu0 %2425 }
 0xc88   : > { %15257 = vrcp.f32 %v2426_v1 }
 0xc8b   : > { %v2541_v6 = vpop.permute.xlu0 %2540 }
 0xc8c   : > { %v2546_v8 = vsel %vm2004_vm1, %v2541_v6, 0 }
 0xc8e   : > { %v15256_v2 = vpop.eup %15255 }
 0xc8f   : > { %v2429_v4 = vmul.f32 %v15256_v2, %v15252_v59 }
 0xc92   : > { %v15258_v3 = vpop.eup %15257 }
 0xc93   : > { %v2430_v5 = vmul.f32 %v15258_v3, %v15254_v61 }
 0xc95   : > { %v2431_v7 = vpack.c.bf16 %v2430_v5, %v2429_v4 }
 0xc97   : > { %13507 = vmatmul.mubr.msk.bf16.vlgmr.msra.gmra.mrb[32].mxu1 %vm2052_vm2, %v2431_v7 }
 0xc98   : > { %13519 = vmatpush3.bf16.xpose.msra.mxu1 %v2546_v8  ;;  %13520 = vmatprep.mubr.msk.bf16.mxu1 %vm16491_vm0, %v16490_v0 }
 0xc99   : > { %13530 = vmatprep.subr.bf16.mxu1 %v16490_v0 }
 0xc9f   : > { %13521 = vmatmul.mubr.msk.bf16.vlgmr.msra.gmra.mrb[36].mxu1 %vm2004_vm1, %v2539_v11  ;;  %v14643_v11 = vld [vmem:[#allocation10] ss:$20 sps:$4 sm:$0xff]  }
 0xca0   : > { %13534 = vmatprep.mubr.msk.bf16.mxu1 %vm16491_vm0, %v16490_v0  ;;  %13531 = vmatpush3.bf16.msra.mxu1 %v14641_v35  ;;  %v14664_v35 = vld [vmem:[#allocation10 + $0x80] ss:$20 sps:$4 sm:$0xff]  }
 0xca1   : > { %13532 = vmatprep.subr.bf16.mxu1 %v16490_v0 }
 0xd6a   : > { %v2472_v13 = vpop.f32.mrb[32].mxu1 }
 0xd6b   : > { %v13508_v14 = vpop.f32.mrb[33].mxu1 }
 0xd6c   : > { %v2475_v15 = vpop.f32.mrb[34].mxu1  ;;  %v14648_v14 = vld [vmem:[#allocation10 + $0xc] ss:$20 sps:$4 sm:$0xff]  }
 0xd6d   : > { %v2479_v16 = vpack.c.bf16 %v2475_v15, %v2472_v13  ;;  %v13509_v17 = vpop.f32.mrb[35].mxu1  ;;  %v14646_v13 = vld [vmem:[#allocation10 + $0x8] ss:$20 sps:$4 sm:$0xff]   ;;  %v14651_v15 = vld [vmem:[#allocation10 + $0x2c] ss:$20 sps:$4 sm:$0xff]  }
 0xd6e   : > { %v14649_v17 = vld [vmem:[#allocation10 + $0x28] ss:$20 sps:$4 sm:$0xff]  }
 0xd6f   : > { %13515 = vmatmul.mubr.msk.bf16.vlgmr.msra.gmra.mrb[8].mxu0 %vm2004_vm1, %v2479_v16  ;;  %v14654_v16 = vld [vmem:[#allocation10 + $0x34] ss:$20 sps:$4 sm:$0xff]  }
 0xd70   : > { %13526 = vmatprep.mubr.msk.bf16.mxu0 %vm16491_vm0, %v16490_v0 }
 0xd72   : > { %v2582_v18 = vpop.f32.mrb[36].mxu1 }
 0xd73   : > { %v13522_v19 = vpop.f32.mrb[37].mxu1  ;;  %v2589_v20 = vsel %vm2052_vm2, %v2582_v18, -inf }
 0xd74   : > { %2590 = vmax.xlane.f32.xlu1 %v2589_v20  ;;  %v2585_v21 = vpop.f32.mrb[38].mxu1 }
 0xd75   : > { %v13523_v22 = vpop.f32.mrb[39].mxu1  ;;  %v2592_v23 = vsel %vm2052_vm2, %v2585_v21, -inf }
 0xd76   : > { %2593 = vmax.xlane.f32.xlu0 %v2592_v23 }
 0xe01   : > { %v2591_v24 = vpop.xlane.xlu1 %2590 }
 0xe02   : > { %v2595_v25 = vsub.f32 %v2582_v18, %v2591_v24  ;;  %v14652_v18 = vld [vmem:[#allocation10 + $0x30] ss:$20 sps:$4 sm:$0xff]  }
 0xe03   : > { %v2594_v26 = vpop.xlane.xlu0 %2593 }
 0xe04   : > { %v2597_v27 = vmul.f32 1.442695, %v2595_v25  ;;  %v2596_v28 = vsub.f32 %v2585_v21, %v2594_v26 }
 0xe06   : > { %15259 = vpow2.f32 %v2597_v27  ;;  %v2599_v29 = vmul.f32 1.442695, %v2596_v28  ;;  %v14657_v27 = vld [vmem:[#allocation10 + $0x54] ss:$20 sps:$4 sm:$0xff]   ;;  %v14655_v28 = vld [vmem:[#allocation10 + $0x50] ss:$20 sps:$4 sm:$0xff]  }
 0xe08   : > { %15261 = vpow2.f32 %v2599_v29  ;;  %v14660_v29 = vld [vmem:[#allocation10 + $0x5c] ss:$20 sps:$4 sm:$0xff]  }
 0xe10   : > { %v15260_v30 = vpop.eup %15259 }
 0xe11   : > { %v2601_v31 = vsel %vm2052_vm2, %v15260_v30, 0.0 }
 0xe12   : > { %v15262_v32 = vpop.eup %15261  ;;  %2602 = vadd.xlane.f32.xlu0 %v2601_v31  ;;  %v14663_v31 = vld [vmem:[#allocation10 + $0x7c] ss:$20 sps:$4 sm:$0xff]  }
 0xe13   : > { %v2604_v34 = vsel %vm2052_vm2, %v15262_v32, 0.0 }
 0xe14   : > { %2605 = vadd.xlane.f32.xlu1 %v2604_v34  ;;  %v14666_v34 = vld [vmem:[#allocation10 + $0x84] ss:$20 sps:$4 sm:$0xff]  }
 0xe28   : > { %2612 = vrot.lane.b32.xlu0 %v17317_v10, %s16495_s28 }
 0xe42   : > { %v2529_v38 = vpop.f32.mrb[8].mxu0 }
 0xe43   : > { %v2536_v39 = vadd.f32 %v2529_v38, %v17385_v33  ;;  %v13516_v40 = vpop.f32.mrb[9].mxu0  ;;  %v14642_v33 = vld [vmem:[%s18463_s11 + $0x38] sm:$0xff]   ;;  %v14667_v38 = vld [vmem:[#allocation10 + $0xa0] ss:$20 sps:$4 sm:$0xff]  }
 0xe44   : > { %v2532_v41 = vpop.f32.mrb[10].mxu0  ;;  %13533 = vmatpush3.bf16.msra.mxu1 %v14642_v33  ;;  %v14670_v40 = vld [vmem:[#allocation10 + $0xa8] ss:$20 sps:$4 sm:$0xff]   ;;  %v14685_v33 = vld [vmem:[#allocation10 + $0x118] ss:$20 sps:$4 sm:$0xff]  }
 0xe45   : > { %v2537_v42 = vadd.f32 %v2532_v41, %v17387_v37  ;;  %v13517_v43 = vpop.f32.mrb[11].mxu0  ;;  %3097 = vmatprep.subr.bf16.mxu1 %v14648_v14  ;;  %v14672_v41 = vld [vmem:[#allocation10 + $0xac] ss:$20 sps:$4 sm:$0xff]  }
 0xe46   : > { %v14678_v43 = vld [vmem:[#allocation10 + $0xd4] ss:$20 sps:$4 sm:$0xff]  }
 0xe9f   : > { %v2603_v44 = vpop.xlane.xlu0 %2602 }
 0xea0   : > { %15263 = vrcp.f32 %v2603_v44  ;;  %v14673_v44 = vld [vmem:[#allocation10 + $0xc8] ss:$20 sps:$4 sm:$0xff]  }
 0xea1   : > { %v2606_v45 = vpop.xlane.xlu1 %2605 }
 0xea2   : > { %15265 = vrcp.f32 %v2606_v45  ;;  %v14676_v45 = vld [vmem:[#allocation10 + $0xd0] ss:$20 sps:$4 sm:$0xff]  }
 0xea3   : > { %v2613_v49 = vpop.permute.xlu0 %2612 }
 0xea4   : > { %13525 = vmatpush3.bf16.msra.mxu0 %v2613_v49  ;;  %v14681_v49 = vld [vmem:[#allocation10 + $0xf4] ss:$20 sps:$4 sm:$0xff]  }
 0xea5   : > { %3054 = vmatprep.subr.bf16.mxu0 %v14645_v12 }
 0xeaa   : > { %v15264_v10 = vpop.eup %15263 }
 0xeab   : > { %v2609_v55 = vmul.f32 %v15264_v10, %v15260_v30  ;;  %v14658_v30 = vld [vmem:[#allocation10 + $0x58] ss:$20 sps:$4 sm:$0xff]   ;;  %v14684_v10 = vld [vmem:[#allocation10 + $0xfc] ss:$20 sps:$4 sm:$0xff]  }
 0xeac   : > { %v15266_v53 = vpop.eup %15265 }
 0xead   : > { %v2610_v56 = vmul.f32 %v15266_v53, %v15262_v32  ;;  %v14661_v32 = vld [vmem:[#allocation10 + $0x78] ss:$20 sps:$4 sm:$0xff]   ;;  %v14679_v53 = vld [vmem:[#allocation10 + $0xf0] ss:$20 sps:$4 sm:$0xff]  }
 0xeaf   : > { %v2611_v57 = vpack.c.bf16 %v2610_v56, %v2609_v55  ;;  %v14682_v55 = vld [vmem:[#allocation10 + $0xf8] ss:$20 sps:$4 sm:$0xff]   ;;  %v14687_v56 = vld [vmem:[#allocation10 + $0x11c] ss:$20 sps:$4 sm:$0xff]  }
 0xeb1   : > { %13527 = vmatmul.mubr.msk.bf16.vlgmr.msra.gmra.mrb[12].mxu0 %vm2052_vm2, %v2611_v57  ;;  %v14690_v57 = vld [vmem:[#allocation10 + $0x124] ss:$20 sps:$4 sm:$0xff]  }
 0xeb2   : > { %3086 = vmatprep.mubr.bf16.mxu0 %v16492_v36  ;;  %3055 = vmatpush1.bf16.msra.mxu0 %v14643_v11 }
 0xeb3   : > { %3056 = vmatprep.subr.bf16.mxu0 %v14651_v15  ;;  %v14700_v15 = vld [vmem:[#allocation12] sm:$0xff]  }
 0xeb6   : > { %3057 = vmatpush1.bf16.msra.mxu0 %v14649_v17  ;;  %v14692_v17 = vld [vmem:[#allocation10 + $0x38] ss:$20 sps:$4 sm:$0xff]  }
 0xeb7   : > { %3058 = vmatprep.subr.bf16.mxu0 %v14657_v27  ;;  %v14716_v27 = vld [vmem:[#allocation12 + $0x20] sm:$0xff]  }
 0xeba   : > { %3059 = vmatpush1.bf16.msra.mxu0 %v14655_v28  ;;  %v14719_v28 = vld [vmem:[#allocation12 + $0x68] sm:$0xff]  }
 0xebb   : > { %3060 = vmatprep.subr.bf16.mxu0 %v14663_v31  ;;  %v14697_v31 = vld [vmem:[#allocation10 + $0x100] ss:$20 sps:$4 sm:$0xff]  }
 0xebe   : > { %3061 = vmatpush1.bf16.msra.mxu0 %v14661_v32  ;;  %v14698_v32 = vld [vmem:[#allocation10 + $0x128] ss:$20 sps:$4 sm:$0xff]  }
 0xf84   : > { %v2652_v58 = vpop.f32.mrb[12].mxu0 }
 0xf85   : > { %v13528_v37 = vpop.f32.mrb[13].mxu0 }
 0xf86   : > { %v2655_v59 = vpop.f32.mrb[14].mxu0  ;;  %v14699_v37 = vld [vmem:[#allocation12 + $0x40] sm:$0xff]  }
 0xf87   : > { %v2659_v60 = vpack.c.bf16 %v2655_v59, %v2652_v58  ;;  %v13529_v61 = vpop.f32.mrb[15].mxu0  ;;  %v14688_v58 = vld [vmem:[#allocation10 + $0x120] ss:$20 sps:$4 sm:$0xff]  }
 0xf89   : > { %13535 = vmatmul.mubr.msk.bf16.vlgmr.msra.gmra.mrb[40].mxu1 %vm2004_vm1, %v2659_v60 }
 0xf8a   : > { %3129 = vmatprep.mubr.bf16.mxu1 %v16492_v36  ;;  %3098 = vmatpush1.bf16.msra.mxu1 %v14646_v13  ;;  %v14691_v13 = vld [vmem:[#allocation10 + $0x10] ss:$20 sps:$4 sm:$0xff]  }
 0xf8b   : > { %3099 = vmatprep.subr.bf16.mxu1 %v14654_v16  ;;  %v14703_v16 = vld [vmem:[#allocation12 + $0x48] sm:$0xff]  }
 0xf8e   : > { %3100 = vmatpush1.bf16.msra.mxu1 %v14652_v18  ;;  %v14704_v18 = vld [vmem:[#allocation12 + $0x8] sm:$0xff]  }
 0xf8f   : > { %3101 = vmatprep.subr.bf16.mxu1 %v14660_v29  ;;  %v14696_v29 = vld [vmem:[#allocation10 + $0xd8] ss:$20 sps:$4 sm:$0xff]  }
 0xf92   : > { %3102 = vmatpush1.bf16.msra.mxu1 %v14658_v30  ;;  %v14720_v30 = vld [vmem:[#allocation12 + $0x28] sm:$0xff]  }
 0xf93   : > { %3103 = vmatprep.subr.bf16.mxu1 %v14666_v34  ;;  %v14701_v34 = vld [vmem:[#allocation12 + $0xc0] sm:$0xff]  }
 0xf96   : > { %3104 = vmatpush1.bf16.msra.mxu1 %v14664_v35  ;;  %v14702_v35 = vld [vmem:[#allocation12 + $0x80] sm:$0xff]  }
 0xf97   : > { %3105 = vmatprep.subr.bf16.mxu1 %v14672_v41  ;;  %v14710_v41 = vld [vmem:[#allocation12 + $0x90] sm:$0xff]  }
 0xf9a   : > { %3106 = vmatpush1.bf16.msra.mxu1 %v14670_v40  ;;  %v14709_v40 = vld [vmem:[#allocation12 + $0xd0] sm:$0xff]  }
 0xf9b   : > { %3107 = vmatprep.subr.bf16.mxu1 %v14678_v43  ;;  %v14714_v43 = vld [vmem:[#allocation12 + $0x98] sm:$0xff]  }
 0xf9e   : > { %3108 = vmatpush1.bf16.msra.mxu1 %v14676_v45  ;;  %v14718_v45 = vld [vmem:[#allocation12 + $0xa0] sm:$0xff]  }
 0xf9f   : > { %3109 = vmatprep.subr.bf16.mxu1 %v14684_v10  ;;  %v14722_v10 = vld [vmem:[#allocation12 + $0xa8] sm:$0xff]  }
 0xfa2   : > { %3110 = vmatpush1.bf16.msra.mxu1 %v14682_v55  ;;  %v14724_v55 = vld [vmem:[#allocation12 + $0x30] sm:$0xff]  }
 0xfa3   : > { %3111 = vmatprep.subr.bf16.mxu1 %v14690_v57  ;;  %v14726_v57 = vld [vmem:[#allocation12 + $0xb0] sm:$0xff]  }
 0xfa6   : > { %3112 = vmatpush1.bf16.msra.mxu1 %v14688_v58  ;;  %v14728_v58 = vld [vmem:[#allocation12 + $0x38] sm:$0xff]  }
 0xfa7   : > { %12985 = vmatprep.subr.bf16.mxu1 %v14699_v37  ;;  %v14729_v37 = vld [vmem:[#allocation12 + $0xf8] sm:$0xff]  }
0x105c   : > { %v2709_v9 = vpop.f32.mrb[40].mxu1 }
0x105d   : > { %v2716_v63 = vadd.f32 %v2709_v9, %v2536_v39  ;;  %v13536_v1 = vpop.f32.mrb[41].mxu1  ;;  %v14669_v39 = vld [vmem:[#allocation10 + $0xa4] ss:$20 sps:$4 sm:$0xff]  }
0x105e   : > { %v2712_v2 = vpop.f32.mrb[42].mxu1  ;;  %3062 = vmatprep.subr.bf16.mxu0 %v14669_v39  ;;  %v14706_v39 = vld [vmem:[#allocation12 + $0x88] sm:$0xff]  }
0x105f   : > { %v2725_v3 = vadd.f32 %v12327_v62, %v2716_v63  ;;  %v2717_v4 = vadd.f32 %v2712_v2, %v2537_v42  ;;  %v13537_v5 = vpop.f32.mrb[43].mxu1  ;;  %v14675_v42 = vld [vmem:[#allocation10 + $0xcc] ss:$20 sps:$4 sm:$0xff]   ;;  %3063 = vmatpush1.bf16.msra.mxu0 %v14667_v38 }
0x1060   : > { %3064 = vmatprep.subr.bf16.mxu0 %v14675_v42  ;;  %v14705_v38 = vld [vmem:[#allocation12 + $0xc8] sm:$0xff]   ;;  %v14713_v42 = vld [vmem:[#allocation12 + $0xd8] sm:$0xff]  }
0x1061   : > { %v2726_v6 = vadd.f32 %v12327_v62, %v2717_v4  ;;  %v2727_v7 = vadd.f32 %v2725_v3, %v17287_v46  ;;  %v12328_v3 = vld [vmem:[#allocation7] ss:$0 sm:$0xff] }
0x1063   : > { %2731 = vadd.xlane.f32.xlu1 %v2727_v7  ;;  %v2728_v8 = vadd.f32 %v2726_v6, %v17289_v47  ;;  %3065 = vmatpush1.bf16.msra.mxu0 %v14673_v44  ;;  %v14717_v44 = vld [vmem:[#allocation12 + $0xe0] sm:$0xff]  }
0x1064   : > { %3066 = vmatprep.subr.bf16.mxu0 %v14681_v49  ;;  %v14721_v49 = vld [vmem:[#allocation12 + $0xe8] sm:$0xff]  }
0x1067   : > { %2733 = vadd.xlane.f32.xlu1 %v2728_v8  ;;  %3067 = vmatpush1.bf16.msra.mxu0 %v14679_v53  ;;  %v14723_v53 = vld [vmem:[#allocation12 + $0x70] sm:$0xff]  }
0x1068   : > { %3068 = vmatprep.subr.bf16.mxu0 %v14687_v56  ;;  %v14725_v56 = vld [vmem:[#allocation12 + $0xf0] sm:$0xff]  }
0x106b   : > { %3069 = vmatpush1.bf16.msra.mxu0 %v14685_v33  ;;  %v14727_v33 = vld [vmem:[#allocation12 + $0x78] sm:$0xff]  }
0x106c   : > { %13538 = vmatprep.subr.bf16.mxu0 %v16490_v0 }
0x10f0   : > { %v2732_v19 = vpop.xlane.xlu1 %2731 }
0x10f1   : > { %v2736_v20 = vmul.f32 0.0078125, %v2732_v19  ;;  %v14707_v19 = vld [vmem:[#allocation12 + $0x50] sm:$0xff]  }
0x10f3   : > { %v17432_v21 = vsub.f32 %v2727_v7, %v2736_v20  ;;  %v12329_v7 = vld [vmem:[#allocation9] ss:$0 sm:$0xff]  ;;  %v14693_v20 = vld [vmem:[#allocation10 + $0x60] ss:$20 sps:$4 sm:$0xff]  }
0x10f4   : > { %v2734_v22 = vpop.xlane.xlu1 %2733 }
0x10f5   : > { %v2737_v23 = vmul.f32 0.0078125, %v2734_v22  ;;  %v2740_v24 = vmul.f32 %v17432_v21, %v17432_v21  ;;  %v14711_v22 = vld [vmem:[#allocation12 + $0x58] sm:$0xff]  }
0x10f7   : > { %2742 = vadd.xlane.f32.xlu1 %v2740_v24  ;;  %v17436_v25 = vsub.f32 %v2728_v8, %v2737_v23  ;;  %v14694_v23 = vld [vmem:[#allocation10 + $0x88] ss:$20 sps:$4 sm:$0xff]  }
0x10f8   : > { %v14712_v24 = vld [vmem:[#allocation12 + $0x18] sm:$0xff]  }
0x10f9   : > { %v2741_v26 = vmul.f32 %v17436_v25, %v17436_v25 }
0x10fb   : > { %2744 = vadd.xlane.f32.xlu1 %v2741_v26  ;;  %v14695_v26 = vld [vmem:[#allocation10 + $0xb0] ss:$20 sps:$4 sm:$0xff]  }
0x1184   : > { %v2743_v59 = vpop.xlane.xlu1 %2742 }
0x1185   : > { %v2746_v60 = vmul.f32 0.0078125, %v2743_v59  ;;  %v14730_v59 = vld [vmem:[#allocation12 + $0xb8] sm:$0xff]  }
0x1187   : > { %v2748_v61 = vadd.f32 1e-05, %v2746_v60  ;;  %v2819_v60 = vld [vmem:[%s18464_s1] sm:$0x1f] }
0x1188   : > { %v2745_v9 = vpop.xlane.xlu1 %2744 }
0x1189   : > { %15267 = vrsqrt.f32 %v2748_v61  ;;  %v2747_v62 = vmul.f32 0.0078125, %v2745_v9  ;;  %v17461_v61 = vsub.s32 3, %v17301_v50  ;;  %v2824_v9 = vrot.slane %v2819_v60, %v17304_v51 }
0x118b   : > { %v2749_v63 = vadd.f32 1e-05, %v2747_v62  ;;  %v2832_v62 = vrot.slane %v2819_v60, %v17307_v52 }
0x118d   : > { %15269 = vrsqrt.f32 %v2749_v63  ;;  %v2828_v63 = vrot.slane %v2819_v60, %v17310_v54 }
0x1193   : > { %v15268_v1 = vpop.eup %15267 }
0x1194   : > { %v2752_v2 = vmul.f32 %v15268_v1, %v17432_v21  ;;  %v14708_v21 = vld [vmem:[#allocation12 + $0x10] sm:$0xff]   ;;  %v2836_v1 = vrot.slane %v2819_v60, %v17461_v61 }
0x1196   : > { %v2760_v6 = vmul.f32 %v12328_v3, %v2752_v2 }
0x1197   : > { %v15270_v4 = vpop.eup %15269 }
0x1198   : > { %v2753_v5 = vmul.f32 %v15270_v4, %v17436_v25  ;;  %v17443_v11 = vadd.f32 %v12329_v7, %v2760_v6  ;;  %v14715_v25 = vld [vmem:[#allocation12 + $0x60] sm:$0xff]  }
0x119a   : > { %v2761_v8 = vmul.f32 %v12328_v3, %v2753_v5 }
0x119c   : > { %v17445_v12 = vadd.f32 %v12329_v7, %v2761_v8 }
0x119e   : > { %v2770_v14 = vpack.c.bf16 %v17445_v12, %v17443_v11 }
0x11a0   : > { %3087 = vmatmul.mubr.bf16.vlgmr.msra.gmra.mrb[16].mxu0 %v2770_v14  ;;  %3130 = vmatmul.mubr.bf16.vlgmr.msra.gmra.mrb[44].mxu1 %v2770_v14 }
0x11a1   : > { %13539 = vmatpush3.bf16.msra.mxu0 %v14691_v13  ;;  %13554 = vmatprep.mubr.msk.bf16.mxu0 %vm16491_vm0, %v16490_v0 }
0x11a2   : > { %13540 = vmatprep.subr.bf16.mxu0 %v16490_v0  ;;  %12986 = vmatpush3.bf16.msra.mxu1 %v14700_v15 }
0x11a3   : > { %12987 = vmatprep.subr.bf16.mxu1 %v14703_v16 }
0x11a5   : > { %13541 = vmatpush3.bf16.msra.mxu0 %v14692_v17 }
0x11a6   : > { %13542 = vmatprep.subr.bf16.mxu0 %v16490_v0  ;;  %12988 = vmatpush3.bf16.msra.mxu1 %v14704_v18 }
0x11a7   : > { %12989 = vmatprep.subr.bf16.mxu1 %v14707_v19 }
0x11a9   : > { %13543 = vmatpush3.bf16.msra.mxu0 %v14693_v20 }
0x11aa   : > { %13544 = vmatprep.subr.bf16.mxu0 %v16490_v0  ;;  %12990 = vmatpush3.bf16.msra.mxu1 %v14708_v21 }
0x11ab   : > { %12991 = vmatprep.subr.bf16.mxu1 %v14711_v22 }
0x11ad   : > { %13545 = vmatpush3.bf16.msra.mxu0 %v14694_v23 }
0x11ae   : > { %13546 = vmatprep.subr.bf16.mxu0 %v16490_v0  ;;  %12992 = vmatpush3.bf16.msra.mxu1 %v14712_v24 }
0x11af   : > { %12993 = vmatprep.subr.bf16.mxu1 %v14715_v25 }
0x11b1   : > { %13547 = vmatpush3.bf16.msra.mxu0 %v14695_v26 }
0x11b2   : > { %13548 = vmatprep.subr.bf16.mxu0 %v16490_v0  ;;  %12994 = vmatpush3.bf16.msra.mxu1 %v14716_v27 }
0x11b3   : > { %12995 = vmatprep.subr.bf16.mxu1 %v14719_v28 }
0x11b5   : > { %13549 = vmatpush3.bf16.msra.mxu0 %v14696_v29 }
0x11b6   : > { %13550 = vmatprep.subr.bf16.mxu0 %v16490_v0  ;;  %12996 = vmatpush3.bf16.msra.mxu1 %v14720_v30 }
0x11b7   : > { %12997 = vmatprep.subr.bf16.mxu1 %v14723_v53 }
0x11b9   : > { %13551 = vmatpush3.bf16.msra.mxu0 %v14697_v31 }
0x11ba   : > { %13552 = vmatprep.subr.bf16.mxu0 %v16490_v0  ;;  %12998 = vmatpush3.bf16.msra.mxu1 %v14724_v55 }
0x11bb   : > { %12999 = vmatprep.subr.bf16.mxu1 %v14727_v33  ;;  %v14738_v33 = vld [vmem:[#allocation12 + $0x138] sm:$0xff]  }
0x11bd   : > { %13553 = vmatpush3.bf16.msra.mxu0 %v14698_v32 }
0x11be   : > { %13007 = vmatprep.subr.bf16.mxu0 %v14701_v34  ;;  %13000 = vmatpush3.bf16.msra.mxu1 %v14728_v58 }
0x11bf   : > { %13558 = vmatprep.subr.bf16.mxu1 %v16490_v0 }
0x11c0   : > { %13555 = vmatmul.mubr.bf16.vlgmr.msra.gmra.mrb[20].mxu0 %v2770_v14 }
0x11c1   : > { %13008 = vmatpush3.bf16.msra.mxu0 %v14702_v35  ;;  %v14731_v35 = vld [vmem:[#allocation12 + $0x100] sm:$0xff]  }
0x11c2   : > { %13009 = vmatprep.subr.bf16.mxu0 %v14705_v38  ;;  %v14732_v38 = vld [vmem:[#allocation12 + $0x108] sm:$0xff]  }
0x11c5   : > { %13010 = vmatpush3.bf16.msra.mxu0 %v14706_v39  ;;  %v14733_v39 = vld [vmem:[#allocation12 + $0x110] sm:$0xff]  }
0x11c6   : > { %13011 = vmatprep.subr.bf16.mxu0 %v14709_v40  ;;  %v14734_v40 = vld [vmem:[#allocation12 + $0x118] sm:$0xff]  }
0x11c9   : > { %13012 = vmatpush3.bf16.msra.mxu0 %v14710_v41  ;;  %v14735_v41 = vld [vmem:[#allocation12 + $0x120] sm:$0xff]  }
0x11ca   : > { %13013 = vmatprep.subr.bf16.mxu0 %v14713_v42  ;;  %v17475_v42 = vsub.s32 4, %v17301_v50 }
0x11cd   : > { %13014 = vmatpush3.bf16.msra.mxu0 %v14714_v43  ;;  %v14736_v43 = vld [vmem:[#allocation12 + $0x128] sm:$0xff]  }
0x11ce   : > { %13015 = vmatprep.subr.bf16.mxu0 %v14717_v44  ;;  %v2840_v44 = vrot.slane %v2819_v60, %v17475_v42 }
0x11d1   : > { %13016 = vmatpush3.bf16.msra.mxu0 %v14718_v45 }
0x11d2   : > { %13017 = vmatprep.subr.bf16.mxu0 %v14721_v49  ;;  %v14737_v49 = vld [vmem:[#allocation12 + $0x130] sm:$0xff]  }
0x11d5   : > { %13018 = vmatpush3.bf16.msra.mxu0 %v14722_v10 }
0x11d6   : > { %13019 = vmatprep.subr.bf16.mxu0 %v14725_v56 }
0x11d9   : > { %13020 = vmatpush3.bf16.msra.mxu0 %v14726_v57 }
0x11da   : > { %13021 = vmatprep.subr.bf16.mxu0 %v14729_v37 }
0x11dd   : > { %13022 = vmatpush3.bf16.msra.mxu0 %v14730_v59 }
0x1273   : > { %v3088_v2 = vpop.f32.mrb[16].mxu0  ;;  %v3131_v3 = vpop.f32.mrb[44].mxu1 }
0x1274   : > { %v3089_v4 = vadd.f32 %v3088_v2, %v2824_v9  ;;  %v3132_v5 = vadd.f32 %v3131_v3, %v2832_v62  ;;  %v3090_v6 = vpop.f32.mrb[17].mxu0  ;;  %v3133_v7 = vpop.f32.mrb[45].mxu1 }
0x1275   : > { %v3091_v8 = vadd.f32 %v3090_v6, %v2828_v63  ;;  %v3134_v13 = vadd.f32 %v3133_v7, %v2836_v1  ;;  %v3092_v14 = vpop.f32.mrb[18].mxu0  ;;  %v3135_v15 = vpop.f32.mrb[46].mxu1 }
0x1276   : > { %v3093_v16 = vadd.f32 %v3092_v14, %v2824_v9  ;;  %v3136_v17 = vadd.f32 %v3135_v15, %v2832_v62  ;;  %v3094_v18 = vpop.f32.mrb[19].mxu0  ;;  %v3137_v19 = vpop.f32.mrb[47].mxu1  ;;  %v3181_v22 = vmax.f32 %v3089_v4, 0.0  ;;  %v3183_v23 = vmax.f32 %v3132_v5, 0.0  ;;  %v12370_v9 = vld [vmem:[#allocation13] ss:$0 sm:$0xff] }
0x1277   : > { %v3095_v20 = vadd.f32 %v3094_v18, %v2828_v63  ;;  %v3138_v21 = vadd.f32 %v3137_v19, %v2836_v1  ;;  %v3182_v26 = vmax.f32 %v3091_v8, 0.0  ;;  %v3184_v27 = vmax.f32 %v3134_v13, 0.0 }
0x1278   : > { %v3186_v24 = vmax.f32 %v3093_v16, 0.0  ;;  %v3188_v25 = vmax.f32 %v3136_v17, 0.0 }
0x1279   : > { %v3187_v28 = vmax.f32 %v3095_v20, 0.0  ;;  %v3189_v29 = vmax.f32 %v3138_v21, 0.0 }
0x127a   : > { %v3191_v30 = vpack.c.bf16 %v3186_v24, %v3181_v22  ;;  %v3193_v31 = vpack.c.bf16 %v3188_v25, %v3183_v23  ;;  %v14739_v25 = vld [vmem:[#allocation2 + $0xc0] ss:$12 sps:$4 sm:$0xff]  }
0x127b   : > { %v3192_v32 = vpack.c.bf16 %v3187_v28, %v3182_v26  ;;  %v3194_v34 = vpack.c.bf16 %v3189_v29, %v3184_v27  ;;  %v14741_v26 = vld [vmem:[#allocation2 + $0xc4] ss:$12 sps:$4 sm:$0xff]   ;;  %v14742_v27 = vld [vmem:[#allocation2 + $0xc8] ss:$12 sps:$4 sm:$0xff]  }
0x127c   : > { %v14745_v28 = vld [vmem:[#allocation2 + $0xdc] ss:$12 sps:$4 sm:$0xff]   ;;  %3868 = vmatprep.subr.bf16.mxu0 %v14741_v26  ;;  %v14743_v29 = vld [vmem:[#allocation2 + $0xd8] ss:$12 sps:$4 sm:$0xff]  }
0x127d   : > { %3555 = vmatprep.mubr.bf16.mxu1 %v3192_v32  ;;  %3596 = vmatprep.mubr.bf16.mxu0 %v3194_v34 }
0x127e   : > { %3556 = vmatmul.mubr.bf16.vlgmr.msra.gmra.mrb[48].mxu1 %v3191_v30  ;;  %3597 = vmatmul.mubr.bf16.vlgmr.msra.gmra.mrb[24].mxu0 %v3193_v31 }
0x127f   : > { %13559 = vmatpush3.bf16.msra.mxu1 %v14731_v35  ;;  %13574 = vmatprep.mubr.msk.bf16.mxu1 %vm16491_vm0, %v16490_v0 }
0x1280   : > { %13560 = vmatprep.subr.bf16.mxu1 %v16490_v0  ;;  %3900 = vmatprep.mubr.bf16.mxu0 %v16492_v36 }
0x1281   : > { %3869 = vmatpush1.bf16.msra.mxu0 %v14739_v25 }
0x1282   : > { %3870 = vmatprep.subr.bf16.mxu0 %v14745_v28 }
0x1283   : > { %13561 = vmatpush3.bf16.msra.mxu1 %v14732_v38 }
0x1284   : > { %13562 = vmatprep.subr.bf16.mxu1 %v16490_v0 }
0x1285   : > { %3871 = vmatpush1.bf16.msra.mxu0 %v14743_v29 }
0x1287   : > { %13563 = vmatpush3.bf16.msra.mxu1 %v14733_v39  ;;  %v14746_v39 = vld [vmem:[#allocation2 + $0xe0] ss:$12 sps:$4 sm:$0xff]  }
0x1288   : > { %13564 = vmatprep.subr.bf16.mxu1 %v16490_v0 }
0x128b   : > { %13565 = vmatpush3.bf16.msra.mxu1 %v14734_v40  ;;  %v14749_v40 = vld [vmem:[#allocation2 + $0xf4] ss:$12 sps:$4 sm:$0xff]  }
0x128c   : > { %13566 = vmatprep.subr.bf16.mxu1 %v16490_v0  ;;  %3872 = vmatprep.subr.bf16.mxu0 %v14749_v40 }
0x128f   : > { %13567 = vmatpush3.bf16.msra.mxu1 %v14735_v41  ;;  %v14747_v41 = vld [vmem:[#allocation2 + $0xf0] ss:$12 sps:$4 sm:$0xff]  }
0x1290   : > { %13568 = vmatprep.subr.bf16.mxu1 %v16490_v0  ;;  %3873 = vmatpush1.bf16.msra.mxu0 %v14747_v41 }
0x1293   : > { %v3174_v45 = vpop.f32.mrb[20].mxu0  ;;  %13569 = vmatpush3.bf16.msra.mxu1 %v14736_v43  ;;  %v14750_v43 = vld [vmem:[#allocation2 + $0xf8] ss:$12 sps:$4 sm:$0xff]  }
0x1294   : > { %v3175_v10 = vadd.f32 %v3174_v45, %v2840_v44  ;;  %v13556_v53 = vpop.f32.mrb[21].mxu0  ;;  %13570 = vmatprep.subr.bf16.mxu1 %v16490_v0  ;;  %v14751_v45 = vld [vmem:[#allocation2 + $0x108] ss:$12 sps:$4 sm:$0xff]  }
0x1295   : > { %v3177_v55 = vpop.f32.mrb[22].mxu0  ;;  %v14757_v53 = vld [vmem:[#allocation2 + $0x124] ss:$12 sps:$4 sm:$0xff]  }
0x1296   : > { %v3178_v56 = vadd.f32 %v3177_v55, %v2840_v44  ;;  %v13557_v57 = vpop.f32.mrb[23].mxu0  ;;  %v3185_v50 = vmax.f32 %v3175_v10, 0.0  ;;  %v14753_v44 = vld [vmem:[#allocation2 + $0x10c] ss:$12 sps:$4 sm:$0xff]   ;;  %v14758_v55 = vld [vmem:[#allocation2 + $0x128] ss:$12 sps:$4 sm:$0xff]  }
0x1297   : > { %13571 = vmatpush3.bf16.msra.mxu1 %v14737_v49  ;;  %v14754_v49 = vld [vmem:[#allocation2 + $0x110] ss:$12 sps:$4 sm:$0xff]   ;;  %3874 = vmatprep.subr.bf16.mxu0 %v14753_v44  ;;  %v14755_v10 = vld [vmem:[#allocation2 + $0x120] ss:$12 sps:$4 sm:$0xff]   ;;  %v14759_v57 = vld [vmem:[#allocation2 + $0x138] ss:$12 sps:$4 sm:$0xff]  }
0x1298   : > { %v3190_v58 = vmax.f32 %v3178_v56, 0.0  ;;  %13572 = vmatprep.subr.bf16.mxu1 %v16490_v0  ;;  %3875 = vmatpush1.bf16.msra.mxu0 %v14751_v45  ;;  %v14761_v56 = vld [vmem:[#allocation2 + $0x13c] ss:$12 sps:$4 sm:$0xff]  }
0x1299   : > { %3876 = vmatprep.subr.bf16.mxu0 %v14757_v53 }
0x129a   : > { %v3195_v37 = vpack.c.bf16 %v3190_v58, %v3185_v50  ;;  %v14765_v50 = vld [vmem:[#allocation2 + $0x154] ss:$12 sps:$4 sm:$0xff]   ;;  %v14763_v58 = vld [vmem:[#allocation2 + $0x150] ss:$12 sps:$4 sm:$0xff]  }
0x129b   : > { %13573 = vmatpush3.bf16.msra.mxu1 %v14738_v33  ;;  %v14762_v33 = vld [vmem:[#allocation2 + $0x140] ss:$12 sps:$4 sm:$0xff]  }
0x129c   : > { %13578 = vmatprep.subr.bf16.mxu1 %v16490_v0  ;;  %3877 = vmatpush1.bf16.msra.mxu0 %v14755_v10 }
0x129d   : > { %3878 = vmatprep.subr.bf16.mxu0 %v14761_v56 }
0x129e   : > { %13575 = vmatmul.mubr.bf16.vlgmr.msra.gmra.mrb[52].mxu1 %v3195_v37  ;;  %v14766_v37 = vld [vmem:[#allocation2 + $0x158] ss:$12 sps:$4 sm:$0xff]  }
0x129f   : > { %13594 = vmatprep.mubr.msk.bf16.mxu1 %vm16491_vm0, %v16490_v0  ;;  %13579 = vmatpush3.bf16.msra.mxu1 %v14742_v27 }
0x12a0   : > { %13580 = vmatprep.subr.bf16.mxu1 %v16490_v0  ;;  %3879 = vmatpush1.bf16.msra.mxu0 %v14759_v57 }
0x12a1   : > { %3880 = vmatprep.subr.bf16.mxu0 %v14765_v50 }
0x12a3   : > { %13581 = vmatpush3.bf16.msra.mxu1 %v14746_v39 }
0x12a4   : > { %13582 = vmatprep.subr.bf16.mxu1 %v16490_v0  ;;  %3881 = vmatpush1.bf16.msra.mxu0 %v14763_v58 }
0x12a7   : > { %13583 = vmatpush3.bf16.msra.mxu1 %v14750_v43 }
0x12a8   : > { %13584 = vmatprep.subr.bf16.mxu1 %v16490_v0 }
0x12ab   : > { %13585 = vmatpush3.bf16.msra.mxu1 %v14754_v49 }
0x12ac   : > { %13586 = vmatprep.subr.bf16.mxu1 %v16490_v0 }
0x12af   : > { %13587 = vmatpush3.bf16.msra.mxu1 %v14758_v55 }
0x12b0   : > { %13588 = vmatprep.subr.bf16.mxu1 %v16490_v0 }
0x12b3   : > { %13589 = vmatpush3.bf16.msra.mxu1 %v14762_v33 }
0x12b4   : > { %13590 = vmatprep.subr.bf16.mxu1 %v16490_v0 }
0x12b7   : > { %13591 = vmatpush3.bf16.msra.mxu1 %v14766_v37 }
0x12b8   : > { %13592 = vmatprep.subr.bf16.mxu1 %v16490_v0 }
0x1351   : > { %v13001_v59 = vpop.f32.mrb[48].mxu1  ;;  %v13023_v60 = vpop.f32.mrb[24].mxu0 }
0x1352   : > { %v13002_v62 = vpop.f32.mrb[49].mxu1  ;;  %v13024_v63 = vpop.f32.mrb[25].mxu0 }
0x1353   : > { %v13003_v1 = vadd.f32 %v13002_v62, %v13001_v59  ;;  %v13025_v2 = vadd.f32 %v13024_v63, %v13023_v60  ;;  %v13004_v3 = vpop.f32.mrb[50].mxu1  ;;  %v13026_v4 = vpop.f32.mrb[26].mxu0  ;;  %v14769_v59 = vld [vmem:[#allocation2 + $0x16c] ss:$12 sps:$4 sm:$0xff]   ;;  %v14767_v60 = vld [vmem:[#allocation2 + $0x168] ss:$12 sps:$4 sm:$0xff]  }
0x1354   : > { %v13005_v5 = vpop.f32.mrb[51].mxu1  ;;  %v13027_v6 = vpop.f32.mrb[27].mxu0  ;;  %3882 = vmatprep.subr.bf16.mxu0 %v14769_v59 }
0x1355   : > { %v3558_v7 = vadd.f32 %v13003_v1, %v12370_v9  ;;  %v13006_v8 = vadd.f32 %v13005_v5, %v13004_v3  ;;  %v13028_v13 = vadd.f32 %v13027_v6, %v13026_v4  ;;  %3883 = vmatpush1.bf16.msra.mxu0 %v14767_v60 }
0x1356   : > { %13598 = vmatprep.subr.bf16.mxu0 %v16490_v0 }
0x1357   : > { %v3561_v14 = vadd.f32 %v13006_v8, %v12370_v9  ;;  %v3599_v15 = vadd.f32 %v13025_v2, %v3558_v7  ;;  %v14770_v9 = vld [vmem:[#allocation2 + $0x170] ss:$12 sps:$4 sm:$0xff]   ;;  %v12411_v7 = vld [vmem:[#allocation15] ss:$0 sm:$0xff] }
0x1358   : > { %13593 = vmatpush3.bf16.msra.mxu1 %v14770_v9 }
0x1359   : > { %v3602_v16 = vadd.f32 %v13028_v13, %v3561_v14  ;;  %13604 = vmatprep.subr.bf16.mxu1 %v16490_v0 }
0x1371   : > { %v3639_v17 = vpop.f32.mrb[52].mxu1 }
0x1372   : > { %v3640_v18 = vadd.f32 %v3639_v17, %v3599_v15  ;;  %v13576_v19 = vpop.f32.mrb[53].mxu1  ;;  %v12412_v15 = vld [vmem:[#allocation16] ss:$0 sm:$0xff] }
0x1373   : > { %v3642_v20 = vpop.f32.mrb[54].mxu1 }
0x1374   : > { %v3643_v21 = vadd.f32 %v3642_v20, %v3602_v16  ;;  %v13577_v22 = vpop.f32.mrb[55].mxu1  ;;  %v3646_v23 = vadd.f32 %v3640_v18, %v17443_v11  ;;  %v3723_v20 = vld [vmem:[#allocation4 + $0x3] sm:$0x7] }
0x1375   : > { %v3736_v22 = vrot.slane %v3723_v20, %v17307_v52  ;;  %v3732_v25 = vrot.slane %v3723_v20, %v17310_v54 }
0x1376   : > { %3650 = vadd.xlane.f32.xlu1 %v3646_v23  ;;  %v3647_v24 = vadd.f32 %v3643_v21, %v17445_v12  ;;  %v3728_v21 = vrot.slane %v3723_v20, %v17304_v51 }
0x137a   : > { %3652 = vadd.xlane.f32.xlu1 %v3647_v24 }
0x1403   : > { %v3651_v30 = vpop.xlane.xlu1 %3650 }
0x1404   : > { %v3654_v31 = vmul.f32 0.0078125, %v3651_v30 }
0x1406   : > { %v17487_v32 = vsub.f32 %v3646_v23, %v3654_v31 }
0x1407   : > { %v3653_v11 = vpop.xlane.xlu1 %3652 }
0x1408   : > { %v3655_v34 = vmul.f32 0.0078125, %v3653_v11  ;;  %v3658_v12 = vmul.f32 %v17487_v32, %v17487_v32 }
0x140a   : > { %3660 = vadd.xlane.f32.xlu0 %v3658_v12  ;;  %v3657_v35 = vsub.f32 %v3647_v24, %v3655_v34 }
0x140c   : > { %v3659_v38 = vmul.f32 %v3657_v35, %v3657_v35 }
0x140e   : > { %3662 = vadd.xlane.f32.xlu1 %v3659_v38 }
0x1497   : > { %v3661_v62 = vpop.xlane.xlu0 %3660 }
0x1498   : > { %v3664_v63 = vmul.f32 0.0078125, %v3661_v62 }
0x149a   : > { %v3666_v1 = vadd.f32 1e-05, %v3664_v63 }
0x149b   : > { %v3663_v2 = vpop.xlane.xlu1 %3662 }
0x149c   : > { %15271 = vrsqrt.f32 %v3666_v1  ;;  %v3665_v3 = vmul.f32 0.0078125, %v3663_v2 }
0x149e   : > { %v3667_v4 = vadd.f32 1e-05, %v3665_v3 }
0x14a0   : > { %15273 = vrsqrt.f32 %v3667_v4 }
0x14a6   : > { %v15272_v5 = vpop.eup %15271 }
0x14a7   : > { %v3670_v6 = vmul.f32 %v15272_v5, %v17487_v32 }
0x14a9   : > { %v3678_v14 = vmul.f32 %v12411_v7, %v3670_v6 }
0x14aa   : > { %v15274_v8 = vpop.eup %15273 }
0x14ab   : > { %v3671_v13 = vmul.f32 %v15274_v8, %v3657_v35  ;;  %v17500_v17 = vadd.f32 %v12412_v15, %v3678_v14 }
0x14ad   : > { %v3679_v16 = vmul.f32 %v12411_v7, %v3671_v13 }
0x14af   : > { %v17502_v18 = vadd.f32 %v12412_v15, %v3679_v16 }
0x14b1   : > { %v3688_v19 = vpack.c.bf16 %v17502_v18, %v17500_v17 }
0x14b3   : > { %3901 = vmatmul.mubr.bf16.vlgmr.msra.gmra.mrb[28].mxu0 %v3688_v19  ;;  %13595 = vmatmul.mubr.bf16.vlgmr.msra.gmra.mrb[56].mxu1 %v3688_v19 }
0x14b4   : > { %13600 = vmatprep.mubr.msk.bf16.mxu0 %vm16491_vm0, %v16490_v0  ;;  %13606 = vmatprep.mubr.msk.bf16.mxu1 %vm16491_vm0, %v16490_v0 }
0x1586   : > { %v3902_v23 = vpop.f32.mrb[28].mxu0  ;;  %v3945_v24 = vpop.f32.mrb[56].mxu1 }
0x1587   : > { %v3904_v26 = vpop.f32.mrb[29].mxu0  ;;  %v13596_v27 = vpop.f32.mrb[57].mxu1  ;;  %v3903_v30 = vadd.f32 %v3902_v23, %v3728_v21  ;;  %v3946_v31 = vadd.f32 %v3945_v24, %v3736_v22 }
0x1588   : > { %v3906_v28 = vpop.f32.mrb[30].mxu0  ;;  %v3948_v29 = vpop.f32.mrb[58].mxu1  ;;  %v3905_v35 = vadd.f32 %v3904_v26, %v3732_v25 }
0x1589   : > { %v3907_v32 = vadd.f32 %v3906_v28, %v3728_v21  ;;  %v3949_v11 = vadd.f32 %v3948_v29, %v3736_v22  ;;  %v3908_v34 = vpop.f32.mrb[31].mxu0  ;;  %v13597_v12 = vpop.f32.mrb[59].mxu1 }
0x158a   : > { %v3909_v38 = vadd.f32 %v3908_v34, %v3732_v25 }
0x158b   : > { %v17513_v39 = vpack.c.bf16 %v3907_v32, %v3903_v30  ;;  %v17515_v40 = vpack.c.bf16 %v3949_v11, %v3946_v31  ;;  %v14773_v32 = vld [vmem:[%s18463_s11 + $0x50] sm:$0xff]   ;;  %v14774_v11 = vld [vmem:[%s18463_s11 + $0x58] sm:$0xff]  }
0x158c   : > { %v17517_v41 = vpack.c.bf16 %v3909_v38, %v3905_v35 }
0x158d   : > { %13605 = vmatpush3.bf16.msra.mxu1 %v17515_v40 }
0x158e   : > { %4091 = vrot.lane.b32.xlu1 %v17517_v41, %s16493_s9  ;;  %v3976_v43 = vsel %vm2004_vm1, %v17517_v41, 0  ;;  %13616 = vmatprep.subr.bf16.mxu1 %v16490_v0 }
0x158f   : > { %13599 = vmatpush3.bf16.xpose.msra.mxu0 %v3976_v43 }
0x1590   : > { %13610 = vmatprep.subr.bf16.mxu0 %v16490_v0 }
0x1592   : > { %4088 = vrot.lane.b32.xlu1 %v17513_v39, %s16493_s9 }
0x1596   : > { %13601 = vmatmul.mubr.msk.bf16.vlgmr.msra.gmra.mrb[32].mxu0 %vm2004_vm1, %v17513_v39 }
0x1597   : > { %13612 = vmatprep.mubr.msk.bf16.mxu0 %vm16491_vm0, %v16490_v0 }
0x1600   : > { %v4092_v44 = vpop.permute.xlu1 %4091 }
0x1601   : > { %v4097_v45 = vsel %vm2004_vm1, %v4092_v44, 0 }
0x1602   : > { %13611 = vmatpush3.bf16.xpose.msra.mxu0 %v4097_v45 }
0x1603   : > { %13622 = vmatprep.subr.bf16.mxu0 %v16490_v0 }
0x1604   : > { %v4089_v49 = vpop.permute.xlu1 %4088 }
0x1609   : > { %13613 = vmatmul.mubr.msk.bf16.vlgmr.msra.gmra.mrb[36].mxu0 %vm2004_vm1, %v4089_v49  ;;  %v14771_v49 = vld [vmem:[%s18463_s11 + $0x40] sm:$0xff]  }
0x160a   : > { %13626 = vmatprep.mubr.msk.bf16.mxu0 %vm16491_vm0, %v16490_v0  ;;  %13623 = vmatpush3.bf16.msra.mxu0 %v14773_v32 }
0x160b   : > { %13624 = vmatprep.subr.bf16.mxu0 %v16490_v0 }
0x160e   : > { %13625 = vmatpush3.bf16.msra.mxu0 %v14774_v11 }
0x160f   : > { %13638 = vmatprep.subr.bf16.mxu0 %v16490_v0 }
0x1669   : > { %v4012_v10 = vpop.f32.mrb[32].mxu0 }
0x166a   : > { %v13602_v53 = vpop.f32.mrb[33].mxu0  ;;  %v4019_v55 = vsel %vm2052_vm2, %v4012_v10, -inf }
0x166b   : > { %4020 = vmax.xlane.f32.xlu1 %v4019_v55  ;;  %v4015_v56 = vpop.f32.mrb[34].mxu0  ;;  %v14772_v53 = vld [vmem:[%s18463_s11 + $0x48] sm:$0xff]  }
0x166c   : > { %v13603_v57 = vpop.f32.mrb[35].mxu0  ;;  %v4022_v33 = vsel %vm2052_vm2, %v4015_v56, -inf }
0x166d   : > { %4023 = vmax.xlane.f32.xlu0 %v4022_v33 }
0x167c   : > { %4326 = vrot.lane.b32.xlu1 %v17517_v41, %s16494_s6 }
0x1680   : > { %4324 = vrot.lane.b32.xlu1 %v17513_v39, %s16494_s6 }
0x16dc   : > { %v4133_v50 = vpop.f32.mrb[36].mxu0 }
0x16dd   : > { %v13614_v58 = vpop.f32.mrb[37].mxu0  ;;  %v4140_v37 = vsel %vm2052_vm2, %v4133_v50, -inf }
0x16de   : > { %4141 = vmax.xlane.f32.xlu0 %v4140_v37  ;;  %v4136_v59 = vpop.f32.mrb[38].mxu0 }
0x16df   : > { %v13615_v60 = vpop.f32.mrb[39].mxu0  ;;  %v4143_v9 = vsel %vm2052_vm2, %v4136_v59, -inf }
0x16e2   : > { %4144 = vmax.xlane.f32.xlu0 %v4143_v9 }
0x16f8   : > { %v4021_v62 = vpop.xlane.xlu1 %4020 }
0x16f9   : > { %v4025_v63 = vsub.f32 %v4012_v10, %v4021_v62 }
0x16fa   : > { %v4024_v1 = vpop.xlane.xlu0 %4023 }
0x16fb   : > { %v4027_v2 = vmul.f32 1.442695, %v4025_v63  ;;  %v4026_v3 = vsub.f32 %v4015_v56, %v4024_v1 }
0x16fd   : > { %15275 = vpow2.f32 %v4027_v2  ;;  %v4029_v4 = vmul.f32 1.442695, %v4026_v3 }
0x16ff   : > { %15277 = vpow2.f32 %v4029_v4 }
0x1707   : > { %v15276_v5 = vpop.eup %15275 }
0x1708   : > { %v4031_v6 = vsel %vm2052_vm2, %v15276_v5, 0.0 }
0x1709   : > { %v15278_v7 = vpop.eup %15277  ;;  %4032 = vadd.xlane.f32.xlu0 %v4031_v6 }
0x170a   : > { %v4034_v8 = vsel %vm2052_vm2, %v15278_v7, 0.0 }
0x170d   : > { %4035 = vadd.xlane.f32.xlu0 %v4034_v8 }
0x176b   : > { %v4142_v13 = vpop.xlane.xlu0 %4141 }
0x176c   : > { %v4146_v14 = vsub.f32 %v4133_v50, %v4142_v13 }
0x176e   : > { %v4148_v15 = vmul.f32 1.442695, %v4146_v14 }
0x176f   : > { %v4145_v16 = vpop.xlane.xlu0 %4144 }
0x1770   : > { %15279 = vpow2.f32 %v4148_v15  ;;  %v4147_v19 = vsub.f32 %v4136_v59, %v4145_v16  ;;  %v4327_v59 = vpop.permute.xlu1 %4326 }
0x1771   : > { %v4332_v63 = vsel %vm2004_vm1, %v4327_v59, 0 }
0x1772   : > { %v4150_v20 = vmul.f32 1.442695, %v4147_v19 }
0x1774   : > { %15281 = vpow2.f32 %v4150_v20  ;;  %v4325_v1 = vpop.permute.xlu1 %4324 }
0x177a   : > { %v15280_v21 = vpop.eup %15279 }
0x177b   : > { %v4152_v22 = vsel %vm2052_vm2, %v15280_v21, 0.0 }
0x177c   : > { %4153 = vadd.xlane.f32.xlu0 %v4152_v22 }
0x177e   : > { %v15282_v23 = vpop.eup %15281 }
0x177f   : > { %v4155_v24 = vsel %vm2052_vm2, %v15282_v23, 0.0 }
0x1780   : > { %4156 = vadd.xlane.f32.xlu0 %v4155_v24 }
0x1796   : > { %4164 = vrot.lane.b32.xlu0 %v17515_v40, %s16493_s9  ;;  %v4033_v25 = vpop.xlane.xlu0 %4032 }
0x1797   : > { %15283 = vrcp.f32 %v4033_v25 }
0x179a   : > { %v4036_v26 = vpop.xlane.xlu0 %4035 }
0x179b   : > { %15285 = vrcp.f32 %v4036_v26 }
0x17a1   : > { %v15284_v27 = vpop.eup %15283 }
0x17a2   : > { %v4039_v29 = vmul.f32 %v15284_v27, %v15276_v5 }
0x17a5   : > { %v15286_v28 = vpop.eup %15285 }
0x17a6   : > { %v4040_v30 = vmul.f32 %v15286_v28, %v15278_v7 }
0x17a8   : > { %v4041_v31 = vpack.c.bf16 %v4040_v30, %v4039_v29 }
0x17aa   : > { %13607 = vmatmul.mubr.msk.bf16.vlgmr.msra.gmra.mrb[60].mxu1 %vm2052_vm2, %v4041_v31 }
0x17ab   : > { %13618 = vmatprep.mubr.msk.bf16.mxu1 %vm16491_vm0, %v16490_v0 }
0x1809   : > { %v4154_v34 = vpop.xlane.xlu0 %4153 }
0x180a   : > { %15287 = vrcp.f32 %v4154_v34 }
0x180d   : > { %v4157_v12 = vpop.xlane.xlu0 %4156 }
0x180e   : > { %15289 = vrcp.f32 %v4157_v12 }
0x1811   : > { %v4165_v35 = vpop.permute.xlu0 %4164 }
0x1812   : > { %13617 = vmatpush3.bf16.msra.mxu1 %v4165_v35 }
0x1813   : > { %13630 = vmatprep.subr.bf16.mxu1 %v16490_v0 }
0x1814   : > { %v15288_v38 = vpop.eup %15287 }
0x1815   : > { %v4160_v44 = vmul.f32 %v15288_v38, %v15280_v21 }
0x1818   : > { %v15290_v43 = vpop.eup %15289 }
0x1819   : > { %v4161_v45 = vmul.f32 %v15290_v43, %v15282_v23 }
0x181b   : > { %v4162_v10 = vpack.c.bf16 %v4161_v45, %v4160_v44 }
0x181d   : > { %13619 = vmatmul.mubr.msk.bf16.vlgmr.msra.gmra.mrb[64].mxu1 %vm2052_vm2, %v4162_v10 }
0x181e   : > { %13631 = vmatpush3.bf16.msra.mxu1 %v14771_v49  ;;  %13634 = vmatprep.mubr.msk.bf16.mxu1 %vm16491_vm0, %v16490_v0 }
0x181f   : > { %13632 = vmatprep.subr.bf16.mxu1 %v16490_v0 }
0x1822   : > { %13633 = vmatpush3.bf16.msra.mxu1 %v14772_v53 }
0x1823   : > { %13644 = vmatprep.subr.bf16.mxu1 %v16490_v0 }
0x187d   : > { %v4079_v55 = vpop.f32.mrb[60].mxu1 }
0x187e   : > { %v13608_v56 = vpop.f32.mrb[61].mxu1 }
0x187f   : > { %v4082_v57 = vpop.f32.mrb[62].mxu1 }
0x1880   : > { %v4086_v33 = vpack.c.bf16 %v4082_v57, %v4079_v55  ;;  %v13609_v50 = vpop.f32.mrb[63].mxu1  ;;  %v14776_v55 = vld [vmem:[%s18463_s11 + $0x68] sm:$0xff]  }
0x1882   : > { %13635 = vmatmul.mubr.msk.bf16.vlgmr.msra.gmra.mrb[68].mxu1 %vm2004_vm1, %v4086_v33 }
0x1883   : > { %13646 = vmatprep.mubr.msk.bf16.mxu1 %vm16491_vm0, %v16490_v0 }
0x18f0   : > { %v4204_v58 = vpop.f32.mrb[64].mxu1 }
0x18f1   : > { %v13620_v37 = vpop.f32.mrb[65].mxu1 }
0x18f2   : > { %v4207_v60 = vpop.f32.mrb[66].mxu1 }
0x18f3   : > { %v4211_v9 = vpack.c.bf16 %v4207_v60, %v4204_v58  ;;  %v13621_v62 = vpop.f32.mrb[67].mxu1 }
0x18f5   : > { %13627 = vmatmul.mubr.msk.bf16.vlgmr.msra.gmra.mrb[40].mxu0 %vm2004_vm1, %v4211_v9 }
0x18f6   : > { %13639 = vmatpush3.bf16.xpose.msra.mxu0 %v4332_v63  ;;  %13640 = vmatprep.mubr.msk.bf16.mxu0 %vm16491_vm0, %v16490_v0 }
0x18f7   : > { %13650 = vmatprep.subr.bf16.mxu0 %v16490_v0 }
0x18fd   : > { %13641 = vmatmul.mubr.msk.bf16.vlgmr.msra.gmra.mrb[44].mxu0 %vm2004_vm1, %v4325_v1 }
0x18fe   : > { %13654 = vmatprep.mubr.msk.bf16.mxu0 %vm16491_vm0, %v16490_v0 }
0x1955   : > { %v4317_v2 = vpop.f32.mrb[68].mxu1 }
0x1956   : > { %v13636_v3 = vpop.f32.mrb[69].mxu1 }
0x1957   : > { %v4320_v4 = vpop.f32.mrb[70].mxu1 }
0x1958   : > { %v13637_v5 = vpop.f32.mrb[71].mxu1 }
0x19c8   : > { %v4261_v6 = vpop.f32.mrb[40].mxu0 }
0x19c9   : > { %v17577_v7 = vadd.f32 %v4317_v2, %v4261_v6  ;;  %v13628_v8 = vpop.f32.mrb[41].mxu0 }
0x19ca   : > { %v4264_v13 = vpop.f32.mrb[42].mxu0 }
0x19cb   : > { %v17579_v14 = vadd.f32 %v4320_v4, %v4264_v13  ;;  %v13629_v15 = vpop.f32.mrb[43].mxu0 }
0x19d0   : > { %v4368_v16 = vpop.f32.mrb[44].mxu0 }
0x19d1   : > { %v13642_v19 = vpop.f32.mrb[45].mxu0  ;;  %v4375_v20 = vsel %vm2052_vm2, %v4368_v16, -inf }
0x19d2   : > { %4376 = vmax.xlane.f32.xlu0 %v4375_v20  ;;  %v4371_v21 = vpop.f32.mrb[46].mxu0 }
0x19d3   : > { %v13643_v22 = vpop.f32.mrb[47].mxu0  ;;  %v4378_v23 = vsel %vm2052_vm2, %v4371_v21, -inf }
0x19d4   : > { %4379 = vmax.xlane.f32.xlu1 %v4378_v23 }
0x19e5   : > { %4506 = vrot.lane.b32.xlu1 %v17517_v41, %s16495_s28 }
0x19e9   : > { %4504 = vrot.lane.b32.xlu1 %v17513_v39, %s16495_s28  ;;  %v14775_v39 = vld [vmem:[%s18463_s11 + $0x60] sm:$0xff]  }
0x19ea   : > { %13651 = vmatpush3.bf16.msra.mxu0 %v14775_v39 }
0x19eb   : > { %13652 = vmatprep.subr.bf16.mxu0 %v16490_v0 }
0x19ee   : > { %13653 = vmatpush3.bf16.msra.mxu0 %v14776_v55 }
0x19ef   : > { %13664 = vmatprep.subr.bf16.mxu0 %v16490_v0 }
0x1a5f   : > { %v4377_v24 = vpop.xlane.xlu0 %4376 }
0x1a60   : > { %v4381_v25 = vsub.f32 %v4368_v16, %v4377_v24 }
0x1a61   : > { %v4380_v26 = vpop.xlane.xlu1 %4379 }
0x1a62   : > { %v4383_v27 = vmul.f32 1.442695, %v4381_v25  ;;  %v4382_v28 = vsub.f32 %v4371_v21, %v4380_v26 }
0x1a64   : > { %15291 = vpow2.f32 %v4383_v27  ;;  %v4385_v29 = vmul.f32 1.442695, %v4382_v28 }
0x1a65   : > { %v4507_v45 = vpop.permute.xlu1 %4506 }
0x1a66   : > { %15293 = vpow2.f32 %v4385_v29  ;;  %v4512_v10 = vsel %vm2004_vm1, %v4507_v45, 0 }
0x1a69   : > { %v4505_v53 = vpop.permute.xlu1 %4504 }
0x1a6e   : > { %v15292_v30 = vpop.eup %15291 }
0x1a6f   : > { %v4387_v31 = vsel %vm2052_vm2, %v15292_v30, 0.0 }
0x1a70   : > { %v15294_v32 = vpop.eup %15293  ;;  %4388 = vadd.xlane.f32.xlu0 %v4387_v31 }
0x1a71   : > { %v4390_v11 = vsel %vm2052_vm2, %v15294_v32, 0.0 }
0x1a74   : > { %4391 = vadd.xlane.f32.xlu0 %v4390_v11 }
0x1a8a   : > { %4398 = vrot.lane.b32.xlu0 %v17515_v40, %s16494_s6 }
0x1afd   : > { %v4389_v41 = vpop.xlane.xlu0 %4388 }
0x1afe   : > { %15295 = vrcp.f32 %v4389_v41 }
0x1b01   : > { %v4392_v34 = vpop.xlane.xlu0 %4391 }
0x1b02   : > { %15297 = vrcp.f32 %v4392_v34 }
0x1b05   : > { %v4399_v12 = vpop.permute.xlu0 %4398 }
0x1b06   : > { %13645 = vmatpush3.bf16.msra.mxu1 %v4399_v12 }
0x1b07   : > { %13658 = vmatprep.subr.bf16.mxu1 %v16490_v0 }
0x1b08   : > { %v15296_v35 = vpop.eup %15295 }
0x1b09   : > { %v4395_v43 = vmul.f32 %v15296_v35, %v15292_v30  ;;  %v12473_v35 = vld [vmem:[#allocation6 + $0x1] ss:$0 sm:$0xff] }
0x1b0c   : > { %v15298_v38 = vpop.eup %15297 }
0x1b0d   : > { %v4396_v44 = vmul.f32 %v15298_v38, %v15294_v32 }
0x1b0f   : > { %v4397_v49 = vpack.c.bf16 %v4396_v44, %v4395_v43 }
0x1b11   : > { %13647 = vmatmul.mubr.msk.bf16.vlgmr.msra.gmra.mrb[72].mxu1 %vm2052_vm2, %v4397_v49 }
0x1b12   : > { %13659 = vmatpush3.bf16.xpose.msra.mxu1 %v4512_v10  ;;  %13660 = vmatprep.mubr.msk.bf16.mxu1 %vm16491_vm0, %v16490_v0 }
0x1b13   : > { %13670 = vmatprep.subr.bf16.mxu1 %v16490_v0 }
0x1b19   : > { %13661 = vmatmul.mubr.msk.bf16.vlgmr.msra.gmra.mrb[76].mxu1 %vm2004_vm1, %v4505_v53 }
0x1b1a   : > { %13674 = vmatprep.mubr.msk.bf16.mxu1 %vm16491_vm0, %v16490_v0 }
0x1be4   : > { %v4438_v56 = vpop.f32.mrb[72].mxu1 }
0x1be5   : > { %v13648_v57 = vpop.f32.mrb[73].mxu1 }
0x1be6   : > { %v4441_v33 = vpop.f32.mrb[74].mxu1  ;;  %v14779_v57 = vld [vmem:[#allocation10 + $0x140] ss:$20 sps:$4 sm:$0xff]  }
0x1be7   : > { %v4445_v50 = vpack.c.bf16 %v4441_v33, %v4438_v56  ;;  %v13649_v58 = vpop.f32.mrb[75].mxu1  ;;  %v14781_v33 = vld [vmem:[#allocation10 + $0x144] ss:$20 sps:$4 sm:$0xff]  }
0x1be8   : > { %v14784_v58 = vld [vmem:[#allocation10 + $0x14c] ss:$20 sps:$4 sm:$0xff]  }
0x1be9   : > { %13655 = vmatmul.mubr.msk.bf16.vlgmr.msra.gmra.mrb[48].mxu0 %vm2004_vm1, %v4445_v50  ;;  %v14782_v50 = vld [vmem:[#allocation10 + $0x148] ss:$20 sps:$4 sm:$0xff]  }
0x1bea   : > { %13666 = vmatprep.mubr.msk.bf16.mxu0 %vm16491_vm0, %v16490_v0 }
0x1bec   : > { %v4548_v37 = vpop.f32.mrb[76].mxu1 }
0x1bed   : > { %v13662_v59 = vpop.f32.mrb[77].mxu1  ;;  %v4555_v60 = vsel %vm2052_vm2, %v4548_v37, -inf }
0x1bee   : > { %4556 = vmax.xlane.f32.xlu1 %v4555_v60  ;;  %v4551_v9 = vpop.f32.mrb[78].mxu1  ;;  %v14790_v59 = vld [vmem:[#allocation10 + $0x174] ss:$20 sps:$4 sm:$0xff]  }
0x1bef   : > { %v13663_v62 = vpop.f32.mrb[79].mxu1  ;;  %v4558_v63 = vsel %vm2052_vm2, %v4551_v9, -inf  ;;  %v14785_v60 = vld [vmem:[#allocation10 + $0x168] ss:$20 sps:$4 sm:$0xff]  }
0x1bf0   : > { %4559 = vmax.xlane.f32.xlu0 %v4558_v63 }
0x1bff   : > { %4578 = vrot.lane.b32.xlu1 %v17515_v40, %s16495_s28  ;;  %v14777_v40 = vld [vmem:[%s18463_s11 + $0x70] sm:$0xff]  }
0x1c00   : > { %13671 = vmatpush3.bf16.msra.mxu1 %v14777_v40  ;;  %v14800_v40 = vld [vmem:[#allocation10 + $0x1c0] ss:$20 sps:$4 sm:$0xff]  }
0x1c01   : > { %13672 = vmatprep.subr.bf16.mxu1 %v16490_v0 }
0x1c7b   : > { %v4557_v1 = vpop.xlane.xlu1 %4556 }
0x1c7c   : > { %v4561_v2 = vsub.f32 %v4548_v37, %v4557_v1  ;;  %v14787_v37 = vld [vmem:[#allocation10 + $0x16c] ss:$20 sps:$4 sm:$0xff]  }
0x1c7d   : > { %v4560_v3 = vpop.xlane.xlu0 %4559 }
0x1c7e   : > { %v4563_v4 = vmul.f32 1.442695, %v4561_v2  ;;  %v4562_v5 = vsub.f32 %v4551_v9, %v4560_v3  ;;  %v14788_v9 = vld [vmem:[#allocation10 + $0x170] ss:$20 sps:$4 sm:$0xff]  }
0x1c7f   : > { %v4579_v6 = vpop.permute.xlu1 %4578 }
0x1c80   : > { %15299 = vpow2.f32 %v4563_v4  ;;  %v4565_v8 = vmul.f32 1.442695, %v4562_v5  ;;  %13665 = vmatpush3.bf16.msra.mxu0 %v4579_v6  ;;  %v14793_v5 = vld [vmem:[#allocation10 + $0x194] ss:$20 sps:$4 sm:$0xff]   ;;  %v14791_v6 = vld [vmem:[#allocation10 + $0x190] ss:$20 sps:$4 sm:$0xff]  }
0x1c81   : > { %5024 = vmatprep.subr.bf16.mxu0 %v14781_v33 }
0x1c82   : > { %15301 = vpow2.f32 %v4565_v8  ;;  %v14796_v8 = vld [vmem:[#allocation10 + $0x19c] ss:$20 sps:$4 sm:$0xff]  }
0x1c8a   : > { %v15300_v13 = vpop.eup %15299 }
0x1c8b   : > { %v4567_v15 = vsel %vm2052_vm2, %v15300_v13, 0.0 }
0x1c8c   : > { %v15302_v16 = vpop.eup %15301  ;;  %4568 = vadd.xlane.f32.xlu0 %v4567_v15  ;;  %v14799_v15 = vld [vmem:[#allocation10 + $0x1bc] ss:$20 sps:$4 sm:$0xff]  }
0x1c8d   : > { %v4570_v19 = vsel %vm2052_vm2, %v15302_v16, 0.0 }
0x1c90   : > { %4571 = vadd.xlane.f32.xlu0 %v4570_v19  ;;  %v14802_v19 = vld [vmem:[#allocation10 + $0x1c4] ss:$20 sps:$4 sm:$0xff]  }
0x1cbc   : > { %v4495_v20 = vpop.f32.mrb[48].mxu0 }
0x1cbd   : > { %v4502_v21 = vadd.f32 %v4495_v20, %v17577_v7  ;;  %v13656_v22 = vpop.f32.mrb[49].mxu0  ;;  %v14778_v7 = vld [vmem:[%s18463_s11 + $0x78] sm:$0xff]   ;;  %v14803_v20 = vld [vmem:[#allocation10 + $0x1e0] ss:$20 sps:$4 sm:$0xff]  }
0x1cbe   : > { %v4498_v23 = vpop.f32.mrb[50].mxu0  ;;  %13673 = vmatpush3.bf16.msra.mxu1 %v14778_v7  ;;  %v14806_v22 = vld [vmem:[#allocation10 + $0x1e8] ss:$20 sps:$4 sm:$0xff]   ;;  %v14826_v7 = vld [vmem:[#allocation10 + $0x264] ss:$20 sps:$4 sm:$0xff]  }
0x1cbf   : > { %v4503_v24 = vadd.f32 %v4498_v23, %v17579_v14  ;;  %v13657_v25 = vpop.f32.mrb[51].mxu0  ;;  %5067 = vmatprep.subr.bf16.mxu1 %v14784_v58  ;;  %v14808_v23 = vld [vmem:[#allocation10 + $0x1ec] ss:$20 sps:$4 sm:$0xff]   ;;  %v14827_v58 = vld [vmem:[#allocation10 + $0x150] ss:$20 sps:$4 sm:$0xff]  }
0x1cc0   : > { %v14814_v25 = vld [vmem:[#allocation10 + $0x214] ss:$20 sps:$4 sm:$0xff]  }
0x1d19   : > { %v4569_v26 = vpop.xlane.xlu0 %4568 }
0x1d1a   : > { %15303 = vrcp.f32 %v4569_v26  ;;  %v14809_v26 = vld [vmem:[#allocation10 + $0x208] ss:$20 sps:$4 sm:$0xff]  }
0x1d1d   : > { %v4572_v27 = vpop.xlane.xlu0 %4571 }
0x1d1e   : > { %15305 = vrcp.f32 %v4572_v27  ;;  %v14812_v27 = vld [vmem:[#allocation10 + $0x210] ss:$20 sps:$4 sm:$0xff]  }
0x1d24   : > { %v15304_v28 = vpop.eup %15303 }
0x1d25   : > { %v4575_v30 = vmul.f32 %v15304_v28, %v15300_v13  ;;  %v14794_v13 = vld [vmem:[#allocation10 + $0x198] ss:$20 sps:$4 sm:$0xff]   ;;  %v14817_v28 = vld [vmem:[#allocation10 + $0x234] ss:$20 sps:$4 sm:$0xff]  }
0x1d28   : > { %v15306_v29 = vpop.eup %15305 }
0x1d29   : > { %v4576_v31 = vmul.f32 %v15306_v29, %v15302_v16  ;;  %v14797_v16 = vld [vmem:[#allocation10 + $0x1b8] ss:$20 sps:$4 sm:$0xff]   ;;  %v14820_v29 = vld [vmem:[#allocation10 + $0x23c] ss:$20 sps:$4 sm:$0xff]  }
0x1d2b   : > { %v4577_v32 = vpack.c.bf16 %v4576_v31, %v4575_v30  ;;  %v14815_v30 = vld [vmem:[#allocation10 + $0x230] ss:$20 sps:$4 sm:$0xff]   ;;  %v14818_v31 = vld [vmem:[#allocation10 + $0x238] ss:$20 sps:$4 sm:$0xff]  }
0x1d2d   : > { %13667 = vmatmul.mubr.msk.bf16.vlgmr.msra.gmra.mrb[52].mxu0 %vm2052_vm2, %v4577_v32  ;;  %v14823_v32 = vld [vmem:[#allocation10 + $0x25c] ss:$20 sps:$4 sm:$0xff]  }
0x1d2e   : > { %5056 = vmatprep.mubr.bf16.mxu0 %v16492_v36  ;;  %5025 = vmatpush1.bf16.msra.mxu0 %v14779_v57 }
0x1d2f   : > { %5026 = vmatprep.subr.bf16.mxu0 %v14787_v37 }
0x1d32   : > { %5027 = vmatpush1.bf16.msra.mxu0 %v14785_v60  ;;  %v14839_v60 = vld [vmem:[#allocation12 + $0x188] sm:$0xff]  }
0x1d33   : > { %5028 = vmatprep.subr.bf16.mxu0 %v14793_v5  ;;  %v14831_v5 = vld [vmem:[#allocation10 + $0x1f0] ss:$20 sps:$4 sm:$0xff]  }
0x1d36   : > { %5029 = vmatpush1.bf16.msra.mxu0 %v14791_v6  ;;  %v14853_v6 = vld [vmem:[#allocation12 + $0x160] sm:$0xff]  }
0x1d37   : > { %5030 = vmatprep.subr.bf16.mxu0 %v14799_v15  ;;  %v14857_v15 = vld [vmem:[#allocation12 + $0x168] sm:$0xff]  }
0x1d3a   : > { %5031 = vmatpush1.bf16.msra.mxu0 %v14797_v16  ;;  %v14833_v16 = vld [vmem:[#allocation10 + $0x240] ss:$20 sps:$4 sm:$0xff]  }
0x1e00   : > { %v4618_v11 = vpop.f32.mrb[52].mxu0 }
0x1e01   : > { %v13668_v39 = vpop.f32.mrb[53].mxu0 }
0x1e02   : > { %v4621_v41 = vpop.f32.mrb[54].mxu0  ;;  %v14824_v39 = vld [vmem:[#allocation10 + $0x260] ss:$20 sps:$4 sm:$0xff]  }
0x1e03   : > { %v4625_v14 = vpack.c.bf16 %v4621_v41, %v4618_v11  ;;  %v13669_v34 = vpop.f32.mrb[55].mxu0  ;;  %v14821_v11 = vld [vmem:[#allocation10 + $0x258] ss:$20 sps:$4 sm:$0xff]   ;;  %v14835_v41 = vld [vmem:[#allocation12 + $0x180] sm:$0xff]  }
0x1e05   : > { %13675 = vmatmul.mubr.msk.bf16.vlgmr.msra.gmra.mrb[80].mxu1 %vm2004_vm1, %v4625_v14 }
0x1e06   : > { %5099 = vmatprep.mubr.bf16.mxu1 %v16492_v36  ;;  %5068 = vmatpush1.bf16.msra.mxu1 %v14782_v50 }
0x1e07   : > { %5069 = vmatprep.subr.bf16.mxu1 %v14790_v59  ;;  %v14837_v59 = vld [vmem:[#allocation12 + $0x140] sm:$0xff]  }
0x1e0a   : > { %5070 = vmatpush1.bf16.msra.mxu1 %v14788_v9  ;;  %v14828_v9 = vld [vmem:[#allocation10 + $0x178] ss:$20 sps:$4 sm:$0xff]  }
0x1e0b   : > { %5071 = vmatprep.subr.bf16.mxu1 %v14796_v8  ;;  %v14855_v8 = vld [vmem:[#allocation12 + $0x1a8] sm:$0xff]  }
0x1e0e   : > { %5072 = vmatpush1.bf16.msra.mxu1 %v14794_v13  ;;  %v14832_v13 = vld [vmem:[#allocation10 + $0x218] ss:$20 sps:$4 sm:$0xff]  }
0x1e0f   : > { %5073 = vmatprep.subr.bf16.mxu1 %v14802_v19  ;;  %v14834_v19 = vld [vmem:[#allocation10 + $0x268] ss:$20 sps:$4 sm:$0xff]  }
0x1e12   : > { %5074 = vmatpush1.bf16.msra.mxu1 %v14800_v40  ;;  %v14836_v40 = vld [vmem:[#allocation12 + $0x200] sm:$0xff]  }
0x1e13   : > { %5075 = vmatprep.subr.bf16.mxu1 %v14808_v23  ;;  %v14844_v23 = vld [vmem:[#allocation12 + $0x210] sm:$0xff]  }
0x1e16   : > { %5076 = vmatpush1.bf16.msra.mxu1 %v14806_v22  ;;  %v14842_v22 = vld [vmem:[#allocation12 + $0x1c8] sm:$0xff]  }
0x1e17   : > { %5077 = vmatprep.subr.bf16.mxu1 %v14814_v25  ;;  %v14848_v25 = vld [vmem:[#allocation12 + $0x218] sm:$0xff]  }
0x1e1a   : > { %5078 = vmatpush1.bf16.msra.mxu1 %v14812_v27  ;;  %v14852_v27 = vld [vmem:[#allocation12 + $0x220] sm:$0xff]  }
0x1e1b   : > { %5079 = vmatprep.subr.bf16.mxu1 %v14820_v29  ;;  %v14856_v29 = vld [vmem:[#allocation12 + $0x228] sm:$0xff]  }
0x1e1e   : > { %5080 = vmatpush1.bf16.msra.mxu1 %v14818_v31  ;;  %v14859_v31 = vld [vmem:[#allocation12 + $0x1b0] sm:$0xff]  }
0x1e1f   : > { %5081 = vmatprep.subr.bf16.mxu1 %v14826_v7  ;;  %v14861_v7 = vld [vmem:[#allocation12 + $0x170] sm:$0xff]  }
0x1e22   : > { %5082 = vmatpush1.bf16.msra.mxu1 %v14824_v39  ;;  %v14863_v39 = vld [vmem:[#allocation12 + $0x1b8] sm:$0xff]  }
0x1e23   : > { %13084 = vmatprep.subr.bf16.mxu1 %v14835_v41  ;;  %v14864_v41 = vld [vmem:[#allocation12 + $0x238] sm:$0xff]  }
0x1ed8   : > { %v4675_v12 = vpop.f32.mrb[80].mxu1 }
0x1ed9   : > { %v4682_v38 = vadd.f32 %v4675_v12, %v4502_v21  ;;  %v13676_v43 = vpop.f32.mrb[81].mxu1  ;;  %v14805_v21 = vld [vmem:[#allocation10 + $0x1e4] ss:$20 sps:$4 sm:$0xff]  }
0x1eda   : > { %v4678_v44 = vpop.f32.mrb[82].mxu1  ;;  %5032 = vmatprep.subr.bf16.mxu0 %v14805_v21  ;;  %v14840_v21 = vld [vmem:[#allocation12 + $0x208] sm:$0xff]  }
0x1edb   : > { %v4692_v45 = vadd.f32 %v12473_v35, %v4682_v38  ;;  %v4683_v49 = vadd.f32 %v4678_v44, %v4503_v24  ;;  %v13677_v10 = vpop.f32.mrb[83].mxu1  ;;  %v14811_v24 = vld [vmem:[#allocation10 + $0x20c] ss:$20 sps:$4 sm:$0xff]   ;;  %5033 = vmatpush1.bf16.msra.mxu0 %v14803_v20 }
0x1edc   : > { %5034 = vmatprep.subr.bf16.mxu0 %v14811_v24  ;;  %v14838_v20 = vld [vmem:[#allocation12 + $0x1c0] sm:$0xff]   ;;  %v14846_v24 = vld [vmem:[#allocation12 + $0x1d0] sm:$0xff]  }
0x1edd   : > { %v4693_v53 = vadd.f32 %v12473_v35, %v4683_v49  ;;  %v4694_v55 = vadd.f32 %v4692_v45, %v17500_v17  ;;  %v12474_v49 = vld [vmem:[#allocation7 + $0x1] ss:$0 sm:$0xff] }
0x1edf   : > { %4700 = vadd.xlane.f32.xlu0 %v4694_v55  ;;  %v4695_v56 = vadd.f32 %v4693_v53, %v17502_v18  ;;  %5035 = vmatpush1.bf16.msra.mxu0 %v14809_v26  ;;  %v14850_v26 = vld [vmem:[#allocation12 + $0x1d8] sm:$0xff]  }
0x1ee0   : > { %5036 = vmatprep.subr.bf16.mxu0 %v14817_v28  ;;  %v14854_v28 = vld [vmem:[#allocation12 + $0x1e0] sm:$0xff]  }
0x1ee3   : > { %4702 = vadd.xlane.f32.xlu0 %v4695_v56  ;;  %5037 = vmatpush1.bf16.msra.mxu0 %v14815_v30  ;;  %v14858_v30 = vld [vmem:[#allocation12 + $0x1e8] sm:$0xff]  }
0x1ee4   : > { %5038 = vmatprep.subr.bf16.mxu0 %v14823_v32  ;;  %v14860_v32 = vld [vmem:[#allocation12 + $0x230] sm:$0xff]  }
0x1ee7   : > { %5039 = vmatpush1.bf16.msra.mxu0 %v14821_v11  ;;  %v14862_v11 = vld [vmem:[#allocation12 + $0x1f0] sm:$0xff]  }
0x1ee8   : > { %13678 = vmatprep.subr.bf16.mxu0 %v16490_v0 }
0x1f6c   : > { %v4701_v17 = vpop.xlane.xlu0 %4700 }
0x1f6d   : > { %v4704_v62 = vmul.f32 0.0078125, %v4701_v17  ;;  %v14841_v17 = vld [vmem:[#allocation12 + $0x148] sm:$0xff]  }
0x1f6f   : > { %v17624_v18 = vsub.f32 %v4694_v55, %v4704_v62  ;;  %v14843_v62 = vld [vmem:[#allocation12 + $0x190] sm:$0xff]  }
0x1f70   : > { %v4703_v63 = vpop.xlane.xlu0 %4702 }
0x1f71   : > { %v4705_v1 = vmul.f32 0.0078125, %v4703_v63  ;;  %v4708_v2 = vmul.f32 %v17624_v18, %v17624_v18  ;;  %v14845_v63 = vld [vmem:[#allocation12 + $0x150] sm:$0xff]  }
0x1f73   : > { %4710 = vadd.xlane.f32.xlu0 %v4708_v2  ;;  %v17628_v3 = vsub.f32 %v4695_v56, %v4705_v1  ;;  %v12475_v56 = vld [vmem:[#allocation9 + $0x1] ss:$0 sm:$0xff] }
0x1f74   : > { %v14847_v1 = vld [vmem:[#allocation12 + $0x198] sm:$0xff]  }
0x1f75   : > { %v4709_v4 = vmul.f32 %v17628_v3, %v17628_v3  ;;  %v14830_v2 = vld [vmem:[#allocation10 + $0x1c8] ss:$20 sps:$4 sm:$0xff]  }
0x1f77   : > { %4712 = vadd.xlane.f32.xlu0 %v4709_v4  ;;  %v14851_v4 = vld [vmem:[#allocation12 + $0x1a0] sm:$0xff]  }
0x2000   : > { %v4711_v14 = vpop.xlane.xlu0 %4710 }
0x2001   : > { %v4714_v34 = vmul.f32 0.0078125, %v4711_v14  ;;  %v14865_v14 = vld [vmem:[#allocation12 + $0x178] sm:$0xff]  }
0x2003   : > { %v4716_v12 = vadd.f32 1e-05, %v4714_v34  ;;  %v14866_v34 = vld [vmem:[#allocation12 + $0x1f8] sm:$0xff]  }
0x2004   : > { %v4713_v35 = vpop.xlane.xlu0 %4712 }
0x2005   : > { %15307 = vrsqrt.f32 %v4716_v12  ;;  %v4715_v38 = vmul.f32 0.0078125, %v4713_v35  ;;  %v14869_v12 = vld [vmem:[#allocation18 + $0x4] ss:$12 sps:$4 sm:$0xff]  }
0x2006   : > { %v17652_v35 = vld [vmem:[%s18464_s1 + $0x5] sm:$0x1f] }
0x2007   : > { %v4717_v43 = vadd.f32 1e-05, %v4715_v38  ;;  %v4794_v38 = vrot.slane %v17652_v35, %v17304_v51 }
0x2009   : > { %15309 = vrsqrt.f32 %v4717_v43  ;;  %v4802_v43 = vrot.slane %v17652_v35, %v17307_v52 }
0x200f   : > { %v15308_v44 = vpop.eup %15307 }
0x2010   : > { %v4720_v45 = vmul.f32 %v15308_v44, %v17624_v18  ;;  %v14829_v18 = vld [vmem:[#allocation10 + $0x1a0] ss:$20 sps:$4 sm:$0xff]   ;;  %v4798_v44 = vrot.slane %v17652_v35, %v17310_v54 }
0x2012   : > { %v4728_v55 = vmul.f32 %v12474_v49, %v4720_v45  ;;  %v4806_v45 = vrot.slane %v17652_v35, %v17461_v61 }
0x2013   : > { %v15310_v10 = vpop.eup %15309 }
0x2014   : > { %v4721_v53 = vmul.f32 %v15310_v10, %v17628_v3  ;;  %v17635_v33 = vadd.f32 %v12475_v56, %v4728_v55  ;;  %v14849_v3 = vld [vmem:[#allocation12 + $0x158] sm:$0xff]  }
0x2016   : > { %v4729_v57 = vmul.f32 %v12474_v49, %v4721_v53 }
0x2018   : > { %v17637_v50 = vadd.f32 %v12475_v56, %v4729_v57 }
0x201a   : > { %v4738_v37 = vpack.c.bf16 %v17637_v50, %v17635_v33 }
0x201c   : > { %5057 = vmatmul.mubr.bf16.vlgmr.msra.gmra.mrb[56].mxu0 %v4738_v37  ;;  %5100 = vmatmul.mubr.bf16.vlgmr.msra.gmra.mrb[84].mxu1 %v4738_v37 }
0x201d   : > { %13679 = vmatpush3.bf16.msra.mxu0 %v14827_v58  ;;  %13694 = vmatprep.mubr.msk.bf16.mxu0 %vm16491_vm0, %v16490_v0 }
0x201e   : > { %13680 = vmatprep.subr.bf16.mxu0 %v16490_v0  ;;  %13085 = vmatpush3.bf16.msra.mxu1 %v14837_v59 }
0x201f   : > { %13086 = vmatprep.subr.bf16.mxu1 %v14839_v60 }
0x2021   : > { %13681 = vmatpush3.bf16.msra.mxu0 %v14828_v9 }
0x2022   : > { %13682 = vmatprep.subr.bf16.mxu0 %v16490_v0  ;;  %13087 = vmatpush3.bf16.msra.mxu1 %v14841_v17 }
0x2023   : > { %13088 = vmatprep.subr.bf16.mxu1 %v14843_v62 }
0x2025   : > { %13683 = vmatpush3.bf16.msra.mxu0 %v14829_v18 }
0x2026   : > { %13684 = vmatprep.subr.bf16.mxu0 %v16490_v0  ;;  %13089 = vmatpush3.bf16.msra.mxu1 %v14845_v63 }
0x2027   : > { %13090 = vmatprep.subr.bf16.mxu1 %v14847_v1 }
0x2029   : > { %13685 = vmatpush3.bf16.msra.mxu0 %v14830_v2 }
0x202a   : > { %13686 = vmatprep.subr.bf16.mxu0 %v16490_v0  ;;  %13091 = vmatpush3.bf16.msra.mxu1 %v14849_v3 }
0x202b   : > { %13092 = vmatprep.subr.bf16.mxu1 %v14851_v4 }
0x202d   : > { %13687 = vmatpush3.bf16.msra.mxu0 %v14831_v5 }
0x202e   : > { %13688 = vmatprep.subr.bf16.mxu0 %v16490_v0  ;;  %13093 = vmatpush3.bf16.msra.mxu1 %v14853_v6 }
0x202f   : > { %13094 = vmatprep.subr.bf16.mxu1 %v14855_v8 }
0x2031   : > { %13689 = vmatpush3.bf16.msra.mxu0 %v14832_v13 }
0x2032   : > { %13690 = vmatprep.subr.bf16.mxu0 %v16490_v0  ;;  %13095 = vmatpush3.bf16.msra.mxu1 %v14857_v15 }
0x2033   : > { %13096 = vmatprep.subr.bf16.mxu1 %v14859_v31  ;;  %v14882_v31 = vld [vmem:[#allocation12 + $0x258] sm:$0xff]  }
0x2035   : > { %13691 = vmatpush3.bf16.msra.mxu0 %v14833_v16 }
0x2036   : > { %13692 = vmatprep.subr.bf16.mxu0 %v16490_v0  ;;  %13097 = vmatpush3.bf16.msra.mxu1 %v14861_v7  ;;  %v14883_v7 = vld [vmem:[#allocation18 + $0x60] ss:$12 sps:$4 sm:$0xff]  }
0x2037   : > { %13098 = vmatprep.subr.bf16.mxu1 %v14863_v39  ;;  %v14889_v39 = vld [vmem:[#allocation18 + $0x7c] ss:$12 sps:$4 sm:$0xff]  }
0x2039   : > { %13693 = vmatpush3.bf16.msra.mxu0 %v14834_v19 }
0x203a   : > { %13106 = vmatprep.subr.bf16.mxu0 %v14836_v40  ;;  %13099 = vmatpush3.bf16.msra.mxu1 %v14865_v14  ;;  %v14890_v14 = vld [vmem:[#allocation12 + $0x268] sm:$0xff]  }
0x203b   : > { %13698 = vmatprep.subr.bf16.mxu1 %v16490_v0 }
0x203c   : > { %13695 = vmatmul.mubr.bf16.vlgmr.msra.gmra.mrb[60].mxu0 %v4738_v37 }
0x203d   : > { %13107 = vmatpush3.bf16.msra.mxu0 %v14838_v20 }
0x203e   : > { %13108 = vmatprep.subr.bf16.mxu0 %v14840_v21  ;;  %v14867_v21 = vld [vmem:[#allocation18] ss:$12 sps:$4 sm:$0xff]  }
0x2041   : > { %13109 = vmatpush3.bf16.msra.mxu0 %v14842_v22  ;;  %v14870_v22 = vld [vmem:[#allocation12 + $0x240] sm:$0xff]  }
0x2042   : > { %13110 = vmatprep.subr.bf16.mxu0 %v14844_v23  ;;  %v14873_v23 = vld [vmem:[#allocation18 + $0x1c] ss:$12 sps:$4 sm:$0xff]  }
0x2045   : > { %13111 = vmatpush3.bf16.msra.mxu0 %v14846_v24  ;;  %v14871_v24 = vld [vmem:[#allocation18 + $0x18] ss:$12 sps:$4 sm:$0xff]  }
0x2046   : > { %13112 = vmatprep.subr.bf16.mxu0 %v14848_v25  ;;  %v14874_v25 = vld [vmem:[#allocation12 + $0x248] sm:$0xff]  }
0x2049   : > { %13113 = vmatpush3.bf16.msra.mxu0 %v14850_v26  ;;  %v14877_v26 = vld [vmem:[#allocation18 + $0x34] ss:$12 sps:$4 sm:$0xff]  }
0x204a   : > { %13114 = vmatprep.subr.bf16.mxu0 %v14852_v27  ;;  %v14875_v27 = vld [vmem:[#allocation18 + $0x30] ss:$12 sps:$4 sm:$0xff]  }
0x204d   : > { %13115 = vmatpush3.bf16.msra.mxu0 %v14854_v28  ;;  %v14878_v28 = vld [vmem:[#allocation12 + $0x250] sm:$0xff]  }
0x204e   : > { %13116 = vmatprep.subr.bf16.mxu0 %v14856_v29  ;;  %v14881_v29 = vld [vmem:[#allocation18 + $0x4c] ss:$12 sps:$4 sm:$0xff]  }
0x2051   : > { %13117 = vmatpush3.bf16.msra.mxu0 %v14858_v30  ;;  %v14879_v30 = vld [vmem:[#allocation18 + $0x48] ss:$12 sps:$4 sm:$0xff]  }
0x2052   : > { %13118 = vmatprep.subr.bf16.mxu0 %v14860_v32  ;;  %v14885_v32 = vld [vmem:[#allocation18 + $0x64] ss:$12 sps:$4 sm:$0xff]  }
0x2055   : > { %13119 = vmatpush3.bf16.msra.mxu0 %v14862_v11  ;;  %v14886_v11 = vld [vmem:[#allocation12 + $0x260] sm:$0xff]  }
0x2056   : > { %13120 = vmatprep.subr.bf16.mxu0 %v14864_v41  ;;  %v14887_v41 = vld [vmem:[#allocation18 + $0x78] ss:$12 sps:$4 sm:$0xff]  }
0x2059   : > { %13121 = vmatpush3.bf16.msra.mxu0 %v14866_v34  ;;  %v4810_v34 = vrot.slane %v17652_v35, %v17475_v42 }
0x205a   : > { %5840 = vmatprep.subr.bf16.mxu0 %v14869_v12  ;;  %v14893_v12 = vld [vmem:[#allocation18 + $0x94] ss:$12 sps:$4 sm:$0xff]  }
0x20ef   : > { %v5058_v49 = vpop.f32.mrb[56].mxu0  ;;  %v5101_v10 = vpop.f32.mrb[84].mxu1 }
0x20f0   : > { %v5059_v53 = vadd.f32 %v5058_v49, %v4794_v38  ;;  %v5102_v55 = vadd.f32 %v5101_v10, %v4802_v43  ;;  %v5060_v56 = vpop.f32.mrb[57].mxu0  ;;  %v5103_v57 = vpop.f32.mrb[85].mxu1  ;;  %v14897_v10 = vld [vmem:[#allocation18 + $0xac] ss:$12 sps:$4 sm:$0xff]  }
0x20f1   : > { %v5061_v58 = vadd.f32 %v5060_v56, %v4798_v44  ;;  %v5104_v37 = vadd.f32 %v5103_v57, %v4806_v45  ;;  %v5062_v59 = vpop.f32.mrb[58].mxu0  ;;  %v5105_v60 = vpop.f32.mrb[86].mxu1  ;;  %v14895_v57 = vld [vmem:[#allocation18 + $0xa8] ss:$12 sps:$4 sm:$0xff]  }
0x20f2   : > { %v5063_v9 = vadd.f32 %v5062_v59, %v4794_v38  ;;  %v5106_v17 = vadd.f32 %v5105_v60, %v4802_v43  ;;  %v5064_v62 = vpop.f32.mrb[59].mxu0  ;;  %v5107_v18 = vpop.f32.mrb[87].mxu1  ;;  %v5151_v2 = vmax.f32 %v5059_v53, 0.0  ;;  %v5153_v3 = vmax.f32 %v5102_v55, 0.0  ;;  %v14891_v43 = vld [vmem:[#allocation18 + $0x90] ss:$12 sps:$4 sm:$0xff]  }
0x20f3   : > { %v5065_v63 = vadd.f32 %v5064_v62, %v4798_v44  ;;  %v5108_v1 = vadd.f32 %v5107_v18, %v4806_v45  ;;  %v5152_v6 = vmax.f32 %v5061_v58, 0.0  ;;  %v5154_v8 = vmax.f32 %v5104_v37, 0.0  ;;  %v14894_v44 = vld [vmem:[#allocation12 + $0x270] sm:$0xff]   ;;  %v14898_v58 = vld [vmem:[#allocation12 + $0x278] sm:$0xff]  }
0x20f4   : > { %v5156_v4 = vmax.f32 %v5063_v9, 0.0  ;;  %v5158_v5 = vmax.f32 %v5106_v17, 0.0  ;;  %v14899_v60 = vld [vmem:[#allocation18 + $0x8] ss:$12 sps:$4 sm:$0xff]   ;;  %v14900_v9 = vld [vmem:[#allocation18 + $0x20] ss:$12 sps:$4 sm:$0xff]  }
0x20f5   : > { %v5157_v13 = vmax.f32 %v5065_v63, 0.0  ;;  %v5159_v15 = vmax.f32 %v5108_v1, 0.0  ;;  %v14901_v17 = vld [vmem:[#allocation18 + $0x38] ss:$12 sps:$4 sm:$0xff]   ;;  %v14902_v62 = vld [vmem:[#allocation18 + $0x50] ss:$12 sps:$4 sm:$0xff]  }
0x20f6   : > { %v5161_v16 = vpack.c.bf16 %v5156_v4, %v5151_v2  ;;  %v5163_v19 = vpack.c.bf16 %v5158_v5, %v5153_v3  ;;  %v14903_v18 = vld [vmem:[#allocation18 + $0x68] ss:$12 sps:$4 sm:$0xff]   ;;  %v14904_v63 = vld [vmem:[#allocation18 + $0x80] ss:$12 sps:$4 sm:$0xff]   ;;  %v14905_v1 = vld [vmem:[#allocation18 + $0x98] ss:$12 sps:$4 sm:$0xff]  }
0x20f7   : > { %v5162_v40 = vpack.c.bf16 %v5157_v13, %v5152_v6  ;;  %v5164_v20 = vpack.c.bf16 %v5159_v15, %v5154_v8  ;;  %v14906_v2 = vld [vmem:[#allocation18 + $0xb0] ss:$12 sps:$4 sm:$0xff]   ;;  %v12517_v5 = vld [vmem:[#allocation13 + $0x1] ss:$0 sm:$0xff] }
0x20f9   : > { %5527 = vmatprep.mubr.bf16.mxu1 %v5162_v40  ;;  %5568 = vmatprep.mubr.bf16.mxu0 %v5164_v20 }
0x20fa   : > { %5528 = vmatmul.mubr.bf16.vlgmr.msra.gmra.mrb[88].mxu1 %v5161_v16  ;;  %5569 = vmatmul.mubr.bf16.vlgmr.msra.gmra.mrb[64].mxu0 %v5163_v19 }
0x20fb   : > { %13699 = vmatpush3.bf16.msra.mxu1 %v14870_v22  ;;  %5841 = vmatpush1.bf16.msra.mxu0 %v14867_v21 }
0x20fc   : > { %13700 = vmatprep.subr.bf16.mxu1 %v16490_v0  ;;  %5842 = vmatprep.subr.bf16.mxu0 %v14873_v23 }
0x20fd   : > { %13714 = vmatprep.mubr.msk.bf16.mxu1 %vm16491_vm0, %v16490_v0  ;;  %5872 = vmatprep.mubr.bf16.mxu0 %v16492_v36 }
0x20ff   : > { %13701 = vmatpush3.bf16.msra.mxu1 %v14874_v25  ;;  %5843 = vmatpush1.bf16.msra.mxu0 %v14871_v24 }
0x2100   : > { %13702 = vmatprep.subr.bf16.mxu1 %v16490_v0  ;;  %5844 = vmatprep.subr.bf16.mxu0 %v14877_v26  ;;  %v5695_v26 = vld [vmem:[#allocation19] sm:$0x7] }
0x2103   : > { %13703 = vmatpush3.bf16.msra.mxu1 %v14878_v28  ;;  %5845 = vmatpush1.bf16.msra.mxu0 %v14875_v27  ;;  %v5700_v27 = vrot.slane %v5695_v26, %v17304_v51 }
0x2104   : > { %13704 = vmatprep.subr.bf16.mxu1 %v16490_v0  ;;  %5846 = vmatprep.subr.bf16.mxu0 %v14881_v29 }
0x2107   : > { %13705 = vmatpush3.bf16.msra.mxu1 %v14882_v31  ;;  %5847 = vmatpush1.bf16.msra.mxu0 %v14879_v30  ;;  %v5704_v30 = vrot.slane %v5695_v26, %v17310_v54 }
0x2108   : > { %13706 = vmatprep.subr.bf16.mxu1 %v16490_v0  ;;  %5848 = vmatprep.subr.bf16.mxu0 %v14885_v32 }
0x210b   : > { %13707 = vmatpush3.bf16.msra.mxu1 %v14886_v11  ;;  %5849 = vmatpush1.bf16.msra.mxu0 %v14883_v7 }
0x210c   : > { %13708 = vmatprep.subr.bf16.mxu1 %v16490_v0  ;;  %5850 = vmatprep.subr.bf16.mxu0 %v14889_v39 }
0x210f   : > { %v5144_v38 = vpop.f32.mrb[60].mxu0  ;;  %13709 = vmatpush3.bf16.msra.mxu1 %v14890_v14  ;;  %5851 = vmatpush1.bf16.msra.mxu0 %v14887_v41 }
0x2110   : > { %v5145_v45 = vadd.f32 %v5144_v38, %v4810_v34  ;;  %v13696_v49 = vpop.f32.mrb[61].mxu0  ;;  %13710 = vmatprep.subr.bf16.mxu1 %v16490_v0  ;;  %5852 = vmatprep.subr.bf16.mxu0 %v14893_v12 }
0x2111   : > { %v5147_v53 = vpop.f32.mrb[62].mxu0 }
0x2112   : > { %v5148_v55 = vadd.f32 %v5147_v53, %v4810_v34  ;;  %v13697_v56 = vpop.f32.mrb[63].mxu0  ;;  %v5155_v35 = vmax.f32 %v5145_v45, 0.0  ;;  %v5708_v53 = vrot.slane %v5695_v26, %v17307_v52 }
0x2113   : > { %13711 = vmatpush3.bf16.msra.mxu1 %v14894_v44  ;;  %5853 = vmatpush1.bf16.msra.mxu0 %v14891_v43 }
0x2114   : > { %v5160_v37 = vmax.f32 %v5148_v55, 0.0  ;;  %13712 = vmatprep.subr.bf16.mxu1 %v16490_v0  ;;  %5854 = vmatprep.subr.bf16.mxu0 %v14897_v10 }
0x2116   : > { %v5165_v59 = vpack.c.bf16 %v5160_v37, %v5155_v35 }
0x2117   : > { %13713 = vmatpush3.bf16.msra.mxu1 %v14898_v58  ;;  %5855 = vmatpush1.bf16.msra.mxu0 %v14895_v57 }
0x2118   : > { %13718 = vmatprep.subr.bf16.mxu1 %v16490_v0  ;;  %13738 = vmatprep.subr.bf16.mxu0 %v16490_v0 }
0x211a   : > { %13715 = vmatmul.mubr.bf16.vlgmr.msra.gmra.mrb[92].mxu1 %v5165_v59  ;;  %5873 = vmatmul.mubr.bf16.vlgmr.msra.gmra.mrb[68].mxu0 %v17293_v48 }
0x211b   : > { %13719 = vmatpush3.bf16.msra.mxu1 %v14899_v60  ;;  %13734 = vmatprep.mubr.msk.bf16.mxu1 %vm16491_vm0, %v16490_v0 }
0x211c   : > { %13720 = vmatprep.subr.bf16.mxu1 %v16490_v0  ;;  %13740 = vmatprep.mubr.msk.bf16.mxu0 %vm16491_vm0, %v16490_v0 }
0x211f   : > { %13721 = vmatpush3.bf16.msra.mxu1 %v14900_v9 }
0x2120   : > { %13722 = vmatprep.subr.bf16.mxu1 %v16490_v0 }
0x2123   : > { %13723 = vmatpush3.bf16.msra.mxu1 %v14901_v17 }
0x2124   : > { %13724 = vmatprep.subr.bf16.mxu1 %v16490_v0 }
0x2127   : > { %13725 = vmatpush3.bf16.msra.mxu1 %v14902_v62 }
0x2128   : > { %13726 = vmatprep.subr.bf16.mxu1 %v16490_v0 }
0x212b   : > { %13727 = vmatpush3.bf16.msra.mxu1 %v14903_v18 }
0x212c   : > { %13728 = vmatprep.subr.bf16.mxu1 %v16490_v0 }
0x212f   : > { %13729 = vmatpush3.bf16.msra.mxu1 %v14904_v63 }
0x2130   : > { %13730 = vmatprep.subr.bf16.mxu1 %v16490_v0 }
0x2133   : > { %13731 = vmatpush3.bf16.msra.mxu1 %v14905_v1 }
0x2134   : > { %13732 = vmatprep.subr.bf16.mxu1 %v16490_v0 }
0x2137   : > { %13733 = vmatpush3.bf16.msra.mxu1 %v14906_v2 }
0x2138   : > { %13744 = vmatprep.subr.bf16.mxu1 %v16490_v0 }
0x213a   : > { %13735 = vmatmul.mubr.bf16.vlgmr.msra.gmra.mrb[96].mxu1 %v17293_v48 }
0x213b   : > { %13746 = vmatprep.mubr.msk.bf16.mxu1 %vm16491_vm0, %v16490_v0 }
0x21cd   : > { %v13100_v3 = vpop.f32.mrb[88].mxu1  ;;  %v13122_v4 = vpop.f32.mrb[64].mxu0 }
0x21ce   : > { %v13101_v6 = vpop.f32.mrb[89].mxu1  ;;  %v13123_v8 = vpop.f32.mrb[65].mxu0 }
0x21cf   : > { %v13102_v13 = vadd.f32 %v13101_v6, %v13100_v3  ;;  %v13124_v15 = vadd.f32 %v13123_v8, %v13122_v4  ;;  %v13103_v16 = vpop.f32.mrb[90].mxu1  ;;  %v13125_v19 = vpop.f32.mrb[66].mxu0 }
0x21d0   : > { %v13104_v40 = vpop.f32.mrb[91].mxu1  ;;  %v13126_v20 = vpop.f32.mrb[67].mxu0 }
0x21d1   : > { %v5530_v21 = vadd.f32 %v13102_v13, %v12517_v5  ;;  %v13105_v22 = vadd.f32 %v13104_v40, %v13103_v16  ;;  %v13127_v23 = vadd.f32 %v13126_v20, %v13125_v19 }
0x21d3   : > { %v5533_v24 = vadd.f32 %v13105_v22, %v12517_v5  ;;  %v5571_v25 = vadd.f32 %v13124_v15, %v5530_v21 }
0x21d5   : > { %v5574_v48 = vadd.f32 %v13127_v23, %v5533_v24 }
0x21ed   : > { %v5611_v28 = vpop.f32.mrb[92].mxu1  ;;  %v5874_v29 = vpop.f32.mrb[68].mxu0 }
0x21ee   : > { %v17694_v31 = vadd.f32 %v5611_v28, %v5571_v25  ;;  %v13716_v32 = vpop.f32.mrb[93].mxu1  ;;  %v5876_v7 = vpop.f32.mrb[69].mxu0  ;;  %v5875_v41 = vadd.f32 %v5874_v29, %v5700_v27 }
0x21ef   : > { %v5614_v11 = vpop.f32.mrb[94].mxu1  ;;  %v5878_v39 = vpop.f32.mrb[70].mxu0  ;;  %v5877_v43 = vadd.f32 %v5876_v7, %v5704_v30 }
0x21f0   : > { %v17696_v14 = vadd.f32 %v5614_v11, %v5574_v48  ;;  %v5879_v34 = vadd.f32 %v5878_v39, %v5700_v27  ;;  %v13717_v12 = vpop.f32.mrb[95].mxu1  ;;  %v5880_v38 = vpop.f32.mrb[71].mxu0 }
0x21f1   : > { %v5881_v44 = vadd.f32 %v5880_v38, %v5704_v30 }
0x21f2   : > { %v17698_v45 = vpack.c.bf16 %v5879_v34, %v5875_v41 }
0x21f3   : > { %v17700_v49 = vpack.c.bf16 %v5881_v44, %v5877_v43 }
0x21f4   : > { %6059 = vrot.lane.b32.xlu0 %v17698_v45, %s16493_s9 }
0x21f5   : > { %6062 = vrot.lane.b32.xlu1 %v17700_v49, %s16493_s9  ;;  %v5947_v10 = vsel %vm2004_vm1, %v17700_v49, 0 }
0x21f6   : > { %13739 = vmatpush3.bf16.xpose.msra.mxu0 %v5947_v10 }
0x21f7   : > { %13750 = vmatprep.subr.bf16.mxu0 %v16490_v0 }
0x21fd   : > { %13741 = vmatmul.mubr.msk.bf16.vlgmr.msra.gmra.mrb[72].mxu0 %vm2004_vm1, %v17698_v45 }
0x21fe   : > { %13752 = vmatprep.mubr.msk.bf16.mxu0 %vm16491_vm0, %v16490_v0 }
0x220d   : > { %v5917_v55 = vpop.f32.mrb[96].mxu1 }
0x220e   : > { %v13736_v56 = vpop.f32.mrb[97].mxu1  ;;  %v5918_v58 = vadd.f32 %v5917_v55, %v5708_v53  ;;  %v14909_v55 = vld [vmem:[#allocation21 + $0x10] sm:$0xff]  }
0x220f   : > { %v5920_v57 = vpop.f32.mrb[98].mxu1  ;;  %v14910_v56 = vld [vmem:[#allocation21 + $0x18] sm:$0xff]  }
0x2210   : > { %v5921_v35 = vadd.f32 %v5920_v57, %v5708_v53  ;;  %v13737_v37 = vpop.f32.mrb[99].mxu1 }
0x2212   : > { %v17714_v59 = vpack.c.bf16 %v5921_v35, %v5918_v58 }
0x2214   : > { %13745 = vmatpush3.bf16.msra.mxu1 %v17714_v59 }
0x2215   : > { %13756 = vmatprep.subr.bf16.mxu1 %v16490_v0 }
0x2266   : > { %v6060_v17 = vpop.permute.xlu0 %6059 }
0x2267   : > { %v6063_v60 = vpop.permute.xlu1 %6062 }
0x2268   : > { %v6068_v9 = vsel %vm2004_vm1, %v6063_v60, 0 }
0x2269   : > { %13751 = vmatpush3.bf16.xpose.msra.mxu0 %v6068_v9 }
0x226a   : > { %13762 = vmatprep.subr.bf16.mxu0 %v16490_v0 }
0x2270   : > { %13753 = vmatmul.mubr.msk.bf16.vlgmr.msra.gmra.mrb[76].mxu0 %vm2004_vm1, %v6060_v17 }
0x2271   : > { %13766 = vmatprep.mubr.msk.bf16.mxu0 %vm16491_vm0, %v16490_v0  ;;  %13763 = vmatpush3.bf16.msra.mxu0 %v14909_v55 }
0x2272   : > { %13764 = vmatprep.subr.bf16.mxu0 %v16490_v0 }
0x2275   : > { %13765 = vmatpush3.bf16.msra.mxu0 %v14910_v56 }
0x2276   : > { %13778 = vmatprep.subr.bf16.mxu0 %v16490_v0 }
0x22d0   : > { %v5983_v62 = vpop.f32.mrb[72].mxu0 }
0x22d1   : > { %v13742_v18 = vpop.f32.mrb[73].mxu0  ;;  %v5990_v63 = vsel %vm2052_vm2, %v5983_v62, -inf }
0x22d2   : > { %5991 = vmax.xlane.f32.xlu1 %v5990_v63  ;;  %v5986_v1 = vpop.f32.mrb[74].mxu0  ;;  %v14908_v63 = vld [vmem:[#allocation21 + $0x8] sm:$0xff]  }
0x22d3   : > { %v13743_v2 = vpop.f32.mrb[75].mxu0  ;;  %v5993_v3 = vsel %vm2052_vm2, %v5986_v1, -inf }
0x22d4   : > { %5994 = vmax.xlane.f32.xlu0 %v5993_v3 }
0x2343   : > { %v6104_v4 = vpop.f32.mrb[76].mxu0 }
0x2344   : > { %v13754_v5 = vpop.f32.mrb[77].mxu0  ;;  %v6111_v6 = vsel %vm2052_vm2, %v6104_v4, -inf }
0x2345   : > { %6112 = vmax.xlane.f32.xlu1 %v6111_v6  ;;  %v6107_v8 = vpop.f32.mrb[78].mxu0 }
0x2346   : > { %v13755_v13 = vpop.f32.mrb[79].mxu0  ;;  %v6114_v15 = vsel %vm2052_vm2, %v6107_v8, -inf }
0x2349   : > { %6115 = vmax.xlane.f32.xlu1 %v6114_v15 }
0x235f   : > { %v5992_v16 = vpop.xlane.xlu1 %5991 }
0x2360   : > { %v5996_v19 = vsub.f32 %v5983_v62, %v5992_v16  ;;  %v14907_v62 = vld [vmem:[#allocation21] sm:$0xff]  }
0x2361   : > { %v5995_v40 = vpop.xlane.xlu0 %5994 }
0x2362   : > { %v5998_v20 = vmul.f32 1.442695, %v5996_v19  ;;  %v5997_v21 = vsub.f32 %v5986_v1, %v5995_v40 }
0x2364   : > { %15311 = vpow2.f32 %v5998_v20  ;;  %v6000_v22 = vmul.f32 1.442695, %v5997_v21 }
0x2366   : > { %15313 = vpow2.f32 %v6000_v22 }
0x236e   : > { %v15312_v23 = vpop.eup %15311 }
0x236f   : > { %v6002_v24 = vsel %vm2052_vm2, %v15312_v23, 0.0 }
0x2370   : > { %v15314_v25 = vpop.eup %15313  ;;  %6003 = vadd.xlane.f32.xlu1 %v6002_v24 }
0x2371   : > { %v6005_v48 = vsel %vm2052_vm2, %v15314_v25, 0.0 }
0x2374   : > { %6006 = vadd.xlane.f32.xlu1 %v6005_v48 }
0x23d2   : > { %v6113_v26 = vpop.xlane.xlu1 %6112 }
0x23d3   : > { %v6117_v27 = vsub.f32 %v6104_v4, %v6113_v26 }
0x23d5   : > { %v6119_v28 = vmul.f32 1.442695, %v6117_v27 }
0x23d6   : > { %v6116_v29 = vpop.xlane.xlu1 %6115 }
0x23d7   : > { %15315 = vpow2.f32 %v6119_v28  ;;  %v6118_v30 = vsub.f32 %v6107_v8, %v6116_v29 }
0x23d9   : > { %v6121_v32 = vmul.f32 1.442695, %v6118_v30 }
0x23db   : > { %15317 = vpow2.f32 %v6121_v32 }
0x23e1   : > { %v15316_v7 = vpop.eup %15315 }
0x23e2   : > { %v6123_v11 = vsel %vm2052_vm2, %v15316_v7, 0.0 }
0x23e3   : > { %6124 = vadd.xlane.f32.xlu0 %v6123_v11 }
0x23e5   : > { %v15318_v39 = vpop.eup %15317 }
0x23e6   : > { %v6126_v41 = vsel %vm2052_vm2, %v15318_v39, 0.0 }
0x23e7   : > { %6127 = vadd.xlane.f32.xlu1 %v6126_v41 }
0x23f8   : > { %6297 = vrot.lane.b32.xlu1 %v17700_v49, %s16494_s6 }
0x23f9   : > { %6135 = vrot.lane.b32.xlu0 %v17714_v59, %s16493_s9 }
0x23fc   : > { %6295 = vrot.lane.b32.xlu1 %v17698_v45, %s16494_s6 }
0x23fd   : > { %v6004_v34 = vpop.xlane.xlu1 %6003 }
0x23fe   : > { %15319 = vrcp.f32 %v6004_v34 }
0x2401   : > { %v6007_v12 = vpop.xlane.xlu1 %6006 }
0x2402   : > { %15321 = vrcp.f32 %v6007_v12 }
0x2408   : > { %v15320_v38 = vpop.eup %15319 }
0x2409   : > { %v6010_v44 = vmul.f32 %v15320_v38, %v15312_v23 }
0x240c   : > { %v15322_v43 = vpop.eup %15321 }
0x240d   : > { %v6011_v10 = vmul.f32 %v15322_v43, %v15314_v25 }
0x240f   : > { %v6012_v53 = vpack.c.bf16 %v6011_v10, %v6010_v44 }
0x2411   : > { %13747 = vmatmul.mubr.msk.bf16.vlgmr.msra.gmra.mrb[100].mxu1 %vm2052_vm2, %v6012_v53 }
0x2412   : > { %13758 = vmatprep.mubr.msk.bf16.mxu1 %vm16491_vm0, %v16490_v0 }
0x2470   : > { %v6125_v57 = vpop.xlane.xlu0 %6124 }
0x2471   : > { %15323 = vrcp.f32 %v6125_v57 }
0x2474   : > { %v6128_v58 = vpop.xlane.xlu1 %6127  ;;  %v6136_v35 = vpop.permute.xlu0 %6135 }
0x2475   : > { %15325 = vrcp.f32 %v6128_v58  ;;  %13757 = vmatpush3.bf16.msra.mxu1 %v6136_v35 }
0x2476   : > { %13770 = vmatprep.subr.bf16.mxu1 %v16490_v0 }
0x2478   : > { %v6298_v13 = vpop.permute.xlu1 %6297 }
0x2479   : > { %v6303_v40 = vsel %vm2004_vm1, %v6298_v13, 0 }
0x247b   : > { %v15324_v37 = vpop.eup %15323 }
0x247c   : > { %v6131_v9 = vmul.f32 %v15324_v37, %v15316_v7  ;;  %v6296_v20 = vpop.permute.xlu1 %6295 }
0x247f   : > { %v15326_v60 = vpop.eup %15325 }
0x2480   : > { %v6132_v17 = vmul.f32 %v15326_v60, %v15318_v39 }
0x2482   : > { %v6133_v18 = vpack.c.bf16 %v6132_v17, %v6131_v9 }
0x2484   : > { %13759 = vmatmul.mubr.msk.bf16.vlgmr.msra.gmra.mrb[104].mxu1 %vm2052_vm2, %v6133_v18 }
0x2485   : > { %13771 = vmatpush3.bf16.msra.mxu1 %v14907_v62  ;;  %13774 = vmatprep.mubr.msk.bf16.mxu1 %vm16491_vm0, %v16490_v0 }
0x2486   : > { %13772 = vmatprep.subr.bf16.mxu1 %v16490_v0 }
0x2489   : > { %13773 = vmatpush3.bf16.msra.mxu1 %v14908_v63 }
0x248a   : > { %13784 = vmatprep.subr.bf16.mxu1 %v16490_v0 }
0x24e4   : > { %v6050_v1 = vpop.f32.mrb[100].mxu1 }
0x24e5   : > { %v13748_v2 = vpop.f32.mrb[101].mxu1 }
0x24e6   : > { %v6053_v3 = vpop.f32.mrb[102].mxu1  ;;  %v14912_v2 = vld [vmem:[#allocation21 + $0x28] sm:$0xff]  }
0x24e7   : > { %v6057_v4 = vpack.c.bf16 %v6053_v3, %v6050_v1  ;;  %v13749_v5 = vpop.f32.mrb[103].mxu1 }
0x24e9   : > { %13775 = vmatmul.mubr.msk.bf16.vlgmr.msra.gmra.mrb[108].mxu1 %vm2004_vm1, %v6057_v4 }
0x24ea   : > { %13786 = vmatprep.mubr.msk.bf16.mxu1 %vm16491_vm0, %v16490_v0 }
0x2557   : > { %v6175_v6 = vpop.f32.mrb[104].mxu1 }
0x2558   : > { %v13760_v8 = vpop.f32.mrb[105].mxu1 }
0x2559   : > { %v6178_v15 = vpop.f32.mrb[106].mxu1 }
0x255a   : > { %v6182_v16 = vpack.c.bf16 %v6178_v15, %v6175_v6  ;;  %v13761_v19 = vpop.f32.mrb[107].mxu1 }
0x255c   : > { %13767 = vmatmul.mubr.msk.bf16.vlgmr.msra.gmra.mrb[80].mxu0 %vm2004_vm1, %v6182_v16 }
0x255d   : > { %13779 = vmatpush3.bf16.xpose.msra.mxu0 %v6303_v40  ;;  %13780 = vmatprep.mubr.msk.bf16.mxu0 %vm16491_vm0, %v16490_v0 }
0x255e   : > { %13790 = vmatprep.subr.bf16.mxu0 %v16490_v0 }
0x2564   : > { %13781 = vmatmul.mubr.msk.bf16.vlgmr.msra.gmra.mrb[84].mxu0 %vm2004_vm1, %v6296_v20 }
0x2565   : > { %13794 = vmatprep.mubr.msk.bf16.mxu0 %vm16491_vm0, %v16490_v0 }
0x25bc   : > { %v6288_v21 = vpop.f32.mrb[108].mxu1 }
0x25bd   : > { %v13776_v22 = vpop.f32.mrb[109].mxu1 }
0x25be   : > { %v6291_v23 = vpop.f32.mrb[110].mxu1 }
0x25bf   : > { %v13777_v24 = vpop.f32.mrb[111].mxu1 }
0x262f   : > { %v6232_v25 = vpop.f32.mrb[80].mxu0 }
0x2630   : > { %v17759_v48 = vadd.f32 %v6288_v21, %v6232_v25  ;;  %v13768_v26 = vpop.f32.mrb[81].mxu0 }
0x2631   : > { %v6235_v27 = vpop.f32.mrb[82].mxu0 }
0x2632   : > { %v17761_v28 = vadd.f32 %v6291_v23, %v6235_v27  ;;  %v13769_v29 = vpop.f32.mrb[83].mxu0 }
0x2637   : > { %v6339_v30 = vpop.f32.mrb[84].mxu0 }
0x2638   : > { %v13782_v32 = vpop.f32.mrb[85].mxu0  ;;  %v6346_v7 = vsel %vm2052_vm2, %v6339_v30, -inf }
0x2639   : > { %6347 = vmax.xlane.f32.xlu1 %v6346_v7  ;;  %v6342_v11 = vpop.f32.mrb[86].mxu0  ;;  %v5618_v7 = vadd.f32 %v17694_v31, %v17635_v33 }
0x263a   : > { %v13783_v39 = vpop.f32.mrb[87].mxu0  ;;  %v6349_v41 = vsel %vm2052_vm2, %v6342_v11, -inf }
0x263b   : > { %6350 = vmax.xlane.f32.xlu0 %v6349_v41  ;;  %v14913_v39 = vld [vmem:[#allocation21 + $0x30] sm:$0xff]  }
0x264a   : > { %6369 = vrot.lane.b32.xlu1 %v17714_v59, %s16494_s6 }
0x264e   : > { %6475 = vrot.lane.b32.xlu1 %v17698_v45, %s16495_s28  ;;  %v14911_v45 = vld [vmem:[#allocation21 + $0x20] sm:$0xff]  }
0x264f   : > { %13791 = vmatpush3.bf16.msra.mxu0 %v14911_v45 }
0x2650   : > { %13792 = vmatprep.subr.bf16.mxu0 %v16490_v0 }
0x2653   : > { %13793 = vmatpush3.bf16.msra.mxu0 %v14912_v2 }
0x2654   : > { %13804 = vmatprep.subr.bf16.mxu0 %v16490_v0 }
0x26c6   : > { %v6348_v34 = vpop.xlane.xlu1 %6347 }
0x26c7   : > { %v6352_v12 = vsub.f32 %v6339_v30, %v6348_v34 }
0x26c8   : > { %v6351_v38 = vpop.xlane.xlu0 %6350 }
0x26c9   : > { %v6354_v43 = vmul.f32 1.442695, %v6352_v12  ;;  %v6353_v44 = vsub.f32 %v6342_v11, %v6351_v38  ;;  %v5619_v11 = vadd.f32 %v17696_v14, %v17637_v50 }
0x26ca   : > { %v6370_v10 = vpop.permute.xlu1 %6369 }
0x26cb   : > { %15327 = vpow2.f32 %v6354_v43  ;;  %v6356_v53 = vmul.f32 1.442695, %v6353_v44  ;;  %13785 = vmatpush3.bf16.msra.mxu1 %v6370_v10 }
0x26cc   : > { %13798 = vmatprep.subr.bf16.mxu1 %v16490_v0 }
0x26cd   : > { %15329 = vpow2.f32 %v6356_v53 }
0x26d5   : > { %v15328_v55 = vpop.eup %15327 }
0x26d6   : > { %v6358_v56 = vsel %vm2052_vm2, %v15328_v55, 0.0 }
0x26d7   : > { %v15330_v57 = vpop.eup %15329  ;;  %6359 = vadd.xlane.f32.xlu0 %v6358_v56 }
0x26d8   : > { %v6361_v58 = vsel %vm2052_vm2, %v15330_v57, 0.0 }
0x26db   : > { %6362 = vadd.xlane.f32.xlu0 %v6361_v58 }
0x26f1   : > { %6477 = vrot.lane.b32.xlu0 %v17700_v49, %s16495_s28  ;;  %v6476_v49 = vpop.permute.xlu1 %6475 }
0x2764   : > { %v6360_v35 = vpop.xlane.xlu0 %6359 }
0x2765   : > { %15331 = vrcp.f32 %v6360_v35 }
0x2768   : > { %v6363_v37 = vpop.xlane.xlu0 %6362 }
0x2769   : > { %15333 = vrcp.f32 %v6363_v37 }
0x276c   : > { %v6478_v18 = vpop.permute.xlu0 %6477 }
0x276d   : > { %v6483_v1 = vsel %vm2004_vm1, %v6478_v18, 0 }
0x276f   : > { %v15332_v60 = vpop.eup %15331 }
0x2770   : > { %v6366_v17 = vmul.f32 %v15332_v60, %v15328_v55  ;;  %v12604_v60 = vld [vmem:[#allocation22] ss:$0 sm:$0xff] }
0x2773   : > { %v15334_v9 = vpop.eup %15333 }
0x2774   : > { %v6367_v62 = vmul.f32 %v15334_v9, %v15330_v57 }
0x2776   : > { %v6368_v63 = vpack.c.bf16 %v6367_v62, %v6366_v17 }
0x2778   : > { %13787 = vmatmul.mubr.msk.bf16.vlgmr.msra.gmra.mrb[112].mxu1 %vm2052_vm2, %v6368_v63 }
0x2779   : > { %13799 = vmatpush3.bf16.xpose.msra.mxu1 %v6483_v1  ;;  %13800 = vmatprep.mubr.msk.bf16.mxu1 %vm16491_vm0, %v16490_v0 }
0x277a   : > { %13810 = vmatprep.subr.bf16.mxu1 %v16490_v0 }
0x2780   : > { %13801 = vmatmul.mubr.msk.bf16.vlgmr.msra.gmra.mrb[116].mxu1 %vm2004_vm1, %v6476_v49 }
0x2781   : > { %13814 = vmatprep.mubr.msk.bf16.mxu1 %vm16491_vm0, %v16490_v0  ;;  %13811 = vmatpush3.bf16.msra.mxu1 %v14913_v39 }
0x2782   : > { %13812 = vmatprep.subr.bf16.mxu1 %v16490_v0 }
0x284b   : > { %v6409_v3 = vpop.f32.mrb[112].mxu1 }
0x284c   : > { %v13788_v4 = vpop.f32.mrb[113].mxu1 }
0x284d   : > { %v6412_v5 = vpop.f32.mrb[114].mxu1 }
0x284e   : > { %v6416_v6 = vpack.c.bf16 %v6412_v5, %v6409_v3  ;;  %v13789_v8 = vpop.f32.mrb[115].mxu1 }
0x2850   : > { %13795 = vmatmul.mubr.msk.bf16.vlgmr.msra.gmra.mrb[88].mxu0 %vm2004_vm1, %v6416_v6 }
0x2851   : > { %13806 = vmatprep.mubr.msk.bf16.mxu0 %vm16491_vm0, %v16490_v0 }
0x2853   : > { %v6519_v13 = vpop.f32.mrb[116].mxu1 }
0x2854   : > { %v13802_v15 = vpop.f32.mrb[117].mxu1  ;;  %v6526_v16 = vsel %vm2052_vm2, %v6519_v13, -inf }
0x2855   : > { %6527 = vmax.xlane.f32.xlu1 %v6526_v16  ;;  %v6522_v19 = vpop.f32.mrb[118].mxu1 }
0x2856   : > { %v13803_v40 = vpop.f32.mrb[119].mxu1  ;;  %v6529_v20 = vsel %vm2052_vm2, %v6522_v19, -inf }
0x2857   : > { %6530 = vmax.xlane.f32.xlu0 %v6529_v20  ;;  %v14918_v40 = vld [vmem:[#allocation30 + $0x10] ss:$8 sps:$4 sm:$0xff]   ;;  %v14920_v20 = vld [vmem:[#allocation30 + $0x14] ss:$8 sps:$4 sm:$0xff]  }
0x28e2   : > { %v6528_v21 = vpop.xlane.xlu1 %6527 }
0x28e3   : > { %v6532_v22 = vsub.f32 %v6519_v13, %v6528_v21  ;;  %v14921_v21 = vld [vmem:[#allocation30 + $0x20] ss:$8 sps:$4 sm:$0xff]  }
0x28e4   : > { %v6531_v23 = vpop.xlane.xlu0 %6530 }
0x28e5   : > { %v6534_v24 = vmul.f32 1.442695, %v6532_v22  ;;  %v6533_v25 = vsub.f32 %v6522_v19, %v6531_v23  ;;  %v14915_v19 = vld [vmem:[#allocation30] ss:$8 sps:$4 sm:$0xff]   ;;  %v14926_v22 = vld [vmem:[#allocation30 + $0x34] ss:$8 sps:$4 sm:$0xff]  }
0x28e6   : > { %v14924_v23 = vld [vmem:[#allocation30 + $0x30] ss:$8 sps:$4 sm:$0xff]  }
0x28e7   : > { %15335 = vpow2.f32 %v6534_v24  ;;  %v6536_v26 = vmul.f32 1.442695, %v6533_v25  ;;  %v14929_v24 = vld [vmem:[#allocation30 + $0x44] ss:$8 sps:$4 sm:$0xff]   ;;  %v14927_v25 = vld [vmem:[#allocation30 + $0x40] ss:$8 sps:$4 sm:$0xff]  }
0x28e9   : > { %15337 = vpow2.f32 %v6536_v26  ;;  %v14932_v26 = vld [vmem:[#allocation30 + $0x54] ss:$8 sps:$4 sm:$0xff]  }
0x28f1   : > { %v15336_v27 = vpop.eup %15335 }
0x28f2   : > { %v6538_v29 = vsel %vm2052_vm2, %v15336_v27, 0.0 }
0x28f3   : > { %v15338_v30 = vpop.eup %15337  ;;  %6539 = vadd.xlane.f32.xlu0 %v6538_v29  ;;  %v14935_v29 = vld [vmem:[#allocation30 + $0x64] ss:$8 sps:$4 sm:$0xff]  }
0x28f4   : > { %v6541_v32 = vsel %vm2052_vm2, %v15338_v30, 0.0 }
0x28f5   : > { %6542 = vadd.xlane.f32.xlu1 %v6541_v32  ;;  %v14938_v32 = vld [vmem:[#allocation30 + $0x74] ss:$8 sps:$4 sm:$0xff]  }
0x28f9   : > { %5624 = vadd.xlane.f32.xlu1 %v5618_v7 }
0x28fd   : > { %5626 = vadd.xlane.f32.xlu1 %v5619_v11 }
0x2909   : > { %6549 = vrot.lane.b32.xlu0 %v17714_v59, %s16495_s28 }
0x2923   : > { %v6466_v41 = vpop.f32.mrb[88].mxu0 }
0x2924   : > { %v6473_v34 = vadd.f32 %v6466_v41, %v17759_v48  ;;  %v13796_v12 = vpop.f32.mrb[89].mxu0  ;;  %v14914_v48 = vld [vmem:[#allocation21 + $0x38] sm:$0xff]  }
0x2925   : > { %v6469_v38 = vpop.f32.mrb[90].mxu0  ;;  %13813 = vmatpush3.bf16.msra.mxu1 %v14914_v48 }
0x2926   : > { %v6474_v43 = vadd.f32 %v6469_v38, %v17761_v28  ;;  %v13797_v33 = vpop.f32.mrb[91].mxu0 }
0x2980   : > { %v6540_v31 = vpop.xlane.xlu0 %6539 }
0x2981   : > { %15339 = vrcp.f32 %v6540_v31 }
0x2982   : > { %v6543_v44 = vpop.xlane.xlu1 %6542 }
0x2983   : > { %15341 = vrcp.f32 %v6543_v44 }
0x2984   : > { %v6550_v50 = vpop.permute.xlu0 %6549 }
0x2985   : > { %13805 = vmatpush3.bf16.msra.mxu0 %v6550_v50 }
0x2986   : > { %13818 = vmatprep.subr.bf16.mxu0 %v16490_v0  ;;  %v5625_v35 = vpop.xlane.xlu1 %5624 }
0x2987   : > { %v5628_v49 = vmul.f32 0.0078125, %v5625_v35 }
0x2989   : > { %v17807_v5 = vsub.f32 %v5618_v7, %v5628_v49  ;;  %v14936_v7 = vld [vmem:[#allocation30 + $0x70] ss:$8 sps:$4 sm:$0xff]  }
0x298a   : > { %v5627_v4 = vpop.xlane.xlu1 %5626  ;;  %v14945_v49 = vld [vmem:[#allocation27 + $0x30] sm:$0xff]  }
0x298b   : > { %v15340_v14 = vpop.eup %15339  ;;  %v5629_v6 = vmul.f32 0.0078125, %v5627_v4  ;;  %v5632_v15 = vmul.f32 %v17807_v5, %v17807_v5 }
0x298c   : > { %v6546_v10 = vmul.f32 %v15340_v14, %v15336_v27  ;;  %v14930_v27 = vld [vmem:[#allocation30 + $0x50] ss:$8 sps:$4 sm:$0xff]  }
0x298d   : > { %v15342_v59 = vpop.eup %15341  ;;  %v17810_v13 = vsub.f32 %v5619_v11, %v5629_v6  ;;  %v14939_v11 = vld [vmem:[#allocation27] sm:$0xff]  }
0x298e   : > { %v6547_v53 = vmul.f32 %v15342_v59, %v15338_v30  ;;  %v14933_v30 = vld [vmem:[#allocation30 + $0x60] ss:$8 sps:$4 sm:$0xff]  }
0x298f   : > { %v5633_v16 = vmul.f32 %v17810_v13, %v17810_v13 }
0x2990   : > { %v6548_v55 = vpack.c.bf16 %v6547_v53, %v6546_v10 }
0x2992   : > { %13807 = vmatmul.mubr.msk.bf16.vlgmr.msra.gmra.mrb[92].mxu0 %vm2052_vm2, %v6548_v55  ;;  %v14940_v55 = vld [vmem:[#allocation27 + $0x8] sm:$0xff]  }
0x2993   : > { %13834 = vmatprep.mubr.msk.bf16.mxu0 %vm16491_vm0, %v16490_v0  ;;  %13819 = vmatpush3.bf16.msra.mxu0 %v14939_v11 }
0x2994   : > { %13820 = vmatprep.subr.bf16.mxu0 %v16490_v0 }
0x2997   : > { %13821 = vmatpush3.bf16.msra.mxu0 %v14940_v55 }
0x2998   : > { %13822 = vmatprep.subr.bf16.mxu0 %v16490_v0 }
0x2a65   : > { %v6589_v28 = vpop.f32.mrb[92].mxu0 }
0x2a66   : > { %v13808_v56 = vpop.f32.mrb[93].mxu0 }
0x2a67   : > { %v6592_v57 = vpop.f32.mrb[94].mxu0  ;;  %v14941_v56 = vld [vmem:[#allocation27 + $0x10] sm:$0xff]  }
0x2a68   : > { %v6596_v58 = vpack.c.bf16 %v6592_v57, %v6589_v28  ;;  %v13809_v45 = vpop.f32.mrb[95].mxu0  ;;  %v12558_v57 = vld [vmem:[#allocation15 + $0x1] ss:$0 sm:$0xff]  ;;  %13823 = vmatpush3.bf16.msra.mxu0 %v14941_v56 }
0x2a69   : > { %13824 = vmatprep.subr.bf16.mxu0 %v16490_v0 }
0x2a6a   : > { %13815 = vmatmul.mubr.msk.bf16.vlgmr.msra.gmra.mrb[120].mxu1 %vm2004_vm1, %v6596_v58 }
0x2a6b   : > { %6959 = vmatprep.mubr.bf16.mxu1 %v16492_v36 }
0x2b3d   : > { %v6646_v37 = vpop.f32.mrb[120].mxu1 }
0x2b3e   : > { %v6653_v9 = vadd.f32 %v6646_v37, %v6473_v34  ;;  %v13816_v17 = vpop.f32.mrb[121].mxu1  ;;  %v14942_v37 = vld [vmem:[#allocation27 + $0x18] sm:$0xff]  }
0x2b3f   : > { %v6649_v62 = vpop.f32.mrb[122].mxu1  ;;  %13825 = vmatpush3.bf16.msra.mxu0 %v14942_v37 }
0x2b40   : > { %v6662_v18 = vadd.f32 %v12604_v60, %v6653_v9  ;;  %v6654_v63 = vadd.f32 %v6649_v62, %v6474_v43  ;;  %v13817_v1 = vpop.f32.mrb[123].mxu1  ;;  %13826 = vmatprep.subr.bf16.mxu0 %v16490_v0 }
0x2b41   : > { %v14944_v1 = vld [vmem:[#allocation27 + $0x28] sm:$0xff]  }
0x2b42   : > { %v6663_v2 = vadd.f32 %v12604_v60, %v6654_v63  ;;  %v6664_v3 = vadd.f32 %v6662_v18, %v17287_v46  ;;  %v14917_v46 = vld [vmem:[#allocation30 + $0x4] ss:$8 sps:$4 sm:$0xff]   ;;  %v12559_v60 = vld [vmem:[#allocation16 + $0x1] ss:$0 sm:$0xff] }
0x2b43   : > { %6927 = vmatprep.subr.bf16.mxu1 %v14917_v46  ;;  %v14943_v18 = vld [vmem:[#allocation27 + $0x20] sm:$0xff]  }
0x2b44   : > { %6668 = vadd.xlane.f32.xlu1 %v6664_v3  ;;  %v6665_v8 = vadd.f32 %v6663_v2, %v17289_v47  ;;  %6928 = vmatpush1.bf16.msra.mxu1 %v14915_v19  ;;  %v14923_v47 = vld [vmem:[#allocation30 + $0x24] ss:$8 sps:$4 sm:$0xff]   ;;  %v14946_v2 = vld [vmem:[#allocation27 + $0x38] sm:$0xff]  }
0x2b45   : > { %6929 = vmatprep.subr.bf16.mxu1 %v14920_v20  ;;  %13827 = vmatpush3.bf16.msra.mxu0 %v14943_v18  ;;  %v12605_v19 = vld [vmem:[#allocation24] ss:$0 sm:$0xff] }
0x2b46   : > { %13828 = vmatprep.subr.bf16.mxu0 %v16490_v0 }
0x2b48   : > { %6670 = vadd.xlane.f32.xlu1 %v6665_v8  ;;  %6930 = vmatpush1.bf16.msra.mxu1 %v14918_v40 }
0x2b49   : > { %6931 = vmatprep.subr.bf16.mxu1 %v14923_v47  ;;  %13829 = vmatpush3.bf16.msra.mxu0 %v14944_v1  ;;  %v12606_v47 = vld [vmem:[#allocation25] ss:$0 sm:$0xff] }
0x2b4a   : > { %13830 = vmatprep.subr.bf16.mxu0 %v16490_v0 }
0x2b4c   : > { %5634 = vadd.xlane.f32.xlu1 %v5632_v15  ;;  %6932 = vmatpush1.bf16.msra.mxu1 %v14921_v21 }
0x2b4d   : > { %6933 = vmatprep.subr.bf16.mxu1 %v14926_v22  ;;  %13831 = vmatpush3.bf16.msra.mxu0 %v14945_v49 }
0x2b4e   : > { %13832 = vmatprep.subr.bf16.mxu0 %v16490_v0 }
0x2b50   : > { %5636 = vadd.xlane.f32.xlu1 %v5633_v16  ;;  %6934 = vmatpush1.bf16.msra.mxu1 %v14924_v23 }
0x2b51   : > { %6935 = vmatprep.subr.bf16.mxu1 %v14929_v24  ;;  %13833 = vmatpush3.bf16.msra.mxu0 %v14946_v2 }
0x2b52   : > { %13838 = vmatprep.subr.bf16.mxu0 %v16490_v0 }
0x2b54   : > { %6936 = vmatpush1.bf16.msra.mxu1 %v14927_v25  ;;  %v6835_v25 = vld [vmem:[#allocation31] sm:$0x3] }
0x2b55   : > { %6937 = vmatprep.subr.bf16.mxu1 %v14932_v26  ;;  %v6840_v26 = vrot.slane %v6835_v25, %v17304_v51 }
0x2b58   : > { %6938 = vmatpush1.bf16.msra.mxu1 %v14930_v27 }
0x2b59   : > { %6939 = vmatprep.subr.bf16.mxu1 %v14935_v29  ;;  %v6844_v29 = vrot.slane %v6835_v25, %v17310_v54 }
0x2b5c   : > { %6940 = vmatpush1.bf16.msra.mxu1 %v14933_v30 }
0x2b5d   : > { %6941 = vmatprep.subr.bf16.mxu1 %v14938_v32 }
0x2b60   : > { %6942 = vmatpush1.bf16.msra.mxu1 %v14936_v7 }
0x2b61   : > { %13844 = vmatprep.subr.bf16.mxu1 %v16490_v0 }
0x2bd1   : > { %v6669_v39 = vpop.xlane.xlu1 %6668 }
0x2bd2   : > { %v6672_v41 = vmul.f32 0.0078125, %v6669_v39 }
0x2bd4   : > { %v6674_v34 = vsub.f32 %v6664_v3, %v6672_v41 }
0x2bd5   : > { %v6671_v12 = vpop.xlane.xlu1 %6670 }
0x2bd6   : > { %v6673_v38 = vmul.f32 0.0078125, %v6671_v12  ;;  %v6676_v43 = vmul.f32 %v6674_v34, %v6674_v34 }
0x2bd8   : > { %v6675_v33 = vsub.f32 %v6665_v8, %v6673_v38  ;;  %6678 = vadd.xlane.f32.xlu0 %v6676_v43 }
0x2bd9   : > { %v5635_v31 = vpop.xlane.xlu1 %5634 }
0x2bda   : > { %v5638_v44 = vmul.f32 0.0078125, %v5635_v31  ;;  %v6677_v50 = vmul.f32 %v6675_v33, %v6675_v33 }
0x2bdc   : > { %v5640_v14 = vadd.f32 1e-05, %v5638_v44  ;;  %6680 = vadd.xlane.f32.xlu1 %v6677_v50 }
0x2bdd   : > { %v5637_v59 = vpop.xlane.xlu1 %5636 }
0x2bde   : > { %15343 = vrsqrt.f32 %v5640_v14  ;;  %v5639_v10 = vmul.f32 0.0078125, %v5637_v59 }
0x2be0   : > { %v5641_v53 = vadd.f32 1e-05, %v5639_v10 }
0x2be2   : > { %15345 = vrsqrt.f32 %v5641_v53 }
0x2be8   : > { %v15344_v48 = vpop.eup %15343 }
0x2be9   : > { %v5644_v28 = vmul.f32 %v15344_v48, %v17807_v5 }
0x2beb   : > { %v5652_v35 = vmul.f32 %v12558_v57, %v5644_v28 }
0x2bec   : > { %v15346_v58 = vpop.eup %15345 }
0x2bed   : > { %v5645_v45 = vmul.f32 %v15346_v58, %v17810_v13  ;;  %v5660_v17 = vadd.f32 %v12559_v60, %v5652_v35 }
0x2bef   : > { %v5653_v9 = vmul.f32 %v12558_v57, %v5645_v45 }
0x2bf1   : > { %v5661_v62 = vadd.f32 %v12559_v60, %v5653_v9 }
0x2bf3   : > { %v17823_v63 = vpack.c.bf16 %v5661_v62, %v5660_v17 }
0x2bf5   : > { %6960 = vmatmul.mubr.bf16.vlgmr.msra.gmra.mrb[124].mxu1 %v17823_v63 }
0x2bf6   : > { %13846 = vmatprep.mubr.msk.bf16.mxu1 %vm16491_vm0, %v16490_v0 }
0x2c65   : > { %v6679_v3 = vpop.xlane.xlu0 %6678 }
0x2c66   : > { %v6682_v4 = vmul.f32 0.0078125, %v6679_v3 }
0x2c68   : > { %v6684_v5 = vadd.f32 1e-05, %v6682_v4 }
0x2c69   : > { %v6681_v6 = vpop.xlane.xlu1 %6680 }
0x2c6a   : > { %15347 = vrsqrt.f32 %v6684_v5  ;;  %v6683_v8 = vmul.f32 0.0078125, %v6681_v6 }
0x2c6c   : > { %v6685_v13 = vadd.f32 1e-05, %v6683_v8 }
0x2c6e   : > { %15349 = vrsqrt.f32 %v6685_v13 }
0x2c74   : > { %v15348_v15 = vpop.eup %15347 }
0x2c75   : > { %v6688_v16 = vmul.f32 %v15348_v15, %v6674_v34 }
0x2c77   : > { %v6696_v20 = vmul.f32 %v12605_v19, %v6688_v16 }
0x2c78   : > { %v15350_v46 = vpop.eup %15349 }
0x2c79   : > { %v6689_v40 = vmul.f32 %v15350_v46, %v6675_v33  ;;  %v17832_v22 = vadd.f32 %v12606_v47, %v6696_v20  ;;  %v12607_v33 = vld [vmem:[#allocation28] ss:$0 sm:$0xff] }
0x2c7b   : > { %v6697_v21 = vmul.f32 %v12605_v19, %v6689_v40 }
0x2c7d   : > { %v17834_v23 = vadd.f32 %v12606_v47, %v6697_v21 }
0x2c7f   : > { %v6706_v24 = vpack.c.bf16 %v17834_v23, %v17832_v22 }
0x2c81   : > { %13835 = vmatmul.mubr.bf16.vlgmr.msra.gmra.mrb[96].mxu0 %v6706_v24 }
0x2c82   : > { %13840 = vmatprep.mubr.msk.bf16.mxu0 %vm16491_vm0, %v16490_v0 }
0x2cc8   : > { %v6961_v27 = vpop.f32.mrb[124].mxu1 }
0x2cc9   : > { %v6963_v30 = vpop.f32.mrb[125].mxu1  ;;  %v6962_v7 = vadd.f32 %v6961_v27, %v6840_v26 }
0x2cca   : > { %v6965_v32 = vpop.f32.mrb[126].mxu1  ;;  %v6964_v41 = vadd.f32 %v6963_v30, %v6844_v29 }
0x2ccb   : > { %v6966_v11 = vadd.f32 %v6965_v32, %v6840_v26  ;;  %v6967_v39 = vpop.f32.mrb[127].mxu1 }
0x2ccc   : > { %v6968_v34 = vadd.f32 %v6967_v39, %v6844_v29 }
0x2ccd   : > { %v17842_v12 = vpack.c.bf16 %v6966_v11, %v6962_v7 }
0x2cce   : > { %v17844_v38 = vpack.c.bf16 %v6968_v34, %v6964_v41  ;;  %v14949_v34 = vld [vmem:[#allocation33 + $0x10] sm:$0xff]  }
0x2ccf   : > { %7108 = vrot.lane.b32.xlu1 %v17842_v12, %s16493_s9  ;;  %v6993_v43 = vsel %vm2004_vm1, %v17842_v12, 0 }
0x2cd0   : > { %13839 = vmatpush3.bf16.xpose.msra.mxu0 %v6993_v43  ;;  %13845 = vmatpush3.bf16.msra.mxu1 %v17844_v38  ;;  %v14950_v43 = vld [vmem:[#allocation33 + $0x18] sm:$0xff]  }
0x2cd1   : > { %13850 = vmatprep.subr.bf16.mxu0 %v16490_v0  ;;  %13856 = vmatprep.subr.bf16.mxu1 %v16490_v0 }
0x2d41   : > { %v7109_v53 = vpop.permute.xlu1 %7108 }
0x2d42   : > { %v7114_v48 = vsel %vm2004_vm1, %v7109_v53, 0  ;;  %v14947_v53 = vld [vmem:[#allocation33] sm:$0xff]  }
0x2d54   : > { %v6812_v31 = vpop.f32.mrb[96].mxu0 }
0x2d55   : > { %v13836_v44 = vpop.f32.mrb[97].mxu0  ;;  %v6813_v14 = vadd.f32 %v12607_v33, %v6812_v31 }
0x2d56   : > { %v6815_v50 = vpop.f32.mrb[98].mxu0 }
0x2d57   : > { %v6816_v59 = vadd.f32 %v12607_v33, %v6815_v50  ;;  %v13837_v10 = vpop.f32.mrb[99].mxu0 }
0x2d59   : > { %v17853_v55 = vpack.c.bf16 %v6816_v59, %v6813_v14 }
0x2d5b   : > { %7105 = vrot.lane.b32.xlu1 %v17853_v55, %s16493_s9  ;;  %13841 = vmatmul.mubr.msk.bf16.vlgmr.msra.gmra.mrb[100].mxu0 %vm2004_vm1, %v17853_v55 }
0x2d5c   : > { %13851 = vmatpush3.bf16.xpose.msra.mxu0 %v7114_v48  ;;  %13852 = vmatprep.mubr.msk.bf16.mxu0 %vm16491_vm0, %v16490_v0 }
0x2d5d   : > { %13862 = vmatprep.subr.bf16.mxu0 %v16490_v0 }
0x2dcd   : > { %v7106_v28 = vpop.permute.xlu1 %7105 }
0x2dce   : > { %13853 = vmatmul.mubr.msk.bf16.vlgmr.msra.gmra.mrb[104].mxu0 %vm2004_vm1, %v7106_v28  ;;  %v14948_v28 = vld [vmem:[#allocation33 + $0x8] sm:$0xff]  }
0x2dcf   : > { %13866 = vmatprep.mubr.msk.bf16.mxu0 %vm16491_vm0, %v16490_v0  ;;  %13863 = vmatpush3.bf16.msra.mxu0 %v14949_v34 }
0x2dd0   : > { %13864 = vmatprep.subr.bf16.mxu0 %v16490_v0 }
0x2dd3   : > { %13865 = vmatpush3.bf16.msra.mxu0 %v14950_v43 }
0x2dd4   : > { %13878 = vmatprep.subr.bf16.mxu0 %v16490_v0 }
0x2e2e   : > { %v7029_v56 = vpop.f32.mrb[100].mxu0 }
0x2e2f   : > { %v13842_v57 = vpop.f32.mrb[101].mxu0  ;;  %v7036_v58 = vsel %vm2052_vm2, %v7029_v56, -inf }
0x2e30   : > { %7037 = vmax.xlane.f32.xlu1 %v7036_v58  ;;  %v7032_v45 = vpop.f32.mrb[102].mxu0 }
0x2e31   : > { %v13843_v35 = vpop.f32.mrb[103].mxu0  ;;  %v7039_v37 = vsel %vm2052_vm2, %v7032_v45, -inf }
0x2e32   : > { %7040 = vmax.xlane.f32.xlu0 %v7039_v37 }
0x2e41   : > { %7343 = vrot.lane.b32.xlu1 %v17842_v12, %s16494_s6 }
0x2e45   : > { %7341 = vrot.lane.b32.xlu1 %v17853_v55, %s16494_s6 }
0x2ea1   : > { %v7150_v60 = vpop.f32.mrb[104].mxu0 }
0x2ea2   : > { %v13854_v9 = vpop.f32.mrb[105].mxu0  ;;  %v7157_v17 = vsel %vm2052_vm2, %v7150_v60, -inf }
0x2ea3   : > { %7158 = vmax.xlane.f32.xlu0 %v7157_v17  ;;  %v7153_v62 = vpop.f32.mrb[106].mxu0 }
0x2ea4   : > { %v13855_v18 = vpop.f32.mrb[107].mxu0  ;;  %v7160_v1 = vsel %vm2052_vm2, %v7153_v62, -inf }
0x2ea7   : > { %7161 = vmax.xlane.f32.xlu0 %v7160_v1 }
0x2ebd   : > { %v7038_v49 = vpop.xlane.xlu1 %7037 }
0x2ebe   : > { %v7042_v2 = vsub.f32 %v7029_v56, %v7038_v49 }
0x2ebf   : > { %v7041_v3 = vpop.xlane.xlu0 %7040 }
0x2ec0   : > { %v7044_v4 = vmul.f32 1.442695, %v7042_v2  ;;  %v7043_v5 = vsub.f32 %v7032_v45, %v7041_v3 }
0x2ec1   : > { %v7344_v9 = vpop.permute.xlu1 %7343 }
0x2ec2   : > { %15351 = vpow2.f32 %v7044_v4  ;;  %v7046_v6 = vmul.f32 1.442695, %v7043_v5  ;;  %v7349_v1 = vsel %vm2004_vm1, %v7344_v9, 0 }
0x2ec4   : > { %15353 = vpow2.f32 %v7046_v6 }
0x2ec5   : > { %v7342_v49 = vpop.permute.xlu1 %7341 }
0x2ecc   : > { %v15352_v8 = vpop.eup %15351 }
0x2ecd   : > { %v7048_v13 = vsel %vm2052_vm2, %v15352_v8, 0.0 }
0x2ece   : > { %v15354_v15 = vpop.eup %15353  ;;  %7049 = vadd.xlane.f32.xlu0 %v7048_v13 }
0x2ecf   : > { %v7051_v16 = vsel %vm2052_vm2, %v15354_v15, 0.0 }
0x2ed2   : > { %7052 = vadd.xlane.f32.xlu0 %v7051_v16 }
0x2f30   : > { %v7159_v19 = vpop.xlane.xlu0 %7158 }
0x2f31   : > { %v7163_v46 = vsub.f32 %v7150_v60, %v7159_v19 }
0x2f33   : > { %v7165_v40 = vmul.f32 1.442695, %v7163_v46 }
0x2f34   : > { %v7162_v20 = vpop.xlane.xlu0 %7161 }
0x2f35   : > { %15355 = vpow2.f32 %v7165_v40  ;;  %v7164_v47 = vsub.f32 %v7153_v62, %v7162_v20 }
0x2f37   : > { %v7167_v21 = vmul.f32 1.442695, %v7164_v47 }
0x2f39   : > { %15357 = vpow2.f32 %v7167_v21 }
0x2f3f   : > { %v15356_v24 = vpop.eup %15355 }
0x2f40   : > { %v7169_v25 = vsel %vm2052_vm2, %v15356_v24, 0.0 }
0x2f41   : > { %7170 = vadd.xlane.f32.xlu0 %v7169_v25 }
0x2f43   : > { %v15358_v26 = vpop.eup %15357 }
0x2f44   : > { %v7172_v27 = vsel %vm2052_vm2, %v15358_v26, 0.0 }
0x2f45   : > { %7173 = vadd.xlane.f32.xlu0 %v7172_v27 }
0x2f5b   : > { %7181 = vrot.lane.b32.xlu0 %v17844_v38, %s16493_s9  ;;  %v7050_v29 = vpop.xlane.xlu0 %7049 }
0x2f5c   : > { %15359 = vrcp.f32 %v7050_v29 }
0x2f5f   : > { %v7053_v30 = vpop.xlane.xlu0 %7052 }
0x2f60   : > { %15361 = vrcp.f32 %v7053_v30 }
0x2f66   : > { %v15360_v32 = vpop.eup %15359 }
0x2f67   : > { %v7056_v11 = vmul.f32 %v15360_v32, %v15352_v8 }
0x2f6a   : > { %v15362_v7 = vpop.eup %15361 }
0x2f6b   : > { %v7057_v39 = vmul.f32 %v15362_v7, %v15354_v15 }
0x2f6d   : > { %v7058_v41 = vpack.c.bf16 %v7057_v39, %v7056_v11 }
0x2f6f   : > { %13847 = vmatmul.mubr.msk.bf16.vlgmr.msra.gmra.mrb[128].mxu1 %vm2052_vm2, %v7058_v41 }
0x2f70   : > { %13858 = vmatprep.mubr.msk.bf16.mxu1 %vm16491_vm0, %v16490_v0 }
0x2fce   : > { %v7171_v33 = vpop.xlane.xlu0 %7170 }
0x2fcf   : > { %15363 = vrcp.f32 %v7171_v33 }
0x2fd2   : > { %v7174_v31 = vpop.xlane.xlu0 %7173 }
0x2fd3   : > { %15365 = vrcp.f32 %v7174_v31 }
0x2fd6   : > { %v7182_v44 = vpop.permute.xlu0 %7181 }
0x2fd7   : > { %13857 = vmatpush3.bf16.msra.mxu1 %v7182_v44 }
0x2fd8   : > { %13870 = vmatprep.subr.bf16.mxu1 %v16490_v0 }
0x2fd9   : > { %v15364_v50 = vpop.eup %15363 }
0x2fda   : > { %v7177_v59 = vmul.f32 %v15364_v50, %v15356_v24 }
0x2fdd   : > { %v15366_v14 = vpop.eup %15365 }
0x2fde   : > { %v7178_v10 = vmul.f32 %v15366_v14, %v15358_v26 }
0x2fe0   : > { %v7179_v48 = vpack.c.bf16 %v7178_v10, %v7177_v59 }
0x2fe2   : > { %13859 = vmatmul.mubr.msk.bf16.vlgmr.msra.gmra.mrb[132].mxu1 %vm2052_vm2, %v7179_v48  ;;  %v14952_v48 = vld [vmem:[#allocation33 + $0x28] sm:$0xff]  }
0x2fe3   : > { %13871 = vmatpush3.bf16.msra.mxu1 %v14947_v53  ;;  %13874 = vmatprep.mubr.msk.bf16.mxu1 %vm16491_vm0, %v16490_v0 }
0x2fe4   : > { %13872 = vmatprep.subr.bf16.mxu1 %v16490_v0 }
0x2fe7   : > { %13873 = vmatpush3.bf16.msra.mxu1 %v14948_v28 }
0x2fe8   : > { %13884 = vmatprep.subr.bf16.mxu1 %v16490_v0 }
0x3042   : > { %v7096_v56 = vpop.f32.mrb[128].mxu1 }
0x3043   : > { %v13848_v57 = vpop.f32.mrb[129].mxu1 }
0x3044   : > { %v7099_v58 = vpop.f32.mrb[130].mxu1 }
0x3045   : > { %v7103_v45 = vpack.c.bf16 %v7099_v58, %v7096_v56  ;;  %v13849_v35 = vpop.f32.mrb[131].mxu1 }
0x3047   : > { %13875 = vmatmul.mubr.msk.bf16.vlgmr.msra.gmra.mrb[136].mxu1 %vm2004_vm1, %v7103_v45 }
0x3048   : > { %13886 = vmatprep.mubr.msk.bf16.mxu1 %vm16491_vm0, %v16490_v0 }
0x30b5   : > { %v7221_v37 = vpop.f32.mrb[132].mxu1 }
0x30b6   : > { %v13860_v60 = vpop.f32.mrb[133].mxu1 }
0x30b7   : > { %v7224_v17 = vpop.f32.mrb[134].mxu1 }
0x30b8   : > { %v7228_v62 = vpack.c.bf16 %v7224_v17, %v7221_v37  ;;  %v13861_v18 = vpop.f32.mrb[135].mxu1 }
0x30ba   : > { %13867 = vmatmul.mubr.msk.bf16.vlgmr.msra.gmra.mrb[108].mxu0 %vm2004_vm1, %v7228_v62 }
0x30bb   : > { %13879 = vmatpush3.bf16.xpose.msra.mxu0 %v7349_v1  ;;  %13880 = vmatprep.mubr.msk.bf16.mxu0 %vm16491_vm0, %v16490_v0 }
0x30bc   : > { %13890 = vmatprep.subr.bf16.mxu0 %v16490_v0 }
0x30c2   : > { %13881 = vmatmul.mubr.msk.bf16.vlgmr.msra.gmra.mrb[112].mxu0 %vm2004_vm1, %v7342_v49 }
0x30c3   : > { %13894 = vmatprep.mubr.msk.bf16.mxu0 %vm16491_vm0, %v16490_v0 }
0x311a   : > { %v7334_v2 = vpop.f32.mrb[136].mxu1 }
0x311b   : > { %v13876_v3 = vpop.f32.mrb[137].mxu1 }
0x311c   : > { %v7337_v4 = vpop.f32.mrb[138].mxu1 }
0x311d   : > { %v13877_v5 = vpop.f32.mrb[139].mxu1 }
0x318d   : > { %v7278_v6 = vpop.f32.mrb[108].mxu0 }
0x318e   : > { %v17902_v8 = vadd.f32 %v7334_v2, %v7278_v6  ;;  %v13868_v13 = vpop.f32.mrb[109].mxu0 }
0x318f   : > { %v7281_v15 = vpop.f32.mrb[110].mxu0 }
0x3190   : > { %v17904_v16 = vadd.f32 %v7337_v4, %v7281_v15  ;;  %v13869_v19 = vpop.f32.mrb[111].mxu0 }
0x3195   : > { %v7385_v46 = vpop.f32.mrb[112].mxu0 }
0x3196   : > { %v13882_v40 = vpop.f32.mrb[113].mxu0  ;;  %v7392_v20 = vsel %vm2052_vm2, %v7385_v46, -inf }
0x3197   : > { %7393 = vmax.xlane.f32.xlu0 %v7392_v20  ;;  %v7388_v47 = vpop.f32.mrb[114].mxu0 }
0x3198   : > { %v13883_v21 = vpop.f32.mrb[115].mxu0  ;;  %v7395_v24 = vsel %vm2052_vm2, %v7388_v47, -inf }
0x3199   : > { %7396 = vmax.xlane.f32.xlu1 %v7395_v24 }
0x31aa   : > { %7523 = vrot.lane.b32.xlu1 %v17842_v12, %s16495_s28  ;;  %v14951_v12 = vld [vmem:[#allocation33 + $0x20] sm:$0xff]  }
0x31ab   : > { %13891 = vmatpush3.bf16.msra.mxu0 %v14951_v12 }
0x31ac   : > { %13892 = vmatprep.subr.bf16.mxu0 %v16490_v0 }
0x31ae   : > { %7521 = vrot.lane.b32.xlu1 %v17853_v55, %s16495_s28 }
0x31af   : > { %13893 = vmatpush3.bf16.msra.mxu0 %v14952_v48  ;;  %v14955_v48 = vld [vmem:[#allocation39] ss:$20 sps:$4 sm:$0xff]  }
0x31b0   : > { %13904 = vmatprep.subr.bf16.mxu0 %v16490_v0 }
0x3224   : > { %v7394_v25 = vpop.xlane.xlu0 %7393 }
0x3225   : > { %v7398_v26 = vsub.f32 %v7385_v46, %v7394_v25  ;;  %v14953_v46 = vld [vmem:[#allocation33 + $0x30] sm:$0xff]  }
0x3226   : > { %v7397_v27 = vpop.xlane.xlu1 %7396 }
0x3227   : > { %v7400_v29 = vmul.f32 1.442695, %v7398_v26  ;;  %v7399_v30 = vsub.f32 %v7388_v47, %v7397_v27 }
0x3229   : > { %15367 = vpow2.f32 %v7400_v29  ;;  %v7402_v32 = vmul.f32 1.442695, %v7399_v30 }
0x322a   : > { %v7524_v14 = vpop.permute.xlu1 %7523 }
0x322b   : > { %15369 = vpow2.f32 %v7402_v32  ;;  %v7529_v10 = vsel %vm2004_vm1, %v7524_v14, 0 }
0x322e   : > { %v7522_v53 = vpop.permute.xlu1 %7521 }
0x3233   : > { %v15368_v7 = vpop.eup %15367 }
0x3234   : > { %v7404_v11 = vsel %vm2052_vm2, %v15368_v7, 0.0 }
0x3235   : > { %v15370_v39 = vpop.eup %15369  ;;  %7405 = vadd.xlane.f32.xlu0 %v7404_v11  ;;  %v14954_v11 = vld [vmem:[#allocation33 + $0x38] sm:$0xff]  }
0x3236   : > { %v7407_v41 = vsel %vm2052_vm2, %v15370_v39, 0.0 }
0x3239   : > { %7408 = vadd.xlane.f32.xlu0 %v7407_v41 }
0x324f   : > { %7415 = vrot.lane.b32.xlu0 %v17844_v38, %s16494_s6 }
0x32c2   : > { %v7406_v55 = vpop.xlane.xlu0 %7405 }
0x32c3   : > { %15371 = vrcp.f32 %v7406_v55 }
0x32c6   : > { %v7409_v34 = vpop.xlane.xlu0 %7408 }
0x32c7   : > { %15373 = vrcp.f32 %v7409_v34  ;;  %v12652_v34 = vld [vmem:[#allocation34] ss:$0 sm:$0xff] }
0x32ca   : > { %v7416_v43 = vpop.permute.xlu0 %7415 }
0x32cb   : > { %13885 = vmatpush3.bf16.msra.mxu1 %v7416_v43 }
0x32cc   : > { %13898 = vmatprep.subr.bf16.mxu1 %v16490_v0 }
0x32cd   : > { %v15372_v33 = vpop.eup %15371 }
0x32ce   : > { %v7412_v44 = vmul.f32 %v15372_v33, %v15368_v7 }
0x32d1   : > { %v15374_v31 = vpop.eup %15373 }
0x32d2   : > { %v7413_v50 = vmul.f32 %v15374_v31, %v15370_v39 }
0x32d4   : > { %v7414_v59 = vpack.c.bf16 %v7413_v50, %v7412_v44 }
0x32d6   : > { %13887 = vmatmul.mubr.msk.bf16.vlgmr.msra.gmra.mrb[140].mxu1 %vm2052_vm2, %v7414_v59 }
0x32d7   : > { %13899 = vmatpush3.bf16.xpose.msra.mxu1 %v7529_v10  ;;  %13900 = vmatprep.mubr.msk.bf16.mxu1 %vm16491_vm0, %v16490_v0 }
0x32d8   : > { %13910 = vmatprep.subr.bf16.mxu1 %v16490_v0 }
0x32de   : > { %13901 = vmatmul.mubr.msk.bf16.vlgmr.msra.gmra.mrb[144].mxu1 %vm2004_vm1, %v7522_v53 }
0x32df   : > { %13914 = vmatprep.mubr.msk.bf16.mxu1 %vm16491_vm0, %v16490_v0  ;;  %13911 = vmatpush3.bf16.msra.mxu1 %v14953_v46  ;;  %v14979_v46 = vld [vmem:[#allocation39 + $0xa0] ss:$20 sps:$4 sm:$0xff]  }
0x32e0   : > { %13912 = vmatprep.subr.bf16.mxu1 %v16490_v0 }
0x32e3   : > { %13913 = vmatpush3.bf16.msra.mxu1 %v14954_v11  ;;  %v15000_v11 = vld [vmem:[#allocation39 + $0x120] ss:$20 sps:$4 sm:$0xff]  }
0x33a9   : > { %v7455_v28 = vpop.f32.mrb[140].mxu1 }
0x33aa   : > { %v13888_v56 = vpop.f32.mrb[141].mxu1 }
0x33ab   : > { %v7458_v57 = vpop.f32.mrb[142].mxu1  ;;  %v14958_v56 = vld [vmem:[#allocation39 + $0x8] ss:$20 sps:$4 sm:$0xff]  }
0x33ac   : > { %v7462_v58 = vpack.c.bf16 %v7458_v57, %v7455_v28  ;;  %v13889_v45 = vpop.f32.mrb[143].mxu1  ;;  %v14957_v28 = vld [vmem:[#allocation39 + $0x4] ss:$20 sps:$4 sm:$0xff]   ;;  %v14960_v57 = vld [vmem:[#allocation39 + $0xc] ss:$20 sps:$4 sm:$0xff]  }
0x33ad   : > { %v14966_v45 = vld [vmem:[#allocation39 + $0x34] ss:$20 sps:$4 sm:$0xff]   ;;  %8079 = vmatprep.subr.bf16.mxu1 %v14960_v57  ;;  %v15012_v57 = vld [vmem:[#allocation40] sm:$0xff]  }
0x33ae   : > { %13895 = vmatmul.mubr.msk.bf16.vlgmr.msra.gmra.mrb[116].mxu0 %vm2004_vm1, %v7462_v58  ;;  %v14963_v58 = vld [vmem:[#allocation39 + $0x2c] ss:$20 sps:$4 sm:$0xff]  }
0x33af   : > { %13906 = vmatprep.mubr.msk.bf16.mxu0 %vm16491_vm0, %v16490_v0 }
0x33b1   : > { %v7565_v35 = vpop.f32.mrb[144].mxu1 }
0x33b2   : > { %v13902_v37 = vpop.f32.mrb[145].mxu1  ;;  %v7572_v60 = vsel %vm2052_vm2, %v7565_v35, -inf }
0x33b3   : > { %7573 = vmax.xlane.f32.xlu1 %v7572_v60  ;;  %v7568_v9 = vpop.f32.mrb[146].mxu1  ;;  %v14964_v37 = vld [vmem:[#allocation39 + $0x30] ss:$20 sps:$4 sm:$0xff]  }
0x33b4   : > { %v13903_v17 = vpop.f32.mrb[147].mxu1  ;;  %v7575_v62 = vsel %vm2052_vm2, %v7568_v9, -inf }
0x33b5   : > { %7576 = vmax.xlane.f32.xlu0 %v7575_v62 }
0x33c4   : > { %7595 = vrot.lane.b32.xlu1 %v17844_v38, %s16495_s28 }
0x3440   : > { %v7574_v18 = vpop.xlane.xlu1 %7573 }
0x3441   : > { %v7578_v1 = vsub.f32 %v7565_v35, %v7574_v18  ;;  %v14961_v35 = vld [vmem:[#allocation39 + $0x28] ss:$20 sps:$4 sm:$0xff]  }
0x3442   : > { %v7577_v49 = vpop.xlane.xlu0 %7576 }
0x3443   : > { %v7580_v2 = vmul.f32 1.442695, %v7578_v1  ;;  %v7579_v3 = vsub.f32 %v7568_v9, %v7577_v49  ;;  %v14969_v49 = vld [vmem:[#allocation39 + $0x54] ss:$20 sps:$4 sm:$0xff]  }
0x3444   : > { %v7596_v4 = vpop.permute.xlu1 %7595 }
0x3445   : > { %15375 = vpow2.f32 %v7580_v2  ;;  %v7582_v5 = vmul.f32 1.442695, %v7579_v3  ;;  %13905 = vmatpush3.bf16.msra.mxu0 %v7596_v4  ;;  %v14967_v2 = vld [vmem:[#allocation39 + $0x50] ss:$20 sps:$4 sm:$0xff]   ;;  %v14970_v4 = vld [vmem:[#allocation39 + $0x58] ss:$20 sps:$4 sm:$0xff]  }
0x3446   : > { %8036 = vmatprep.subr.bf16.mxu0 %v14957_v28  ;;  %v14972_v3 = vld [vmem:[#allocation39 + $0x5c] ss:$20 sps:$4 sm:$0xff]  }
0x3447   : > { %15377 = vpow2.f32 %v7582_v5  ;;  %v14975_v5 = vld [vmem:[#allocation39 + $0x7c] ss:$20 sps:$4 sm:$0xff]  }
0x3448   : > { %v15003_v28 = vld [vmem:[#allocation39 + $0x10] ss:$20 sps:$4 sm:$0xff]  }
0x344f   : > { %v15376_v6 = vpop.eup %15375 }
0x3450   : > { %v7584_v13 = vsel %vm2052_vm2, %v15376_v6, 0.0 }
0x3451   : > { %v15378_v15 = vpop.eup %15377  ;;  %7585 = vadd.xlane.f32.xlu0 %v7584_v13  ;;  %v14978_v13 = vld [vmem:[#allocation39 + $0x84] ss:$20 sps:$4 sm:$0xff]  }
0x3452   : > { %v7587_v19 = vsel %vm2052_vm2, %v15378_v15, 0.0 }
0x3455   : > { %7588 = vadd.xlane.f32.xlu0 %v7587_v19  ;;  %v14981_v19 = vld [vmem:[#allocation39 + $0xa4] ss:$20 sps:$4 sm:$0xff]  }
0x3481   : > { %v7512_v38 = vpop.f32.mrb[116].mxu0 }
0x3482   : > { %v7519_v40 = vadd.f32 %v7512_v38, %v17902_v8  ;;  %v13896_v20 = vpop.f32.mrb[117].mxu0  ;;  %v14984_v38 = vld [vmem:[#allocation39 + $0xac] ss:$20 sps:$4 sm:$0xff]  }
0x3483   : > { %v7515_v47 = vpop.f32.mrb[118].mxu0  ;;  %v14987_v20 = vld [vmem:[#allocation39 + $0xcc] ss:$20 sps:$4 sm:$0xff]  }
0x3484   : > { %v7520_v21 = vadd.f32 %v7515_v47, %v17904_v16  ;;  %v13897_v24 = vpop.f32.mrb[119].mxu0  ;;  %v14985_v47 = vld [vmem:[#allocation39 + $0xc8] ss:$20 sps:$4 sm:$0xff]  }
0x3485   : > { %v14988_v24 = vld [vmem:[#allocation39 + $0xd0] ss:$20 sps:$4 sm:$0xff]  }
0x34de   : > { %v7586_v25 = vpop.xlane.xlu0 %7585 }
0x34df   : > { %15379 = vrcp.f32 %v7586_v25  ;;  %v14993_v25 = vld [vmem:[#allocation39 + $0xf4] ss:$20 sps:$4 sm:$0xff]  }
0x34e2   : > { %v7589_v26 = vpop.xlane.xlu0 %7588 }
0x34e3   : > { %15381 = vrcp.f32 %v7589_v26  ;;  %v14991_v26 = vld [vmem:[#allocation39 + $0xf0] ss:$20 sps:$4 sm:$0xff]  }
0x34e9   : > { %v15380_v27 = vpop.eup %15379 }
0x34ea   : > { %v7592_v30 = vmul.f32 %v15380_v27, %v15376_v6  ;;  %v14973_v6 = vld [vmem:[#allocation39 + $0x78] ss:$20 sps:$4 sm:$0xff]   ;;  %v14996_v27 = vld [vmem:[#allocation39 + $0xfc] ss:$20 sps:$4 sm:$0xff]  }
0x34ed   : > { %v15382_v29 = vpop.eup %15381 }
0x34ee   : > { %v7593_v32 = vmul.f32 %v15382_v29, %v15378_v15  ;;  %v14976_v15 = vld [vmem:[#allocation39 + $0x80] ss:$20 sps:$4 sm:$0xff]   ;;  %v14994_v29 = vld [vmem:[#allocation39 + $0xf8] ss:$20 sps:$4 sm:$0xff]  }
0x34f0   : > { %v7594_v7 = vpack.c.bf16 %v7593_v32, %v7592_v30  ;;  %v14999_v30 = vld [vmem:[#allocation39 + $0x11c] ss:$20 sps:$4 sm:$0xff]   ;;  %v14997_v32 = vld [vmem:[#allocation39 + $0x118] ss:$20 sps:$4 sm:$0xff]  }
0x34f2   : > { %13907 = vmatmul.mubr.msk.bf16.vlgmr.msra.gmra.mrb[120].mxu0 %vm2052_vm2, %v7594_v7  ;;  %v15002_v7 = vld [vmem:[#allocation39 + $0x124] ss:$20 sps:$4 sm:$0xff]  }
0x34f3   : > { %8068 = vmatprep.mubr.bf16.mxu0 %v16492_v36  ;;  %8037 = vmatpush1.bf16.msra.mxu0 %v14955_v48 }
0x34f4   : > { %8038 = vmatprep.subr.bf16.mxu0 %v14963_v58  ;;  %v15015_v58 = vld [vmem:[#allocation40 + $0x48] sm:$0xff]  }
0x34f7   : > { %8039 = vmatpush1.bf16.msra.mxu0 %v14961_v35  ;;  %v15016_v35 = vld [vmem:[#allocation40 + $0x8] sm:$0xff]  }
0x34f8   : > { %8040 = vmatprep.subr.bf16.mxu0 %v14969_v49  ;;  %v15031_v49 = vld [vmem:[#allocation40 + $0x68] sm:$0xff]  }
0x34fb   : > { %8041 = vmatpush1.bf16.msra.mxu0 %v14967_v2  ;;  %v15008_v2 = vld [vmem:[#allocation39 + $0xd8] ss:$20 sps:$4 sm:$0xff]  }
0x34fc   : > { %8042 = vmatprep.subr.bf16.mxu0 %v14975_v5  ;;  %v15010_v5 = vld [vmem:[#allocation39 + $0x128] ss:$20 sps:$4 sm:$0xff]  }
0x34ff   : > { %8043 = vmatpush1.bf16.msra.mxu0 %v14973_v6  ;;  %v15013_v6 = vld [vmem:[#allocation40 + $0xc0] sm:$0xff]  }
0x3500   : > { %8044 = vmatprep.subr.bf16.mxu0 %v14981_v19  ;;  %v15018_v19 = vld [vmem:[#allocation40 + $0x88] sm:$0xff]  }
0x3503   : > { %8045 = vmatpush1.bf16.msra.mxu0 %v14979_v46  ;;  %v15021_v46 = vld [vmem:[#allocation40 + $0xd0] sm:$0xff]  }
0x3504   : > { %8046 = vmatprep.subr.bf16.mxu0 %v14987_v20  ;;  %v15026_v20 = vld [vmem:[#allocation40 + $0x98] sm:$0xff]  }
0x3507   : > { %8047 = vmatpush1.bf16.msra.mxu0 %v14985_v47  ;;  %v15029_v47 = vld [vmem:[#allocation40 + $0xe0] sm:$0xff]  }
0x3508   : > { %8048 = vmatprep.subr.bf16.mxu0 %v14993_v25  ;;  %v15034_v25 = vld [vmem:[#allocation40 + $0xa8] sm:$0xff]  }
0x350b   : > { %8049 = vmatpush1.bf16.msra.mxu0 %v14991_v26  ;;  %v15035_v26 = vld [vmem:[#allocation40 + $0x70] sm:$0xff]  }
0x350c   : > { %8050 = vmatprep.subr.bf16.mxu0 %v14999_v30  ;;  %v15038_v30 = vld [vmem:[#allocation40 + $0xb0] sm:$0xff]  }
0x350f   : > { %8051 = vmatpush1.bf16.msra.mxu0 %v14997_v32  ;;  %v15039_v32 = vld [vmem:[#allocation40 + $0x78] sm:$0xff]  }
0x3510   : > { %13918 = vmatprep.subr.bf16.mxu0 %v16490_v0 }
0x35c5   : > { %v7635_v8 = vpop.f32.mrb[120].mxu0 }
0x35c6   : > { %v13908_v39 = vpop.f32.mrb[121].mxu0 }
0x35c7   : > { %v7638_v41 = vpop.f32.mrb[122].mxu0 }
0x35c8   : > { %v7642_v16 = vpack.c.bf16 %v7638_v41, %v7635_v8  ;;  %v13909_v12 = vpop.f32.mrb[123].mxu0  ;;  %v15011_v8 = vld [vmem:[#allocation40 + $0x40] sm:$0xff]  }
0x35ca   : > { %13915 = vmatmul.mubr.msk.bf16.vlgmr.msra.gmra.mrb[148].mxu1 %vm2004_vm1, %v7642_v16 }
0x35cb   : > { %8111 = vmatprep.mubr.bf16.mxu1 %v16492_v36  ;;  %8080 = vmatpush1.bf16.msra.mxu1 %v14958_v56 }
0x35cc   : > { %8081 = vmatprep.subr.bf16.mxu1 %v14966_v45  ;;  %v15004_v45 = vld [vmem:[#allocation39 + $0x38] ss:$20 sps:$4 sm:$0xff]  }
0x35cf   : > { %8082 = vmatpush1.bf16.msra.mxu1 %v14964_v37  ;;  %v15019_v37 = vld [vmem:[#allocation40 + $0x50] sm:$0xff]  }
0x35d0   : > { %8083 = vmatprep.subr.bf16.mxu1 %v14972_v3  ;;  %v15032_v3 = vld [vmem:[#allocation40 + $0x28] sm:$0xff]  }
0x35d3   : > { %8084 = vmatpush1.bf16.msra.mxu1 %v14970_v4  ;;  %v15009_v4 = vld [vmem:[#allocation39 + $0x100] ss:$20 sps:$4 sm:$0xff]  }
0x35d4   : > { %8085 = vmatprep.subr.bf16.mxu1 %v14978_v13  ;;  %v15014_v13 = vld [vmem:[#allocation40 + $0x80] sm:$0xff]  }
0x35d7   : > { %8086 = vmatpush1.bf16.msra.mxu1 %v14976_v15  ;;  %v15017_v15 = vld [vmem:[#allocation40 + $0xc8] sm:$0xff]  }
0x35d8   : > { %8087 = vmatprep.subr.bf16.mxu1 %v14984_v38  ;;  %v15022_v38 = vld [vmem:[#allocation40 + $0x90] sm:$0xff]  }
0x369d   : > { %v7692_v55 = vpop.f32.mrb[148].mxu1 }
0x369e   : > { %v7699_v43 = vadd.f32 %v7692_v55, %v7519_v40  ;;  %v13916_v33 = vpop.f32.mrb[149].mxu1  ;;  %v14982_v40 = vld [vmem:[#allocation39 + $0xa8] ss:$20 sps:$4 sm:$0xff]  }
0x369f   : > { %v7695_v31 = vpop.f32.mrb[150].mxu1  ;;  %8088 = vmatpush1.bf16.msra.mxu1 %v14982_v40  ;;  %v15025_v40 = vld [vmem:[#allocation40 + $0xd8] sm:$0xff]  }
0x36a0   : > { %v7708_v44 = vadd.f32 %v12652_v34, %v7699_v43  ;;  %v7700_v50 = vadd.f32 %v7695_v31, %v7520_v21  ;;  %v13917_v14 = vpop.f32.mrb[151].mxu1  ;;  %v14990_v21 = vld [vmem:[#allocation39 + $0xd4] ss:$20 sps:$4 sm:$0xff]   ;;  %v12653_v31 = vld [vmem:[#allocation36] ss:$0 sm:$0xff] }
0x36a1   : > { %8089 = vmatprep.subr.bf16.mxu1 %v14990_v21  ;;  %v15030_v21 = vld [vmem:[#allocation40 + $0xa0] sm:$0xff]  }
0x36a2   : > { %v7709_v59 = vadd.f32 %v12652_v34, %v7700_v50  ;;  %v7710_v10 = vadd.f32 %v7708_v44, %v17832_v22 }
0x36a3   : > { %8090 = vmatpush1.bf16.msra.mxu1 %v14988_v24  ;;  %v15033_v24 = vld [vmem:[#allocation40 + $0xe8] sm:$0xff]  }
0x36a4   : > { %7714 = vadd.xlane.f32.xlu0 %v7710_v10  ;;  %v7711_v53 = vadd.f32 %v7709_v59, %v17834_v23  ;;  %8091 = vmatprep.subr.bf16.mxu1 %v14996_v27  ;;  %v12654_v59 = vld [vmem:[#allocation37] ss:$0 sm:$0xff]  ;;  %v15036_v27 = vld [vmem:[#allocation40 + $0x30] sm:$0xff]  }
0x36a7   : > { %8092 = vmatpush1.bf16.msra.mxu1 %v14994_v29  ;;  %v15037_v29 = vld [vmem:[#allocation40 + $0xf0] sm:$0xff]  }
0x36a8   : > { %7716 = vadd.xlane.f32.xlu0 %v7711_v53  ;;  %8093 = vmatprep.subr.bf16.mxu1 %v15002_v7  ;;  %v15040_v7 = vld [vmem:[#allocation40 + $0x38] sm:$0xff]  }
0x36ab   : > { %8094 = vmatpush1.bf16.msra.mxu1 %v15000_v11  ;;  %v15041_v11 = vld [vmem:[#allocation40 + $0xf8] sm:$0xff]  }
0x36ac   : > { %13220 = vmatprep.subr.bf16.mxu1 %v15011_v8  ;;  %v15042_v8 = vld [vmem:[#allocation40 + $0xb8] sm:$0xff]  }
0x3731   : > { %v7715_v22 = vpop.xlane.xlu0 %7714 }
0x3732   : > { %v7718_v60 = vmul.f32 0.0078125, %v7715_v22  ;;  %v15005_v22 = vld [vmem:[#allocation39 + $0x60] ss:$20 sps:$4 sm:$0xff]  }
0x3734   : > { %v17945_v23 = vsub.f32 %v7710_v10, %v7718_v60  ;;  %v15020_v60 = vld [vmem:[#allocation40 + $0x10] sm:$0xff]  }
0x3735   : > { %v7717_v9 = vpop.xlane.xlu0 %7716 }
0x3736   : > { %v7719_v17 = vmul.f32 0.0078125, %v7717_v9  ;;  %v7722_v62 = vmul.f32 %v17945_v23, %v17945_v23  ;;  %v15006_v9 = vld [vmem:[#allocation39 + $0x88] ss:$20 sps:$4 sm:$0xff]  }
0x3738   : > { %v17949_v18 = vsub.f32 %v7711_v53, %v7719_v17  ;;  %7724 = vadd.xlane.f32.xlu0 %v7722_v62  ;;  %v15024_v17 = vld [vmem:[#allocation40 + $0x18] sm:$0xff]   ;;  %v15027_v62 = vld [vmem:[#allocation40 + $0x60] sm:$0xff]  }
0x373a   : > { %v7723_v1 = vmul.f32 %v17949_v18, %v17949_v18 }
0x373c   : > { %7726 = vadd.xlane.f32.xlu0 %v7723_v1  ;;  %v15028_v1 = vld [vmem:[#allocation40 + $0x20] sm:$0xff]  }
0x37c5   : > { %v7725_v39 = vpop.xlane.xlu0 %7724 }
0x37c6   : > { %v7728_v41 = vmul.f32 0.0078125, %v7725_v39  ;;  %v7801_v39 = vld [vmem:[%s18465_s8] sm:$0x1f] }
0x37c8   : > { %v7730_v16 = vadd.f32 1e-05, %v7728_v41  ;;  %v7806_v41 = vrot.slane %v7801_v39, %v17304_v51 }
0x37c9   : > { %v7727_v12 = vpop.xlane.xlu0 %7726 }
0x37ca   : > { %15383 = vrsqrt.f32 %v7730_v16  ;;  %v7729_v55 = vmul.f32 0.0078125, %v7727_v12  ;;  %v7814_v16 = vrot.slane %v7801_v39, %v17307_v52  ;;  %v7810_v12 = vrot.slane %v7801_v39, %v17310_v54 }
0x37cc   : > { %v7731_v34 = vadd.f32 1e-05, %v7729_v55  ;;  %v7818_v55 = vrot.slane %v7801_v39, %v17461_v61 }
0x37ce   : > { %15385 = vrsqrt.f32 %v7731_v34 }
0x37d4   : > { %v15384_v43 = vpop.eup %15383 }
0x37d5   : > { %v7734_v33 = vmul.f32 %v15384_v43, %v17945_v23  ;;  %v15023_v23 = vld [vmem:[#allocation40 + $0x58] sm:$0xff]  }
0x37d7   : > { %v7742_v14 = vmul.f32 %v12653_v31, %v7734_v33 }
0x37d8   : > { %v15386_v44 = vpop.eup %15385 }
0x37d9   : > { %v7735_v50 = vmul.f32 %v15386_v44, %v17949_v18  ;;  %v17956_v53 = vadd.f32 %v12654_v59, %v7742_v14  ;;  %v15007_v18 = vld [vmem:[#allocation39 + $0xb0] ss:$20 sps:$4 sm:$0xff]  }
0x37db   : > { %v7743_v10 = vmul.f32 %v12653_v31, %v7735_v50 }
0x37dd   : > { %v17958_v48 = vadd.f32 %v12654_v59, %v7743_v10 }
0x37df   : > { %v7752_v56 = vpack.c.bf16 %v17958_v48, %v17956_v53 }
0x37e1   : > { %8069 = vmatmul.mubr.bf16.vlgmr.msra.gmra.mrb[124].mxu0 %v7752_v56  ;;  %8112 = vmatmul.mubr.bf16.vlgmr.msra.gmra.mrb[152].mxu1 %v7752_v56 }
0x37e2   : > { %13919 = vmatpush3.bf16.msra.mxu0 %v15003_v28  ;;  %13934 = vmatprep.mubr.msk.bf16.mxu0 %vm16491_vm0, %v16490_v0 }
0x37e3   : > { %13920 = vmatprep.subr.bf16.mxu0 %v16490_v0  ;;  %13221 = vmatpush3.bf16.msra.mxu1 %v15012_v57 }
0x37e4   : > { %13222 = vmatprep.subr.bf16.mxu1 %v15015_v58 }
0x37e6   : > { %13921 = vmatpush3.bf16.msra.mxu0 %v15004_v45 }
0x37e7   : > { %13922 = vmatprep.subr.bf16.mxu0 %v16490_v0  ;;  %13223 = vmatpush3.bf16.msra.mxu1 %v15016_v35 }
0x37e8   : > { %13224 = vmatprep.subr.bf16.mxu1 %v15019_v37 }
0x37ea   : > { %13923 = vmatpush3.bf16.msra.mxu0 %v15005_v22 }
0x37eb   : > { %13924 = vmatprep.subr.bf16.mxu0 %v16490_v0  ;;  %13225 = vmatpush3.bf16.msra.mxu1 %v15020_v60 }
0x37ec   : > { %13226 = vmatprep.subr.bf16.mxu1 %v15023_v23 }
0x37ee   : > { %13925 = vmatpush3.bf16.msra.mxu0 %v15006_v9 }
0x37ef   : > { %13926 = vmatprep.subr.bf16.mxu0 %v16490_v0  ;;  %13227 = vmatpush3.bf16.msra.mxu1 %v15024_v17 }
0x37f0   : > { %13228 = vmatprep.subr.bf16.mxu1 %v15027_v62 }
0x37f2   : > { %13927 = vmatpush3.bf16.msra.mxu0 %v15007_v18 }
0x37f3   : > { %13928 = vmatprep.subr.bf16.mxu0 %v16490_v0  ;;  %13229 = vmatpush3.bf16.msra.mxu1 %v15028_v1 }
0x37f4   : > { %13230 = vmatprep.subr.bf16.mxu1 %v15031_v49 }
0x37f6   : > { %13929 = vmatpush3.bf16.msra.mxu0 %v15008_v2 }
0x37f7   : > { %13930 = vmatprep.subr.bf16.mxu0 %v16490_v0  ;;  %13231 = vmatpush3.bf16.msra.mxu1 %v15032_v3 }
0x37f8   : > { %13232 = vmatprep.subr.bf16.mxu1 %v15035_v26 }
0x37fa   : > { %13931 = vmatpush3.bf16.msra.mxu0 %v15009_v4 }
0x37fb   : > { %13932 = vmatprep.subr.bf16.mxu0 %v16490_v0  ;;  %13233 = vmatpush3.bf16.msra.mxu1 %v15036_v27  ;;  %v15050_v27 = vld [vmem:[#allocation40 + $0x138] sm:$0xff]  }
0x37fc   : > { %13234 = vmatprep.subr.bf16.mxu1 %v15039_v32 }
0x37fe   : > { %13933 = vmatpush3.bf16.msra.mxu0 %v15010_v5  ;;  %v15043_v5 = vld [vmem:[#allocation40 + $0x100] sm:$0xff]  }
0x37ff   : > { %13242 = vmatprep.subr.bf16.mxu0 %v15013_v6  ;;  %13235 = vmatpush3.bf16.msra.mxu1 %v15040_v7  ;;  %v15044_v6 = vld [vmem:[#allocation40 + $0x108] sm:$0xff]  }
0x3800   : > { %13938 = vmatprep.subr.bf16.mxu1 %v16490_v0 }
0x3801   : > { %13935 = vmatmul.mubr.bf16.vlgmr.msra.gmra.mrb[128].mxu0 %v7752_v56 }
0x3802   : > { %13243 = vmatpush3.bf16.msra.mxu0 %v15014_v13  ;;  %v15045_v13 = vld [vmem:[#allocation40 + $0x110] sm:$0xff]  }
0x3803   : > { %13244 = vmatprep.subr.bf16.mxu0 %v15017_v15  ;;  %v15046_v15 = vld [vmem:[#allocation40 + $0x118] sm:$0xff]  }
0x3806   : > { %13245 = vmatpush3.bf16.msra.mxu0 %v15018_v19  ;;  %v15047_v19 = vld [vmem:[#allocation40 + $0x120] sm:$0xff]  }
0x3807   : > { %13246 = vmatprep.subr.bf16.mxu0 %v15021_v46  ;;  %v15048_v46 = vld [vmem:[#allocation40 + $0x128] sm:$0xff]  }
0x380a   : > { %13247 = vmatpush3.bf16.msra.mxu0 %v15022_v38  ;;  %v7822_v38 = vrot.slane %v7801_v39, %v17475_v42 }
0x380b   : > { %13248 = vmatprep.subr.bf16.mxu0 %v15025_v40 }
0x380e   : > { %13249 = vmatpush3.bf16.msra.mxu0 %v15026_v20  ;;  %v15049_v20 = vld [vmem:[#allocation40 + $0x130] sm:$0xff]  }
0x380f   : > { %13250 = vmatprep.subr.bf16.mxu0 %v15029_v47 }
0x3812   : > { %13251 = vmatpush3.bf16.msra.mxu0 %v15030_v21 }
0x3813   : > { %13252 = vmatprep.subr.bf16.mxu0 %v15033_v24 }
0x3816   : > { %13253 = vmatpush3.bf16.msra.mxu0 %v15034_v25 }
0x3817   : > { %13254 = vmatprep.subr.bf16.mxu0 %v15037_v29 }
0x381a   : > { %13255 = vmatpush3.bf16.msra.mxu0 %v15038_v30 }
0x381b   : > { %13256 = vmatprep.subr.bf16.mxu0 %v15041_v11 }
0x381e   : > { %13257 = vmatpush3.bf16.msra.mxu0 %v15042_v8  ;;  %v12695_v8 = vld [vmem:[#allocation42] ss:$0 sm:$0xff] }
0x38b4   : > { %v8070_v34 = vpop.f32.mrb[124].mxu0  ;;  %v8113_v43 = vpop.f32.mrb[152].mxu1 }
0x38b5   : > { %v8071_v33 = vadd.f32 %v8070_v34, %v7806_v41  ;;  %v8114_v31 = vadd.f32 %v8113_v43, %v7814_v16  ;;  %v8072_v44 = vpop.f32.mrb[125].mxu0  ;;  %v8115_v50 = vpop.f32.mrb[153].mxu1 }
0x38b6   : > { %v8073_v14 = vadd.f32 %v8072_v44, %v7810_v12  ;;  %v8116_v59 = vadd.f32 %v8115_v50, %v7818_v55  ;;  %v8074_v10 = vpop.f32.mrb[126].mxu0  ;;  %v8117_v28 = vpop.f32.mrb[154].mxu1 }
0x38b7   : > { %v8075_v56 = vadd.f32 %v8074_v10, %v7806_v41  ;;  %v8118_v57 = vadd.f32 %v8117_v28, %v7814_v16  ;;  %v8076_v58 = vpop.f32.mrb[127].mxu0  ;;  %v8119_v45 = vpop.f32.mrb[155].mxu1  ;;  %v8163_v22 = vmax.f32 %v8071_v33, 0.0  ;;  %v8165_v60 = vmax.f32 %v8114_v31, 0.0 }
0x38b8   : > { %v8077_v35 = vadd.f32 %v8076_v58, %v7810_v12  ;;  %v8120_v37 = vadd.f32 %v8119_v45, %v7818_v55  ;;  %v8164_v17 = vmax.f32 %v8073_v14, 0.0  ;;  %v8166_v62 = vmax.f32 %v8116_v59, 0.0 }
0x38b9   : > { %v8168_v23 = vmax.f32 %v8075_v56, 0.0  ;;  %v8170_v9 = vmax.f32 %v8118_v57, 0.0 }
0x38ba   : > { %v8169_v18 = vmax.f32 %v8077_v35, 0.0  ;;  %v8171_v1 = vmax.f32 %v8120_v37, 0.0 }
0x38bb   : > { %v8173_v49 = vpack.c.bf16 %v8168_v23, %v8163_v22  ;;  %v8175_v2 = vpack.c.bf16 %v8170_v9, %v8165_v60  ;;  %v15051_v60 = vld [vmem:[#allocation18 + $0xc0] ss:$12 sps:$4 sm:$0xff]   ;;  %v15053_v23 = vld [vmem:[#allocation18 + $0xc4] ss:$12 sps:$4 sm:$0xff]   ;;  %v15054_v9 = vld [vmem:[#allocation18 + $0xc8] ss:$12 sps:$4 sm:$0xff]  }
0x38bc   : > { %v8174_v3 = vpack.c.bf16 %v8169_v18, %v8164_v17  ;;  %v8176_v4 = vpack.c.bf16 %v8171_v1, %v8166_v62  ;;  %v15057_v17 = vld [vmem:[#allocation18 + $0xdc] ss:$12 sps:$4 sm:$0xff]   ;;  %8850 = vmatprep.subr.bf16.mxu0 %v15053_v23  ;;  %v15055_v62 = vld [vmem:[#allocation18 + $0xd8] ss:$12 sps:$4 sm:$0xff]  }
0x38be   : > { %8537 = vmatprep.mubr.bf16.mxu1 %v8174_v3  ;;  %8578 = vmatprep.mubr.bf16.mxu0 %v8176_v4 }
0x38bf   : > { %8538 = vmatmul.mubr.bf16.vlgmr.msra.gmra.mrb[156].mxu1 %v8173_v49  ;;  %8579 = vmatmul.mubr.bf16.vlgmr.msra.gmra.mrb[132].mxu0 %v8175_v2 }
0x38c0   : > { %13939 = vmatpush3.bf16.msra.mxu1 %v15043_v5  ;;  %13954 = vmatprep.mubr.msk.bf16.mxu1 %vm16491_vm0, %v16490_v0  ;;  %v15058_v5 = vld [vmem:[#allocation18 + $0xe0] ss:$12 sps:$4 sm:$0xff]  }
0x38c1   : > { %13940 = vmatprep.subr.bf16.mxu1 %v16490_v0  ;;  %8882 = vmatprep.mubr.bf16.mxu0 %v16492_v36 }
0x38c2   : > { %8851 = vmatpush1.bf16.msra.mxu0 %v15051_v60 }
0x38c3   : > { %8852 = vmatprep.subr.bf16.mxu0 %v15057_v17 }
0x38c4   : > { %13941 = vmatpush3.bf16.msra.mxu1 %v15044_v6  ;;  %v15061_v6 = vld [vmem:[#allocation18 + $0xf4] ss:$12 sps:$4 sm:$0xff]  }
0x38c5   : > { %13942 = vmatprep.subr.bf16.mxu1 %v16490_v0 }
0x38c6   : > { %8853 = vmatpush1.bf16.msra.mxu0 %v15055_v62 }
0x38c7   : > { %8854 = vmatprep.subr.bf16.mxu0 %v15061_v6 }
0x38c8   : > { %13943 = vmatpush3.bf16.msra.mxu1 %v15045_v13  ;;  %v15059_v13 = vld [vmem:[#allocation18 + $0xf0] ss:$12 sps:$4 sm:$0xff]  }
0x38c9   : > { %13944 = vmatprep.subr.bf16.mxu1 %v16490_v0 }
0x38ca   : > { %8855 = vmatpush1.bf16.msra.mxu0 %v15059_v13 }
0x38cc   : > { %13945 = vmatpush3.bf16.msra.mxu1 %v15046_v15  ;;  %v15062_v15 = vld [vmem:[#allocation18 + $0xf8] ss:$12 sps:$4 sm:$0xff]  }
0x38cd   : > { %13946 = vmatprep.subr.bf16.mxu1 %v16490_v0 }
0x38d0   : > { %13947 = vmatpush3.bf16.msra.mxu1 %v15047_v19  ;;  %v15065_v19 = vld [vmem:[#allocation18 + $0x10c] ss:$12 sps:$4 sm:$0xff]  }
0x38d1   : > { %13948 = vmatprep.subr.bf16.mxu1 %v16490_v0  ;;  %8856 = vmatprep.subr.bf16.mxu0 %v15065_v19 }
0x38d4   : > { %v8156_v40 = vpop.f32.mrb[128].mxu0  ;;  %13949 = vmatpush3.bf16.msra.mxu1 %v15048_v46  ;;  %v15063_v46 = vld [vmem:[#allocation18 + $0x108] ss:$12 sps:$4 sm:$0xff]  }
0x38d5   : > { %v8157_v47 = vadd.f32 %v8156_v40, %v7822_v38  ;;  %v13936_v21 = vpop.f32.mrb[129].mxu0  ;;  %13950 = vmatprep.subr.bf16.mxu1 %v16490_v0  ;;  %8857 = vmatpush1.bf16.msra.mxu0 %v15063_v46  ;;  %v15069_v40 = vld [vmem:[#allocation18 + $0x124] ss:$12 sps:$4 sm:$0xff]  }
0x38d6   : > { %v8159_v24 = vpop.f32.mrb[130].mxu0  ;;  %8858 = vmatprep.subr.bf16.mxu0 %v15069_v40  ;;  %v15073_v21 = vld [vmem:[#allocation18 + $0x13c] ss:$12 sps:$4 sm:$0xff]  }
0x38d7   : > { %v8160_v25 = vadd.f32 %v8159_v24, %v7822_v38  ;;  %v13937_v26 = vpop.f32.mrb[131].mxu0  ;;  %v8167_v29 = vmax.f32 %v8157_v47, 0.0  ;;  %v15066_v38 = vld [vmem:[#allocation18 + $0x110] ss:$12 sps:$4 sm:$0xff]   ;;  %v15070_v47 = vld [vmem:[#allocation18 + $0x128] ss:$12 sps:$4 sm:$0xff]  }
0x38d8   : > { %13951 = vmatpush3.bf16.msra.mxu1 %v15049_v20  ;;  %v15067_v20 = vld [vmem:[#allocation18 + $0x120] ss:$12 sps:$4 sm:$0xff]   ;;  %v15071_v24 = vld [vmem:[#allocation18 + $0x138] ss:$12 sps:$4 sm:$0xff]  }
0x38d9   : > { %v8172_v30 = vmax.f32 %v8160_v25, 0.0  ;;  %13952 = vmatprep.subr.bf16.mxu1 %v16490_v0  ;;  %8859 = vmatpush1.bf16.msra.mxu0 %v15067_v20  ;;  %v15074_v25 = vld [vmem:[#allocation18 + $0x140] ss:$12 sps:$4 sm:$0xff]  }
0x38da   : > { %8860 = vmatprep.subr.bf16.mxu0 %v15073_v21  ;;  %v15077_v26 = vld [vmem:[#allocation18 + $0x154] ss:$12 sps:$4 sm:$0xff]  }
0x38db   : > { %v8177_v32 = vpack.c.bf16 %v8172_v30, %v8167_v29  ;;  %v15078_v29 = vld [vmem:[#allocation18 + $0x158] ss:$12 sps:$4 sm:$0xff]  }
0x38dc   : > { %13953 = vmatpush3.bf16.msra.mxu1 %v15050_v27  ;;  %v15075_v27 = vld [vmem:[#allocation18 + $0x150] ss:$12 sps:$4 sm:$0xff]   ;;  %v15081_v30 = vld [vmem:[#allocation18 + $0x16c] ss:$12 sps:$4 sm:$0xff]  }
0x38dd   : > { %13958 = vmatprep.subr.bf16.mxu1 %v16490_v0  ;;  %8861 = vmatpush1.bf16.msra.mxu0 %v15071_v24 }
0x38de   : > { %8862 = vmatprep.subr.bf16.mxu0 %v15077_v26 }
0x38df   : > { %13955 = vmatmul.mubr.bf16.vlgmr.msra.gmra.mrb[160].mxu1 %v8177_v32  ;;  %v15079_v32 = vld [vmem:[#allocation18 + $0x168] ss:$12 sps:$4 sm:$0xff]  }
0x38e0   : > { %13974 = vmatprep.mubr.msk.bf16.mxu1 %vm16491_vm0, %v16490_v0  ;;  %13959 = vmatpush3.bf16.msra.mxu1 %v15054_v9 }
0x38e1   : > { %13960 = vmatprep.subr.bf16.mxu1 %v16490_v0  ;;  %8863 = vmatpush1.bf16.msra.mxu0 %v15075_v27 }
0x38e2   : > { %8864 = vmatprep.subr.bf16.mxu0 %v15081_v30 }
0x38e4   : > { %13961 = vmatpush3.bf16.msra.mxu1 %v15058_v5 }
0x38e5   : > { %13962 = vmatprep.subr.bf16.mxu1 %v16490_v0  ;;  %8865 = vmatpush1.bf16.msra.mxu0 %v15079_v32 }
0x38e6   : > { %13978 = vmatprep.subr.bf16.mxu0 %v16490_v0 }
0x38e8   : > { %13963 = vmatpush3.bf16.msra.mxu1 %v15062_v15 }
0x38e9   : > { %13964 = vmatprep.subr.bf16.mxu1 %v16490_v0 }
0x38ec   : > { %13965 = vmatpush3.bf16.msra.mxu1 %v15066_v38 }
0x38ed   : > { %13966 = vmatprep.subr.bf16.mxu1 %v16490_v0 }
0x38f0   : > { %13967 = vmatpush3.bf16.msra.mxu1 %v15070_v47 }
0x38f1   : > { %13968 = vmatprep.subr.bf16.mxu1 %v16490_v0 }
0x38f4   : > { %13969 = vmatpush3.bf16.msra.mxu1 %v15074_v25 }
0x38f5   : > { %13970 = vmatprep.subr.bf16.mxu1 %v16490_v0 }
0x38f8   : > { %13971 = vmatpush3.bf16.msra.mxu1 %v15078_v29 }
0x38f9   : > { %13972 = vmatprep.subr.bf16.mxu1 %v16490_v0 }
0x3992   : > { %v13236_v7 = vpop.f32.mrb[156].mxu1  ;;  %v13258_v11 = vpop.f32.mrb[132].mxu0 }
0x3993   : > { %v13237_v39 = vpop.f32.mrb[157].mxu1  ;;  %v13259_v41 = vpop.f32.mrb[133].mxu0 }
0x3994   : > { %v13238_v16 = vadd.f32 %v13237_v39, %v13236_v7  ;;  %v13260_v12 = vadd.f32 %v13259_v41, %v13258_v11  ;;  %v13239_v55 = vpop.f32.mrb[158].mxu1  ;;  %v13261_v34 = vpop.f32.mrb[134].mxu0  ;;  %v15082_v7 = vld [vmem:[#allocation18 + $0x170] ss:$12 sps:$4 sm:$0xff]  }
0x3995   : > { %v13240_v43 = vpop.f32.mrb[159].mxu1  ;;  %v13262_v33 = vpop.f32.mrb[135].mxu0  ;;  %13973 = vmatpush3.bf16.msra.mxu1 %v15082_v7 }
0x3996   : > { %v8540_v31 = vadd.f32 %v13238_v16, %v12695_v8  ;;  %v13241_v44 = vadd.f32 %v13240_v43, %v13239_v55  ;;  %v13263_v50 = vadd.f32 %v13262_v33, %v13261_v34  ;;  %13984 = vmatprep.subr.bf16.mxu1 %v16490_v0  ;;  %v12736_v43 = vld [vmem:[#allocation43] ss:$0 sm:$0xff] }
0x3998   : > { %v8543_v14 = vadd.f32 %v13241_v44, %v12695_v8  ;;  %v8581_v59 = vadd.f32 %v13260_v12, %v8540_v31 }
0x399a   : > { %v8584_v10 = vadd.f32 %v13263_v50, %v8543_v14  ;;  %v12737_v50 = vld [vmem:[#allocation45] ss:$0 sm:$0xff] }
0x39b2   : > { %v8621_v28 = vpop.f32.mrb[160].mxu1 }
0x39b3   : > { %v8622_v56 = vadd.f32 %v8621_v28, %v8581_v59  ;;  %v13956_v57 = vpop.f32.mrb[161].mxu1 }
0x39b4   : > { %v8624_v58 = vpop.f32.mrb[162].mxu1 }
0x39b5   : > { %v8628_v45 = vadd.f32 %v8622_v56, %v17956_v53  ;;  %v8625_v35 = vadd.f32 %v8624_v58, %v8584_v10  ;;  %v13957_v37 = vpop.f32.mrb[163].mxu1  ;;  %v8705_v56 = vld [vmem:[#allocation19 + $0x3] sm:$0x7] }
0x39b6   : > { %v8710_v57 = vrot.slane %v8705_v56, %v17304_v51  ;;  %v8718_v58 = vrot.slane %v8705_v56, %v17307_v52  ;;  %v8714_v37 = vrot.slane %v8705_v56, %v17310_v54 }
0x39b7   : > { %v8629_v22 = vadd.f32 %v8625_v35, %v17958_v48  ;;  %8632 = vadd.xlane.f32.xlu1 %v8628_v45 }
0x39b9   : > { %8634 = vadd.xlane.f32.xlu0 %v8629_v22 }
0x3a44   : > { %v8633_v18 = vpop.xlane.xlu1 %8632 }
0x3a45   : > { %v8636_v53 = vmul.f32 0.0078125, %v8633_v18 }
0x3a46   : > { %v8635_v1 = vpop.xlane.xlu0 %8634 }
0x3a47   : > { %v8638_v49 = vsub.f32 %v8628_v45, %v8636_v53  ;;  %v8637_v2 = vmul.f32 0.0078125, %v8635_v1 }
0x3a49   : > { %v17994_v48 = vsub.f32 %v8629_v22, %v8637_v2  ;;  %v8640_v3 = vmul.f32 %v8638_v49, %v8638_v49 }
0x3a4b   : > { %8642 = vadd.xlane.f32.xlu0 %v8640_v3  ;;  %v8641_v4 = vmul.f32 %v17994_v48, %v17994_v48 }
0x3a4f   : > { %8644 = vadd.xlane.f32.xlu0 %v8641_v4 }
0x3ad8   : > { %v8643_v11 = vpop.xlane.xlu0 %8642 }
0x3ad9   : > { %v8646_v8 = vmul.f32 0.0078125, %v8643_v11 }
0x3adb   : > { %v8648_v39 = vadd.f32 1e-05, %v8646_v8 }
0x3adc   : > { %v8645_v41 = vpop.xlane.xlu0 %8644 }
0x3add   : > { %15387 = vrsqrt.f32 %v8648_v39  ;;  %v8647_v16 = vmul.f32 0.0078125, %v8645_v41 }
0x3adf   : > { %v8649_v12 = vadd.f32 1e-05, %v8647_v16 }
0x3ae1   : > { %15389 = vrsqrt.f32 %v8649_v12 }
0x3ae7   : > { %v15388_v55 = vpop.eup %15387 }
0x3ae8   : > { %v8652_v34 = vmul.f32 %v15388_v55, %v8638_v49 }
0x3aea   : > { %v8660_v44 = vmul.f32 %v12736_v43, %v8652_v34 }
0x3aeb   : > { %v15390_v33 = vpop.eup %15389 }
0x3aec   : > { %v8653_v31 = vmul.f32 %v15390_v33, %v17994_v48  ;;  %v18007_v59 = vadd.f32 %v12737_v50, %v8660_v44 }
0x3aee   : > { %v8661_v14 = vmul.f32 %v12736_v43, %v8653_v31 }
0x3af0   : > { %v18009_v10 = vadd.f32 %v12737_v50, %v8661_v14 }
0x3af2   : > { %v8670_v28 = vpack.c.bf16 %v18009_v10, %v18007_v59 }
0x3af4   : > { %8883 = vmatmul.mubr.bf16.vlgmr.msra.gmra.mrb[136].mxu0 %v8670_v28  ;;  %13975 = vmatmul.mubr.bf16.vlgmr.msra.gmra.mrb[164].mxu1 %v8670_v28 }
0x3af5   : > { %13980 = vmatprep.mubr.msk.bf16.mxu0 %vm16491_vm0, %v16490_v0  ;;  %13986 = vmatprep.mubr.msk.bf16.mxu1 %vm16491_vm0, %v16490_v0 }
0x3bc7   : > { %v8884_v45 = vpop.f32.mrb[136].mxu0  ;;  %v8927_v35 = vpop.f32.mrb[164].mxu1 }
0x3bc8   : > { %v8886_v22 = vpop.f32.mrb[137].mxu0  ;;  %v13976_v60 = vpop.f32.mrb[165].mxu1  ;;  %v8885_v17 = vadd.f32 %v8884_v45, %v8710_v57  ;;  %v8928_v62 = vadd.f32 %v8927_v35, %v8718_v58 }
0x3bc9   : > { %v8888_v23 = vpop.f32.mrb[138].mxu0  ;;  %v8930_v9 = vpop.f32.mrb[166].mxu1  ;;  %v8887_v2 = vadd.f32 %v8886_v22, %v8714_v37 }
0x3bca   : > { %v8889_v18 = vadd.f32 %v8888_v23, %v8710_v57  ;;  %v8931_v53 = vadd.f32 %v8930_v9, %v8718_v58  ;;  %v8890_v1 = vpop.f32.mrb[139].mxu0  ;;  %v13977_v49 = vpop.f32.mrb[167].mxu1 }
0x3bcb   : > { %v8891_v48 = vadd.f32 %v8890_v1, %v8714_v37 }
0x3bcc   : > { %v18020_v3 = vpack.c.bf16 %v8889_v18, %v8885_v17  ;;  %v18022_v4 = vpack.c.bf16 %v8931_v53, %v8928_v62  ;;  %v15085_v62 = vld [vmem:[#allocation21 + $0x50] sm:$0xff]   ;;  %v15086_v18 = vld [vmem:[#allocation21 + $0x58] sm:$0xff]  }
0x3bcd   : > { %v18024_v5 = vpack.c.bf16 %v8891_v48, %v8887_v2 }
0x3bce   : > { %13985 = vmatpush3.bf16.msra.mxu1 %v18022_v4  ;;  %9070 = vrot.lane.b32.xlu1 %v18020_v3, %s16493_s9 }
0x3bcf   : > { %9073 = vrot.lane.b32.xlu0 %v18024_v5, %s16493_s9  ;;  %v8958_v6 = vsel %vm2004_vm1, %v18024_v5, 0  ;;  %13996 = vmatprep.subr.bf16.mxu1 %v16490_v0 }
0x3bd0   : > { %13979 = vmatpush3.bf16.xpose.msra.mxu0 %v8958_v6 }
0x3bd1   : > { %13990 = vmatprep.subr.bf16.mxu0 %v16490_v0 }
0x3bd7   : > { %13981 = vmatmul.mubr.msk.bf16.vlgmr.msra.gmra.mrb[140].mxu0 %vm2004_vm1, %v18020_v3 }
0x3bd8   : > { %13992 = vmatprep.mubr.msk.bf16.mxu0 %vm16491_vm0, %v16490_v0 }
0x3c40   : > { %v9071_v19 = vpop.permute.xlu1 %9070 }
0x3c41   : > { %v9074_v13 = vpop.permute.xlu0 %9073 }
0x3c42   : > { %v9079_v15 = vsel %vm2004_vm1, %v9074_v13, 0  ;;  %v15083_v13 = vld [vmem:[#allocation21 + $0x40] sm:$0xff]  }
0x3c43   : > { %13991 = vmatpush3.bf16.xpose.msra.mxu0 %v9079_v15 }
0x3c44   : > { %14002 = vmatprep.subr.bf16.mxu0 %v16490_v0 }
0x3c4a   : > { %13993 = vmatmul.mubr.msk.bf16.vlgmr.msra.gmra.mrb[144].mxu0 %vm2004_vm1, %v9071_v19  ;;  %v15084_v19 = vld [vmem:[#allocation21 + $0x48] sm:$0xff]  }
0x3c4b   : > { %14006 = vmatprep.mubr.msk.bf16.mxu0 %vm16491_vm0, %v16490_v0  ;;  %14003 = vmatpush3.bf16.msra.mxu0 %v15085_v62 }
0x3c4c   : > { %14004 = vmatprep.subr.bf16.mxu0 %v16490_v0 }
0x3c4f   : > { %14005 = vmatpush3.bf16.msra.mxu0 %v15086_v18 }
0x3c50   : > { %14018 = vmatprep.subr.bf16.mxu0 %v16490_v0 }
0x3caa   : > { %v8994_v46 = vpop.f32.mrb[140].mxu0 }
0x3cab   : > { %v13982_v38 = vpop.f32.mrb[141].mxu0  ;;  %v9001_v40 = vsel %vm2052_vm2, %v8994_v46, -inf }
0x3cac   : > { %9002 = vmax.xlane.f32.xlu0 %v9001_v40  ;;  %v8997_v20 = vpop.f32.mrb[142].mxu0 }
0x3cad   : > { %v13983_v47 = vpop.f32.mrb[143].mxu0  ;;  %v9004_v21 = vsel %vm2052_vm2, %v8997_v20, -inf }
0x3cae   : > { %9005 = vmax.xlane.f32.xlu1 %v9004_v21 }
0x3cbf   : > { %9146 = vrot.lane.b32.xlu1 %v18022_v4, %s16493_s9 }
0x3cc3   : > { %9306 = vrot.lane.b32.xlu1 %v18020_v3, %s16494_s6 }
0x3d1d   : > { %v9115_v24 = vpop.f32.mrb[144].mxu0 }
0x3d1e   : > { %v13994_v25 = vpop.f32.mrb[145].mxu0  ;;  %v9122_v26 = vsel %vm2052_vm2, %v9115_v24, -inf }
0x3d1f   : > { %9123 = vmax.xlane.f32.xlu0 %v9122_v26  ;;  %v9118_v27 = vpop.f32.mrb[146].mxu0 }
0x3d20   : > { %v13995_v29 = vpop.f32.mrb[147].mxu0  ;;  %v9125_v30 = vsel %vm2052_vm2, %v9118_v27, -inf }
0x3d23   : > { %9126 = vmax.xlane.f32.xlu0 %v9125_v30 }
0x3d39   : > { %v9003_v32 = vpop.xlane.xlu0 %9002 }
0x3d3a   : > { %v9007_v7 = vsub.f32 %v8994_v46, %v9003_v32 }
0x3d3b   : > { %v9006_v11 = vpop.xlane.xlu1 %9005 }
0x3d3c   : > { %v9009_v8 = vmul.f32 1.442695, %v9007_v7  ;;  %v9008_v39 = vsub.f32 %v8997_v20, %v9006_v11 }
0x3d3e   : > { %15391 = vpow2.f32 %v9009_v8  ;;  %v9011_v41 = vmul.f32 1.442695, %v9008_v39 }
0x3d3f   : > { %v9147_v17 = vpop.permute.xlu1 %9146 }
0x3d40   : > { %15393 = vpow2.f32 %v9011_v41 }
0x3d43   : > { %v9307_v32 = vpop.permute.xlu1 %9306 }
0x3d48   : > { %v15392_v16 = vpop.eup %15391 }
0x3d49   : > { %v9013_v12 = vsel %vm2052_vm2, %v15392_v16, 0.0 }
0x3d4a   : > { %v15394_v55 = vpop.eup %15393  ;;  %9014 = vadd.xlane.f32.xlu0 %v9013_v12 }
0x3d4b   : > { %v9016_v34 = vsel %vm2052_vm2, %v15394_v55, 0.0 }
0x3d4e   : > { %9017 = vadd.xlane.f32.xlu0 %v9016_v34 }
0x3dac   : > { %v9124_v43 = vpop.xlane.xlu0 %9123 }
0x3dad   : > { %v9128_v33 = vsub.f32 %v9115_v24, %v9124_v43 }
0x3daf   : > { %v9130_v31 = vmul.f32 1.442695, %v9128_v33 }
0x3db0   : > { %v9127_v44 = vpop.xlane.xlu0 %9126 }
0x3db1   : > { %15395 = vpow2.f32 %v9130_v31  ;;  %v9129_v50 = vsub.f32 %v9118_v27, %v9127_v44 }
0x3db3   : > { %v9132_v14 = vmul.f32 1.442695, %v9129_v50 }
0x3db5   : > { %15397 = vpow2.f32 %v9132_v14 }
0x3dbb   : > { %v15396_v28 = vpop.eup %15395 }
0x3dbc   : > { %v9134_v56 = vsel %vm2052_vm2, %v15396_v28, 0.0 }
0x3dbd   : > { %9135 = vadd.xlane.f32.xlu0 %v9134_v56 }
0x3dbf   : > { %v15398_v57 = vpop.eup %15397 }
0x3dc0   : > { %v9137_v58 = vsel %vm2052_vm2, %v15398_v57, 0.0 }
0x3dc1   : > { %9138 = vadd.xlane.f32.xlu0 %v9137_v58 }
0x3dd7   : > { %9308 = vrot.lane.b32.xlu0 %v18024_v5, %s16494_s6  ;;  %v9015_v45 = vpop.xlane.xlu0 %9014 }
0x3dd8   : > { %15399 = vrcp.f32 %v9015_v45 }
0x3ddb   : > { %v9018_v35 = vpop.xlane.xlu0 %9017 }
0x3ddc   : > { %15401 = vrcp.f32 %v9018_v35 }
0x3de2   : > { %v15400_v37 = vpop.eup %15399 }
0x3de3   : > { %v9021_v60 = vmul.f32 %v15400_v37, %v15392_v16 }
0x3de6   : > { %v15402_v22 = vpop.eup %15401 }
0x3de7   : > { %v9022_v23 = vmul.f32 %v15402_v22, %v15394_v55 }
0x3de9   : > { %v9023_v9 = vpack.c.bf16 %v9022_v23, %v9021_v60 }
0x3deb   : > { %13987 = vmatmul.mubr.msk.bf16.vlgmr.msra.gmra.mrb[168].mxu1 %vm2052_vm2, %v9023_v9 }
0x3dec   : > { %13997 = vmatpush3.bf16.msra.mxu1 %v9147_v17  ;;  %13998 = vmatprep.mubr.msk.bf16.mxu1 %vm16491_vm0, %v16490_v0  ;;  %v15087_v17 = vld [vmem:[#allocation21 + $0x60] sm:$0xff]  }
0x3ded   : > { %14010 = vmatprep.subr.bf16.mxu1 %v16490_v0 }
0x3e4a   : > { %v9136_v53 = vpop.xlane.xlu0 %9135 }
0x3e4b   : > { %15403 = vrcp.f32 %v9136_v53 }
0x3e4e   : > { %v9139_v1 = vpop.xlane.xlu0 %9138 }
0x3e4f   : > { %15405 = vrcp.f32 %v9139_v1 }
0x3e52   : > { %v9309_v25 = vpop.permute.xlu0 %9308 }
0x3e53   : > { %v9314_v30 = vsel %vm2004_vm1, %v9309_v25, 0 }
0x3e55   : > { %v15404_v49 = vpop.eup %15403 }
0x3e56   : > { %v9142_v48 = vmul.f32 %v15404_v49, %v15396_v28 }
0x3e59   : > { %v15406_v2 = vpop.eup %15405 }
0x3e5a   : > { %v9143_v6 = vmul.f32 %v15406_v2, %v15398_v57 }
0x3e5c   : > { %v9144_v15 = vpack.c.bf16 %v9143_v6, %v9142_v48 }
0x3e5e   : > { %13999 = vmatmul.mubr.msk.bf16.vlgmr.msra.gmra.mrb[172].mxu1 %vm2052_vm2, %v9144_v15  ;;  %v15088_v15 = vld [vmem:[#allocation21 + $0x68] sm:$0xff]  }
0x3e5f   : > { %14011 = vmatpush3.bf16.msra.mxu1 %v15083_v13  ;;  %14014 = vmatprep.mubr.msk.bf16.mxu1 %vm16491_vm0, %v16490_v0 }
0x3e60   : > { %14012 = vmatprep.subr.bf16.mxu1 %v16490_v0 }
0x3e63   : > { %14013 = vmatpush3.bf16.msra.mxu1 %v15084_v19 }
0x3e64   : > { %14024 = vmatprep.subr.bf16.mxu1 %v16490_v0 }
0x3ebe   : > { %v9061_v46 = vpop.f32.mrb[168].mxu1 }
0x3ebf   : > { %v13988_v38 = vpop.f32.mrb[169].mxu1 }
0x3ec0   : > { %v9064_v40 = vpop.f32.mrb[170].mxu1 }
0x3ec1   : > { %v9068_v20 = vpack.c.bf16 %v9064_v40, %v9061_v46  ;;  %v13989_v47 = vpop.f32.mrb[171].mxu1 }
0x3ec3   : > { %14015 = vmatmul.mubr.msk.bf16.vlgmr.msra.gmra.mrb[176].mxu1 %vm2004_vm1, %v9068_v20 }
0x3ec4   : > { %14026 = vmatprep.mubr.msk.bf16.mxu1 %vm16491_vm0, %v16490_v0 }
0x3f31   : > { %v9186_v21 = vpop.f32.mrb[172].mxu1 }
0x3f32   : > { %v14000_v24 = vpop.f32.mrb[173].mxu1 }
0x3f33   : > { %v9189_v26 = vpop.f32.mrb[174].mxu1 }
0x3f34   : > { %v9193_v27 = vpack.c.bf16 %v9189_v26, %v9186_v21  ;;  %v14001_v29 = vpop.f32.mrb[175].mxu1 }
0x3f36   : > { %14007 = vmatmul.mubr.msk.bf16.vlgmr.msra.gmra.mrb[148].mxu0 %vm2004_vm1, %v9193_v27 }
0x3f37   : > { %14019 = vmatpush3.bf16.xpose.msra.mxu0 %v9314_v30  ;;  %14020 = vmatprep.mubr.msk.bf16.mxu0 %vm16491_vm0, %v16490_v0 }
0x3f38   : > { %14030 = vmatprep.subr.bf16.mxu0 %v16490_v0 }
0x3f3e   : > { %14021 = vmatmul.mubr.msk.bf16.vlgmr.msra.gmra.mrb[152].mxu0 %vm2004_vm1, %v9307_v32 }
0x3f3f   : > { %14034 = vmatprep.mubr.msk.bf16.mxu0 %vm16491_vm0, %v16490_v0  ;;  %14031 = vmatpush3.bf16.msra.mxu0 %v15087_v17  ;;  %v15091_v17 = vld [vmem:[#allocation30 + $0x80] ss:$8 sps:$4 sm:$0xff]  }
0x3f40   : > { %14032 = vmatprep.subr.bf16.mxu0 %v16490_v0 }
0x3f43   : > { %14033 = vmatpush3.bf16.msra.mxu0 %v15088_v15  ;;  %v15106_v15 = vld [vmem:[#allocation30 + $0xd0] ss:$8 sps:$4 sm:$0xff]  }
0x3f44   : > { %14044 = vmatprep.subr.bf16.mxu0 %v16490_v0 }
0x3f96   : > { %v9299_v7 = vpop.f32.mrb[176].mxu1 }
0x3f97   : > { %v14016_v11 = vpop.f32.mrb[177].mxu1 }
0x3f98   : > { %v9302_v8 = vpop.f32.mrb[178].mxu1 }
0x3f99   : > { %v14017_v39 = vpop.f32.mrb[179].mxu1 }
0x4009   : > { %v9243_v41 = vpop.f32.mrb[148].mxu0 }
0x400a   : > { %v18080_v16 = vadd.f32 %v9299_v7, %v9243_v41  ;;  %v14008_v12 = vpop.f32.mrb[149].mxu0 }
0x400b   : > { %v9246_v55 = vpop.f32.mrb[150].mxu0 }
0x400c   : > { %v18082_v34 = vadd.f32 %v9302_v8, %v9246_v55  ;;  %v14009_v43 = vpop.f32.mrb[151].mxu0 }
0x4011   : > { %v9350_v33 = vpop.f32.mrb[152].mxu0 }
0x4012   : > { %v14022_v31 = vpop.f32.mrb[153].mxu0  ;;  %v9357_v44 = vsel %vm2052_vm2, %v9350_v33, -inf }
0x4013   : > { %9358 = vmax.xlane.f32.xlu1 %v9357_v44  ;;  %v9353_v50 = vpop.f32.mrb[154].mxu0 }
0x4014   : > { %v14023_v14 = vpop.f32.mrb[155].mxu0  ;;  %v9360_v28 = vsel %vm2052_vm2, %v9353_v50, -inf }
0x4015   : > { %9361 = vmax.xlane.f32.xlu0 %v9360_v28 }
0x40a0   : > { %v9359_v56 = vpop.xlane.xlu1 %9358 }
0x40a1   : > { %v9363_v57 = vsub.f32 %v9350_v33, %v9359_v56 }
0x40a2   : > { %v9362_v58 = vpop.xlane.xlu0 %9361 }
0x40a3   : > { %v9365_v45 = vmul.f32 1.442695, %v9363_v57  ;;  %v9364_v35 = vsub.f32 %v9353_v50, %v9362_v58 }
0x40a5   : > { %15407 = vpow2.f32 %v9365_v45  ;;  %v9367_v37 = vmul.f32 1.442695, %v9364_v35 }
0x40a7   : > { %15409 = vpow2.f32 %v9367_v37 }
0x40af   : > { %v15408_v22 = vpop.eup %15407 }
0x40b0   : > { %v9369_v60 = vsel %vm2052_vm2, %v15408_v22, 0.0 }
0x40b1   : > { %v15410_v23 = vpop.eup %15409  ;;  %9370 = vadd.xlane.f32.xlu0 %v9369_v60  ;;  %v15093_v60 = vld [vmem:[#allocation30 + $0x84] ss:$8 sps:$4 sm:$0xff]  }
0x40b2   : > { %v9372_v9 = vsel %vm2052_vm2, %v15410_v23, 0.0 }
0x40b3   : > { %9373 = vadd.xlane.f32.xlu1 %v9372_v9 }
0x40c4   : > { %9488 = vrot.lane.b32.xlu1 %v18024_v5, %s16495_s28 }
0x40c7   : > { %9380 = vrot.lane.b32.xlu0 %v18022_v4, %s16494_s6 }
0x40c8   : > { %9486 = vrot.lane.b32.xlu1 %v18020_v3, %s16495_s28 }
0x413e   : > { %v9371_v62 = vpop.xlane.xlu0 %9370 }
0x413f   : > { %15411 = vrcp.f32 %v9371_v62 }
0x4140   : > { %v9374_v18 = vpop.xlane.xlu1 %9373 }
0x4141   : > { %15413 = vrcp.f32 %v9374_v18 }
0x4142   : > { %v9381_v53 = vpop.permute.xlu0 %9380 }
0x4143   : > { %14025 = vmatpush3.bf16.msra.mxu1 %v9381_v53  ;;  %v15096_v53 = vld [vmem:[#allocation30 + $0x94] ss:$8 sps:$4 sm:$0xff]  }
0x4144   : > { %14038 = vmatprep.subr.bf16.mxu1 %v16490_v0  ;;  %v9489_v48 = vpop.permute.xlu1 %9488 }
0x4145   : > { %v9494_v3 = vsel %vm2004_vm1, %v9489_v48, 0  ;;  %v15100_v48 = vld [vmem:[#allocation30 + $0xb0] ss:$8 sps:$4 sm:$0xff]  }
0x4148   : > { %v9487_v13 = vpop.permute.xlu1 %9486 }
0x4149   : > { %v15412_v1 = vpop.eup %15411 }
0x414a   : > { %v9377_v49 = vmul.f32 %v15412_v1, %v15408_v22  ;;  %v15094_v1 = vld [vmem:[#allocation30 + $0x90] ss:$8 sps:$4 sm:$0xff]  }
0x414b   : > { %v15414_v5 = vpop.eup %15413 }
0x414c   : > { %v9378_v2 = vmul.f32 %v15414_v5, %v15410_v23  ;;  %v15099_v5 = vld [vmem:[#allocation30 + $0xa4] ss:$8 sps:$4 sm:$0xff]  }
0x414e   : > { %v9379_v6 = vpack.c.bf16 %v9378_v2, %v9377_v49  ;;  %v15097_v49 = vld [vmem:[#allocation30 + $0xa0] ss:$8 sps:$4 sm:$0xff]   ;;  %v15102_v2 = vld [vmem:[#allocation30 + $0xb4] ss:$8 sps:$4 sm:$0xff]  }
0x4150   : > { %14027 = vmatmul.mubr.msk.bf16.vlgmr.msra.gmra.mrb[180].mxu1 %vm2052_vm2, %v9379_v6  ;;  %v15105_v6 = vld [vmem:[#allocation30 + $0xc4] ss:$8 sps:$4 sm:$0xff]  }
0x4151   : > { %14039 = vmatpush3.bf16.xpose.msra.mxu1 %v9494_v3  ;;  %14040 = vmatprep.mubr.msk.bf16.mxu1 %vm16491_vm0, %v16490_v0  ;;  %v15103_v3 = vld [vmem:[#allocation30 + $0xc0] ss:$8 sps:$4 sm:$0xff]  }
0x4152   : > { %14050 = vmatprep.subr.bf16.mxu1 %v16490_v0 }
0x4158   : > { %14041 = vmatmul.mubr.msk.bf16.vlgmr.msra.gmra.mrb[184].mxu1 %vm2004_vm1, %v9487_v13  ;;  %v15108_v13 = vld [vmem:[#allocation30 + $0xd4] ss:$8 sps:$4 sm:$0xff]  }
0x4159   : > { %14054 = vmatprep.mubr.msk.bf16.mxu1 %vm16491_vm0, %v16490_v0 }
0x4223   : > { %v9420_v19 = vpop.f32.mrb[180].mxu1 }
0x4224   : > { %v14028_v46 = vpop.f32.mrb[181].mxu1 }
0x4225   : > { %v9423_v38 = vpop.f32.mrb[182].mxu1  ;;  %v15109_v46 = vld [vmem:[#allocation30 + $0xe0] ss:$8 sps:$4 sm:$0xff]  }
0x4226   : > { %v9427_v40 = vpack.c.bf16 %v9423_v38, %v9420_v19  ;;  %v14029_v20 = vpop.f32.mrb[183].mxu1  ;;  %v15111_v19 = vld [vmem:[#allocation30 + $0xe4] ss:$8 sps:$4 sm:$0xff]   ;;  %v15114_v38 = vld [vmem:[#allocation30 + $0xf4] ss:$8 sps:$4 sm:$0xff]  }
0x4228   : > { %14035 = vmatmul.mubr.msk.bf16.vlgmr.msra.gmra.mrb[156].mxu0 %vm2004_vm1, %v9427_v40  ;;  %v15112_v40 = vld [vmem:[#allocation30 + $0xf0] ss:$8 sps:$4 sm:$0xff]  }
0x4229   : > { %14046 = vmatprep.mubr.msk.bf16.mxu0 %vm16491_vm0, %v16490_v0 }
0x422b   : > { %v9530_v47 = vpop.f32.mrb[184].mxu1 }
0x422c   : > { %v14042_v21 = vpop.f32.mrb[185].mxu1  ;;  %v9537_v24 = vsel %vm2052_vm2, %v9530_v47, -inf }
0x422d   : > { %9538 = vmax.xlane.f32.xlu0 %v9537_v24  ;;  %v9533_v25 = vpop.f32.mrb[186].mxu1 }
0x422e   : > { %v14043_v26 = vpop.f32.mrb[187].mxu1  ;;  %v9540_v27 = vsel %vm2052_vm2, %v9533_v25, -inf }
0x422f   : > { %9541 = vmax.xlane.f32.xlu1 %v9540_v27 }
0x4240   : > { %9560 = vrot.lane.b32.xlu1 %v18022_v4, %s16495_s28  ;;  %v15089_v4 = vld [vmem:[#allocation21 + $0x70] sm:$0xff]  }
0x4241   : > { %14051 = vmatpush3.bf16.msra.mxu1 %v15089_v4 }
0x4242   : > { %14052 = vmatprep.subr.bf16.mxu1 %v16490_v0 }
0x42ba   : > { %v9539_v29 = vpop.xlane.xlu0 %9538 }
0x42bb   : > { %v9543_v30 = vsub.f32 %v9530_v47, %v9539_v29  ;;  %v12782_v47 = vld [vmem:[#allocation22 + $0x1] ss:$0 sm:$0xff] }
0x42bc   : > { %v9542_v32 = vpop.xlane.xlu1 %9541 }
0x42bd   : > { %v9545_v7 = vmul.f32 1.442695, %v9543_v30  ;;  %v9544_v11 = vsub.f32 %v9533_v25, %v9542_v32 }
0x42bf   : > { %15415 = vpow2.f32 %v9545_v7  ;;  %v9547_v8 = vmul.f32 1.442695, %v9544_v11 }
0x42c0   : > { %v9561_v39 = vpop.permute.xlu1 %9560 }
0x42c1   : > { %15417 = vpow2.f32 %v9547_v8  ;;  %14045 = vmatpush3.bf16.msra.mxu0 %v9561_v39  ;;  %v15115_v8 = vld [vmem:[#allocation27 + $0x40] sm:$0xff]  }
0x42c2   : > { %14058 = vmatprep.subr.bf16.mxu0 %v16490_v0 }
0x42c9   : > { %v15416_v41 = vpop.eup %15415 }
0x42ca   : > { %v9549_v12 = vsel %vm2052_vm2, %v15416_v41, 0.0 }
0x42cb   : > { %v15418_v55 = vpop.eup %15417  ;;  %9550 = vadd.xlane.f32.xlu0 %v9549_v12 }
0x42cc   : > { %v9552_v43 = vsel %vm2052_vm2, %v15418_v55, 0.0 }
0x42cf   : > { %9553 = vadd.xlane.f32.xlu0 %v9552_v43 }
0x42fb   : > { %v9477_v33 = vpop.f32.mrb[156].mxu0 }
0x42fc   : > { %v9484_v31 = vadd.f32 %v9477_v33, %v18080_v16  ;;  %v14036_v44 = vpop.f32.mrb[157].mxu0  ;;  %v15090_v16 = vld [vmem:[#allocation21 + $0x78] sm:$0xff]  }
0x42fd   : > { %v9480_v50 = vpop.f32.mrb[158].mxu0  ;;  %14053 = vmatpush3.bf16.msra.mxu1 %v15090_v16  ;;  %v15118_v16 = vld [vmem:[#allocation27 + $0x58] sm:$0xff]  }
0x42fe   : > { %v18118_v14 = vadd.f32 %v9480_v50, %v18082_v34  ;;  %v14037_v28 = vpop.f32.mrb[159].mxu0  ;;  %9945 = vmatprep.subr.bf16.mxu1 %v15093_v60  ;;  %v15117_v50 = vld [vmem:[#allocation27 + $0x50] sm:$0xff]   ;;  %v15119_v60 = vld [vmem:[#allocation27 + $0x60] sm:$0xff]  }
0x4358   : > { %v9551_v56 = vpop.xlane.xlu0 %9550 }
0x4359   : > { %15419 = vrcp.f32 %v9551_v56 }
0x435c   : > { %v9554_v57 = vpop.xlane.xlu0 %9553 }
0x435d   : > { %15421 = vrcp.f32 %v9554_v57 }
0x4363   : > { %v15420_v58 = vpop.eup %15419 }
0x4364   : > { %v9557_v35 = vmul.f32 %v15420_v58, %v15416_v41 }
0x4367   : > { %v15422_v45 = vpop.eup %15421 }
0x4368   : > { %v9558_v37 = vmul.f32 %v15422_v45, %v15418_v55  ;;  %v15116_v55 = vld [vmem:[#allocation27 + $0x48] sm:$0xff]  }
0x436a   : > { %v9559_v22 = vpack.c.bf16 %v9558_v37, %v9557_v35 }
0x436c   : > { %14047 = vmatmul.mubr.msk.bf16.vlgmr.msra.gmra.mrb[160].mxu0 %vm2052_vm2, %v9559_v22 }
0x436d   : > { %14074 = vmatprep.mubr.msk.bf16.mxu0 %vm16491_vm0, %v16490_v0  ;;  %14059 = vmatpush3.bf16.msra.mxu0 %v15115_v8 }
0x436e   : > { %14060 = vmatprep.subr.bf16.mxu0 %v16490_v0 }
0x4371   : > { %14061 = vmatpush3.bf16.msra.mxu0 %v15116_v55 }
0x4372   : > { %14062 = vmatprep.subr.bf16.mxu0 %v16490_v0 }
0x4375   : > { %14063 = vmatpush3.bf16.msra.mxu0 %v15117_v50 }
0x4376   : > { %14064 = vmatprep.subr.bf16.mxu0 %v16490_v0 }
0x4379   : > { %14065 = vmatpush3.bf16.msra.mxu0 %v15118_v16 }
0x437a   : > { %14066 = vmatprep.subr.bf16.mxu0 %v16490_v0 }
0x437d   : > { %14067 = vmatpush3.bf16.msra.mxu0 %v15119_v60 }
0x437e   : > { %14068 = vmatprep.subr.bf16.mxu0 %v16490_v0 }
0x443f   : > { %v9600_v34 = vpop.f32.mrb[160].mxu0 }
0x4440   : > { %v14048_v23 = vpop.f32.mrb[161].mxu0 }
0x4441   : > { %v9603_v9 = vpop.f32.mrb[162].mxu0  ;;  %v15121_v23 = vld [vmem:[#allocation27 + $0x70] sm:$0xff]  }
0x4442   : > { %v9607_v62 = vpack.c.bf16 %v9603_v9, %v9600_v34  ;;  %v14049_v18 = vpop.f32.mrb[163].mxu0  ;;  %v15120_v34 = vld [vmem:[#allocation27 + $0x68] sm:$0xff]   ;;  %v15122_v9 = vld [vmem:[#allocation27 + $0x78] sm:$0xff]  }
0x4443   : > { %14069 = vmatpush3.bf16.msra.mxu0 %v15120_v34 }
0x4444   : > { %14055 = vmatmul.mubr.msk.bf16.vlgmr.msra.gmra.mrb[188].mxu1 %vm2004_vm1, %v9607_v62  ;;  %14070 = vmatprep.subr.bf16.mxu0 %v16490_v0 }
0x4445   : > { %9946 = vmatpush1.bf16.msra.mxu1 %v15091_v17  ;;  %9977 = vmatprep.mubr.bf16.mxu1 %v16492_v36 }
0x4446   : > { %9947 = vmatprep.subr.bf16.mxu1 %v15096_v53 }
0x4447   : > { %14071 = vmatpush3.bf16.msra.mxu0 %v15121_v23 }
0x4448   : > { %14072 = vmatprep.subr.bf16.mxu0 %v16490_v0 }
0x4449   : > { %9948 = vmatpush1.bf16.msra.mxu1 %v15094_v1 }
0x444a   : > { %9949 = vmatprep.subr.bf16.mxu1 %v15099_v5 }
0x444b   : > { %14073 = vmatpush3.bf16.msra.mxu0 %v15122_v9 }
0x444c   : > { %14078 = vmatprep.subr.bf16.mxu0 %v16490_v0 }
0x444d   : > { %9950 = vmatpush1.bf16.msra.mxu1 %v15097_v49 }
0x444e   : > { %9951 = vmatprep.subr.bf16.mxu1 %v15102_v2 }
0x4451   : > { %9952 = vmatpush1.bf16.msra.mxu1 %v15100_v48  ;;  %v12783_v48 = vld [vmem:[#allocation24 + $0x1] ss:$0 sm:$0xff] }
0x4452   : > { %9953 = vmatprep.subr.bf16.mxu1 %v15105_v6 }
0x4455   : > { %9954 = vmatpush1.bf16.msra.mxu1 %v15103_v3 }
0x4456   : > { %9955 = vmatprep.subr.bf16.mxu1 %v15108_v13 }
0x4459   : > { %9956 = vmatpush1.bf16.msra.mxu1 %v15106_v15  ;;  %v12784_v15 = vld [vmem:[#allocation25 + $0x1] ss:$0 sm:$0xff] }
0x445a   : > { %9957 = vmatprep.subr.bf16.mxu1 %v15111_v19 }
0x445d   : > { %9958 = vmatpush1.bf16.msra.mxu1 %v15109_v46 }
0x445e   : > { %9959 = vmatprep.subr.bf16.mxu1 %v15114_v38 }
0x4461   : > { %9960 = vmatpush1.bf16.msra.mxu1 %v15112_v40 }
0x4462   : > { %14084 = vmatprep.subr.bf16.mxu1 %v16490_v0 }
0x4464   : > { %9978 = vmatmul.mubr.bf16.vlgmr.msra.gmra.mrb[192].mxu1 %v17823_v63  ;;  %v9853_v63 = vld [vmem:[#allocation31 + $0x2] sm:$0x3] }
0x4465   : > { %14086 = vmatprep.mubr.msk.bf16.mxu1 %vm16491_vm0, %v16490_v0  ;;  %v9858_v11 = vrot.slane %v9853_v63, %v17304_v51  ;;  %v9862_v41 = vrot.slane %v9853_v63, %v17310_v54 }
0x4517   : > { %v9657_v20 = vpop.f32.mrb[188].mxu1 }
0x4518   : > { %v9664_v21 = vadd.f32 %v9657_v20, %v9484_v31  ;;  %v14056_v24 = vpop.f32.mrb[189].mxu1 }
0x4519   : > { %v9660_v25 = vpop.f32.mrb[190].mxu1 }
0x451a   : > { %v9674_v26 = vadd.f32 %v12782_v47, %v9664_v21  ;;  %v9665_v27 = vadd.f32 %v9660_v25, %v18118_v14  ;;  %v14057_v29 = vpop.f32.mrb[191].mxu1 }
0x451c   : > { %v9675_v30 = vadd.f32 %v12782_v47, %v9665_v27  ;;  %v9676_v32 = vadd.f32 %v9674_v26, %v18007_v59  ;;  %v12785_v47 = vld [vmem:[#allocation28 + $0x1] ss:$0 sm:$0xff] }
0x451e   : > { %9682 = vadd.xlane.f32.xlu0 %v9676_v32  ;;  %v9677_v7 = vadd.f32 %v9675_v30, %v18009_v10 }
0x4522   : > { %9684 = vadd.xlane.f32.xlu0 %v9677_v7 }
0x4537   : > { %v9979_v39 = vpop.f32.mrb[192].mxu1 }
0x4538   : > { %v9981_v12 = vpop.f32.mrb[193].mxu1  ;;  %v9980_v4 = vadd.f32 %v9979_v39, %v9858_v11 }
0x4539   : > { %v9983_v43 = vpop.f32.mrb[194].mxu1  ;;  %v9982_v31 = vadd.f32 %v9981_v12, %v9862_v41 }
0x453a   : > { %v9984_v33 = vadd.f32 %v9983_v43, %v9858_v11  ;;  %v9985_v59 = vpop.f32.mrb[195].mxu1 }
0x453b   : > { %v9986_v44 = vadd.f32 %v9985_v59, %v9862_v41 }
0x453c   : > { %v18135_v10 = vpack.c.bf16 %v9984_v33, %v9980_v4 }
0x453d   : > { %v18137_v14 = vpack.c.bf16 %v9986_v44, %v9982_v31 }
0x453e   : > { %10127 = vrot.lane.b32.xlu1 %v18135_v10, %s16493_s9  ;;  %v10012_v20 = vsel %vm2004_vm1, %v18135_v10, 0 }
0x453f   : > { %14085 = vmatpush3.bf16.msra.mxu1 %v18137_v14 }
0x4540   : > { %14096 = vmatprep.subr.bf16.mxu1 %v16490_v0 }
0x45ab   : > { %v9683_v28 = vpop.xlane.xlu0 %9682 }
0x45ac   : > { %v9686_v56 = vmul.f32 0.0078125, %v9683_v28 }
0x45ae   : > { %v9688_v57 = vsub.f32 %v9676_v32, %v9686_v56 }
0x45af   : > { %v9685_v58 = vpop.xlane.xlu0 %9684 }
0x45b0   : > { %v9687_v45 = vmul.f32 0.0078125, %v9685_v58  ;;  %v9690_v35 = vmul.f32 %v9688_v57, %v9688_v57  ;;  %v10128_v30 = vpop.permute.xlu1 %10127 }
0x45b2   : > { %v9689_v37 = vsub.f32 %v9677_v7, %v9687_v45  ;;  %9692 = vadd.xlane.f32.xlu0 %v9690_v35  ;;  %v10133_v7 = vsel %vm2004_vm1, %v10128_v30, 0 }
0x45b4   : > { %v9691_v22 = vmul.f32 %v9689_v37, %v9689_v37 }
0x45b6   : > { %9694 = vadd.xlane.f32.xlu0 %v9691_v22 }
0x463f   : > { %v9693_v17 = vpop.xlane.xlu0 %9692 }
0x4640   : > { %v9696_v62 = vmul.f32 0.0078125, %v9693_v17 }
0x4642   : > { %v9698_v18 = vadd.f32 1e-05, %v9696_v62 }
0x4643   : > { %v9695_v53 = vpop.xlane.xlu0 %9694 }
0x4644   : > { %15423 = vrsqrt.f32 %v9698_v18  ;;  %v9697_v1 = vmul.f32 0.0078125, %v9695_v53 }
0x4646   : > { %v9699_v5 = vadd.f32 1e-05, %v9697_v1 }
0x4648   : > { %15425 = vrsqrt.f32 %v9699_v5 }
0x464e   : > { %v15424_v49 = vpop.eup %15423 }
0x464f   : > { %v9702_v2 = vmul.f32 %v15424_v49, %v9688_v57 }
0x4651   : > { %v9710_v13 = vmul.f32 %v12783_v48, %v9702_v2 }
0x4652   : > { %v15426_v6 = vpop.eup %15425 }
0x4653   : > { %v9703_v3 = vmul.f32 %v15426_v6, %v9689_v37  ;;  %v18150_v46 = vadd.f32 %v12784_v15, %v9710_v13 }
0x4655   : > { %v9711_v19 = vmul.f32 %v12783_v48, %v9703_v3 }
0x4657   : > { %v18152_v38 = vadd.f32 %v12784_v15, %v9711_v19  ;;  %v15125_v19 = vld [vmem:[#allocation33 + $0x50] sm:$0xff]  }
0x4659   : > { %v9720_v40 = vpack.c.bf16 %v18152_v38, %v18150_v46 }
0x465b   : > { %14075 = vmatmul.mubr.bf16.vlgmr.msra.gmra.mrb[164].mxu0 %v9720_v40  ;;  %v15126_v40 = vld [vmem:[#allocation33 + $0x58] sm:$0xff]  }
0x465c   : > { %14079 = vmatpush3.bf16.xpose.msra.mxu0 %v10012_v20  ;;  %14080 = vmatprep.mubr.msk.bf16.mxu0 %vm16491_vm0, %v16490_v0 }
0x465d   : > { %14090 = vmatprep.subr.bf16.mxu0 %v16490_v0 }
0x472e   : > { %v9828_v21 = vpop.f32.mrb[164].mxu0 }
0x472f   : > { %v14076_v24 = vpop.f32.mrb[165].mxu0  ;;  %v9829_v26 = vadd.f32 %v12785_v47, %v9828_v21 }
0x4730   : > { %v9831_v25 = vpop.f32.mrb[166].mxu0 }
0x4731   : > { %v9832_v27 = vadd.f32 %v12785_v47, %v9831_v25  ;;  %v14077_v29 = vpop.f32.mrb[167].mxu0 }
0x4732   : > { %v15123_v29 = vld [vmem:[#allocation33 + $0x40] sm:$0xff]  }
0x4733   : > { %v18161_v32 = vpack.c.bf16 %v9832_v27, %v9829_v26 }
0x4735   : > { %10124 = vrot.lane.b32.xlu0 %v18161_v32, %s16493_s9  ;;  %14081 = vmatmul.mubr.msk.bf16.vlgmr.msra.gmra.mrb[168].mxu0 %vm2004_vm1, %v18161_v32 }
0x4736   : > { %14091 = vmatpush3.bf16.xpose.msra.mxu0 %v10133_v7  ;;  %14092 = vmatprep.mubr.msk.bf16.mxu0 %vm16491_vm0, %v16490_v0  ;;  %v15124_v7 = vld [vmem:[#allocation33 + $0x48] sm:$0xff]  }
0x4737   : > { %14102 = vmatprep.subr.bf16.mxu0 %v16490_v0 }
0x47a7   : > { %v10125_v63 = vpop.permute.xlu0 %10124 }
0x47a8   : > { %14093 = vmatmul.mubr.msk.bf16.vlgmr.msra.gmra.mrb[172].mxu0 %vm2004_vm1, %v10125_v63 }
0x47a9   : > { %14106 = vmatprep.mubr.msk.bf16.mxu0 %vm16491_vm0, %v16490_v0  ;;  %14103 = vmatpush3.bf16.msra.mxu0 %v15125_v19 }
0x47aa   : > { %14104 = vmatprep.subr.bf16.mxu0 %v16490_v0 }
0x47ad   : > { %14105 = vmatpush3.bf16.msra.mxu0 %v15126_v40 }
0x47ae   : > { %14118 = vmatprep.subr.bf16.mxu0 %v16490_v0 }
0x4808   : > { %v10048_v11 = vpop.f32.mrb[168].mxu0 }
0x4809   : > { %v14082_v8 = vpop.f32.mrb[169].mxu0  ;;  %v10055_v39 = vsel %vm2052_vm2, %v10048_v11, -inf }
0x480a   : > { %10056 = vmax.xlane.f32.xlu1 %v10055_v39  ;;  %v10051_v41 = vpop.f32.mrb[170].mxu0 }
0x480b   : > { %v14083_v12 = vpop.f32.mrb[171].mxu0  ;;  %v10058_v55 = vsel %vm2052_vm2, %v10051_v41, -inf }
0x480c   : > { %10059 = vmax.xlane.f32.xlu0 %v10058_v55 }
0x487b   : > { %v10169_v43 = vpop.f32.mrb[172].mxu0 }
0x487c   : > { %v14094_v4 = vpop.f32.mrb[173].mxu0  ;;  %v10176_v33 = vsel %vm2052_vm2, %v10169_v43, -inf }
0x487d   : > { %10177 = vmax.xlane.f32.xlu1 %v10176_v33  ;;  %v10172_v59 = vpop.f32.mrb[174].mxu0 }
0x487e   : > { %v14095_v31 = vpop.f32.mrb[175].mxu0  ;;  %v10179_v44 = vsel %vm2052_vm2, %v10172_v59, -inf }
0x4881   : > { %10180 = vmax.xlane.f32.xlu1 %v10179_v44 }
0x4897   : > { %v10057_v50 = vpop.xlane.xlu1 %10056 }
0x4898   : > { %v10061_v28 = vsub.f32 %v10048_v11, %v10057_v50 }
0x4899   : > { %v10060_v56 = vpop.xlane.xlu0 %10059 }
0x489a   : > { %v10063_v57 = vmul.f32 1.442695, %v10061_v28  ;;  %v10062_v58 = vsub.f32 %v10051_v41, %v10060_v56 }
0x489c   : > { %15427 = vpow2.f32 %v10063_v57  ;;  %v10065_v45 = vmul.f32 1.442695, %v10062_v58 }
0x489e   : > { %15429 = vpow2.f32 %v10065_v45 }
0x48a6   : > { %v15428_v35 = vpop.eup %15427 }
0x48a7   : > { %v10067_v37 = vsel %vm2052_vm2, %v15428_v35, 0.0 }
0x48a8   : > { %v15430_v22 = vpop.eup %15429  ;;  %10068 = vadd.xlane.f32.xlu1 %v10067_v37 }
0x48a9   : > { %v10070_v16 = vsel %vm2052_vm2, %v15430_v22, 0.0 }
0x48ac   : > { %10071 = vadd.xlane.f32.xlu1 %v10070_v16 }
0x490a   : > { %v10178_v60 = vpop.xlane.xlu1 %10177 }
0x490b   : > { %v10182_v34 = vsub.f32 %v10169_v43, %v10178_v60 }
0x490d   : > { %v10184_v23 = vmul.f32 1.442695, %v10182_v34 }
0x490e   : > { %v10181_v9 = vpop.xlane.xlu1 %10180 }
0x490f   : > { %15431 = vpow2.f32 %v10184_v23  ;;  %v10183_v17 = vsub.f32 %v10172_v59, %v10181_v9 }
0x4911   : > { %v10186_v62 = vmul.f32 1.442695, %v10183_v17 }
0x4913   : > { %15433 = vpow2.f32 %v10186_v62 }
0x4919   : > { %v15432_v18 = vpop.eup %15431 }
0x491a   : > { %v10188_v53 = vsel %vm2052_vm2, %v15432_v18, 0.0 }
0x491b   : > { %10189 = vadd.xlane.f32.xlu0 %v10188_v53 }
0x491d   : > { %v15434_v1 = vpop.eup %15433 }
0x491e   : > { %v10191_v5 = vsel %vm2052_vm2, %v15434_v1, 0.0 }
0x491f   : > { %10192 = vadd.xlane.f32.xlu1 %v10191_v5 }
0x4930   : > { %10362 = vrot.lane.b32.xlu1 %v18135_v10, %s16494_s6 }
0x4931   : > { %10200 = vrot.lane.b32.xlu0 %v18137_v14, %s16493_s9 }
0x4934   : > { %10360 = vrot.lane.b32.xlu1 %v18161_v32, %s16494_s6 }
0x4935   : > { %v10069_v49 = vpop.xlane.xlu1 %10068 }
0x4936   : > { %15435 = vrcp.f32 %v10069_v49 }
0x4939   : > { %v10072_v2 = vpop.xlane.xlu1 %10071 }
0x493a   : > { %15437 = vrcp.f32 %v10072_v2 }
0x4940   : > { %v15436_v48 = vpop.eup %15435 }
0x4941   : > { %v10075_v3 = vmul.f32 %v15436_v48, %v15428_v35 }
0x4944   : > { %v15438_v6 = vpop.eup %15437 }
0x4945   : > { %v10076_v13 = vmul.f32 %v15438_v6, %v15430_v22 }
0x4947   : > { %v10077_v15 = vpack.c.bf16 %v10076_v13, %v10075_v3 }
0x4949   : > { %14087 = vmatmul.mubr.msk.bf16.vlgmr.msra.gmra.mrb[196].mxu1 %vm2052_vm2, %v10077_v15 }
0x494a   : > { %14098 = vmatprep.mubr.msk.bf16.mxu1 %vm16491_vm0, %v16490_v0 }
0x49a8   : > { %v10190_v20 = vpop.xlane.xlu0 %10189 }
0x49a9   : > { %15439 = vrcp.f32 %v10190_v20 }
0x49ac   : > { %v10201_v47 = vpop.permute.xlu0 %10200  ;;  %v10193_v21 = vpop.xlane.xlu1 %10192 }
0x49ad   : > { %15441 = vrcp.f32 %v10193_v21  ;;  %14097 = vmatpush3.bf16.msra.mxu1 %v10201_v47 }
0x49ae   : > { %14110 = vmatprep.subr.bf16.mxu1 %v16490_v0 }
0x49b0   : > { %v10363_v43 = vpop.permute.xlu1 %10362 }
0x49b1   : > { %v10368_v31 = vsel %vm2004_vm1, %v10363_v43, 0 }
0x49b3   : > { %v15440_v24 = vpop.eup %15439 }
0x49b4   : > { %v10196_v26 = vmul.f32 %v15440_v24, %v15432_v18  ;;  %v10361_v44 = vpop.permute.xlu1 %10360 }
0x49b7   : > { %v15442_v25 = vpop.eup %15441 }
0x49b8   : > { %v10197_v27 = vmul.f32 %v15442_v25, %v15434_v1 }
0x49ba   : > { %v10198_v30 = vpack.c.bf16 %v10197_v27, %v10196_v26 }
0x49bc   : > { %14099 = vmatmul.mubr.msk.bf16.vlgmr.msra.gmra.mrb[200].mxu1 %vm2052_vm2, %v10198_v30 }
0x49bd   : > { %14111 = vmatpush3.bf16.msra.mxu1 %v15123_v29  ;;  %14114 = vmatprep.mubr.msk.bf16.mxu1 %vm16491_vm0, %v16490_v0  ;;  %v15128_v29 = vld [vmem:[#allocation33 + $0x68] sm:$0xff]  }
0x49be   : > { %14112 = vmatprep.subr.bf16.mxu1 %v16490_v0 }
0x49c1   : > { %14113 = vmatpush3.bf16.msra.mxu1 %v15124_v7 }
0x49c2   : > { %14124 = vmatprep.subr.bf16.mxu1 %v16490_v0 }
0x4a1c   : > { %v10115_v63 = vpop.f32.mrb[196].mxu1 }
0x4a1d   : > { %v14088_v11 = vpop.f32.mrb[197].mxu1 }
0x4a1e   : > { %v10118_v8 = vpop.f32.mrb[198].mxu1 }
0x4a1f   : > { %v10122_v39 = vpack.c.bf16 %v10118_v8, %v10115_v63  ;;  %v14089_v41 = vpop.f32.mrb[199].mxu1 }
0x4a21   : > { %14115 = vmatmul.mubr.msk.bf16.vlgmr.msra.gmra.mrb[204].mxu1 %vm2004_vm1, %v10122_v39 }
0x4a22   : > { %14126 = vmatprep.mubr.msk.bf16.mxu1 %vm16491_vm0, %v16490_v0 }
0x4a8f   : > { %v10240_v12 = vpop.f32.mrb[200].mxu1 }
0x4a90   : > { %v14100_v55 = vpop.f32.mrb[201].mxu1 }
0x4a91   : > { %v10243_v4 = vpop.f32.mrb[202].mxu1 }
0x4a92   : > { %v10247_v33 = vpack.c.bf16 %v10243_v4, %v10240_v12  ;;  %v14101_v59 = vpop.f32.mrb[203].mxu1 }
0x4a94   : > { %14107 = vmatmul.mubr.msk.bf16.vlgmr.msra.gmra.mrb[176].mxu0 %vm2004_vm1, %v10247_v33 }
0x4a95   : > { %14119 = vmatpush3.bf16.xpose.msra.mxu0 %v10368_v31  ;;  %14120 = vmatprep.mubr.msk.bf16.mxu0 %vm16491_vm0, %v16490_v0 }
0x4a96   : > { %14130 = vmatprep.subr.bf16.mxu0 %v16490_v0 }
0x4a9c   : > { %14121 = vmatmul.mubr.msk.bf16.vlgmr.msra.gmra.mrb[180].mxu0 %vm2004_vm1, %v10361_v44 }
0x4a9d   : > { %14134 = vmatprep.mubr.msk.bf16.mxu0 %vm16491_vm0, %v16490_v0 }
0x4af4   : > { %v10353_v50 = vpop.f32.mrb[204].mxu1 }
0x4af5   : > { %v14116_v28 = vpop.f32.mrb[205].mxu1 }
0x4af6   : > { %v10356_v56 = vpop.f32.mrb[206].mxu1 }
0x4af7   : > { %v14117_v57 = vpop.f32.mrb[207].mxu1 }
0x4b67   : > { %v10297_v58 = vpop.f32.mrb[176].mxu0 }
0x4b68   : > { %v18210_v45 = vadd.f32 %v10353_v50, %v10297_v58  ;;  %v14108_v35 = vpop.f32.mrb[177].mxu0 }
0x4b69   : > { %v10300_v37 = vpop.f32.mrb[178].mxu0 }
0x4b6a   : > { %v18212_v22 = vadd.f32 %v10356_v56, %v10300_v37  ;;  %v14109_v16 = vpop.f32.mrb[179].mxu0  ;;  %v15129_v37 = vld [vmem:[#allocation33 + $0x70] sm:$0xff]  }
0x4b6f   : > { %v10404_v60 = vpop.f32.mrb[180].mxu0 }
0x4b70   : > { %v14122_v34 = vpop.f32.mrb[181].mxu0  ;;  %v10411_v23 = vsel %vm2052_vm2, %v10404_v60, -inf }
0x4b71   : > { %10412 = vmax.xlane.f32.xlu0 %v10411_v23  ;;  %v10407_v9 = vpop.f32.mrb[182].mxu0 }
0x4b72   : > { %v14123_v17 = vpop.f32.mrb[183].mxu0  ;;  %v10414_v62 = vsel %vm2052_vm2, %v10407_v9, -inf }
0x4b73   : > { %10415 = vmax.xlane.f32.xlu1 %v10414_v62 }
0x4b84   : > { %10434 = vrot.lane.b32.xlu1 %v18137_v14, %s16494_s6 }
0x4b88   : > { %10540 = vrot.lane.b32.xlu1 %v18161_v32, %s16495_s28  ;;  %v15127_v32 = vld [vmem:[#allocation33 + $0x60] sm:$0xff]  }
0x4b89   : > { %14131 = vmatpush3.bf16.msra.mxu0 %v15127_v32  ;;  %v12830_v32 = vld [vmem:[#allocation34 + $0x1] ss:$0 sm:$0xff] }
0x4b8a   : > { %14132 = vmatprep.subr.bf16.mxu0 %v16490_v0 }
0x4b8d   : > { %14133 = vmatpush3.bf16.msra.mxu0 %v15128_v29  ;;  %v15133_v29 = vld [vmem:[#allocation39 + $0x144] ss:$20 sps:$4 sm:$0xff]  }
0x4b8e   : > { %14144 = vmatprep.subr.bf16.mxu0 %v16490_v0 }
0x4bfe   : > { %v10413_v18 = vpop.xlane.xlu0 %10412 }
0x4bff   : > { %v10417_v53 = vsub.f32 %v10404_v60, %v10413_v18 }
0x4c00   : > { %v10416_v1 = vpop.xlane.xlu1 %10415 }
0x4c01   : > { %v10419_v5 = vmul.f32 1.442695, %v10417_v53  ;;  %v10418_v49 = vsub.f32 %v10407_v9, %v10416_v1 }
0x4c03   : > { %15443 = vpow2.f32 %v10419_v5  ;;  %v10421_v2 = vmul.f32 1.442695, %v10418_v49 }
0x4c04   : > { %v10435_v48 = vpop.permute.xlu1 %10434 }
0x4c05   : > { %15445 = vpow2.f32 %v10421_v2  ;;  %14125 = vmatpush3.bf16.msra.mxu1 %v10435_v48 }
0x4c06   : > { %14138 = vmatprep.subr.bf16.mxu1 %v16490_v0 }
0x4c0d   : > { %v15444_v6 = vpop.eup %15443 }
0x4c0e   : > { %v10423_v3 = vsel %vm2052_vm2, %v15444_v6, 0.0 }
0x4c0f   : > { %v15446_v13 = vpop.eup %15445  ;;  %10424 = vadd.xlane.f32.xlu0 %v10423_v3 }
0x4c10   : > { %v10426_v15 = vsel %vm2052_vm2, %v15446_v13, 0.0 }
0x4c13   : > { %10427 = vadd.xlane.f32.xlu0 %v10426_v15 }
0x4c29   : > { %10542 = vrot.lane.b32.xlu0 %v18135_v10, %s16495_s28  ;;  %v10541_v10 = vpop.permute.xlu1 %10540 }
0x4c9c   : > { %v10425_v19 = vpop.xlane.xlu0 %10424 }
0x4c9d   : > { %15447 = vrcp.f32 %v10425_v19 }
0x4ca0   : > { %v10428_v40 = vpop.xlane.xlu0 %10427 }
0x4ca1   : > { %15449 = vrcp.f32 %v10428_v40 }
0x4ca4   : > { %v10543_v25 = vpop.permute.xlu0 %10542 }
0x4ca5   : > { %v10548_v27 = vsel %vm2004_vm1, %v10543_v25, 0 }
0x4ca7   : > { %v15448_v20 = vpop.eup %15447 }
0x4ca8   : > { %v10431_v21 = vmul.f32 %v15448_v20, %v15444_v6 }
0x4cab   : > { %v15450_v47 = vpop.eup %15449 }
0x4cac   : > { %v10432_v24 = vmul.f32 %v15450_v47, %v15446_v13 }
0x4cae   : > { %v10433_v26 = vpack.c.bf16 %v10432_v24, %v10431_v21 }
0x4cb0   : > { %14127 = vmatmul.mubr.msk.bf16.vlgmr.msra.gmra.mrb[208].mxu1 %vm2052_vm2, %v10433_v26 }
0x4cb1   : > { %14139 = vmatpush3.bf16.xpose.msra.mxu1 %v10548_v27  ;;  %14140 = vmatprep.mubr.msk.bf16.mxu1 %vm16491_vm0, %v16490_v0 }
0x4cb2   : > { %14150 = vmatprep.subr.bf16.mxu1 %v16490_v0 }
0x4cb8   : > { %14141 = vmatmul.mubr.msk.bf16.vlgmr.msra.gmra.mrb[212].mxu1 %vm2004_vm1, %v10541_v10  ;;  %v15131_v10 = vld [vmem:[#allocation39 + $0x140] ss:$20 sps:$4 sm:$0xff]  }
0x4cb9   : > { %14154 = vmatprep.mubr.msk.bf16.mxu1 %vm16491_vm0, %v16490_v0  ;;  %14151 = vmatpush3.bf16.msra.mxu1 %v15129_v37  ;;  %v15160_v37 = vld [vmem:[#allocation39 + $0x1ec] ss:$20 sps:$4 sm:$0xff]  }
0x4cba   : > { %14152 = vmatprep.subr.bf16.mxu1 %v16490_v0 }
0x4d83   : > { %v10474_v30 = vpop.f32.mrb[208].mxu1 }
0x4d84   : > { %v14128_v7 = vpop.f32.mrb[209].mxu1 }
0x4d85   : > { %v10477_v63 = vpop.f32.mrb[210].mxu1  ;;  %v15136_v7 = vld [vmem:[#allocation39 + $0x14c] ss:$20 sps:$4 sm:$0xff]  }
0x4d86   : > { %v10481_v11 = vpack.c.bf16 %v10477_v63, %v10474_v30  ;;  %v14129_v8 = vpop.f32.mrb[211].mxu1  ;;  %v15134_v30 = vld [vmem:[#allocation39 + $0x148] ss:$20 sps:$4 sm:$0xff]  }
0x4d87   : > { %v15142_v63 = vld [vmem:[#allocation39 + $0x174] ss:$20 sps:$4 sm:$0xff]   ;;  %v15140_v8 = vld [vmem:[#allocation39 + $0x170] ss:$20 sps:$4 sm:$0xff]  }
0x4d88   : > { %14135 = vmatmul.mubr.msk.bf16.vlgmr.msra.gmra.mrb[184].mxu0 %vm2004_vm1, %v10481_v11  ;;  %v15137_v11 = vld [vmem:[#allocation39 + $0x168] ss:$20 sps:$4 sm:$0xff]  }
0x4d89   : > { %14146 = vmatprep.mubr.msk.bf16.mxu0 %vm16491_vm0, %v16490_v0 }
0x4d8b   : > { %v10584_v39 = vpop.f32.mrb[212].mxu1 }
0x4d8c   : > { %v14142_v41 = vpop.f32.mrb[213].mxu1  ;;  %v10591_v12 = vsel %vm2052_vm2, %v10584_v39, -inf }
0x4d8d   : > { %10592 = vmax.xlane.f32.xlu1 %v10591_v12  ;;  %v10587_v55 = vpop.f32.mrb[214].mxu1 }
0x4d8e   : > { %v14143_v43 = vpop.f32.mrb[215].mxu1  ;;  %v10594_v4 = vsel %vm2052_vm2, %v10587_v55, -inf }
0x4d8f   : > { %10595 = vmax.xlane.f32.xlu0 %v10594_v4 }
0x4e1a   : > { %v10593_v33 = vpop.xlane.xlu1 %10592 }
0x4e1b   : > { %v10597_v59 = vsub.f32 %v10584_v39, %v10593_v33  ;;  %v15145_v33 = vld [vmem:[#allocation39 + $0x194] ss:$20 sps:$4 sm:$0xff]  }
0x4e1c   : > { %v10596_v31 = vpop.xlane.xlu0 %10595 }
0x4e1d   : > { %v10599_v44 = vmul.f32 1.442695, %v10597_v59  ;;  %v10598_v50 = vsub.f32 %v10587_v55, %v10596_v31  ;;  %v15143_v59 = vld [vmem:[#allocation39 + $0x190] ss:$20 sps:$4 sm:$0xff]  }
0x4e1e   : > { %v15148_v31 = vld [vmem:[#allocation39 + $0x19c] ss:$20 sps:$4 sm:$0xff]  }
0x4e1f   : > { %15451 = vpow2.f32 %v10599_v44  ;;  %v10601_v28 = vmul.f32 1.442695, %v10598_v50  ;;  %v15146_v44 = vld [vmem:[#allocation39 + $0x198] ss:$20 sps:$4 sm:$0xff]   ;;  %v15151_v50 = vld [vmem:[#allocation39 + $0x1bc] ss:$20 sps:$4 sm:$0xff]  }
0x4e21   : > { %15453 = vpow2.f32 %v10601_v28  ;;  %v15149_v28 = vld [vmem:[#allocation39 + $0x1b8] ss:$20 sps:$4 sm:$0xff]  }
0x4e29   : > { %v15452_v56 = vpop.eup %15451 }
0x4e2a   : > { %v10603_v57 = vsel %vm2052_vm2, %v15452_v56, 0.0 }
0x4e2b   : > { %v15454_v58 = vpop.eup %15453  ;;  %10604 = vadd.xlane.f32.xlu0 %v10603_v57  ;;  %v15152_v57 = vld [vmem:[#allocation39 + $0x1c0] ss:$20 sps:$4 sm:$0xff]  }
0x4e2c   : > { %v10606_v35 = vsel %vm2052_vm2, %v15454_v58, 0.0 }
0x4e2d   : > { %10607 = vadd.xlane.f32.xlu1 %v10606_v35  ;;  %v15155_v35 = vld [vmem:[#allocation39 + $0x1e0] ss:$20 sps:$4 sm:$0xff]  }
0x4e41   : > { %10614 = vrot.lane.b32.xlu0 %v18137_v14, %s16495_s28 }
0x4e5b   : > { %v10531_v16 = vpop.f32.mrb[184].mxu0 }
0x4e5c   : > { %v10538_v60 = vadd.f32 %v10531_v16, %v18210_v45  ;;  %v14136_v34 = vpop.f32.mrb[185].mxu0  ;;  %v15130_v45 = vld [vmem:[#allocation33 + $0x78] sm:$0xff]   ;;  %v15158_v16 = vld [vmem:[#allocation39 + $0x1e8] ss:$20 sps:$4 sm:$0xff]  }
0x4e5d   : > { %v10534_v23 = vpop.f32.mrb[186].mxu0  ;;  %14153 = vmatpush3.bf16.msra.mxu1 %v15130_v45  ;;  %v15161_v34 = vld [vmem:[#allocation39 + $0x208] ss:$20 sps:$4 sm:$0xff]  }
0x4e5e   : > { %v10539_v9 = vadd.f32 %v10534_v23, %v18212_v22  ;;  %v14137_v17 = vpop.f32.mrb[187].mxu0  ;;  %11103 = vmatprep.subr.bf16.mxu1 %v15136_v7  ;;  %v15166_v23 = vld [vmem:[#allocation39 + $0x214] ss:$20 sps:$4 sm:$0xff]   ;;  %v15180_v7 = vld [vmem:[#allocation39 + $0x178] ss:$20 sps:$4 sm:$0xff]  }
0x4e5f   : > { %v15169_v17 = vld [vmem:[#allocation39 + $0x234] ss:$20 sps:$4 sm:$0xff]  }
0x4eb8   : > { %v10605_v62 = vpop.xlane.xlu0 %10604 }
0x4eb9   : > { %15455 = vrcp.f32 %v10605_v62  ;;  %v15167_v62 = vld [vmem:[#allocation39 + $0x230] ss:$20 sps:$4 sm:$0xff]  }
0x4eba   : > { %v10608_v18 = vpop.xlane.xlu1 %10607 }
0x4ebb   : > { %15457 = vrcp.f32 %v10608_v18  ;;  %v15172_v18 = vld [vmem:[#allocation39 + $0x23c] ss:$20 sps:$4 sm:$0xff]  }
0x4ebc   : > { %v10615_v53 = vpop.permute.xlu0 %10614 }
0x4ebd   : > { %14145 = vmatpush3.bf16.msra.mxu0 %v10615_v53  ;;  %v15170_v53 = vld [vmem:[#allocation39 + $0x238] ss:$20 sps:$4 sm:$0xff]  }
0x4ebe   : > { %11060 = vmatprep.subr.bf16.mxu0 %v15133_v29  ;;  %v15188_v29 = vld [vmem:[#allocation40 + $0x140] sm:$0xff]  }
0x4ec3   : > { %v15456_v1 = vpop.eup %15455 }
0x4ec4   : > { %v10611_v5 = vmul.f32 %v15456_v1, %v15452_v56  ;;  %v15154_v56 = vld [vmem:[#allocation39 + $0x1c4] ss:$20 sps:$4 sm:$0xff]   ;;  %v15175_v1 = vld [vmem:[#allocation39 + $0x25c] ss:$20 sps:$4 sm:$0xff]  }
0x4ec5   : > { %v15458_v14 = vpop.eup %15457 }
0x4ec6   : > { %v10612_v49 = vmul.f32 %v15458_v14, %v15454_v58  ;;  %v15157_v58 = vld [vmem:[#allocation39 + $0x1e4] ss:$20 sps:$4 sm:$0xff]  }
0x4ec7   : > { %v15173_v14 = vld [vmem:[#allocation39 + $0x258] ss:$20 sps:$4 sm:$0xff]  }
0x4ec8   : > { %v10613_v2 = vpack.c.bf16 %v10612_v49, %v10611_v5  ;;  %v15178_v5 = vld [vmem:[#allocation39 + $0x264] ss:$20 sps:$4 sm:$0xff]   ;;  %v15176_v49 = vld [vmem:[#allocation39 + $0x260] ss:$20 sps:$4 sm:$0xff]  }
0x4eca   : > { %14147 = vmatmul.mubr.msk.bf16.vlgmr.msra.gmra.mrb[188].mxu0 %vm2052_vm2, %v10613_v2  ;;  %v15187_v2 = vld [vmem:[#allocation40 + $0x180] sm:$0xff]  }
0x4ecb   : > { %11092 = vmatprep.mubr.bf16.mxu0 %v16492_v36  ;;  %11061 = vmatpush1.bf16.msra.mxu0 %v15131_v10 }
0x4f9d   : > { %v10654_v48 = vpop.f32.mrb[188].mxu0 }
0x4f9e   : > { %v14148_v22 = vpop.f32.mrb[189].mxu0 }
0x4f9f   : > { %v10657_v6 = vpop.f32.mrb[190].mxu0 }
0x4fa0   : > { %v10661_v3 = vpack.c.bf16 %v10657_v6, %v10654_v48  ;;  %v14149_v13 = vpop.f32.mrb[191].mxu0 }
0x4fa2   : > { %14155 = vmatmul.mubr.msk.bf16.vlgmr.msra.gmra.mrb[216].mxu1 %vm2004_vm1, %v10661_v3 }
0x4fa3   : > { %11135 = vmatprep.mubr.bf16.mxu1 %v16492_v36  ;;  %v15139_v36 = vld [vmem:[#allocation39 + $0x16c] ss:$20 sps:$4 sm:$0xff]   ;;  %11104 = vmatpush1.bf16.msra.mxu1 %v15134_v30 }
0x4fa4   : > { %11062 = vmatprep.subr.bf16.mxu0 %v15139_v36  ;;  %11105 = vmatprep.subr.bf16.mxu1 %v15142_v63  ;;  %v15191_v30 = vld [vmem:[#allocation40 + $0x188] sm:$0xff]   ;;  %v15195_v63 = vld [vmem:[#allocation40 + $0x190] sm:$0xff]  }
0x4fa5   : > { %11063 = vmatpush1.bf16.msra.mxu0 %v15137_v11  ;;  %v15192_v36 = vld [vmem:[#allocation40 + $0x148] sm:$0xff]   ;;  %v15181_v11 = vld [vmem:[#allocation39 + $0x1a0] ss:$20 sps:$4 sm:$0xff]  }
0x4fa6   : > { %11064 = vmatprep.subr.bf16.mxu0 %v15145_v33  ;;  %v15208_v33 = vld [vmem:[#allocation40 + $0x168] sm:$0xff]  }
0x4fa7   : > { %11106 = vmatpush1.bf16.msra.mxu1 %v15140_v8  ;;  %v15196_v8 = vld [vmem:[#allocation40 + $0x150] sm:$0xff]  }
0x4fa8   : > { %11107 = vmatprep.subr.bf16.mxu1 %v15148_v31  ;;  %v15186_v31 = vld [vmem:[#allocation39 + $0x268] ss:$20 sps:$4 sm:$0xff]  }
0x4fa9   : > { %11065 = vmatpush1.bf16.msra.mxu0 %v15143_v59  ;;  %v15185_v59 = vld [vmem:[#allocation39 + $0x240] ss:$20 sps:$4 sm:$0xff]  }
0x4faa   : > { %11066 = vmatprep.subr.bf16.mxu0 %v15151_v50  ;;  %v15190_v50 = vld [vmem:[#allocation40 + $0x1c0] sm:$0xff]  }
0x4fab   : > { %11108 = vmatpush1.bf16.msra.mxu1 %v15146_v44  ;;  %v15189_v44 = vld [vmem:[#allocation40 + $0x200] sm:$0xff]  }
0x4fac   : > { %11109 = vmatprep.subr.bf16.mxu1 %v15154_v56  ;;  %v15194_v56 = vld [vmem:[#allocation40 + $0x1c8] sm:$0xff]  }
0x4fad   : > { %11067 = vmatpush1.bf16.msra.mxu0 %v15149_v28  ;;  %v15193_v28 = vld [vmem:[#allocation40 + $0x208] sm:$0xff]  }
0x4fae   : > { %11068 = vmatprep.subr.bf16.mxu0 %v15157_v58  ;;  %v15198_v58 = vld [vmem:[#allocation40 + $0x1d0] sm:$0xff]  }
0x4faf   : > { %11110 = vmatpush1.bf16.msra.mxu1 %v15152_v57  ;;  %v15197_v57 = vld [vmem:[#allocation40 + $0x210] sm:$0xff]  }
0x4fb0   : > { %11111 = vmatprep.subr.bf16.mxu1 %v15160_v37  ;;  %v15202_v37 = vld [vmem:[#allocation40 + $0x1d8] sm:$0xff]  }
0x4fb1   : > { %11069 = vmatpush1.bf16.msra.mxu0 %v15155_v35  ;;  %v15201_v35 = vld [vmem:[#allocation40 + $0x218] sm:$0xff]  }
0x4fb3   : > { %11112 = vmatpush1.bf16.msra.mxu1 %v15158_v16  ;;  %v15205_v16 = vld [vmem:[#allocation40 + $0x220] sm:$0xff]  }
0x4fb4   : > { %11113 = vmatprep.subr.bf16.mxu1 %v15166_v23  ;;  %v15210_v23 = vld [vmem:[#allocation40 + $0x1e8] sm:$0xff]  }
0x5075   : > { %v10711_v15 = vpop.f32.mrb[216].mxu1 }
0x5076   : > { %v10718_v19 = vadd.f32 %v10711_v15, %v10538_v60  ;;  %v14156_v40 = vpop.f32.mrb[217].mxu1  ;;  %v15163_v60 = vld [vmem:[#allocation39 + $0x20c] ss:$20 sps:$4 sm:$0xff]  }
0x5077   : > { %v10714_v20 = vpop.f32.mrb[218].mxu1  ;;  %11070 = vmatprep.subr.bf16.mxu0 %v15163_v60  ;;  %v15206_v60 = vld [vmem:[#allocation40 + $0x1e0] sm:$0xff]  }
0x5078   : > { %v10728_v47 = vadd.f32 %v12830_v32, %v10718_v19  ;;  %v10719_v21 = vadd.f32 %v10714_v20, %v10539_v9  ;;  %v14157_v24 = vpop.f32.mrb[219].mxu1  ;;  %v15164_v9 = vld [vmem:[#allocation39 + $0x210] ss:$20 sps:$4 sm:$0xff]   ;;  %11071 = vmatpush1.bf16.msra.mxu0 %v15161_v34  ;;  %v12831_v19 = vld [vmem:[#allocation36 + $0x1] ss:$0 sm:$0xff]  ;;  %v15209_v34 = vld [vmem:[#allocation40 + $0x228] sm:$0xff]  }
0x5079   : > { %11114 = vmatpush1.bf16.msra.mxu1 %v15164_v9  ;;  %11072 = vmatprep.subr.bf16.mxu0 %v15169_v17  ;;  %v15211_v9 = vld [vmem:[#allocation40 + $0x1b0] sm:$0xff]  }
0x507a   : > { %v10729_v25 = vadd.f32 %v12830_v32, %v10719_v21  ;;  %v10730_v26 = vadd.f32 %v10728_v47, %v18150_v46  ;;  %11115 = vmatprep.subr.bf16.mxu1 %v15172_v18  ;;  %v12832_v21 = vld [vmem:[#allocation37 + $0x1] ss:$0 sm:$0xff]  ;;  %v15212_v17 = vld [vmem:[#allocation40 + $0x170] sm:$0xff]  }
0x507b   : > { %v15214_v18 = vld [vmem:[#allocation40 + $0x1f0] sm:$0xff]  }
0x507c   : > { %10736 = vadd.xlane.f32.xlu1 %v10730_v26  ;;  %v10731_v27 = vadd.f32 %v10729_v25, %v18152_v38  ;;  %11073 = vmatpush1.bf16.msra.mxu0 %v15167_v62  ;;  %v15213_v62 = vld [vmem:[#allocation40 + $0x230] sm:$0xff]  }
0x507d   : > { %11116 = vmatpush1.bf16.msra.mxu1 %v15170_v53  ;;  %11074 = vmatprep.subr.bf16.mxu0 %v15175_v1  ;;  %v15215_v53 = vld [vmem:[#allocation40 + $0x1b8] sm:$0xff]  }
0x507e   : > { %11117 = vmatprep.subr.bf16.mxu1 %v15178_v5  ;;  %v15216_v1 = vld [vmem:[#allocation40 + $0x178] sm:$0xff]  }
0x507f   : > { %v15218_v5 = vld [vmem:[#allocation40 + $0x1f8] sm:$0xff]  }
0x5080   : > { %10738 = vadd.xlane.f32.xlu1 %v10731_v27  ;;  %11075 = vmatpush1.bf16.msra.mxu0 %v15173_v14  ;;  %v15217_v14 = vld [vmem:[#allocation40 + $0x238] sm:$0xff]  }
0x5081   : > { %11118 = vmatpush1.bf16.msra.mxu1 %v15176_v49  ;;  %14158 = vmatprep.subr.bf16.mxu0 %v16490_v0  ;;  %v12833_v49 = vld [vmem:[%s18465_s8 + $0x5] sm:$0x1f] }
0x5082   : > { %13356 = vmatprep.subr.bf16.mxu1 %v15187_v2  ;;  %v10830_v2 = vrot.slane %v12833_v49, %v17304_v51 }
0x5109   : > { %v10737_v46 = vpop.xlane.xlu1 %10736 }
0x510a   : > { %v10740_v39 = vmul.f32 0.0078125, %v10737_v46  ;;  %v15199_v46 = vld [vmem:[#allocation40 + $0x198] sm:$0xff]  }
0x510c   : > { %v18253_v38 = vsub.f32 %v10730_v26, %v10740_v39  ;;  %v15182_v39 = vld [vmem:[#allocation39 + $0x1c8] ss:$20 sps:$4 sm:$0xff]  }
0x510d   : > { %v10739_v41 = vpop.xlane.xlu1 %10738 }
0x510e   : > { %v10741_v12 = vmul.f32 0.0078125, %v10739_v41  ;;  %v10744_v55 = vmul.f32 %v18253_v38, %v18253_v38  ;;  %v15203_v41 = vld [vmem:[#allocation40 + $0x1a0] sm:$0xff]  }
0x5110   : > { %v18257_v43 = vsub.f32 %v10731_v27, %v10741_v12  ;;  %10746 = vadd.xlane.f32.xlu1 %v10744_v55  ;;  %v15179_v27 = vld [vmem:[#allocation39 + $0x150] ss:$20 sps:$4 sm:$0xff]  }
0x5111   : > { %v15183_v12 = vld [vmem:[#allocation39 + $0x1f0] ss:$20 sps:$4 sm:$0xff]  }
0x5112   : > { %v10745_v4 = vmul.f32 %v18257_v43, %v18257_v43  ;;  %v15204_v55 = vld [vmem:[#allocation40 + $0x160] sm:$0xff]  }
0x5114   : > { %10748 = vadd.xlane.f32.xlu1 %v10745_v4  ;;  %v15184_v4 = vld [vmem:[#allocation39 + $0x218] ss:$20 sps:$4 sm:$0xff]  }
0x519d   : > { %v10747_v45 = vpop.xlane.xlu1 %10746 }
0x519e   : > { %v10750_v48 = vmul.f32 0.0078125, %v10747_v45  ;;  %v10838_v45 = vrot.slane %v12833_v49, %v17307_v52 }
0x51a0   : > { %v10752_v22 = vadd.f32 1e-05, %v10750_v48  ;;  %v10834_v48 = vrot.slane %v12833_v49, %v17310_v54 }
0x51a1   : > { %v10749_v6 = vpop.xlane.xlu1 %10748 }
0x51a2   : > { %15459 = vrsqrt.f32 %v10752_v22  ;;  %v10751_v3 = vmul.f32 0.0078125, %v10749_v6  ;;  %v10842_v22 = vrot.slane %v12833_v49, %v17461_v61 }
0x51a4   : > { %v10753_v13 = vadd.f32 1e-05, %v10751_v3 }
0x51a6   : > { %15461 = vrsqrt.f32 %v10753_v13 }
0x51ac   : > { %v15460_v15 = vpop.eup %15459 }
0x51ad   : > { %v10756_v32 = vmul.f32 %v15460_v15, %v18253_v38  ;;  %v15200_v38 = vld [vmem:[#allocation40 + $0x158] sm:$0xff]  }
0x51af   : > { %v10764_v47 = vmul.f32 %v12831_v19, %v10756_v32 }
0x51b0   : > { %v15462_v40 = vpop.eup %15461 }
0x51b1   : > { %v10757_v20 = vmul.f32 %v15462_v40, %v18257_v43  ;;  %v18264_v25 = vadd.f32 %v12832_v21, %v10764_v47  ;;  %v15207_v43 = vld [vmem:[#allocation40 + $0x1a8] sm:$0xff]  }
0x51b3   : > { %v10765_v24 = vmul.f32 %v12831_v19, %v10757_v20 }
0x51b5   : > { %v18266_v26 = vadd.f32 %v12832_v21, %v10765_v24 }
0x51b7   : > { %v10774_v10 = vpack.c.bf16 %v18266_v26, %v18264_v25 }
0x51b9   : > { %11093 = vmatmul.mubr.bf16.vlgmr.msra.gmra.mrb[192].mxu0 %v10774_v10  ;;  %11136 = vmatmul.mubr.bf16.vlgmr.msra.gmra.mrb[220].mxu1 %v10774_v10 }
0x51ba   : > { %14159 = vmatpush3.bf16.msra.mxu0 %v15179_v27  ;;  %14174 = vmatprep.mubr.msk.bf16.mxu0 %vm16491_vm0, %v16490_v0 }
0x51bb   : > { %14160 = vmatprep.subr.bf16.mxu0 %v16490_v0  ;;  %13357 = vmatpush3.bf16.msra.mxu1 %v15188_v29 }
0x51bc   : > { %13358 = vmatprep.subr.bf16.mxu1 %v15191_v30 }
0x51be   : > { %14161 = vmatpush3.bf16.msra.mxu0 %v15180_v7 }
0x51bf   : > { %14162 = vmatprep.subr.bf16.mxu0 %v16490_v0  ;;  %13359 = vmatpush3.bf16.msra.mxu1 %v15192_v36 }
0x51c0   : > { %13360 = vmatprep.subr.bf16.mxu1 %v15195_v63 }
0x51c2   : > { %14163 = vmatpush3.bf16.msra.mxu0 %v15181_v11 }
0x51c3   : > { %14164 = vmatprep.subr.bf16.mxu0 %v16490_v0  ;;  %13361 = vmatpush3.bf16.msra.mxu1 %v15196_v8 }
0x51c4   : > { %13362 = vmatprep.subr.bf16.mxu1 %v15199_v46 }
0x51c6   : > { %14165 = vmatpush3.bf16.msra.mxu0 %v15182_v39 }
0x51c7   : > { %14166 = vmatprep.subr.bf16.mxu0 %v16490_v0  ;;  %13363 = vmatpush3.bf16.msra.mxu1 %v15200_v38 }
0x51c8   : > { %13364 = vmatprep.subr.bf16.mxu1 %v15203_v41 }
0x51ca   : > { %14167 = vmatpush3.bf16.msra.mxu0 %v15183_v12  ;;  %v15219_v12 = vld [vmem:[#allocation40 + $0x240] sm:$0xff]  }
0x51cb   : > { %14168 = vmatprep.subr.bf16.mxu0 %v16490_v0  ;;  %13365 = vmatpush3.bf16.msra.mxu1 %v15204_v55  ;;  %v15220_v55 = vld [vmem:[#allocation40 + $0x248] sm:$0xff]  }
0x51cc   : > { %13366 = vmatprep.subr.bf16.mxu1 %v15207_v43  ;;  %v15221_v43 = vld [vmem:[#allocation40 + $0x250] sm:$0xff]  }
0x51ce   : > { %14169 = vmatpush3.bf16.msra.mxu0 %v15184_v4  ;;  %v15222_v4 = vld [vmem:[#allocation40 + $0x258] sm:$0xff]  }
0x51cf   : > { %14170 = vmatprep.subr.bf16.mxu0 %v16490_v0  ;;  %13367 = vmatpush3.bf16.msra.mxu1 %v15208_v33  ;;  %v15223_v33 = vld [vmem:[#allocation40 + $0x260] sm:$0xff]  }
0x51d0   : > { %13368 = vmatprep.subr.bf16.mxu1 %v15211_v9  ;;  %v12874_v9 = vld [vmem:[#allocation42 + $0x1] ss:$0 sm:$0xff] }
0x51d2   : > { %14171 = vmatpush3.bf16.msra.mxu0 %v15185_v59  ;;  %v15224_v59 = vld [vmem:[#allocation40 + $0x268] sm:$0xff]  }
0x51d3   : > { %14172 = vmatprep.subr.bf16.mxu0 %v16490_v0  ;;  %13369 = vmatpush3.bf16.msra.mxu1 %v15212_v17 }
0x51d4   : > { %13370 = vmatprep.subr.bf16.mxu1 %v15215_v53 }
0x51d6   : > { %14173 = vmatpush3.bf16.msra.mxu0 %v15186_v31  ;;  %v10846_v31 = vrot.slane %v12833_v49, %v17475_v42 }
0x51d7   : > { %13378 = vmatprep.subr.bf16.mxu0 %v15189_v44  ;;  %13371 = vmatpush3.bf16.msra.mxu1 %v15216_v1 }
0x51d8   : > { %14178 = vmatprep.subr.bf16.mxu1 %v16490_v0 }
0x51d9   : > { %14175 = vmatmul.mubr.bf16.vlgmr.msra.gmra.mrb[196].mxu0 %v10774_v10 }
0x51da   : > { %13379 = vmatpush3.bf16.msra.mxu0 %v15190_v50  ;;  %v15225_v50 = vld [vmem:[#allocation40 + $0x270] sm:$0xff]  }
0x51db   : > { %13380 = vmatprep.subr.bf16.mxu0 %v15193_v28 }
0x51de   : > { %13381 = vmatpush3.bf16.msra.mxu0 %v15194_v56 }
0x51df   : > { %13382 = vmatprep.subr.bf16.mxu0 %v15197_v57 }
0x51e2   : > { %13383 = vmatpush3.bf16.msra.mxu0 %v15198_v58 }
0x51e3   : > { %13384 = vmatprep.subr.bf16.mxu0 %v15201_v35 }
0x51e6   : > { %13385 = vmatpush3.bf16.msra.mxu0 %v15202_v37  ;;  %v15226_v37 = vld [vmem:[#allocation40 + $0x278] sm:$0xff]  }
0x51e7   : > { %13386 = vmatprep.subr.bf16.mxu0 %v15205_v16 }
0x51ea   : > { %13387 = vmatpush3.bf16.msra.mxu0 %v15206_v60 }
0x51eb   : > { %13388 = vmatprep.subr.bf16.mxu0 %v15209_v34 }
0x51ee   : > { %13389 = vmatpush3.bf16.msra.mxu0 %v15210_v23 }
0x51ef   : > { %13390 = vmatprep.subr.bf16.mxu0 %v15213_v62 }
0x51f2   : > { %13391 = vmatpush3.bf16.msra.mxu0 %v15214_v18 }
0x51f3   : > { %13392 = vmatprep.subr.bf16.mxu0 %v15217_v14 }
0x51f6   : > { %13393 = vmatpush3.bf16.msra.mxu0 %v15218_v5 }
0x51f7   : > { %14198 = vmatprep.subr.bf16.mxu0 %v16490_v0 }
0x528c   : > { %v11094_v6 = vpop.f32.mrb[192].mxu0  ;;  %v11137_v3 = vpop.f32.mrb[220].mxu1 }
0x528d   : > { %v11095_v13 = vadd.f32 %v11094_v6, %v10830_v2  ;;  %v11138_v15 = vadd.f32 %v11137_v3, %v10838_v45  ;;  %v11096_v32 = vpop.f32.mrb[193].mxu0  ;;  %v11139_v19 = vpop.f32.mrb[221].mxu1 }
0x528e   : > { %v11097_v40 = vadd.f32 %v11096_v32, %v10834_v48  ;;  %v11140_v20 = vadd.f32 %v11139_v19, %v10842_v22  ;;  %v11098_v47 = vpop.f32.mrb[194].mxu0  ;;  %v11141_v21 = vpop.f32.mrb[222].mxu1 }
0x528f   : > { %v11099_v24 = vadd.f32 %v11098_v47, %v10830_v2  ;;  %v11142_v27 = vadd.f32 %v11141_v21, %v10838_v45  ;;  %v11100_v10 = vpop.f32.mrb[195].mxu0  ;;  %v11143_v51 = vpop.f32.mrb[223].mxu1  ;;  %v11187_v30 = vmax.f32 %v11095_v13, 0.0  ;;  %v11189_v54 = vmax.f32 %v11138_v15, 0.0 }
0x5290   : > { %v11101_v29 = vadd.f32 %v11100_v10, %v10834_v48  ;;  %v11144_v52 = vadd.f32 %v11143_v51, %v10842_v22  ;;  %v11188_v36 = vmax.f32 %v11097_v40, 0.0  ;;  %v11190_v63 = vmax.f32 %v11140_v20, 0.0 }
0x5291   : > { %v11192_v7 = vmax.f32 %v11099_v24, 0.0  ;;  %v11194_v61 = vmax.f32 %v11142_v27, 0.0  ;;  %v15227_v24 = vld [vmem:[#allocation46] sm:$0xff]  }
0x5292   : > { %v11193_v11 = vmax.f32 %v11101_v29, 0.0  ;;  %v11195_v8 = vmax.f32 %v11144_v52, 0.0 }
0x5293   : > { %v11197_v46 = vpack.c.bf16 %v11192_v7, %v11187_v30  ;;  %v11199_v39 = vpack.c.bf16 %v11194_v61, %v11189_v54  ;;  %v15230_v61 = vld [vmem:[#allocation46 + $0x18] sm:$0xff]  }
0x5294   : > { %v11198_v38 = vpack.c.bf16 %v11193_v11, %v11188_v36  ;;  %v11200_v41 = vpack.c.bf16 %v11195_v8, %v11190_v63  ;;  %v15231_v36 = vld [vmem:[#allocation46 + $0x20] sm:$0xff]   ;;  %v15232_v63 = vld [vmem:[#allocation46 + $0x28] sm:$0xff]   ;;  %v15233_v11 = vld [vmem:[#allocation46 + $0x30] sm:$0xff]  }
0x5295   : > { %v15234_v8 = vld [vmem:[#allocation46 + $0x38] sm:$0xff]  }
0x5296   : > { %11563 = vmatprep.mubr.bf16.mxu1 %v11198_v38  ;;  %11604 = vmatprep.mubr.bf16.mxu0 %v11200_v41 }
0x5297   : > { %11564 = vmatmul.mubr.bf16.vlgmr.msra.gmra.mrb[224].mxu1 %v11197_v46  ;;  %11605 = vmatmul.mubr.bf16.vlgmr.msra.gmra.mrb[200].mxu0 %v11199_v39 }
0x5298   : > { %14179 = vmatpush3.bf16.msra.mxu1 %v15219_v12  ;;  %14194 = vmatprep.mubr.msk.bf16.mxu1 %vm16491_vm0, %v16490_v0 }
0x5299   : > { %14180 = vmatprep.subr.bf16.mxu1 %v16490_v0  ;;  %14214 = vmatprep.mubr.msk.bf16.mxu0 %vm16491_vm0, %v16490_v0 }
0x529a   : > { %14199 = vmatpush3.bf16.msra.mxu0 %v15227_v24 }
0x529b   : > { %14200 = vmatprep.subr.bf16.mxu0 %v16490_v0 }
0x529c   : > { %14181 = vmatpush3.bf16.msra.mxu1 %v15220_v55 }
0x529d   : > { %14182 = vmatprep.subr.bf16.mxu1 %v16490_v0 }
0x52a0   : > { %14183 = vmatpush3.bf16.msra.mxu1 %v15221_v43 }
0x52a1   : > { %14184 = vmatprep.subr.bf16.mxu1 %v16490_v0 }
0x52a4   : > { %14185 = vmatpush3.bf16.msra.mxu1 %v15222_v4 }
0x52a5   : > { %14186 = vmatprep.subr.bf16.mxu1 %v16490_v0 }
0x52a8   : > { %14187 = vmatpush3.bf16.msra.mxu1 %v15223_v33  ;;  %v12915_v33 = vld [vmem:[#allocation43 + $0x1] ss:$0 sm:$0xff] }
0x52a9   : > { %14188 = vmatprep.subr.bf16.mxu1 %v16490_v0 }
0x52ac   : > { %v11180_v44 = vpop.f32.mrb[196].mxu0  ;;  %14189 = vmatpush3.bf16.msra.mxu1 %v15224_v59 }
0x52ad   : > { %v11181_v28 = vadd.f32 %v11180_v44, %v10846_v31  ;;  %v14176_v56 = vpop.f32.mrb[197].mxu0  ;;  %14190 = vmatprep.subr.bf16.mxu1 %v16490_v0 }
0x52ae   : > { %v11183_v57 = vpop.f32.mrb[198].mxu0 }
0x52af   : > { %v11184_v58 = vadd.f32 %v11183_v57, %v10846_v31  ;;  %v14177_v35 = vpop.f32.mrb[199].mxu0  ;;  %v11191_v16 = vmax.f32 %v11181_v28, 0.0 }
0x52b0   : > { %14191 = vmatpush3.bf16.msra.mxu1 %v15225_v50  ;;  %v12916_v50 = vld [vmem:[#allocation45 + $0x1] ss:$0 sm:$0xff] }
0x52b1   : > { %v11196_v60 = vmax.f32 %v11184_v58, 0.0  ;;  %14192 = vmatprep.subr.bf16.mxu1 %v16490_v0  ;;  %v12917_v58 = vld [vmem:[#allocation48] ss:$0 sm:$0xff] }
0x52b3   : > { %v11201_v34 = vpack.c.bf16 %v11196_v60, %v11191_v16 }
0x52b4   : > { %14193 = vmatpush3.bf16.msra.mxu1 %v15226_v37 }
0x52b7   : > { %14195 = vmatmul.mubr.bf16.vlgmr.msra.gmra.mrb[228].mxu1 %v11201_v34 }
0x536a   : > { %v13372_v42 = vpop.f32.mrb[224].mxu1  ;;  %v13394_v23 = vpop.f32.mrb[200].mxu0 }
0x536b   : > { %v13373_v17 = vpop.f32.mrb[225].mxu1  ;;  %v13395_v62 = vpop.f32.mrb[201].mxu0 }
0x536c   : > { %v13374_v18 = vadd.f32 %v13373_v17, %v13372_v42  ;;  %v13396_v53 = vadd.f32 %v13395_v62, %v13394_v23  ;;  %v13375_v1 = vpop.f32.mrb[226].mxu1  ;;  %v13397_v14 = vpop.f32.mrb[202].mxu0 }
0x536d   : > { %v13376_v5 = vpop.f32.mrb[227].mxu1  ;;  %v13398_v49 = vpop.f32.mrb[203].mxu0 }
0x536e   : > { %v11566_v2 = vadd.f32 %v13374_v18, %v12874_v9  ;;  %v13377_v45 = vadd.f32 %v13376_v5, %v13375_v1  ;;  %v13399_v48 = vadd.f32 %v13398_v49, %v13397_v14 }
0x5370   : > { %v11569_v22 = vadd.f32 %v13377_v45, %v12874_v9  ;;  %v11607_v6 = vadd.f32 %v13396_v53, %v11566_v2 }
0x5372   : > { %v11610_v3 = vadd.f32 %v13399_v48, %v11569_v22 }
0x538a   : > { %v11647_v13 = vpop.f32.mrb[228].mxu1 }
0x538b   : > { %v11648_v15 = vadd.f32 %v11647_v13, %v11607_v6  ;;  %v14196_v32 = vpop.f32.mrb[229].mxu1 }
0x538c   : > { %v11650_v19 = vpop.f32.mrb[230].mxu1 }
0x538d   : > { %v11654_v40 = vadd.f32 %v11648_v15, %v18264_v25  ;;  %v11651_v20 = vadd.f32 %v11650_v19, %v11610_v3  ;;  %v14197_v47 = vpop.f32.mrb[231].mxu1  ;;  %v15228_v25 = vld [vmem:[#allocation46 + $0x8] sm:$0xff]  }
0x538e   : > { %14201 = vmatpush3.bf16.msra.mxu0 %v15228_v25 }
0x538f   : > { %11660 = vadd.xlane.f32.xlu1 %v11654_v40  ;;  %v11655_v21 = vadd.f32 %v11651_v20, %v18266_v26  ;;  %14202 = vmatprep.subr.bf16.mxu0 %v16490_v0  ;;  %v15229_v26 = vld [vmem:[#allocation46 + $0x10] sm:$0xff]  }
0x5392   : > { %14203 = vmatpush3.bf16.msra.mxu0 %v15229_v26 }
0x5393   : > { %11662 = vadd.xlane.f32.xlu1 %v11655_v21  ;;  %14204 = vmatprep.subr.bf16.mxu0 %v16490_v0 }
0x5396   : > { %14205 = vmatpush3.bf16.msra.mxu0 %v15230_v61 }
0x5397   : > { %14206 = vmatprep.subr.bf16.mxu0 %v16490_v0 }
0x539a   : > { %14207 = vmatpush3.bf16.msra.mxu0 %v15231_v36 }
0x539b   : > { %14208 = vmatprep.subr.bf16.mxu0 %v16490_v0 }
0x539e   : > { %14209 = vmatpush3.bf16.msra.mxu0 %v15232_v63 }
0x539f   : > { %14210 = vmatprep.subr.bf16.mxu0 %v16490_v0 }
0x53a2   : > { %14211 = vmatpush3.bf16.msra.mxu0 %v15233_v11 }
0x53a3   : > { %14212 = vmatprep.subr.bf16.mxu0 %v16490_v0 }
0x53a6   : > { %14213 = vmatpush3.bf16.msra.mxu0 %v15234_v8 }
0x541c   : > { %v11661_v27 = vpop.xlane.xlu1 %11660 }
0x541d   : > { %v11664_v10 = vmul.f32 0.0078125, %v11661_v27 }
0x541f   : > { %v11666_v51 = vsub.f32 %v11654_v40, %v11664_v10 }
0x5420   : > { %v11663_v29 = vpop.xlane.xlu1 %11662 }
0x5421   : > { %v11665_v52 = vmul.f32 0.0078125, %v11663_v29  ;;  %v11668_v30 = vmul.f32 %v11666_v51, %v11666_v51 }
0x5423   : > { %v11667_v54 = vsub.f32 %v11655_v21, %v11665_v52  ;;  %11670 = vadd.xlane.f32.xlu0 %v11668_v30 }
0x5425   : > { %v11669_v7 = vmul.f32 %v11667_v54, %v11667_v54 }
0x5427   : > { %11672 = vadd.xlane.f32.xlu1 %v11669_v7 }
0x54b0   : > { %v11671_v46 = vpop.xlane.xlu0 %11670 }
0x54b1   : > { %v11674_v39 = vmul.f32 0.0078125, %v11671_v46 }
0x54b3   : > { %v11676_v38 = vadd.f32 1e-05, %v11674_v39 }
0x54b4   : > { %v11673_v41 = vpop.xlane.xlu1 %11672 }
0x54b5   : > { %15463 = vrsqrt.f32 %v11676_v38  ;;  %v11675_v12 = vmul.f32 0.0078125, %v11673_v41 }
0x54b7   : > { %v11677_v55 = vadd.f32 1e-05, %v11675_v12 }
0x54b9   : > { %15465 = vrsqrt.f32 %v11677_v55 }
0x54bf   : > { %v15464_v43 = vpop.eup %15463 }
0x54c0   : > { %v11680_v4 = vmul.f32 %v15464_v43, %v11666_v51 }
0x54c2   : > { %v11688_v44 = vmul.f32 %v12915_v33, %v11680_v4 }
0x54c3   : > { %v15466_v59 = vpop.eup %15465 }
0x54c4   : > { %v11681_v31 = vmul.f32 %v15466_v59, %v11667_v54  ;;  %v11696_v0 = vadd.f32 %v12916_v50, %v11688_v44 }
0x54c6   : > { %v11689_v28 = vmul.f32 %v12915_v33, %v11681_v31 }
0x54c8   : > { %v11697_v56 = vadd.f32 %v12916_v50, %v11689_v28 }
0x54ca   : > { %v11698_v57 = vpack.c.bf16 %v11697_v56, %v11696_v0 }
0x54cc   : > { %14215 = vmatmul.mubr.bf16.vlgmr.msra.gmra.mrb[204].mxu0 %v11698_v57 }
0x559f   : > { %v11804_v35 = vpop.f32.mrb[204].mxu0 }
0x55a0   : > { %v11805_v37 = vadd.f32 %v12917_v58, %v11804_v35  ;;  %v14216_v16 = vpop.f32.mrb[205].mxu0 }
0x55a1   : > { %v11807_v60 = vpop.f32.mrb[206].mxu0 }
0x55a2   : > { %11811 = vst [vmem:[%s1602_s5] sm:$0xff] %v11805_v37  ;;  %v11808_v34 = vadd.f32 %v12917_v58, %v11807_v60  ;;  %v14217_v42 = vpop.f32.mrb[207].mxu0 }
0x55a4   : > { %11812 = vst [vmem:[%s1602_s5 + $0x8] sm:$0xff] %v11808_v34 }
0x55a5 PF: > { %s103_s15 = sadd.s32 1, %s16405_s15  }
0x55a6   : > { %p100_p5 = scmp.ge.s32.totalorder %s103_s15, 4  }
0x55a8   :  { %102 = sbr.rel (!%p100_p5) target bundleno = 85 (0x55), region = 397 }
0x55af   :  { %11834 = vsyncpa [#allocation3], 1 }
0x55b0   :  { %11836 = vsyncpa [#allocation3 + $0x1], 1 }
0x55b1   :  { %11837 = vsyncpa [#allocation5], 1 }
0x55b2   :  { %11838 = vsyncpa [#allocation8], 1 }
0x55b3   :  { %11839 = vsyncpa [#allocation11], 1 }
0x55b4   :  { %11840 = vsyncpa [#allocation14], 1 }
0x55b5   :  { %11841 = vsyncpa [#allocation17], 1 }
0x55b6   :  { %11842 = vsyncpa [#allocation20], 1 }
0x55b7   :  { %11843 = vsyncpa [#allocation23], 1 }
0x55b8   :  { %11844 = vsyncpa [#allocation26], 1 }
0x55b9   :  { %11845 = vsyncpa [#allocation29], 1 }
0x55ba   :  { %11846 = vsyncpa [#allocation32], 1 }
0x55bb   :  { %11847 = vsyncpa [#allocation35], 1 }
0x55bc   :  { %11848 = vsyncpa [#allocation38], 1 }
0x55bd   :  { %11849 = vsyncpa [#allocation41], 1 }
0x55be   :  { %11850 = vsyncpa [#allocation44], 1 }
0x55bf   :  { %11851 = vsyncpa [#allocation47], 1 }

</bundles_post_ra>
